<compile_context>
chip_gen: v5e
topology: v5e:2x2
jax: 0.10.0
libtpu: 0.0.40
codegen_flags: <defaults>
</compile_context>

<pallas_src>
import math

import jax
import jax.numpy as jnp
from jax.experimental import pallas as pl
from jax.experimental.pallas import tpu as pltpu

# ---- model hyperparameters (module defaults) --------------------------------
N_FEATURES = 50
D_MODEL = 128
N_HEADS = 8
N_HIDDEN = 512
N_LAYERS = 4
HEAD_DIM = D_MODEL // N_HEADS
LN_EPS = 1e-5
NEG_INF = -1e30          # additive causal-mask bias (softmax -> exact 0)
F_PAD = 128              # lane-dense padding of the n_features=50 decoder output

_LAYER_PARAM_NAMES = [
    "wq", "bq", "wk", "bk", "wv", "bv",            # in_proj (split, pre-transposed)
    "wo", "bo",                                    # out_proj
    "g1", "be1",                                   # norm1
    "w1", "b1", "w2", "b2",                        # feed-forward
    "g2", "be2",                                   # norm2
]


# ---- fused Pallas kernel -----------------------------------------------------
def fused_encoder_kernel(x_ref, pe_ref, bias_ref,
                         wq_ref, bq_ref, wk_ref, bk_ref, wv_ref, bv_ref,
                         wo_ref, bo_ref, g1_ref, be1_ref,
                         w1_ref, b1_ref, w2_ref, b2_ref,
                         g2_ref, be2_ref,
                         wd_ref, bd_ref,
                         dec_ref):
    """Grid (num_batch_tiles,). One grid step = full 4-layer forward for B_TILE seqs.

    x_ref:    (BT, S, 1)  f32 raw input columns for this batch tile
    pe_ref:   (S, D)      f32 positional-encoding table (resident)
    bias_ref: (S, S)      f32 additive causal mask, 0 / NEG_INF (resident)
    w*_ref:   (L, r, c)   stacked per-layer weights (resident; bf16 GEMM weights)
    wd_ref:   (D, F_PAD)  f32 decoder weight (lane-padded)
    bd_ref:   (1, F_PAD)  f32 decoder bias (lane-padded)
    dec_ref:  (1, BT, F_PAD) f32 decoder output slab for this batch tile
    """
    BT, S, _ = x_ref.shape
    D = pe_ref.shape[1]
    M = BT * S

    # ---- PositionalEncoding forward: h = x + pe (dropout = identity, eval) ----
    h = (x_ref[...] + pe_ref[...][None, :, :]).reshape(M, D)        # (M, D) f32
    bias = bias_ref[...]                                             # (S, S)

    # ---- 4 encoder layers, unrolled in-kernel, weights indexed per layer ------
    for l in range(N_LAYERS):
        xb = h.astype(jnp.bfloat16)

        # q/k/v projections: bf16 operands, f32 accumulation; 1/sqrt(hd) is
        # pre-folded into wq/bq at init, so no extra scale op here.
        q = jnp.dot(xb, wq_ref[l], preferred_element_type=jnp.float32) + bq_ref[l]
        k = jnp.dot(xb, wk_ref[l], preferred_element_type=jnp.float32) + bk_ref[l]
        v = jnp.dot(xb, wv_ref[l], preferred_element_type=jnp.float32) + bv_ref[l]
        q3 = q.reshape(BT, S, D)
        k3 = k.reshape(BT, S, D)
        v3 = v.reshape(BT, S, D)

        # per-head attention, batched over the batch tile (single batch dim);
        # lane slices of width HEAD_DIM -> no explicit head transposes.
        ctx_heads = []
        for hh in range(N_HEADS):
            sl = slice(hh * HEAD_DIM, (hh + 1) * HEAD_DIM)
            s = jnp.einsum('bqd,bkd->bqk', q3[:, :, sl], k3[:, :, sl],
                           preferred_element_type=jnp.float32)       # (BT, S, S)
            s = s + bias[None, :, :]
            s = s - jnp.max(s, axis=-1, keepdims=True)
            p = jnp.exp(s)
            p = p * pl.reciprocal(jnp.sum(p, axis=-1, keepdims=True), approx=True)
            ctx_heads.append(jnp.einsum('bqk,bkd->bqd', p, v3[:, :, sl],
                                        preferred_element_type=jnp.float32))
        attn = jnp.concatenate(ctx_heads, axis=-1).reshape(M, D)      # (M, D) f32
        attn = jnp.dot(attn.astype(jnp.bfloat16), wo_ref[l],
                       preferred_element_type=jnp.float32) + bo_ref[l]

        # residual + LayerNorm 1 (f32, one-pass variance)
        y = h + attn
        mu = jnp.mean(y, axis=-1, keepdims=True)
        var = jnp.mean(y * y, axis=-1, keepdims=True) - mu * mu
        y = (y - mu) * jax.lax.rsqrt(var + LN_EPS) * g1_ref[l] + be1_ref[l]

        # feed-forward (ReLU), bf16 GEMMs, f32 accumulation
        hid = jnp.dot(y.astype(jnp.bfloat16), w1_ref[l],
                      preferred_element_type=jnp.float32) + b1_ref[l]
        hid = jnp.maximum(hid, 0.0)
        ff = jnp.dot(hid.astype(jnp.bfloat16), w2_ref[l],
                     preferred_element_type=jnp.float32) + b2_ref[l]

        # residual + LayerNorm 2 (f32, one-pass variance)
        z = y + ff
        mu2 = jnp.mean(z, axis=-1, keepdims=True)
        var2 = jnp.mean(z * z, axis=-1, keepdims=True) - mu2 * mu2
        h = (z - mu2) * jax.lax.rsqrt(var2 + LN_EPS) * g2_ref[l] + be2_ref[l]

    # ---- folded decoder on the last timestep of every sequence ----------------
    last = h.reshape(BT, S, D)[:, S - 1:S, :].reshape(BT, D)          # (BT, D)
    dec = jnp.dot(last, wd_ref[...], preferred_element_type=jnp.float32) + bd_ref[...]
    dec_ref[...] = dec[None, :, :]                                    # dense (BT, F_PAD) store


# ---- helpers -----------------------------------------------------------------
def make_positional_encoding(seq_len, d_model):
    position = jnp.arange(seq_len, dtype=jnp.float32)[:, None]
    div_term = jnp.exp(jnp.arange(0, d_model, 2, dtype=jnp.float32)
                       * (-math.log(10000.0) / d_model))
    angles = position * div_term                        # (S, D/2)
    pe = jnp.zeros((seq_len, d_model), dtype=jnp.float32)
    pe = pe.at[:, 0::2].set(jnp.sin(angles))
    pe = pe.at[:, 1::2].set(jnp.cos(angles))
    return pe


def _pick_b_tile(B, S, target_rows=256):
    """Batch-tile size: fill ~256 MXU rows (v6e/v7x; >=128 covers v5e) while
    keeping at least two grid blocks when the batch allows it (v7x megacore)."""
    bt = max(1, min(B, max(1, target_rows // max(S, 1))))
    while bt > 1 and -(-B // bt) < 2:
        bt = max(1, bt // 2)
    return bt


# ---- wrapper -----------------------------------------------------------------
@jax.jit
def transformer_forward(x, params):
    """x: (batch, seq) float32 -> (1, batch, n_features), matching output[-1:]."""
    B, S = x.shape
    b_tile = _pick_b_tile(B, S)
    num_tiles = pl.cdiv(B, b_tile)
    B_pad = num_tiles * b_tile

    pe = make_positional_encoding(S, D_MODEL)                         # (S, D) f32
    idx = jnp.arange(S, dtype=jnp.int32)
    causal_bias = jnp.where(idx[None, :] <= idx[:, None],
                            0.0, NEG_INF).astype(jnp.float32)          # (S, S)

    x3 = x[:, :, None].astype(jnp.float32)                            # (B, S, 1)
    if B_pad != B:
        x3 = jnp.pad(x3, ((0, B_pad - B), (0, 0), (0, 0)))

    st = params["stacked"]
    in_specs = [
        pl.BlockSpec((b_tile, S, 1), lambda b: (b, 0, 0)),            # x batch tile
        pl.BlockSpec((S, D_MODEL), lambda b: (0, 0)),                 # pe (resident)
        pl.BlockSpec((S, S), lambda b: (0, 0)),                       # causal bias (resident)
    ]
    args = [x3, pe, causal_bias]
    for name in _LAYER_PARAM_NAMES:
        w = st[name]                                                  # (L, r, c)
        # full stacked array, constant index_map -> DMA'd once, stays VMEM-resident
        in_specs.append(pl.BlockSpec(w.shape, lambda b: (0, 0, 0)))
        args.append(w)
    in_specs += [
        pl.BlockSpec((D_MODEL, F_PAD), lambda b: (0, 0)),             # wd (padded, resident)
        pl.BlockSpec((1, F_PAD), lambda b: (0, 0)),                   # bd (padded, resident)
    ]
    args += [params["wd"], params["bd"]]

    dec = pl.pallas_call(
        fused_encoder_kernel,
        out_shape=jax.ShapeDtypeStruct((num_tiles, b_tile, F_PAD), jnp.float32),
        grid=(num_tiles,),
        in_specs=in_specs,
        out_specs=pl.BlockSpec((1, b_tile, F_PAD), lambda b: (b, 0, 0)),
        compiler_params=pltpu.CompilerParams(
            dimension_semantics=("parallel",),
            vmem_limit_bytes=32 * 1024 * 1024),
    )(*args)

    out = dec.reshape(B_pad, F_PAD)[:B, :N_FEATURES]                  # unpad + slice lanes
    return out[None]                                                  # (1, B, n_features)


# ---- deterministic parameter init (shapes per nn.TransformerEncoderLayer) -----
def init_params(key):
    k = key

    def nxt():
        nonlocal k
        k, sub = jax.random.split(k)
        return sub

    scale = 1.0 / math.sqrt(HEAD_DIM)                 # folded into the q projection
    stacked = {name: [] for name in _LAYER_PARAM_NAMES}
    for _ in range(N_LAYERS):
        in_proj = jax.random.uniform(nxt(), (3 * D_MODEL, D_MODEL),
                                     minval=-0.1, maxval=0.1, dtype=jnp.float32)
        wq, wk, wv = (in_proj[:D_MODEL], in_proj[D_MODEL:2 * D_MODEL],
                      in_proj[2 * D_MODEL:])
        wo = jax.random.uniform(nxt(), (D_MODEL, D_MODEL),
                                minval=-0.1, maxval=0.1, dtype=jnp.float32)
        w1 = jax.random.uniform(nxt(), (N_HIDDEN, D_MODEL),
                                minval=-0.05, maxval=0.05, dtype=jnp.float32)
        w2 = jax.random.uniform(nxt(), (D_MODEL, N_HIDDEN),
                                minval=-0.05, maxval=0.05, dtype=jnp.float32)
        vals = dict(
            # 1/sqrt(head_dim) baked into wq (bq is zero; a nonzero bq would be scaled too)
            wq=(wq.T * scale).astype(jnp.bfloat16), bq=jnp.zeros((1, D_MODEL), jnp.float32),
            wk=wk.T.astype(jnp.bfloat16), bk=jnp.zeros((1, D_MODEL), jnp.float32),
            wv=wv.T.astype(jnp.bfloat16), bv=jnp.zeros((1, D_MODEL), jnp.float32),
            wo=wo.T.astype(jnp.bfloat16), bo=jnp.zeros((1, D_MODEL), jnp.float32),
            g1=jnp.ones((1, D_MODEL), jnp.float32),
            be1=jnp.zeros((1, D_MODEL), jnp.float32),
            w1=w1.T.astype(jnp.bfloat16), b1=jnp.zeros((1, N_HIDDEN), jnp.float32),
            w2=w2.T.astype(jnp.bfloat16), b2=jnp.zeros((1, D_MODEL), jnp.float32),
            g2=jnp.ones((1, D_MODEL), jnp.float32),
            be2=jnp.zeros((1, D_MODEL), jnp.float32),
        )
        for name in _LAYER_PARAM_NAMES:
            stacked[name].append(vals[name])
    stacked = {name: jnp.stack(v, axis=0) for name, v in stacked.items()}

    # decoder: init_weights() -> weight ~ U(-0.1, 0.1), bias = 0; zero-pad to 128 lanes
    wd = jax.random.uniform(nxt(), (N_FEATURES, D_MODEL),
                            minval=-0.1, maxval=0.1, dtype=jnp.float32)
    wd_pad = jnp.zeros((D_MODEL, F_PAD), jnp.float32).at[:, :N_FEATURES].set(wd.T)
    bd_pad = jnp.zeros((1, F_PAD), jnp.float32)
    return {"stacked": stacked, "wd": wd_pad, "bd": bd_pad}


if __name__ == "__main__":
    key = jax.random.PRNGKey(0)
    pkey, xkey = jax.random.split(key)
    params = init_params(pkey)

    B, S = 4, 8                                   # small batch / sequence length
    x = jax.random.normal(xkey, (B, S), dtype=jnp.float32)

    out = transformer_forward(x, params)
    out = jax.block_until_ready(out)
    assert out.shape == (1, B, N_FEATURES), out.shape
    assert bool(jnp.all(jnp.isfinite(out)))
    print("KERNEL_OK")
</pallas_src>

<mosaic_0001>
module attributes {stable_mosaic.version = 11 : i64} {
  func.func @fused_encoder_kernel(%arg0: i32, %arg1: memref<2x8x1xf32, #tpu.memory_space<vmem>>, %arg2: memref<8x128xf32, #tpu.memory_space<vmem>>, %arg3: memref<8x8xf32, #tpu.memory_space<vmem>>, %arg4: memref<4x128x128xbf16, #tpu.memory_space<vmem>>, %arg5: memref<4x1x128xf32, #tpu.memory_space<vmem>>, %arg6: memref<4x128x128xbf16, #tpu.memory_space<vmem>>, %arg7: memref<4x1x128xf32, #tpu.memory_space<vmem>>, %arg8: memref<4x128x128xbf16, #tpu.memory_space<vmem>>, %arg9: memref<4x1x128xf32, #tpu.memory_space<vmem>>, %arg10: memref<4x128x128xbf16, #tpu.memory_space<vmem>>, %arg11: memref<4x1x128xf32, #tpu.memory_space<vmem>>, %arg12: memref<4x1x128xf32, #tpu.memory_space<vmem>>, %arg13: memref<4x1x128xf32, #tpu.memory_space<vmem>>, %arg14: memref<4x128x512xbf16, #tpu.memory_space<vmem>>, %arg15: memref<4x1x512xf32, #tpu.memory_space<vmem>>, %arg16: memref<4x512x128xbf16, #tpu.memory_space<vmem>>, %arg17: memref<4x1x128xf32, #tpu.memory_space<vmem>>, %arg18: memref<4x1x128xf32, #tpu.memory_space<vmem>>, %arg19: memref<4x1x128xf32, #tpu.memory_space<vmem>>, %arg20: memref<128x128xf32, #tpu.memory_space<vmem>>, %arg21: memref<1x128xf32, #tpu.memory_space<vmem>>, %arg22: memref<1x2x128xf32, #tpu.memory_space<vmem>>) attributes {dimension_semantics = [#tpu.dimension_semantics<parallel>], iteration_bounds = array<i64: 2>, scalar_prefetch = 0 : i64, scratch_operands = 0 : i64, tpu.core_type = #tpu.core_type<tc>, window_params = [{transform_indices = @transform_0, window_bounds = array<i64: 2, 8, 1>}, {pipeline_mode = #tpu.pipeline_mode<synchronous>, transform_indices = @transform_1, window_bounds = array<i64: 8, 128>}, {pipeline_mode = #tpu.pipeline_mode<synchronous>, transform_indices = @transform_2, window_bounds = array<i64: 8, 8>}, {pipeline_mode = #tpu.pipeline_mode<synchronous>, transform_indices = @transform_3, window_bounds = array<i64: 4, 128, 128>}, {pipeline_mode = #tpu.pipeline_mode<synchronous>, transform_indices = @transform_4, window_bounds = array<i64: 4, 1, 128>}, {pipeline_mode = #tpu.pipeline_mode<synchronous>, transform_indices = @transform_5, window_bounds = array<i64: 4, 128, 128>}, {pipeline_mode = #tpu.pipeline_mode<synchronous>, transform_indices = @transform_6, window_bounds = array<i64: 4, 1, 128>}, {pipeline_mode = #tpu.pipeline_mode<synchronous>, transform_indices = @transform_7, window_bounds = array<i64: 4, 128, 128>}, {pipeline_mode = #tpu.pipeline_mode<synchronous>, transform_indices = @transform_8, window_bounds = array<i64: 4, 1, 128>}, {pipeline_mode = #tpu.pipeline_mode<synchronous>, transform_indices = @transform_9, window_bounds = array<i64: 4, 128, 128>}, {pipeline_mode = #tpu.pipeline_mode<synchronous>, transform_indices = @transform_10, window_bounds = array<i64: 4, 1, 128>}, {pipeline_mode = #tpu.pipeline_mode<synchronous>, transform_indices = @transform_11, window_bounds = array<i64: 4, 1, 128>}, {pipeline_mode = #tpu.pipeline_mode<synchronous>, transform_indices = @transform_12, window_bounds = array<i64: 4, 1, 128>}, {pipeline_mode = #tpu.pipeline_mode<synchronous>, transform_indices = @transform_13, window_bounds = array<i64: 4, 128, 512>}, {pipeline_mode = #tpu.pipeline_mode<synchronous>, transform_indices = @transform_14, window_bounds = array<i64: 4, 1, 512>}, {pipeline_mode = #tpu.pipeline_mode<synchronous>, transform_indices = @transform_15, window_bounds = array<i64: 4, 512, 128>}, {pipeline_mode = #tpu.pipeline_mode<synchronous>, transform_indices = @transform_16, window_bounds = array<i64: 4, 1, 128>}, {pipeline_mode = #tpu.pipeline_mode<synchronous>, transform_indices = @transform_17, window_bounds = array<i64: 4, 1, 128>}, {pipeline_mode = #tpu.pipeline_mode<synchronous>, transform_indices = @transform_18, window_bounds = array<i64: 4, 1, 128>}, {pipeline_mode = #tpu.pipeline_mode<synchronous>, transform_indices = @transform_19, window_bounds = array<i64: 128, 128>}, {pipeline_mode = #tpu.pipeline_mode<synchronous>, transform_indices = @transform_20, window_bounds = array<i64: 1, 128>}, {transform_indices = @transform_21, window_bounds = array<i64: 1, 2, 128>}]} {
    %c0 = arith.constant 0 : index
    %c0_0 = arith.constant 0 : index
    %c0_1 = arith.constant 0 : index
    %0 = vector.load %arg1[%c0, %c0_0, %c0_1] : memref<2x8x1xf32, #tpu.memory_space<vmem>>, vector<2x8x1xf32>
    %c0_2 = arith.constant 0 : index
    %c0_3 = arith.constant 0 : index
    %1 = vector.load %arg2[%c0_2, %c0_3] : memref<8x128xf32, #tpu.memory_space<vmem>>, vector<8x128xf32>
    %2 = vector.shape_cast %1 : vector<8x128xf32> to vector<1x8x128xf32>
    %3 = vector.broadcast %0 : vector<2x8x1xf32> to vector<2x8x128xf32>
    %4 = vector.broadcast %2 : vector<1x8x128xf32> to vector<2x8x128xf32>
    %5 = arith.addf %3, %4 : vector<2x8x128xf32>
    %6 = vector.shape_cast %5 : vector<2x8x128xf32> to vector<16x128xf32>
    %c0_4 = arith.constant 0 : index
    %c0_5 = arith.constant 0 : index
    %7 = vector.load %arg3[%c0_4, %c0_5] : memref<8x8xf32, #tpu.memory_space<vmem>>, vector<8x8xf32>
    %8 = arith.truncf %6 : vector<16x128xf32> to vector<16x128xbf16>
    %c0_6 = arith.constant 0 : index
    %c0_7 = arith.constant 0 : index
    %c0_8 = arith.constant 0 : index
    %9 = vector.load %arg4[%c0_6, %c0_7, %c0_8] : memref<4x128x128xbf16, #tpu.memory_space<vmem>>, vector<1x128x128xbf16>
    %10 = vector.shape_cast %9 : vector<1x128x128xbf16> to vector<128x128xbf16>
    %cst = arith.constant dense<0.000000e+00> : vector<16x128xf32>
    %11 = tpu.matmul %8, %10, %cst {dimension_numbers = #tpu.dot_dimension_numbers<[1], [0], [0], [1], [0, 0, 1, 1], [], []>} : vector<16x128xbf16>, vector<128x128xbf16>, vector<16x128xf32> -> vector<16x128xf32>
    %c0_9 = arith.constant 0 : index
    %c0_10 = arith.constant 0 : index
    %c0_11 = arith.constant 0 : index
    %12 = vector.load %arg5[%c0_9, %c0_10, %c0_11] : memref<4x1x128xf32, #tpu.memory_space<vmem>>, vector<1x1x128xf32>
    %13 = vector.shape_cast %12 : vector<1x1x128xf32> to vector<1x128xf32>
    %14 = vector.broadcast %13 : vector<1x128xf32> to vector<16x128xf32>
    %15 = arith.addf %11, %14 : vector<16x128xf32>
    %c0_12 = arith.constant 0 : index
    %c0_13 = arith.constant 0 : index
    %c0_14 = arith.constant 0 : index
    %16 = vector.load %arg6[%c0_12, %c0_13, %c0_14] : memref<4x128x128xbf16, #tpu.memory_space<vmem>>, vector<1x128x128xbf16>
    %17 = vector.shape_cast %16 : vector<1x128x128xbf16> to vector<128x128xbf16>
    %cst_15 = arith.constant dense<0.000000e+00> : vector<16x128xf32>
    %18 = tpu.matmul %8, %17, %cst_15 {dimension_numbers = #tpu.dot_dimension_numbers<[1], [0], [0], [1], [0, 0, 1, 1], [], []>} : vector<16x128xbf16>, vector<128x128xbf16>, vector<16x128xf32> -> vector<16x128xf32>
    %c0_16 = arith.constant 0 : index
    %c0_17 = arith.constant 0 : index
    %c0_18 = arith.constant 0 : index
    %19 = vector.load %arg7[%c0_16, %c0_17, %c0_18] : memref<4x1x128xf32, #tpu.memory_space<vmem>>, vector<1x1x128xf32>
    %20 = vector.shape_cast %19 : vector<1x1x128xf32> to vector<1x128xf32>
    %21 = vector.broadcast %20 : vector<1x128xf32> to vector<16x128xf32>
    %22 = arith.addf %18, %21 : vector<16x128xf32>
    %c0_19 = arith.constant 0 : index
    %c0_20 = arith.constant 0 : index
    %c0_21 = arith.constant 0 : index
    %23 = vector.load %arg8[%c0_19, %c0_20, %c0_21] : memref<4x128x128xbf16, #tpu.memory_space<vmem>>, vector<1x128x128xbf16>
    %24 = vector.shape_cast %23 : vector<1x128x128xbf16> to vector<128x128xbf16>
    %cst_22 = arith.constant dense<0.000000e+00> : vector<16x128xf32>
    %25 = tpu.matmul %8, %24, %cst_22 {dimension_numbers = #tpu.dot_dimension_numbers<[1], [0], [0], [1], [0, 0, 1, 1], [], []>} : vector<16x128xbf16>, vector<128x128xbf16>, vector<16x128xf32> -> vector<16x128xf32>
    %c0_23 = arith.constant 0 : index
    %c0_24 = arith.constant 0 : index
    %c0_25 = arith.constant 0 : index
    %26 = vector.load %arg9[%c0_23, %c0_24, %c0_25] : memref<4x1x128xf32, #tpu.memory_space<vmem>>, vector<1x1x128xf32>
    %27 = vector.shape_cast %26 : vector<1x1x128xf32> to vector<1x128xf32>
    %28 = vector.broadcast %27 : vector<1x128xf32> to vector<16x128xf32>
    %29 = arith.addf %25, %28 : vector<16x128xf32>
    %30 = vector.shape_cast %15 : vector<16x128xf32> to vector<2x8x128xf32>
    %31 = vector.shape_cast %22 : vector<16x128xf32> to vector<2x8x128xf32>
    %32 = vector.shape_cast %29 : vector<16x128xf32> to vector<2x8x128xf32>
    %33 = vector.extract_strided_slice %30 {offsets = [0, 0, 0], sizes = [2, 8, 16], strides = [1, 1, 1]} : vector<2x8x128xf32> to vector<2x8x16xf32>
    %34 = vector.extract_strided_slice %31 {offsets = [0, 0, 0], sizes = [2, 8, 16], strides = [1, 1, 1]} : vector<2x8x128xf32> to vector<2x8x16xf32>
    "tpu.trace_start"() <{level = 10 : i32, message = "bqd,bkd->bqk"}> : () -> ()
    %cst_26 = arith.constant dense<0.000000e+00> : vector<2x8x8xf32>
    %35 = tpu.matmul %33, %34, %cst_26 {dimension_numbers = #tpu.dot_dimension_numbers<[2], [2], [1], [1], [0, 0, 0, 1, 1, 1], [0], [0]>} : vector<2x8x16xf32>, vector<2x8x16xf32>, vector<2x8x8xf32> -> vector<2x8x8xf32>
    "tpu.trace_stop"() : () -> ()
    %36 = vector.shape_cast %7 : vector<8x8xf32> to vector<1x8x8xf32>
    %37 = vector.broadcast %36 : vector<1x8x8xf32> to vector<2x8x8xf32>
    %38 = arith.addf %35, %37 : vector<2x8x8xf32>
    %cst_27 = arith.constant dense<0xFF800000> : vector<2x8xf32>
    %39 = vector.multi_reduction <maximumf>, %38, %cst_27 [2] : vector<2x8x8xf32> to vector<2x8xf32>
    %40 = vector.shape_cast %39 : vector<2x8xf32> to vector<2x8x1xf32>
    %41 = vector.broadcast %40 : vector<2x8x1xf32> to vector<2x8x8xf32>
    %42 = arith.subf %38, %41 : vector<2x8x8xf32>
    %43 = math.exp %42 : vector<2x8x8xf32>
    %cst_28 = arith.constant dense<0.000000e+00> : vector<2x8xf32>
    %44 = vector.multi_reduction <add>, %43, %cst_28 [2] : vector<2x8x8xf32> to vector<2x8xf32>
    %45 = vector.shape_cast %44 : vector<2x8xf32> to vector<2x8x1xf32>
    %46 = tpu.reciprocal %45 {approx = true} : vector<2x8x1xf32> -> vector<2x8x1xf32>
    %47 = vector.broadcast %46 : vector<2x8x1xf32> to vector<2x8x8xf32>
    %48 = arith.mulf %43, %47 : vector<2x8x8xf32>
    %49 = vector.extract_strided_slice %32 {offsets = [0, 0, 0], sizes = [2, 8, 16], strides = [1, 1, 1]} : vector<2x8x128xf32> to vector<2x8x16xf32>
    "tpu.trace_start"() <{level = 10 : i32, message = "bqk,bkd->bqd"}> : () -> ()
    %cst_29 = arith.constant dense<0.000000e+00> : vector<2x8x16xf32>
    %50 = tpu.matmul %48, %49, %cst_29 {dimension_numbers = #tpu.dot_dimension_numbers<[2], [1], [1], [2], [0, 0, 0, 1, 1, 2], [0], [0]>} : vector<2x8x8xf32>, vector<2x8x16xf32>, vector<2x8x16xf32> -> vector<2x8x16xf32>
    "tpu.trace_stop"() : () -> ()
    %51 = vector.extract_strided_slice %30 {offsets = [0, 0, 16], sizes = [2, 8, 16], strides = [1, 1, 1]} : vector<2x8x128xf32> to vector<2x8x16xf32>
    %52 = vector.extract_strided_slice %31 {offsets = [0, 0, 16], sizes = [2, 8, 16], strides = [1, 1, 1]} : vector<2x8x128xf32> to vector<2x8x16xf32>
    "tpu.trace_start"() <{level = 10 : i32, message = "bqd,bkd->bqk"}> : () -> ()
    %cst_30 = arith.constant dense<0.000000e+00> : vector<2x8x8xf32>
    %53 = tpu.matmul %51, %52, %cst_30 {dimension_numbers = #tpu.dot_dimension_numbers<[2], [2], [1], [1], [0, 0, 0, 1, 1, 1], [0], [0]>} : vector<2x8x16xf32>, vector<2x8x16xf32>, vector<2x8x8xf32> -> vector<2x8x8xf32>
    "tpu.trace_stop"() : () -> ()
    %54 = vector.shape_cast %7 : vector<8x8xf32> to vector<1x8x8xf32>
    %55 = vector.broadcast %54 : vector<1x8x8xf32> to vector<2x8x8xf32>
    %56 = arith.addf %53, %55 : vector<2x8x8xf32>
    %cst_31 = arith.constant dense<0xFF800000> : vector<2x8xf32>
    %57 = vector.multi_reduction <maximumf>, %56, %cst_31 [2] : vector<2x8x8xf32> to vector<2x8xf32>
    %58 = vector.shape_cast %57 : vector<2x8xf32> to vector<2x8x1xf32>
    %59 = vector.broadcast %58 : vector<2x8x1xf32> to vector<2x8x8xf32>
    %60 = arith.subf %56, %59 : vector<2x8x8xf32>
    %61 = math.exp %60 : vector<2x8x8xf32>
    %cst_32 = arith.constant dense<0.000000e+00> : vector<2x8xf32>
    %62 = vector.multi_reduction <add>, %61, %cst_32 [2] : vector<2x8x8xf32> to vector<2x8xf32>
    %63 = vector.shape_cast %62 : vector<2x8xf32> to vector<2x8x1xf32>
    %64 = tpu.reciprocal %63 {approx = true} : vector<2x8x1xf32> -> vector<2x8x1xf32>
    %65 = vector.broadcast %64 : vector<2x8x1xf32> to vector<2x8x8xf32>
    %66 = arith.mulf %61, %65 : vector<2x8x8xf32>
    %67 = vector.extract_strided_slice %32 {offsets = [0, 0, 16], sizes = [2, 8, 16], strides = [1, 1, 1]} : vector<2x8x128xf32> to vector<2x8x16xf32>
    "tpu.trace_start"() <{level = 10 : i32, message = "bqk,bkd->bqd"}> : () -> ()
    %cst_33 = arith.constant dense<0.000000e+00> : vector<2x8x16xf32>
    %68 = tpu.matmul %66, %67, %cst_33 {dimension_numbers = #tpu.dot_dimension_numbers<[2], [1], [1], [2], [0, 0, 0, 1, 1, 2], [0], [0]>} : vector<2x8x8xf32>, vector<2x8x16xf32>, vector<2x8x16xf32> -> vector<2x8x16xf32>
    "tpu.trace_stop"() : () -> ()
    %69 = vector.extract_strided_slice %30 {offsets = [0, 0, 32], sizes = [2, 8, 16], strides = [1, 1, 1]} : vector<2x8x128xf32> to vector<2x8x16xf32>
    %70 = vector.extract_strided_slice %31 {offsets = [0, 0, 32], sizes = [2, 8, 16], strides = [1, 1, 1]} : vector<2x8x128xf32> to vector<2x8x16xf32>
    "tpu.trace_start"() <{level = 10 : i32, message = "bqd,bkd->bqk"}> : () -> ()
    %cst_34 = arith.constant dense<0.000000e+00> : vector<2x8x8xf32>
    %71 = tpu.matmul %69, %70, %cst_34 {dimension_numbers = #tpu.dot_dimension_numbers<[2], [2], [1], [1], [0, 0, 0, 1, 1, 1], [0], [0]>} : vector<2x8x16xf32>, vector<2x8x16xf32>, vector<2x8x8xf32> -> vector<2x8x8xf32>
    "tpu.trace_stop"() : () -> ()
    %72 = vector.shape_cast %7 : vector<8x8xf32> to vector<1x8x8xf32>
    %73 = vector.broadcast %72 : vector<1x8x8xf32> to vector<2x8x8xf32>
    %74 = arith.addf %71, %73 : vector<2x8x8xf32>
    %cst_35 = arith.constant dense<0xFF800000> : vector<2x8xf32>
    %75 = vector.multi_reduction <maximumf>, %74, %cst_35 [2] : vector<2x8x8xf32> to vector<2x8xf32>
    %76 = vector.shape_cast %75 : vector<2x8xf32> to vector<2x8x1xf32>
    %77 = vector.broadcast %76 : vector<2x8x1xf32> to vector<2x8x8xf32>
    %78 = arith.subf %74, %77 : vector<2x8x8xf32>
    %79 = math.exp %78 : vector<2x8x8xf32>
    %cst_36 = arith.constant dense<0.000000e+00> : vector<2x8xf32>
    %80 = vector.multi_reduction <add>, %79, %cst_36 [2] : vector<2x8x8xf32> to vector<2x8xf32>
    %81 = vector.shape_cast %80 : vector<2x8xf32> to vector<2x8x1xf32>
    %82 = tpu.reciprocal %81 {approx = true} : vector<2x8x1xf32> -> vector<2x8x1xf32>
    %83 = vector.broadcast %82 : vector<2x8x1xf32> to vector<2x8x8xf32>
    %84 = arith.mulf %79, %83 : vector<2x8x8xf32>
    %85 = vector.extract_strided_slice %32 {offsets = [0, 0, 32], sizes = [2, 8, 16], strides = [1, 1, 1]} : vector<2x8x128xf32> to vector<2x8x16xf32>
    "tpu.trace_start"() <{level = 10 : i32, message = "bqk,bkd->bqd"}> : () -> ()
    %cst_37 = arith.constant dense<0.000000e+00> : vector<2x8x16xf32>
    %86 = tpu.matmul %84, %85, %cst_37 {dimension_numbers = #tpu.dot_dimension_numbers<[2], [1], [1], [2], [0, 0, 0, 1, 1, 2], [0], [0]>} : vector<2x8x8xf32>, vector<2x8x16xf32>, vector<2x8x16xf32> -> vector<2x8x16xf32>
    "tpu.trace_stop"() : () -> ()
    %87 = vector.extract_strided_slice %30 {offsets = [0, 0, 48], sizes = [2, 8, 16], strides = [1, 1, 1]} : vector<2x8x128xf32> to vector<2x8x16xf32>
    %88 = vector.extract_strided_slice %31 {offsets = [0, 0, 48], sizes = [2, 8, 16], strides = [1, 1, 1]} : vector<2x8x128xf32> to vector<2x8x16xf32>
    "tpu.trace_start"() <{level = 10 : i32, message = "bqd,bkd->bqk"}> : () -> ()
    %cst_38 = arith.constant dense<0.000000e+00> : vector<2x8x8xf32>
    %89 = tpu.matmul %87, %88, %cst_38 {dimension_numbers = #tpu.dot_dimension_numbers<[2], [2], [1], [1], [0, 0, 0, 1, 1, 1], [0], [0]>} : vector<2x8x16xf32>, vector<2x8x16xf32>, vector<2x8x8xf32> -> vector<2x8x8xf32>
    "tpu.trace_stop"() : () -> ()
    %90 = vector.shape_cast %7 : vector<8x8xf32> to vector<1x8x8xf32>
    %91 = vector.broadcast %90 : vector<1x8x8xf32> to vector<2x8x8xf32>
    %92 = arith.addf %89, %91 : vector<2x8x8xf32>
    %cst_39 = arith.constant dense<0xFF800000> : vector<2x8xf32>
    %93 = vector.multi_reduction <maximumf>, %92, %cst_39 [2] : vector<2x8x8xf32> to vector<2x8xf32>
    %94 = vector.shape_cast %93 : vector<2x8xf32> to vector<2x8x1xf32>
    %95 = vector.broadcast %94 : vector<2x8x1xf32> to vector<2x8x8xf32>
    %96 = arith.subf %92, %95 : vector<2x8x8xf32>
    %97 = math.exp %96 : vector<2x8x8xf32>
    %cst_40 = arith.constant dense<0.000000e+00> : vector<2x8xf32>
    %98 = vector.multi_reduction <add>, %97, %cst_40 [2] : vector<2x8x8xf32> to vector<2x8xf32>
    %99 = vector.shape_cast %98 : vector<2x8xf32> to vector<2x8x1xf32>
    %100 = tpu.reciprocal %99 {approx = true} : vector<2x8x1xf32> -> vector<2x8x1xf32>
    %101 = vector.broadcast %100 : vector<2x8x1xf32> to vector<2x8x8xf32>
    %102 = arith.mulf %97, %101 : vector<2x8x8xf32>
    %103 = vector.extract_strided_slice %32 {offsets = [0, 0, 48], sizes = [2, 8, 16], strides = [1, 1, 1]} : vector<2x8x128xf32> to vector<2x8x16xf32>
    "tpu.trace_start"() <{level = 10 : i32, message = "bqk,bkd->bqd"}> : () -> ()
    %cst_41 = arith.constant dense<0.000000e+00> : vector<2x8x16xf32>
    %104 = tpu.matmul %102, %103, %cst_41 {dimension_numbers = #tpu.dot_dimension_numbers<[2], [1], [1], [2], [0, 0, 0, 1, 1, 2], [0], [0]>} : vector<2x8x8xf32>, vector<2x8x16xf32>, vector<2x8x16xf32> -> vector<2x8x16xf32>
    "tpu.trace_stop"() : () -> ()
    %105 = vector.extract_strided_slice %30 {offsets = [0, 0, 64], sizes = [2, 8, 16], strides = [1, 1, 1]} : vector<2x8x128xf32> to vector<2x8x16xf32>
    %106 = vector.extract_strided_slice %31 {offsets = [0, 0, 64], sizes = [2, 8, 16], strides = [1, 1, 1]} : vector<2x8x128xf32> to vector<2x8x16xf32>
    "tpu.trace_start"() <{level = 10 : i32, message = "bqd,bkd->bqk"}> : () -> ()
    %cst_42 = arith.constant dense<0.000000e+00> : vector<2x8x8xf32>
    %107 = tpu.matmul %105, %106, %cst_42 {dimension_numbers = #tpu.dot_dimension_numbers<[2], [2], [1], [1], [0, 0, 0, 1, 1, 1], [0], [0]>} : vector<2x8x16xf32>, vector<2x8x16xf32>, vector<2x8x8xf32> -> vector<2x8x8xf32>
    "tpu.trace_stop"() : () -> ()
    %108 = vector.shape_cast %7 : vector<8x8xf32> to vector<1x8x8xf32>
    %109 = vector.broadcast %108 : vector<1x8x8xf32> to vector<2x8x8xf32>
    %110 = arith.addf %107, %109 : vector<2x8x8xf32>
    %cst_43 = arith.constant dense<0xFF800000> : vector<2x8xf32>
    %111 = vector.multi_reduction <maximumf>, %110, %cst_43 [2] : vector<2x8x8xf32> to vector<2x8xf32>
    %112 = vector.shape_cast %111 : vector<2x8xf32> to vector<2x8x1xf32>
    %113 = vector.broadcast %112 : vector<2x8x1xf32> to vector<2x8x8xf32>
    %114 = arith.subf %110, %113 : vector<2x8x8xf32>
    %115 = math.exp %114 : vector<2x8x8xf32>
    %cst_44 = arith.constant dense<0.000000e+00> : vector<2x8xf32>
    %116 = vector.multi_reduction <add>, %115, %cst_44 [2] : vector<2x8x8xf32> to vector<2x8xf32>
    %117 = vector.shape_cast %116 : vector<2x8xf32> to vector<2x8x1xf32>
    %118 = tpu.reciprocal %117 {approx = true} : vector<2x8x1xf32> -> vector<2x8x1xf32>
    %119 = vector.broadcast %118 : vector<2x8x1xf32> to vector<2x8x8xf32>
    %120 = arith.mulf %115, %119 : vector<2x8x8xf32>
    %121 = vector.extract_strided_slice %32 {offsets = [0, 0, 64], sizes = [2, 8, 16], strides = [1, 1, 1]} : vector<2x8x128xf32> to vector<2x8x16xf32>
    "tpu.trace_start"() <{level = 10 : i32, message = "bqk,bkd->bqd"}> : () -> ()
    %cst_45 = arith.constant dense<0.000000e+00> : vector<2x8x16xf32>
    %122 = tpu.matmul %120, %121, %cst_45 {dimension_numbers = #tpu.dot_dimension_numbers<[2], [1], [1], [2], [0, 0, 0, 1, 1, 2], [0], [0]>} : vector<2x8x8xf32>, vector<2x8x16xf32>, vector<2x8x16xf32> -> vector<2x8x16xf32>
    "tpu.trace_stop"() : () -> ()
    %123 = vector.extract_strided_slice %30 {offsets = [0, 0, 80], sizes = [2, 8, 16], strides = [1, 1, 1]} : vector<2x8x128xf32> to vector<2x8x16xf32>
    %124 = vector.extract_strided_slice %31 {offsets = [0, 0, 80], sizes = [2, 8, 16], strides = [1, 1, 1]} : vector<2x8x128xf32> to vector<2x8x16xf32>
    "tpu.trace_start"() <{level = 10 : i32, message = "bqd,bkd->bqk"}> : () -> ()
    %cst_46 = arith.constant dense<0.000000e+00> : vector<2x8x8xf32>
    %125 = tpu.matmul %123, %124, %cst_46 {dimension_numbers = #tpu.dot_dimension_numbers<[2], [2], [1], [1], [0, 0, 0, 1, 1, 1], [0], [0]>} : vector<2x8x16xf32>, vector<2x8x16xf32>, vector<2x8x8xf32> -> vector<2x8x8xf32>
    "tpu.trace_stop"() : () -> ()
    %126 = vector.shape_cast %7 : vector<8x8xf32> to vector<1x8x8xf32>
    %127 = vector.broadcast %126 : vector<1x8x8xf32> to vector<2x8x8xf32>
    %128 = arith.addf %125, %127 : vector<2x8x8xf32>
    %cst_47 = arith.constant dense<0xFF800000> : vector<2x8xf32>
    %129 = vector.multi_reduction <maximumf>, %128, %cst_47 [2] : vector<2x8x8xf32> to vector<2x8xf32>
    %130 = vector.shape_cast %129 : vector<2x8xf32> to vector<2x8x1xf32>
    %131 = vector.broadcast %130 : vector<2x8x1xf32> to vector<2x8x8xf32>
    %132 = arith.subf %128, %131 : vector<2x8x8xf32>
    %133 = math.exp %132 : vector<2x8x8xf32>
    %cst_48 = arith.constant dense<0.000000e+00> : vector<2x8xf32>
    %134 = vector.multi_reduction <add>, %133, %cst_48 [2] : vector<2x8x8xf32> to vector<2x8xf32>
    %135 = vector.shape_cast %134 : vector<2x8xf32> to vector<2x8x1xf32>
    %136 = tpu.reciprocal %135 {approx = true} : vector<2x8x1xf32> -> vector<2x8x1xf32>
    %137 = vector.broadcast %136 : vector<2x8x1xf32> to vector<2x8x8xf32>
    %138 = arith.mulf %133, %137 : vector<2x8x8xf32>
    %139 = vector.extract_strided_slice %32 {offsets = [0, 0, 80], sizes = [2, 8, 16], strides = [1, 1, 1]} : vector<2x8x128xf32> to vector<2x8x16xf32>
    "tpu.trace_start"() <{level = 10 : i32, message = "bqk,bkd->bqd"}> : () -> ()
    %cst_49 = arith.constant dense<0.000000e+00> : vector<2x8x16xf32>
    %140 = tpu.matmul %138, %139, %cst_49 {dimension_numbers = #tpu.dot_dimension_numbers<[2], [1], [1], [2], [0, 0, 0, 1, 1, 2], [0], [0]>} : vector<2x8x8xf32>, vector<2x8x16xf32>, vector<2x8x16xf32> -> vector<2x8x16xf32>
    "tpu.trace_stop"() : () -> ()
    %141 = vector.extract_strided_slice %30 {offsets = [0, 0, 96], sizes = [2, 8, 16], strides = [1, 1, 1]} : vector<2x8x128xf32> to vector<2x8x16xf32>
    %142 = vector.extract_strided_slice %31 {offsets = [0, 0, 96], sizes = [2, 8, 16], strides = [1, 1, 1]} : vector<2x8x128xf32> to vector<2x8x16xf32>
    "tpu.trace_start"() <{level = 10 : i32, message = "bqd,bkd->bqk"}> : () -> ()
    %cst_50 = arith.constant dense<0.000000e+00> : vector<2x8x8xf32>
    %143 = tpu.matmul %141, %142, %cst_50 {dimension_numbers = #tpu.dot_dimension_numbers<[2], [2], [1], [1], [0, 0, 0, 1, 1, 1], [0], [0]>} : vector<2x8x16xf32>, vector<2x8x16xf32>, vector<2x8x8xf32> -> vector<2x8x8xf32>
    "tpu.trace_stop"() : () -> ()
    %144 = vector.shape_cast %7 : vector<8x8xf32> to vector<1x8x8xf32>
    %145 = vector.broadcast %144 : vector<1x8x8xf32> to vector<2x8x8xf32>
    %146 = arith.addf %143, %145 : vector<2x8x8xf32>
    %cst_51 = arith.constant dense<0xFF800000> : vector<2x8xf32>
    %147 = vector.multi_reduction <maximumf>, %146, %cst_51 [2] : vector<2x8x8xf32> to vector<2x8xf32>
    %148 = vector.shape_cast %147 : vector<2x8xf32> to vector<2x8x1xf32>
    %149 = vector.broadcast %148 : vector<2x8x1xf32> to vector<2x8x8xf32>
    %150 = arith.subf %146, %149 : vector<2x8x8xf32>
    %151 = math.exp %150 : vector<2x8x8xf32>
    %cst_52 = arith.constant dense<0.000000e+00> : vector<2x8xf32>
    %152 = vector.multi_reduction <add>, %151, %cst_52 [2] : vector<2x8x8xf32> to vector<2x8xf32>
    %153 = vector.shape_cast %152 : vector<2x8xf32> to vector<2x8x1xf32>
    %154 = tpu.reciprocal %153 {approx = true} : vector<2x8x1xf32> -> vector<2x8x1xf32>
    %155 = vector.broadcast %154 : vector<2x8x1xf32> to vector<2x8x8xf32>
    %156 = arith.mulf %151, %155 : vector<2x8x8xf32>
    %157 = vector.extract_strided_slice %32 {offsets = [0, 0, 96], sizes = [2, 8, 16], strides = [1, 1, 1]} : vector<2x8x128xf32> to vector<2x8x16xf32>
    "tpu.trace_start"() <{level = 10 : i32, message = "bqk,bkd->bqd"}> : () -> ()
    %cst_53 = arith.constant dense<0.000000e+00> : vector<2x8x16xf32>
    %158 = tpu.matmul %156, %157, %cst_53 {dimension_numbers = #tpu.dot_dimension_numbers<[2], [1], [1], [2], [0, 0, 0, 1, 1, 2], [0], [0]>} : vector<2x8x8xf32>, vector<2x8x16xf32>, vector<2x8x16xf32> -> vector<2x8x16xf32>
    "tpu.trace_stop"() : () -> ()
    %159 = vector.extract_strided_slice %30 {offsets = [0, 0, 112], sizes = [2, 8, 16], strides = [1, 1, 1]} : vector<2x8x128xf32> to vector<2x8x16xf32>
    %160 = vector.extract_strided_slice %31 {offsets = [0, 0, 112], sizes = [2, 8, 16], strides = [1, 1, 1]} : vector<2x8x128xf32> to vector<2x8x16xf32>
    "tpu.trace_start"() <{level = 10 : i32, message = "bqd,bkd->bqk"}> : () -> ()
    %cst_54 = arith.constant dense<0.000000e+00> : vector<2x8x8xf32>
    %161 = tpu.matmul %159, %160, %cst_54 {dimension_numbers = #tpu.dot_dimension_numbers<[2], [2], [1], [1], [0, 0, 0, 1, 1, 1], [0], [0]>} : vector<2x8x16xf32>, vector<2x8x16xf32>, vector<2x8x8xf32> -> vector<2x8x8xf32>
    "tpu.trace_stop"() : () -> ()
    %162 = vector.shape_cast %7 : vector<8x8xf32> to vector<1x8x8xf32>
    %163 = vector.broadcast %162 : vector<1x8x8xf32> to vector<2x8x8xf32>
    %164 = arith.addf %161, %163 : vector<2x8x8xf32>
    %cst_55 = arith.constant dense<0xFF800000> : vector<2x8xf32>
    %165 = vector.multi_reduction <maximumf>, %164, %cst_55 [2] : vector<2x8x8xf32> to vector<2x8xf32>
    %166 = vector.shape_cast %165 : vector<2x8xf32> to vector<2x8x1xf32>
    %167 = vector.broadcast %166 : vector<2x8x1xf32> to vector<2x8x8xf32>
    %168 = arith.subf %164, %167 : vector<2x8x8xf32>
    %169 = math.exp %168 : vector<2x8x8xf32>
    %cst_56 = arith.constant dense<0.000000e+00> : vector<2x8xf32>
    %170 = vector.multi_reduction <add>, %169, %cst_56 [2] : vector<2x8x8xf32> to vector<2x8xf32>
    %171 = vector.shape_cast %170 : vector<2x8xf32> to vector<2x8x1xf32>
    %172 = tpu.reciprocal %171 {approx = true} : vector<2x8x1xf32> -> vector<2x8x1xf32>
    %173 = vector.broadcast %172 : vector<2x8x1xf32> to vector<2x8x8xf32>
    %174 = arith.mulf %169, %173 : vector<2x8x8xf32>
    %175 = vector.extract_strided_slice %32 {offsets = [0, 0, 112], sizes = [2, 8, 16], strides = [1, 1, 1]} : vector<2x8x128xf32> to vector<2x8x16xf32>
    "tpu.trace_start"() <{level = 10 : i32, message = "bqk,bkd->bqd"}> : () -> ()
    %cst_57 = arith.constant dense<0.000000e+00> : vector<2x8x16xf32>
    %176 = tpu.matmul %174, %175, %cst_57 {dimension_numbers = #tpu.dot_dimension_numbers<[2], [1], [1], [2], [0, 0, 0, 1, 1, 2], [0], [0]>} : vector<2x8x8xf32>, vector<2x8x16xf32>, vector<2x8x16xf32> -> vector<2x8x16xf32>
    "tpu.trace_stop"() : () -> ()
    %177 = tpu.concatenate %50, %68, %86, %104, %122, %140, %158, %176 in 2 : vector<2x8x16xf32>, vector<2x8x16xf32>, vector<2x8x16xf32>, vector<2x8x16xf32>, vector<2x8x16xf32>, vector<2x8x16xf32>, vector<2x8x16xf32>, vector<2x8x16xf32> -> vector<2x8x128xf32>
    %178 = vector.shape_cast %177 : vector<2x8x128xf32> to vector<16x128xf32>
    %179 = arith.truncf %178 : vector<16x128xf32> to vector<16x128xbf16>
    %c0_58 = arith.constant 0 : index
    %c0_59 = arith.constant 0 : index
    %c0_60 = arith.constant 0 : index
    %180 = vector.load %arg10[%c0_58, %c0_59, %c0_60] : memref<4x128x128xbf16, #tpu.memory_space<vmem>>, vector<1x128x128xbf16>
    %181 = vector.shape_cast %180 : vector<1x128x128xbf16> to vector<128x128xbf16>
    %cst_61 = arith.constant dense<0.000000e+00> : vector<16x128xf32>
    %182 = tpu.matmul %179, %181, %cst_61 {dimension_numbers = #tpu.dot_dimension_numbers<[1], [0], [0], [1], [0, 0, 1, 1], [], []>} : vector<16x128xbf16>, vector<128x128xbf16>, vector<16x128xf32> -> vector<16x128xf32>
    %c0_62 = arith.constant 0 : index
    %c0_63 = arith.constant 0 : index
    %c0_64 = arith.constant 0 : index
    %183 = vector.load %arg11[%c0_62, %c0_63, %c0_64] : memref<4x1x128xf32, #tpu.memory_space<vmem>>, vector<1x1x128xf32>
    %184 = vector.shape_cast %183 : vector<1x1x128xf32> to vector<1x128xf32>
    %185 = vector.broadcast %184 : vector<1x128xf32> to vector<16x128xf32>
    %186 = arith.addf %182, %185 : vector<16x128xf32>
    %187 = arith.addf %6, %186 : vector<16x128xf32>
    %cst_65 = arith.constant dense<0.000000e+00> : vector<16xf32>
    %188 = vector.multi_reduction <add>, %187, %cst_65 [1] : vector<16x128xf32> to vector<16xf32>
    %189 = vector.shape_cast %188 : vector<16xf32> to vector<16x1xf32>
    %cst_66 = arith.constant 1.280000e+02 : f32
    %190 = vector.broadcast %cst_66 : f32 to vector<16x1xf32>
    %191 = arith.divf %189, %190 : vector<16x1xf32>
    %192 = arith.mulf %187, %187 : vector<16x128xf32>
    %cst_67 = arith.constant dense<0.000000e+00> : vector<16xf32>
    %193 = vector.multi_reduction <add>, %192, %cst_67 [1] : vector<16x128xf32> to vector<16xf32>
    %194 = vector.shape_cast %193 : vector<16xf32> to vector<16x1xf32>
    %cst_68 = arith.constant 1.280000e+02 : f32
    %195 = vector.broadcast %cst_68 : f32 to vector<16x1xf32>
    %196 = arith.divf %194, %195 : vector<16x1xf32>
    %197 = arith.mulf %191, %191 : vector<16x1xf32>
    %198 = arith.subf %196, %197 : vector<16x1xf32>
    %199 = vector.broadcast %191 : vector<16x1xf32> to vector<16x128xf32>
    %200 = arith.subf %187, %199 : vector<16x128xf32>
    %cst_69 = arith.constant 9.99999974E-6 : f32
    %201 = vector.broadcast %cst_69 : f32 to vector<16x1xf32>
    %202 = arith.addf %198, %201 : vector<16x1xf32>
    %203 = math.rsqrt %202 : vector<16x1xf32>
    %204 = vector.broadcast %203 : vector<16x1xf32> to vector<16x128xf32>
    %205 = arith.mulf %200, %204 : vector<16x128xf32>
    %c0_70 = arith.constant 0 : index
    %c0_71 = arith.constant 0 : index
    %c0_72 = arith.constant 0 : index
    %206 = vector.load %arg12[%c0_70, %c0_71, %c0_72] : memref<4x1x128xf32, #tpu.memory_space<vmem>>, vector<1x1x128xf32>
    %207 = vector.shape_cast %206 : vector<1x1x128xf32> to vector<1x128xf32>
    %208 = vector.broadcast %207 : vector<1x128xf32> to vector<16x128xf32>
    %209 = arith.mulf %205, %208 : vector<16x128xf32>
    %c0_73 = arith.constant 0 : index
    %c0_74 = arith.constant 0 : index
    %c0_75 = arith.constant 0 : index
    %210 = vector.load %arg13[%c0_73, %c0_74, %c0_75] : memref<4x1x128xf32, #tpu.memory_space<vmem>>, vector<1x1x128xf32>
    %211 = vector.shape_cast %210 : vector<1x1x128xf32> to vector<1x128xf32>
    %212 = vector.broadcast %211 : vector<1x128xf32> to vector<16x128xf32>
    %213 = arith.addf %209, %212 : vector<16x128xf32>
    %214 = arith.truncf %213 : vector<16x128xf32> to vector<16x128xbf16>
    %c0_76 = arith.constant 0 : index
    %c0_77 = arith.constant 0 : index
    %c0_78 = arith.constant 0 : index
    %215 = vector.load %arg14[%c0_76, %c0_77, %c0_78] : memref<4x128x512xbf16, #tpu.memory_space<vmem>>, vector<1x128x512xbf16>
    %216 = vector.shape_cast %215 : vector<1x128x512xbf16> to vector<128x512xbf16>
    %cst_79 = arith.constant dense<0.000000e+00> : vector<16x512xf32>
    %217 = tpu.matmul %214, %216, %cst_79 {dimension_numbers = #tpu.dot_dimension_numbers<[1], [0], [0], [1], [0, 0, 1, 1], [], []>} : vector<16x128xbf16>, vector<128x512xbf16>, vector<16x512xf32> -> vector<16x512xf32>
    %c0_80 = arith.constant 0 : index
    %c0_81 = arith.constant 0 : index
    %c0_82 = arith.constant 0 : index
    %218 = vector.load %arg15[%c0_80, %c0_81, %c0_82] : memref<4x1x512xf32, #tpu.memory_space<vmem>>, vector<1x1x512xf32>
    %219 = vector.shape_cast %218 : vector<1x1x512xf32> to vector<1x512xf32>
    %220 = vector.broadcast %219 : vector<1x512xf32> to vector<16x512xf32>
    %221 = arith.addf %217, %220 : vector<16x512xf32>
    %cst_83 = arith.constant 0.000000e+00 : f32
    %222 = vector.broadcast %cst_83 : f32 to vector<16x512xf32>
    %223 = arith.maximumf %221, %222 : vector<16x512xf32>
    %224 = arith.truncf %223 : vector<16x512xf32> to vector<16x512xbf16>
    %c0_84 = arith.constant 0 : index
    %c0_85 = arith.constant 0 : index
    %c0_86 = arith.constant 0 : index
    %225 = vector.load %arg16[%c0_84, %c0_85, %c0_86] : memref<4x512x128xbf16, #tpu.memory_space<vmem>>, vector<1x512x128xbf16>
    %226 = vector.shape_cast %225 : vector<1x512x128xbf16> to vector<512x128xbf16>
    %cst_87 = arith.constant dense<0.000000e+00> : vector<16x128xf32>
    %227 = tpu.matmul %224, %226, %cst_87 {dimension_numbers = #tpu.dot_dimension_numbers<[1], [0], [0], [1], [0, 0, 1, 1], [], []>} : vector<16x512xbf16>, vector<512x128xbf16>, vector<16x128xf32> -> vector<16x128xf32>
    %c0_88 = arith.constant 0 : index
    %c0_89 = arith.constant 0 : index
    %c0_90 = arith.constant 0 : index
    %228 = vector.load %arg17[%c0_88, %c0_89, %c0_90] : memref<4x1x128xf32, #tpu.memory_space<vmem>>, vector<1x1x128xf32>
    %229 = vector.shape_cast %228 : vector<1x1x128xf32> to vector<1x128xf32>
    %230 = vector.broadcast %229 : vector<1x128xf32> to vector<16x128xf32>
    %231 = arith.addf %227, %230 : vector<16x128xf32>
    %232 = arith.addf %213, %231 : vector<16x128xf32>
    %cst_91 = arith.constant dense<0.000000e+00> : vector<16xf32>
    %233 = vector.multi_reduction <add>, %232, %cst_91 [1] : vector<16x128xf32> to vector<16xf32>
    %234 = vector.shape_cast %233 : vector<16xf32> to vector<16x1xf32>
    %cst_92 = arith.constant 1.280000e+02 : f32
    %235 = vector.broadcast %cst_92 : f32 to vector<16x1xf32>
    %236 = arith.divf %234, %235 : vector<16x1xf32>
    %237 = arith.mulf %232, %232 : vector<16x128xf32>
    %cst_93 = arith.constant dense<0.000000e+00> : vector<16xf32>
    %238 = vector.multi_reduction <add>, %237, %cst_93 [1] : vector<16x128xf32> to vector<16xf32>
    %239 = vector.shape_cast %238 : vector<16xf32> to vector<16x1xf32>
    %cst_94 = arith.constant 1.280000e+02 : f32
    %240 = vector.broadcast %cst_94 : f32 to vector<16x1xf32>
    %241 = arith.divf %239, %240 : vector<16x1xf32>
    %242 = arith.mulf %236, %236 : vector<16x1xf32>
    %243 = arith.subf %241, %242 : vector<16x1xf32>
    %244 = vector.broadcast %236 : vector<16x1xf32> to vector<16x128xf32>
    %245 = arith.subf %232, %244 : vector<16x128xf32>
    %cst_95 = arith.constant 9.99999974E-6 : f32
    %246 = vector.broadcast %cst_95 : f32 to vector<16x1xf32>
    %247 = arith.addf %243, %246 : vector<16x1xf32>
    %248 = math.rsqrt %247 : vector<16x1xf32>
    %249 = vector.broadcast %248 : vector<16x1xf32> to vector<16x128xf32>
    %250 = arith.mulf %245, %249 : vector<16x128xf32>
    %c0_96 = arith.constant 0 : index
    %c0_97 = arith.constant 0 : index
    %c0_98 = arith.constant 0 : index
    %251 = vector.load %arg18[%c0_96, %c0_97, %c0_98] : memref<4x1x128xf32, #tpu.memory_space<vmem>>, vector<1x1x128xf32>
    %252 = vector.shape_cast %251 : vector<1x1x128xf32> to vector<1x128xf32>
    %253 = vector.broadcast %252 : vector<1x128xf32> to vector<16x128xf32>
    %254 = arith.mulf %250, %253 : vector<16x128xf32>
    %c0_99 = arith.constant 0 : index
    %c0_100 = arith.constant 0 : index
    %c0_101 = arith.constant 0 : index
    %255 = vector.load %arg19[%c0_99, %c0_100, %c0_101] : memref<4x1x128xf32, #tpu.memory_space<vmem>>, vector<1x1x128xf32>
    %256 = vector.shape_cast %255 : vector<1x1x128xf32> to vector<1x128xf32>
    %257 = vector.broadcast %256 : vector<1x128xf32> to vector<16x128xf32>
    %258 = arith.addf %254, %257 : vector<16x128xf32>
    %259 = arith.truncf %258 : vector<16x128xf32> to vector<16x128xbf16>
    %c1 = arith.constant 1 : index
    %c0_102 = arith.constant 0 : index
    %c0_103 = arith.constant 0 : index
    %260 = vector.load %arg4[%c1, %c0_102, %c0_103] : memref<4x128x128xbf16, #tpu.memory_space<vmem>>, vector<1x128x128xbf16>
    %261 = vector.shape_cast %260 : vector<1x128x128xbf16> to vector<128x128xbf16>
    %cst_104 = arith.constant dense<0.000000e+00> : vector<16x128xf32>
    %262 = tpu.matmul %259, %261, %cst_104 {dimension_numbers = #tpu.dot_dimension_numbers<[1], [0], [0], [1], [0, 0, 1, 1], [], []>} : vector<16x128xbf16>, vector<128x128xbf16>, vector<16x128xf32> -> vector<16x128xf32>
    %c1_105 = arith.constant 1 : index
    %c0_106 = arith.constant 0 : index
    %c0_107 = arith.constant 0 : index
    %263 = vector.load %arg5[%c1_105, %c0_106, %c0_107] : memref<4x1x128xf32, #tpu.memory_space<vmem>>, vector<1x1x128xf32>
    %264 = vector.shape_cast %263 : vector<1x1x128xf32> to vector<1x128xf32>
    %265 = vector.broadcast %264 : vector<1x128xf32> to vector<16x128xf32>
    %266 = arith.addf %262, %265 : vector<16x128xf32>
    %c1_108 = arith.constant 1 : index
    %c0_109 = arith.constant 0 : index
    %c0_110 = arith.constant 0 : index
    %267 = vector.load %arg6[%c1_108, %c0_109, %c0_110] : memref<4x128x128xbf16, #tpu.memory_space<vmem>>, vector<1x128x128xbf16>
    %268 = vector.shape_cast %267 : vector<1x128x128xbf16> to vector<128x128xbf16>
    %cst_111 = arith.constant dense<0.000000e+00> : vector<16x128xf32>
    %269 = tpu.matmul %259, %268, %cst_111 {dimension_numbers = #tpu.dot_dimension_numbers<[1], [0], [0], [1], [0, 0, 1, 1], [], []>} : vector<16x128xbf16>, vector<128x128xbf16>, vector<16x128xf32> -> vector<16x128xf32>
    %c1_112 = arith.constant 1 : index
    %c0_113 = arith.constant 0 : index
    %c0_114 = arith.constant 0 : index
    %270 = vector.load %arg7[%c1_112, %c0_113, %c0_114] : memref<4x1x128xf32, #tpu.memory_space<vmem>>, vector<1x1x128xf32>
    %271 = vector.shape_cast %270 : vector<1x1x128xf32> to vector<1x128xf32>
    %272 = vector.broadcast %271 : vector<1x128xf32> to vector<16x128xf32>
    %273 = arith.addf %269, %272 : vector<16x128xf32>
    %c1_115 = arith.constant 1 : index
    %c0_116 = arith.constant 0 : index
    %c0_117 = arith.constant 0 : index
    %274 = vector.load %arg8[%c1_115, %c0_116, %c0_117] : memref<4x128x128xbf16, #tpu.memory_space<vmem>>, vector<1x128x128xbf16>
    %275 = vector.shape_cast %274 : vector<1x128x128xbf16> to vector<128x128xbf16>
    %cst_118 = arith.constant dense<0.000000e+00> : vector<16x128xf32>
    %276 = tpu.matmul %259, %275, %cst_118 {dimension_numbers = #tpu.dot_dimension_numbers<[1], [0], [0], [1], [0, 0, 1, 1], [], []>} : vector<16x128xbf16>, vector<128x128xbf16>, vector<16x128xf32> -> vector<16x128xf32>
    %c1_119 = arith.constant 1 : index
    %c0_120 = arith.constant 0 : index
    %c0_121 = arith.constant 0 : index
    %277 = vector.load %arg9[%c1_119, %c0_120, %c0_121] : memref<4x1x128xf32, #tpu.memory_space<vmem>>, vector<1x1x128xf32>
    %278 = vector.shape_cast %277 : vector<1x1x128xf32> to vector<1x128xf32>
    %279 = vector.broadcast %278 : vector<1x128xf32> to vector<16x128xf32>
    %280 = arith.addf %276, %279 : vector<16x128xf32>
    %281 = vector.shape_cast %266 : vector<16x128xf32> to vector<2x8x128xf32>
    %282 = vector.shape_cast %273 : vector<16x128xf32> to vector<2x8x128xf32>
    %283 = vector.shape_cast %280 : vector<16x128xf32> to vector<2x8x128xf32>
    %284 = vector.extract_strided_slice %281 {offsets = [0, 0, 0], sizes = [2, 8, 16], strides = [1, 1, 1]} : vector<2x8x128xf32> to vector<2x8x16xf32>
    %285 = vector.extract_strided_slice %282 {offsets = [0, 0, 0], sizes = [2, 8, 16], strides = [1, 1, 1]} : vector<2x8x128xf32> to vector<2x8x16xf32>
    "tpu.trace_start"() <{level = 10 : i32, message = "bqd,bkd->bqk"}> : () -> ()
    %cst_122 = arith.constant dense<0.000000e+00> : vector<2x8x8xf32>
    %286 = tpu.matmul %284, %285, %cst_122 {dimension_numbers = #tpu.dot_dimension_numbers<[2], [2], [1], [1], [0, 0, 0, 1, 1, 1], [0], [0]>} : vector<2x8x16xf32>, vector<2x8x16xf32>, vector<2x8x8xf32> -> vector<2x8x8xf32>
    "tpu.trace_stop"() : () -> ()
    %287 = vector.shape_cast %7 : vector<8x8xf32> to vector<1x8x8xf32>
    %288 = vector.broadcast %287 : vector<1x8x8xf32> to vector<2x8x8xf32>
    %289 = arith.addf %286, %288 : vector<2x8x8xf32>
    %cst_123 = arith.constant dense<0xFF800000> : vector<2x8xf32>
    %290 = vector.multi_reduction <maximumf>, %289, %cst_123 [2] : vector<2x8x8xf32> to vector<2x8xf32>
    %291 = vector.shape_cast %290 : vector<2x8xf32> to vector<2x8x1xf32>
    %292 = vector.broadcast %291 : vector<2x8x1xf32> to vector<2x8x8xf32>
    %293 = arith.subf %289, %292 : vector<2x8x8xf32>
    %294 = math.exp %293 : vector<2x8x8xf32>
    %cst_124 = arith.constant dense<0.000000e+00> : vector<2x8xf32>
    %295 = vector.multi_reduction <add>, %294, %cst_124 [2] : vector<2x8x8xf32> to vector<2x8xf32>
    %296 = vector.shape_cast %295 : vector<2x8xf32> to vector<2x8x1xf32>
    %297 = tpu.reciprocal %296 {approx = true} : vector<2x8x1xf32> -> vector<2x8x1xf32>
    %298 = vector.broadcast %297 : vector<2x8x1xf32> to vector<2x8x8xf32>
    %299 = arith.mulf %294, %298 : vector<2x8x8xf32>
    %300 = vector.extract_strided_slice %283 {offsets = [0, 0, 0], sizes = [2, 8, 16], strides = [1, 1, 1]} : vector<2x8x128xf32> to vector<2x8x16xf32>
    "tpu.trace_start"() <{level = 10 : i32, message = "bqk,bkd->bqd"}> : () -> ()
    %cst_125 = arith.constant dense<0.000000e+00> : vector<2x8x16xf32>
    %301 = tpu.matmul %299, %300, %cst_125 {dimension_numbers = #tpu.dot_dimension_numbers<[2], [1], [1], [2], [0, 0, 0, 1, 1, 2], [0], [0]>} : vector<2x8x8xf32>, vector<2x8x16xf32>, vector<2x8x16xf32> -> vector<2x8x16xf32>
    "tpu.trace_stop"() : () -> ()
    %302 = vector.extract_strided_slice %281 {offsets = [0, 0, 16], sizes = [2, 8, 16], strides = [1, 1, 1]} : vector<2x8x128xf32> to vector<2x8x16xf32>
    %303 = vector.extract_strided_slice %282 {offsets = [0, 0, 16], sizes = [2, 8, 16], strides = [1, 1, 1]} : vector<2x8x128xf32> to vector<2x8x16xf32>
    "tpu.trace_start"() <{level = 10 : i32, message = "bqd,bkd->bqk"}> : () -> ()
    %cst_126 = arith.constant dense<0.000000e+00> : vector<2x8x8xf32>
    %304 = tpu.matmul %302, %303, %cst_126 {dimension_numbers = #tpu.dot_dimension_numbers<[2], [2], [1], [1], [0, 0, 0, 1, 1, 1], [0], [0]>} : vector<2x8x16xf32>, vector<2x8x16xf32>, vector<2x8x8xf32> -> vector<2x8x8xf32>
    "tpu.trace_stop"() : () -> ()
    %305 = vector.shape_cast %7 : vector<8x8xf32> to vector<1x8x8xf32>
    %306 = vector.broadcast %305 : vector<1x8x8xf32> to vector<2x8x8xf32>
    %307 = arith.addf %304, %306 : vector<2x8x8xf32>
    %cst_127 = arith.constant dense<0xFF800000> : vector<2x8xf32>
    %308 = vector.multi_reduction <maximumf>, %307, %cst_127 [2] : vector<2x8x8xf32> to vector<2x8xf32>
    %309 = vector.shape_cast %308 : vector<2x8xf32> to vector<2x8x1xf32>
    %310 = vector.broadcast %309 : vector<2x8x1xf32> to vector<2x8x8xf32>
    %311 = arith.subf %307, %310 : vector<2x8x8xf32>
    %312 = math.exp %311 : vector<2x8x8xf32>
    %cst_128 = arith.constant dense<0.000000e+00> : vector<2x8xf32>
    %313 = vector.multi_reduction <add>, %312, %cst_128 [2] : vector<2x8x8xf32> to vector<2x8xf32>
    %314 = vector.shape_cast %313 : vector<2x8xf32> to vector<2x8x1xf32>
    %315 = tpu.reciprocal %314 {approx = true} : vector<2x8x1xf32> -> vector<2x8x1xf32>
    %316 = vector.broadcast %315 : vector<2x8x1xf32> to vector<2x8x8xf32>
    %317 = arith.mulf %312, %316 : vector<2x8x8xf32>
    %318 = vector.extract_strided_slice %283 {offsets = [0, 0, 16], sizes = [2, 8, 16], strides = [1, 1, 1]} : vector<2x8x128xf32> to vector<2x8x16xf32>
    "tpu.trace_start"() <{level = 10 : i32, message = "bqk,bkd->bqd"}> : () -> ()
    %cst_129 = arith.constant dense<0.000000e+00> : vector<2x8x16xf32>
    %319 = tpu.matmul %317, %318, %cst_129 {dimension_numbers = #tpu.dot_dimension_numbers<[2], [1], [1], [2], [0, 0, 0, 1, 1, 2], [0], [0]>} : vector<2x8x8xf32>, vector<2x8x16xf32>, vector<2x8x16xf32> -> vector<2x8x16xf32>
    "tpu.trace_stop"() : () -> ()
    %320 = vector.extract_strided_slice %281 {offsets = [0, 0, 32], sizes = [2, 8, 16], strides = [1, 1, 1]} : vector<2x8x128xf32> to vector<2x8x16xf32>
    %321 = vector.extract_strided_slice %282 {offsets = [0, 0, 32], sizes = [2, 8, 16], strides = [1, 1, 1]} : vector<2x8x128xf32> to vector<2x8x16xf32>
    "tpu.trace_start"() <{level = 10 : i32, message = "bqd,bkd->bqk"}> : () -> ()
    %cst_130 = arith.constant dense<0.000000e+00> : vector<2x8x8xf32>
    %322 = tpu.matmul %320, %321, %cst_130 {dimension_numbers = #tpu.dot_dimension_numbers<[2], [2], [1], [1], [0, 0, 0, 1, 1, 1], [0], [0]>} : vector<2x8x16xf32>, vector<2x8x16xf32>, vector<2x8x8xf32> -> vector<2x8x8xf32>
    "tpu.trace_stop"() : () -> ()
    %323 = vector.shape_cast %7 : vector<8x8xf32> to vector<1x8x8xf32>
    %324 = vector.broadcast %323 : vector<1x8x8xf32> to vector<2x8x8xf32>
    %325 = arith.addf %322, %324 : vector<2x8x8xf32>
    %cst_131 = arith.constant dense<0xFF800000> : vector<2x8xf32>
    %326 = vector.multi_reduction <maximumf>, %325, %cst_131 [2] : vector<2x8x8xf32> to vector<2x8xf32>
    %327 = vector.shape_cast %326 : vector<2x8xf32> to vector<2x8x1xf32>
    %328 = vector.broadcast %327 : vector<2x8x1xf32> to vector<2x8x8xf32>
    %329 = arith.subf %325, %328 : vector<2x8x8xf32>
    %330 = math.exp %329 : vector<2x8x8xf32>
    %cst_132 = arith.constant dense<0.000000e+00> : vector<2x8xf32>
    %331 = vector.multi_reduction <add>, %330, %cst_132 [2] : vector<2x8x8xf32> to vector<2x8xf32>
    %332 = vector.shape_cast %331 : vector<2x8xf32> to vector<2x8x1xf32>
    %333 = tpu.reciprocal %332 {approx = true} : vector<2x8x1xf32> -> vector<2x8x1xf32>
    %334 = vector.broadcast %333 : vector<2x8x1xf32> to vector<2x8x8xf32>
    %335 = arith.mulf %330, %334 : vector<2x8x8xf32>
    %336 = vector.extract_strided_slice %283 {offsets = [0, 0, 32], sizes = [2, 8, 16], strides = [1, 1, 1]} : vector<2x8x128xf32> to vector<2x8x16xf32>
    "tpu.trace_start"() <{level = 10 : i32, message = "bqk,bkd->bqd"}> : () -> ()
    %cst_133 = arith.constant dense<0.000000e+00> : vector<2x8x16xf32>
    %337 = tpu.matmul %335, %336, %cst_133 {dimension_numbers = #tpu.dot_dimension_numbers<[2], [1], [1], [2], [0, 0, 0, 1, 1, 2], [0], [0]>} : vector<2x8x8xf32>, vector<2x8x16xf32>, vector<2x8x16xf32> -> vector<2x8x16xf32>
    "tpu.trace_stop"() : () -> ()
    %338 = vector.extract_strided_slice %281 {offsets = [0, 0, 48], sizes = [2, 8, 16], strides = [1, 1, 1]} : vector<2x8x128xf32> to vector<2x8x16xf32>
    %339 = vector.extract_strided_slice %282 {offsets = [0, 0, 48], sizes = [2, 8, 16], strides = [1, 1, 1]} : vector<2x8x128xf32> to vector<2x8x16xf32>
    "tpu.trace_start"() <{level = 10 : i32, message = "bqd,bkd->bqk"}> : () -> ()
    %cst_134 = arith.constant dense<0.000000e+00> : vector<2x8x8xf32>
    %340 = tpu.matmul %338, %339, %cst_134 {dimension_numbers = #tpu.dot_dimension_numbers<[2], [2], [1], [1], [0, 0, 0, 1, 1, 1], [0], [0]>} : vector<2x8x16xf32>, vector<2x8x16xf32>, vector<2x8x8xf32> -> vector<2x8x8xf32>
    "tpu.trace_stop"() : () -> ()
    %341 = vector.shape_cast %7 : vector<8x8xf32> to vector<1x8x8xf32>
    %342 = vector.broadcast %341 : vector<1x8x8xf32> to vector<2x8x8xf32>
    %343 = arith.addf %340, %342 : vector<2x8x8xf32>
    %cst_135 = arith.constant dense<0xFF800000> : vector<2x8xf32>
    %344 = vector.multi_reduction <maximumf>, %343, %cst_135 [2] : vector<2x8x8xf32> to vector<2x8xf32>
    %345 = vector.shape_cast %344 : vector<2x8xf32> to vector<2x8x1xf32>
    %346 = vector.broadcast %345 : vector<2x8x1xf32> to vector<2x8x8xf32>
    %347 = arith.subf %343, %346 : vector<2x8x8xf32>
    %348 = math.exp %347 : vector<2x8x8xf32>
    %cst_136 = arith.constant dense<0.000000e+00> : vector<2x8xf32>
    %349 = vector.multi_reduction <add>, %348, %cst_136 [2] : vector<2x8x8xf32> to vector<2x8xf32>
    %350 = vector.shape_cast %349 : vector<2x8xf32> to vector<2x8x1xf32>
    %351 = tpu.reciprocal %350 {approx = true} : vector<2x8x1xf32> -> vector<2x8x1xf32>
    %352 = vector.broadcast %351 : vector<2x8x1xf32> to vector<2x8x8xf32>
    %353 = arith.mulf %348, %352 : vector<2x8x8xf32>
    %354 = vector.extract_strided_slice %283 {offsets = [0, 0, 48], sizes = [2, 8, 16], strides = [1, 1, 1]} : vector<2x8x128xf32> to vector<2x8x16xf32>
    "tpu.trace_start"() <{level = 10 : i32, message = "bqk,bkd->bqd"}> : () -> ()
    %cst_137 = arith.constant dense<0.000000e+00> : vector<2x8x16xf32>
    %355 = tpu.matmul %353, %354, %cst_137 {dimension_numbers = #tpu.dot_dimension_numbers<[2], [1], [1], [2], [0, 0, 0, 1, 1, 2], [0], [0]>} : vector<2x8x8xf32>, vector<2x8x16xf32>, vector<2x8x16xf32> -> vector<2x8x16xf32>
    "tpu.trace_stop"() : () -> ()
    %356 = vector.extract_strided_slice %281 {offsets = [0, 0, 64], sizes = [2, 8, 16], strides = [1, 1, 1]} : vector<2x8x128xf32> to vector<2x8x16xf32>
    %357 = vector.extract_strided_slice %282 {offsets = [0, 0, 64], sizes = [2, 8, 16], strides = [1, 1, 1]} : vector<2x8x128xf32> to vector<2x8x16xf32>
    "tpu.trace_start"() <{level = 10 : i32, message = "bqd,bkd->bqk"}> : () -> ()
    %cst_138 = arith.constant dense<0.000000e+00> : vector<2x8x8xf32>
    %358 = tpu.matmul %356, %357, %cst_138 {dimension_numbers = #tpu.dot_dimension_numbers<[2], [2], [1], [1], [0, 0, 0, 1, 1, 1], [0], [0]>} : vector<2x8x16xf32>, vector<2x8x16xf32>, vector<2x8x8xf32> -> vector<2x8x8xf32>
    "tpu.trace_stop"() : () -> ()
    %359 = vector.shape_cast %7 : vector<8x8xf32> to vector<1x8x8xf32>
    %360 = vector.broadcast %359 : vector<1x8x8xf32> to vector<2x8x8xf32>
    %361 = arith.addf %358, %360 : vector<2x8x8xf32>
    %cst_139 = arith.constant dense<0xFF800000> : vector<2x8xf32>
    %362 = vector.multi_reduction <maximumf>, %361, %cst_139 [2] : vector<2x8x8xf32> to vector<2x8xf32>
    %363 = vector.shape_cast %362 : vector<2x8xf32> to vector<2x8x1xf32>
    %364 = vector.broadcast %363 : vector<2x8x1xf32> to vector<2x8x8xf32>
    %365 = arith.subf %361, %364 : vector<2x8x8xf32>
    %366 = math.exp %365 : vector<2x8x8xf32>
    %cst_140 = arith.constant dense<0.000000e+00> : vector<2x8xf32>
    %367 = vector.multi_reduction <add>, %366, %cst_140 [2] : vector<2x8x8xf32> to vector<2x8xf32>
    %368 = vector.shape_cast %367 : vector<2x8xf32> to vector<2x8x1xf32>
    %369 = tpu.reciprocal %368 {approx = true} : vector<2x8x1xf32> -> vector<2x8x1xf32>
    %370 = vector.broadcast %369 : vector<2x8x1xf32> to vector<2x8x8xf32>
    %371 = arith.mulf %366, %370 : vector<2x8x8xf32>
    %372 = vector.extract_strided_slice %283 {offsets = [0, 0, 64], sizes = [2, 8, 16], strides = [1, 1, 1]} : vector<2x8x128xf32> to vector<2x8x16xf32>
    "tpu.trace_start"() <{level = 10 : i32, message = "bqk,bkd->bqd"}> : () -> ()
    %cst_141 = arith.constant dense<0.000000e+00> : vector<2x8x16xf32>
    %373 = tpu.matmul %371, %372, %cst_141 {dimension_numbers = #tpu.dot_dimension_numbers<[2], [1], [1], [2], [0, 0, 0, 1, 1, 2], [0], [0]>} : vector<2x8x8xf32>, vector<2x8x16xf32>, vector<2x8x16xf32> -> vector<2x8x16xf32>
    "tpu.trace_stop"() : () -> ()
    %374 = vector.extract_strided_slice %281 {offsets = [0, 0, 80], sizes = [2, 8, 16], strides = [1, 1, 1]} : vector<2x8x128xf32> to vector<2x8x16xf32>
    %375 = vector.extract_strided_slice %282 {offsets = [0, 0, 80], sizes = [2, 8, 16], strides = [1, 1, 1]} : vector<2x8x128xf32> to vector<2x8x16xf32>
    "tpu.trace_start"() <{level = 10 : i32, message = "bqd,bkd->bqk"}> : () -> ()
    %cst_142 = arith.constant dense<0.000000e+00> : vector<2x8x8xf32>
    %376 = tpu.matmul %374, %375, %cst_142 {dimension_numbers = #tpu.dot_dimension_numbers<[2], [2], [1], [1], [0, 0, 0, 1, 1, 1], [0], [0]>} : vector<2x8x16xf32>, vector<2x8x16xf32>, vector<2x8x8xf32> -> vector<2x8x8xf32>
    "tpu.trace_stop"() : () -> ()
    %377 = vector.shape_cast %7 : vector<8x8xf32> to vector<1x8x8xf32>
    %378 = vector.broadcast %377 : vector<1x8x8xf32> to vector<2x8x8xf32>
    %379 = arith.addf %376, %378 : vector<2x8x8xf32>
    %cst_143 = arith.constant dense<0xFF800000> : vector<2x8xf32>
    %380 = vector.multi_reduction <maximumf>, %379, %cst_143 [2] : vector<2x8x8xf32> to vector<2x8xf32>
    %381 = vector.shape_cast %380 : vector<2x8xf32> to vector<2x8x1xf32>
    %382 = vector.broadcast %381 : vector<2x8x1xf32> to vector<2x8x8xf32>
    %383 = arith.subf %379, %382 : vector<2x8x8xf32>
    %384 = math.exp %383 : vector<2x8x8xf32>
    %cst_144 = arith.constant dense<0.000000e+00> : vector<2x8xf32>
    %385 = vector.multi_reduction <add>, %384, %cst_144 [2] : vector<2x8x8xf32> to vector<2x8xf32>
    %386 = vector.shape_cast %385 : vector<2x8xf32> to vector<2x8x1xf32>
    %387 = tpu.reciprocal %386 {approx = true} : vector<2x8x1xf32> -> vector<2x8x1xf32>
    %388 = vector.broadcast %387 : vector<2x8x1xf32> to vector<2x8x8xf32>
    %389 = arith.mulf %384, %388 : vector<2x8x8xf32>
    %390 = vector.extract_strided_slice %283 {offsets = [0, 0, 80], sizes = [2, 8, 16], strides = [1, 1, 1]} : vector<2x8x128xf32> to vector<2x8x16xf32>
    "tpu.trace_start"() <{level = 10 : i32, message = "bqk,bkd->bqd"}> : () -> ()
    %cst_145 = arith.constant dense<0.000000e+00> : vector<2x8x16xf32>
    %391 = tpu.matmul %389, %390, %cst_145 {dimension_numbers = #tpu.dot_dimension_numbers<[2], [1], [1], [2], [0, 0, 0, 1, 1, 2], [0], [0]>} : vector<2x8x8xf32>, vector<2x8x16xf32>, vector<2x8x16xf32> -> vector<2x8x16xf32>
    "tpu.trace_stop"() : () -> ()
    %392 = vector.extract_strided_slice %281 {offsets = [0, 0, 96], sizes = [2, 8, 16], strides = [1, 1, 1]} : vector<2x8x128xf32> to vector<2x8x16xf32>
    %393 = vector.extract_strided_slice %282 {offsets = [0, 0, 96], sizes = [2, 8, 16], strides = [1, 1, 1]} : vector<2x8x128xf32> to vector<2x8x16xf32>
    "tpu.trace_start"() <{level = 10 : i32, message = "bqd,bkd->bqk"}> : () -> ()
    %cst_146 = arith.constant dense<0.000000e+00> : vector<2x8x8xf32>
    %394 = tpu.matmul %392, %393, %cst_146 {dimension_numbers = #tpu.dot_dimension_numbers<[2], [2], [1], [1], [0, 0, 0, 1, 1, 1], [0], [0]>} : vector<2x8x16xf32>, vector<2x8x16xf32>, vector<2x8x8xf32> -> vector<2x8x8xf32>
    "tpu.trace_stop"() : () -> ()
    %395 = vector.shape_cast %7 : vector<8x8xf32> to vector<1x8x8xf32>
    %396 = vector.broadcast %395 : vector<1x8x8xf32> to vector<2x8x8xf32>
    %397 = arith.addf %394, %396 : vector<2x8x8xf32>
    %cst_147 = arith.constant dense<0xFF800000> : vector<2x8xf32>
    %398 = vector.multi_reduction <maximumf>, %397, %cst_147 [2] : vector<2x8x8xf32> to vector<2x8xf32>
    %399 = vector.shape_cast %398 : vector<2x8xf32> to vector<2x8x1xf32>
    %400 = vector.broadcast %399 : vector<2x8x1xf32> to vector<2x8x8xf32>
    %401 = arith.subf %397, %400 : vector<2x8x8xf32>
    %402 = math.exp %401 : vector<2x8x8xf32>
    %cst_148 = arith.constant dense<0.000000e+00> : vector<2x8xf32>
    %403 = vector.multi_reduction <add>, %402, %cst_148 [2] : vector<2x8x8xf32> to vector<2x8xf32>
    %404 = vector.shape_cast %403 : vector<2x8xf32> to vector<2x8x1xf32>
    %405 = tpu.reciprocal %404 {approx = true} : vector<2x8x1xf32> -> vector<2x8x1xf32>
    %406 = vector.broadcast %405 : vector<2x8x1xf32> to vector<2x8x8xf32>
    %407 = arith.mulf %402, %406 : vector<2x8x8xf32>
    %408 = vector.extract_strided_slice %283 {offsets = [0, 0, 96], sizes = [2, 8, 16], strides = [1, 1, 1]} : vector<2x8x128xf32> to vector<2x8x16xf32>
    "tpu.trace_start"() <{level = 10 : i32, message = "bqk,bkd->bqd"}> : () -> ()
    %cst_149 = arith.constant dense<0.000000e+00> : vector<2x8x16xf32>
    %409 = tpu.matmul %407, %408, %cst_149 {dimension_numbers = #tpu.dot_dimension_numbers<[2], [1], [1], [2], [0, 0, 0, 1, 1, 2], [0], [0]>} : vector<2x8x8xf32>, vector<2x8x16xf32>, vector<2x8x16xf32> -> vector<2x8x16xf32>
    "tpu.trace_stop"() : () -> ()
    %410 = vector.extract_strided_slice %281 {offsets = [0, 0, 112], sizes = [2, 8, 16], strides = [1, 1, 1]} : vector<2x8x128xf32> to vector<2x8x16xf32>
    %411 = vector.extract_strided_slice %282 {offsets = [0, 0, 112], sizes = [2, 8, 16], strides = [1, 1, 1]} : vector<2x8x128xf32> to vector<2x8x16xf32>
    "tpu.trace_start"() <{level = 10 : i32, message = "bqd,bkd->bqk"}> : () -> ()
    %cst_150 = arith.constant dense<0.000000e+00> : vector<2x8x8xf32>
    %412 = tpu.matmul %410, %411, %cst_150 {dimension_numbers = #tpu.dot_dimension_numbers<[2], [2], [1], [1], [0, 0, 0, 1, 1, 1], [0], [0]>} : vector<2x8x16xf32>, vector<2x8x16xf32>, vector<2x8x8xf32> -> vector<2x8x8xf32>
    "tpu.trace_stop"() : () -> ()
    %413 = vector.shape_cast %7 : vector<8x8xf32> to vector<1x8x8xf32>
    %414 = vector.broadcast %413 : vector<1x8x8xf32> to vector<2x8x8xf32>
    %415 = arith.addf %412, %414 : vector<2x8x8xf32>
    %cst_151 = arith.constant dense<0xFF800000> : vector<2x8xf32>
    %416 = vector.multi_reduction <maximumf>, %415, %cst_151 [2] : vector<2x8x8xf32> to vector<2x8xf32>
    %417 = vector.shape_cast %416 : vector<2x8xf32> to vector<2x8x1xf32>
    %418 = vector.broadcast %417 : vector<2x8x1xf32> to vector<2x8x8xf32>
    %419 = arith.subf %415, %418 : vector<2x8x8xf32>
    %420 = math.exp %419 : vector<2x8x8xf32>
    %cst_152 = arith.constant dense<0.000000e+00> : vector<2x8xf32>
    %421 = vector.multi_reduction <add>, %420, %cst_152 [2] : vector<2x8x8xf32> to vector<2x8xf32>
    %422 = vector.shape_cast %421 : vector<2x8xf32> to vector<2x8x1xf32>
    %423 = tpu.reciprocal %422 {approx = true} : vector<2x8x1xf32> -> vector<2x8x1xf32>
    %424 = vector.broadcast %423 : vector<2x8x1xf32> to vector<2x8x8xf32>
    %425 = arith.mulf %420, %424 : vector<2x8x8xf32>
    %426 = vector.extract_strided_slice %283 {offsets = [0, 0, 112], sizes = [2, 8, 16], strides = [1, 1, 1]} : vector<2x8x128xf32> to vector<2x8x16xf32>
    "tpu.trace_start"() <{level = 10 : i32, message = "bqk,bkd->bqd"}> : () -> ()
    %cst_153 = arith.constant dense<0.000000e+00> : vector<2x8x16xf32>
    %427 = tpu.matmul %425, %426, %cst_153 {dimension_numbers = #tpu.dot_dimension_numbers<[2], [1], [1], [2], [0, 0, 0, 1, 1, 2], [0], [0]>} : vector<2x8x8xf32>, vector<2x8x16xf32>, vector<2x8x16xf32> -> vector<2x8x16xf32>
    "tpu.trace_stop"() : () -> ()
    %428 = tpu.concatenate %301, %319, %337, %355, %373, %391, %409, %427 in 2 : vector<2x8x16xf32>, vector<2x8x16xf32>, vector<2x8x16xf32>, vector<2x8x16xf32>, vector<2x8x16xf32>, vector<2x8x16xf32>, vector<2x8x16xf32>, vector<2x8x16xf32> -> vector<2x8x128xf32>
    %429 = vector.shape_cast %428 : vector<2x8x128xf32> to vector<16x128xf32>
    %430 = arith.truncf %429 : vector<16x128xf32> to vector<16x128xbf16>
    %c1_154 = arith.constant 1 : index
    %c0_155 = arith.constant 0 : index
    %c0_156 = arith.constant 0 : index
    %431 = vector.load %arg10[%c1_154, %c0_155, %c0_156] : memref<4x128x128xbf16, #tpu.memory_space<vmem>>, vector<1x128x128xbf16>
    %432 = vector.shape_cast %431 : vector<1x128x128xbf16> to vector<128x128xbf16>
    %cst_157 = arith.constant dense<0.000000e+00> : vector<16x128xf32>
    %433 = tpu.matmul %430, %432, %cst_157 {dimension_numbers = #tpu.dot_dimension_numbers<[1], [0], [0], [1], [0, 0, 1, 1], [], []>} : vector<16x128xbf16>, vector<128x128xbf16>, vector<16x128xf32> -> vector<16x128xf32>
    %c1_158 = arith.constant 1 : index
    %c0_159 = arith.constant 0 : index
    %c0_160 = arith.constant 0 : index
    %434 = vector.load %arg11[%c1_158, %c0_159, %c0_160] : memref<4x1x128xf32, #tpu.memory_space<vmem>>, vector<1x1x128xf32>
    %435 = vector.shape_cast %434 : vector<1x1x128xf32> to vector<1x128xf32>
    %436 = vector.broadcast %435 : vector<1x128xf32> to vector<16x128xf32>
    %437 = arith.addf %433, %436 : vector<16x128xf32>
    %438 = arith.addf %258, %437 : vector<16x128xf32>
    %cst_161 = arith.constant dense<0.000000e+00> : vector<16xf32>
    %439 = vector.multi_reduction <add>, %438, %cst_161 [1] : vector<16x128xf32> to vector<16xf32>
    %440 = vector.shape_cast %439 : vector<16xf32> to vector<16x1xf32>
    %cst_162 = arith.constant 1.280000e+02 : f32
    %441 = vector.broadcast %cst_162 : f32 to vector<16x1xf32>
    %442 = arith.divf %440, %441 : vector<16x1xf32>
    %443 = arith.mulf %438, %438 : vector<16x128xf32>
    %cst_163 = arith.constant dense<0.000000e+00> : vector<16xf32>
    %444 = vector.multi_reduction <add>, %443, %cst_163 [1] : vector<16x128xf32> to vector<16xf32>
    %445 = vector.shape_cast %444 : vector<16xf32> to vector<16x1xf32>
    %cst_164 = arith.constant 1.280000e+02 : f32
    %446 = vector.broadcast %cst_164 : f32 to vector<16x1xf32>
    %447 = arith.divf %445, %446 : vector<16x1xf32>
    %448 = arith.mulf %442, %442 : vector<16x1xf32>
    %449 = arith.subf %447, %448 : vector<16x1xf32>
    %450 = vector.broadcast %442 : vector<16x1xf32> to vector<16x128xf32>
    %451 = arith.subf %438, %450 : vector<16x128xf32>
    %cst_165 = arith.constant 9.99999974E-6 : f32
    %452 = vector.broadcast %cst_165 : f32 to vector<16x1xf32>
    %453 = arith.addf %449, %452 : vector<16x1xf32>
    %454 = math.rsqrt %453 : vector<16x1xf32>
    %455 = vector.broadcast %454 : vector<16x1xf32> to vector<16x128xf32>
    %456 = arith.mulf %451, %455 : vector<16x128xf32>
    %c1_166 = arith.constant 1 : index
    %c0_167 = arith.constant 0 : index
    %c0_168 = arith.constant 0 : index
    %457 = vector.load %arg12[%c1_166, %c0_167, %c0_168] : memref<4x1x128xf32, #tpu.memory_space<vmem>>, vector<1x1x128xf32>
    %458 = vector.shape_cast %457 : vector<1x1x128xf32> to vector<1x128xf32>
    %459 = vector.broadcast %458 : vector<1x128xf32> to vector<16x128xf32>
    %460 = arith.mulf %456, %459 : vector<16x128xf32>
    %c1_169 = arith.constant 1 : index
    %c0_170 = arith.constant 0 : index
    %c0_171 = arith.constant 0 : index
    %461 = vector.load %arg13[%c1_169, %c0_170, %c0_171] : memref<4x1x128xf32, #tpu.memory_space<vmem>>, vector<1x1x128xf32>
    %462 = vector.shape_cast %461 : vector<1x1x128xf32> to vector<1x128xf32>
    %463 = vector.broadcast %462 : vector<1x128xf32> to vector<16x128xf32>
    %464 = arith.addf %460, %463 : vector<16x128xf32>
    %465 = arith.truncf %464 : vector<16x128xf32> to vector<16x128xbf16>
    %c1_172 = arith.constant 1 : index
    %c0_173 = arith.constant 0 : index
    %c0_174 = arith.constant 0 : index
    %466 = vector.load %arg14[%c1_172, %c0_173, %c0_174] : memref<4x128x512xbf16, #tpu.memory_space<vmem>>, vector<1x128x512xbf16>
    %467 = vector.shape_cast %466 : vector<1x128x512xbf16> to vector<128x512xbf16>
    %cst_175 = arith.constant dense<0.000000e+00> : vector<16x512xf32>
    %468 = tpu.matmul %465, %467, %cst_175 {dimension_numbers = #tpu.dot_dimension_numbers<[1], [0], [0], [1], [0, 0, 1, 1], [], []>} : vector<16x128xbf16>, vector<128x512xbf16>, vector<16x512xf32> -> vector<16x512xf32>
    %c1_176 = arith.constant 1 : index
    %c0_177 = arith.constant 0 : index
    %c0_178 = arith.constant 0 : index
    %469 = vector.load %arg15[%c1_176, %c0_177, %c0_178] : memref<4x1x512xf32, #tpu.memory_space<vmem>>, vector<1x1x512xf32>
    %470 = vector.shape_cast %469 : vector<1x1x512xf32> to vector<1x512xf32>
    %471 = vector.broadcast %470 : vector<1x512xf32> to vector<16x512xf32>
    %472 = arith.addf %468, %471 : vector<16x512xf32>
    %cst_179 = arith.constant 0.000000e+00 : f32
    %473 = vector.broadcast %cst_179 : f32 to vector<16x512xf32>
    %474 = arith.maximumf %472, %473 : vector<16x512xf32>
    %475 = arith.truncf %474 : vector<16x512xf32> to vector<16x512xbf16>
    %c1_180 = arith.constant 1 : index
    %c0_181 = arith.constant 0 : index
    %c0_182 = arith.constant 0 : index
    %476 = vector.load %arg16[%c1_180, %c0_181, %c0_182] : memref<4x512x128xbf16, #tpu.memory_space<vmem>>, vector<1x512x128xbf16>
    %477 = vector.shape_cast %476 : vector<1x512x128xbf16> to vector<512x128xbf16>
    %cst_183 = arith.constant dense<0.000000e+00> : vector<16x128xf32>
    %478 = tpu.matmul %475, %477, %cst_183 {dimension_numbers = #tpu.dot_dimension_numbers<[1], [0], [0], [1], [0, 0, 1, 1], [], []>} : vector<16x512xbf16>, vector<512x128xbf16>, vector<16x128xf32> -> vector<16x128xf32>
    %c1_184 = arith.constant 1 : index
    %c0_185 = arith.constant 0 : index
    %c0_186 = arith.constant 0 : index
    %479 = vector.load %arg17[%c1_184, %c0_185, %c0_186] : memref<4x1x128xf32, #tpu.memory_space<vmem>>, vector<1x1x128xf32>
    %480 = vector.shape_cast %479 : vector<1x1x128xf32> to vector<1x128xf32>
    %481 = vector.broadcast %480 : vector<1x128xf32> to vector<16x128xf32>
    %482 = arith.addf %478, %481 : vector<16x128xf32>
    %483 = arith.addf %464, %482 : vector<16x128xf32>
    %cst_187 = arith.constant dense<0.000000e+00> : vector<16xf32>
    %484 = vector.multi_reduction <add>, %483, %cst_187 [1] : vector<16x128xf32> to vector<16xf32>
    %485 = vector.shape_cast %484 : vector<16xf32> to vector<16x1xf32>
    %cst_188 = arith.constant 1.280000e+02 : f32
    %486 = vector.broadcast %cst_188 : f32 to vector<16x1xf32>
    %487 = arith.divf %485, %486 : vector<16x1xf32>
    %488 = arith.mulf %483, %483 : vector<16x128xf32>
    %cst_189 = arith.constant dense<0.000000e+00> : vector<16xf32>
    %489 = vector.multi_reduction <add>, %488, %cst_189 [1] : vector<16x128xf32> to vector<16xf32>
    %490 = vector.shape_cast %489 : vector<16xf32> to vector<16x1xf32>
    %cst_190 = arith.constant 1.280000e+02 : f32
    %491 = vector.broadcast %cst_190 : f32 to vector<16x1xf32>
    %492 = arith.divf %490, %491 : vector<16x1xf32>
    %493 = arith.mulf %487, %487 : vector<16x1xf32>
    %494 = arith.subf %492, %493 : vector<16x1xf32>
    %495 = vector.broadcast %487 : vector<16x1xf32> to vector<16x128xf32>
    %496 = arith.subf %483, %495 : vector<16x128xf32>
    %cst_191 = arith.constant 9.99999974E-6 : f32
    %497 = vector.broadcast %cst_191 : f32 to vector<16x1xf32>
    %498 = arith.addf %494, %497 : vector<16x1xf32>
    %499 = math.rsqrt %498 : vector<16x1xf32>
    %500 = vector.broadcast %499 : vector<16x1xf32> to vector<16x128xf32>
    %501 = arith.mulf %496, %500 : vector<16x128xf32>
    %c1_192 = arith.constant 1 : index
    %c0_193 = arith.constant 0 : index
    %c0_194 = arith.constant 0 : index
    %502 = vector.load %arg18[%c1_192, %c0_193, %c0_194] : memref<4x1x128xf32, #tpu.memory_space<vmem>>, vector<1x1x128xf32>
    %503 = vector.shape_cast %502 : vector<1x1x128xf32> to vector<1x128xf32>
    %504 = vector.broadcast %503 : vector<1x128xf32> to vector<16x128xf32>
    %505 = arith.mulf %501, %504 : vector<16x128xf32>
    %c1_195 = arith.constant 1 : index
    %c0_196 = arith.constant 0 : index
    %c0_197 = arith.constant 0 : index
    %506 = vector.load %arg19[%c1_195, %c0_196, %c0_197] : memref<4x1x128xf32, #tpu.memory_space<vmem>>, vector<1x1x128xf32>
    %507 = vector.shape_cast %506 : vector<1x1x128xf32> to vector<1x128xf32>
    %508 = vector.broadcast %507 : vector<1x128xf32> to vector<16x128xf32>
    %509 = arith.addf %505, %508 : vector<16x128xf32>
    %510 = arith.truncf %509 : vector<16x128xf32> to vector<16x128xbf16>
    %c2 = arith.constant 2 : index
    %c0_198 = arith.constant 0 : index
    %c0_199 = arith.constant 0 : index
    %511 = vector.load %arg4[%c2, %c0_198, %c0_199] : memref<4x128x128xbf16, #tpu.memory_space<vmem>>, vector<1x128x128xbf16>
    %512 = vector.shape_cast %511 : vector<1x128x128xbf16> to vector<128x128xbf16>
    %cst_200 = arith.constant dense<0.000000e+00> : vector<16x128xf32>
    %513 = tpu.matmul %510, %512, %cst_200 {dimension_numbers = #tpu.dot_dimension_numbers<[1], [0], [0], [1], [0, 0, 1, 1], [], []>} : vector<16x128xbf16>, vector<128x128xbf16>, vector<16x128xf32> -> vector<16x128xf32>
    %c2_201 = arith.constant 2 : index
    %c0_202 = arith.constant 0 : index
    %c0_203 = arith.constant 0 : index
    %514 = vector.load %arg5[%c2_201, %c0_202, %c0_203] : memref<4x1x128xf32, #tpu.memory_space<vmem>>, vector<1x1x128xf32>
    %515 = vector.shape_cast %514 : vector<1x1x128xf32> to vector<1x128xf32>
    %516 = vector.broadcast %515 : vector<1x128xf32> to vector<16x128xf32>
    %517 = arith.addf %513, %516 : vector<16x128xf32>
    %c2_204 = arith.constant 2 : index
    %c0_205 = arith.constant 0 : index
    %c0_206 = arith.constant 0 : index
    %518 = vector.load %arg6[%c2_204, %c0_205, %c0_206] : memref<4x128x128xbf16, #tpu.memory_space<vmem>>, vector<1x128x128xbf16>
    %519 = vector.shape_cast %518 : vector<1x128x128xbf16> to vector<128x128xbf16>
    %cst_207 = arith.constant dense<0.000000e+00> : vector<16x128xf32>
    %520 = tpu.matmul %510, %519, %cst_207 {dimension_numbers = #tpu.dot_dimension_numbers<[1], [0], [0], [1], [0, 0, 1, 1], [], []>} : vector<16x128xbf16>, vector<128x128xbf16>, vector<16x128xf32> -> vector<16x128xf32>
    %c2_208 = arith.constant 2 : index
    %c0_209 = arith.constant 0 : index
    %c0_210 = arith.constant 0 : index
    %521 = vector.load %arg7[%c2_208, %c0_209, %c0_210] : memref<4x1x128xf32, #tpu.memory_space<vmem>>, vector<1x1x128xf32>
    %522 = vector.shape_cast %521 : vector<1x1x128xf32> to vector<1x128xf32>
    %523 = vector.broadcast %522 : vector<1x128xf32> to vector<16x128xf32>
    %524 = arith.addf %520, %523 : vector<16x128xf32>
    %c2_211 = arith.constant 2 : index
    %c0_212 = arith.constant 0 : index
    %c0_213 = arith.constant 0 : index
    %525 = vector.load %arg8[%c2_211, %c0_212, %c0_213] : memref<4x128x128xbf16, #tpu.memory_space<vmem>>, vector<1x128x128xbf16>
    %526 = vector.shape_cast %525 : vector<1x128x128xbf16> to vector<128x128xbf16>
    %cst_214 = arith.constant dense<0.000000e+00> : vector<16x128xf32>
    %527 = tpu.matmul %510, %526, %cst_214 {dimension_numbers = #tpu.dot_dimension_numbers<[1], [0], [0], [1], [0, 0, 1, 1], [], []>} : vector<16x128xbf16>, vector<128x128xbf16>, vector<16x128xf32> -> vector<16x128xf32>
    %c2_215 = arith.constant 2 : index
    %c0_216 = arith.constant 0 : index
    %c0_217 = arith.constant 0 : index
    %528 = vector.load %arg9[%c2_215, %c0_216, %c0_217] : memref<4x1x128xf32, #tpu.memory_space<vmem>>, vector<1x1x128xf32>
    %529 = vector.shape_cast %528 : vector<1x1x128xf32> to vector<1x128xf32>
    %530 = vector.broadcast %529 : vector<1x128xf32> to vector<16x128xf32>
    %531 = arith.addf %527, %530 : vector<16x128xf32>
    %532 = vector.shape_cast %517 : vector<16x128xf32> to vector<2x8x128xf32>
    %533 = vector.shape_cast %524 : vector<16x128xf32> to vector<2x8x128xf32>
    %534 = vector.shape_cast %531 : vector<16x128xf32> to vector<2x8x128xf32>
    %535 = vector.extract_strided_slice %532 {offsets = [0, 0, 0], sizes = [2, 8, 16], strides = [1, 1, 1]} : vector<2x8x128xf32> to vector<2x8x16xf32>
    %536 = vector.extract_strided_slice %533 {offsets = [0, 0, 0], sizes = [2, 8, 16], strides = [1, 1, 1]} : vector<2x8x128xf32> to vector<2x8x16xf32>
    "tpu.trace_start"() <{level = 10 : i32, message = "bqd,bkd->bqk"}> : () -> ()
    %cst_218 = arith.constant dense<0.000000e+00> : vector<2x8x8xf32>
    %537 = tpu.matmul %535, %536, %cst_218 {dimension_numbers = #tpu.dot_dimension_numbers<[2], [2], [1], [1], [0, 0, 0, 1, 1, 1], [0], [0]>} : vector<2x8x16xf32>, vector<2x8x16xf32>, vector<2x8x8xf32> -> vector<2x8x8xf32>
    "tpu.trace_stop"() : () -> ()
    %538 = vector.shape_cast %7 : vector<8x8xf32> to vector<1x8x8xf32>
    %539 = vector.broadcast %538 : vector<1x8x8xf32> to vector<2x8x8xf32>
    %540 = arith.addf %537, %539 : vector<2x8x8xf32>
    %cst_219 = arith.constant dense<0xFF800000> : vector<2x8xf32>
    %541 = vector.multi_reduction <maximumf>, %540, %cst_219 [2] : vector<2x8x8xf32> to vector<2x8xf32>
    %542 = vector.shape_cast %541 : vector<2x8xf32> to vector<2x8x1xf32>
    %543 = vector.broadcast %542 : vector<2x8x1xf32> to vector<2x8x8xf32>
    %544 = arith.subf %540, %543 : vector<2x8x8xf32>
    %545 = math.exp %544 : vector<2x8x8xf32>
    %cst_220 = arith.constant dense<0.000000e+00> : vector<2x8xf32>
    %546 = vector.multi_reduction <add>, %545, %cst_220 [2] : vector<2x8x8xf32> to vector<2x8xf32>
    %547 = vector.shape_cast %546 : vector<2x8xf32> to vector<2x8x1xf32>
    %548 = tpu.reciprocal %547 {approx = true} : vector<2x8x1xf32> -> vector<2x8x1xf32>
    %549 = vector.broadcast %548 : vector<2x8x1xf32> to vector<2x8x8xf32>
    %550 = arith.mulf %545, %549 : vector<2x8x8xf32>
    %551 = vector.extract_strided_slice %534 {offsets = [0, 0, 0], sizes = [2, 8, 16], strides = [1, 1, 1]} : vector<2x8x128xf32> to vector<2x8x16xf32>
    "tpu.trace_start"() <{level = 10 : i32, message = "bqk,bkd->bqd"}> : () -> ()
    %cst_221 = arith.constant dense<0.000000e+00> : vector<2x8x16xf32>
    %552 = tpu.matmul %550, %551, %cst_221 {dimension_numbers = #tpu.dot_dimension_numbers<[2], [1], [1], [2], [0, 0, 0, 1, 1, 2], [0], [0]>} : vector<2x8x8xf32>, vector<2x8x16xf32>, vector<2x8x16xf32> -> vector<2x8x16xf32>
    "tpu.trace_stop"() : () -> ()
    %553 = vector.extract_strided_slice %532 {offsets = [0, 0, 16], sizes = [2, 8, 16], strides = [1, 1, 1]} : vector<2x8x128xf32> to vector<2x8x16xf32>
    %554 = vector.extract_strided_slice %533 {offsets = [0, 0, 16], sizes = [2, 8, 16], strides = [1, 1, 1]} : vector<2x8x128xf32> to vector<2x8x16xf32>
    "tpu.trace_start"() <{level = 10 : i32, message = "bqd,bkd->bqk"}> : () -> ()
    %cst_222 = arith.constant dense<0.000000e+00> : vector<2x8x8xf32>
    %555 = tpu.matmul %553, %554, %cst_222 {dimension_numbers = #tpu.dot_dimension_numbers<[2], [2], [1], [1], [0, 0, 0, 1, 1, 1], [0], [0]>} : vector<2x8x16xf32>, vector<2x8x16xf32>, vector<2x8x8xf32> -> vector<2x8x8xf32>
    "tpu.trace_stop"() : () -> ()
    %556 = vector.shape_cast %7 : vector<8x8xf32> to vector<1x8x8xf32>
    %557 = vector.broadcast %556 : vector<1x8x8xf32> to vector<2x8x8xf32>
    %558 = arith.addf %555, %557 : vector<2x8x8xf32>
    %cst_223 = arith.constant dense<0xFF800000> : vector<2x8xf32>
    %559 = vector.multi_reduction <maximumf>, %558, %cst_223 [2] : vector<2x8x8xf32> to vector<2x8xf32>
    %560 = vector.shape_cast %559 : vector<2x8xf32> to vector<2x8x1xf32>
    %561 = vector.broadcast %560 : vector<2x8x1xf32> to vector<2x8x8xf32>
    %562 = arith.subf %558, %561 : vector<2x8x8xf32>
    %563 = math.exp %562 : vector<2x8x8xf32>
    %cst_224 = arith.constant dense<0.000000e+00> : vector<2x8xf32>
    %564 = vector.multi_reduction <add>, %563, %cst_224 [2] : vector<2x8x8xf32> to vector<2x8xf32>
    %565 = vector.shape_cast %564 : vector<2x8xf32> to vector<2x8x1xf32>
    %566 = tpu.reciprocal %565 {approx = true} : vector<2x8x1xf32> -> vector<2x8x1xf32>
    %567 = vector.broadcast %566 : vector<2x8x1xf32> to vector<2x8x8xf32>
    %568 = arith.mulf %563, %567 : vector<2x8x8xf32>
    %569 = vector.extract_strided_slice %534 {offsets = [0, 0, 16], sizes = [2, 8, 16], strides = [1, 1, 1]} : vector<2x8x128xf32> to vector<2x8x16xf32>
    "tpu.trace_start"() <{level = 10 : i32, message = "bqk,bkd->bqd"}> : () -> ()
    %cst_225 = arith.constant dense<0.000000e+00> : vector<2x8x16xf32>
    %570 = tpu.matmul %568, %569, %cst_225 {dimension_numbers = #tpu.dot_dimension_numbers<[2], [1], [1], [2], [0, 0, 0, 1, 1, 2], [0], [0]>} : vector<2x8x8xf32>, vector<2x8x16xf32>, vector<2x8x16xf32> -> vector<2x8x16xf32>
    "tpu.trace_stop"() : () -> ()
    %571 = vector.extract_strided_slice %532 {offsets = [0, 0, 32], sizes = [2, 8, 16], strides = [1, 1, 1]} : vector<2x8x128xf32> to vector<2x8x16xf32>
    %572 = vector.extract_strided_slice %533 {offsets = [0, 0, 32], sizes = [2, 8, 16], strides = [1, 1, 1]} : vector<2x8x128xf32> to vector<2x8x16xf32>
    "tpu.trace_start"() <{level = 10 : i32, message = "bqd,bkd->bqk"}> : () -> ()
    %cst_226 = arith.constant dense<0.000000e+00> : vector<2x8x8xf32>
    %573 = tpu.matmul %571, %572, %cst_226 {dimension_numbers = #tpu.dot_dimension_numbers<[2], [2], [1], [1], [0, 0, 0, 1, 1, 1], [0], [0]>} : vector<2x8x16xf32>, vector<2x8x16xf32>, vector<2x8x8xf32> -> vector<2x8x8xf32>
    "tpu.trace_stop"() : () -> ()
    %574 = vector.shape_cast %7 : vector<8x8xf32> to vector<1x8x8xf32>
    %575 = vector.broadcast %574 : vector<1x8x8xf32> to vector<2x8x8xf32>
    %576 = arith.addf %573, %575 : vector<2x8x8xf32>
    %cst_227 = arith.constant dense<0xFF800000> : vector<2x8xf32>
    %577 = vector.multi_reduction <maximumf>, %576, %cst_227 [2] : vector<2x8x8xf32> to vector<2x8xf32>
    %578 = vector.shape_cast %577 : vector<2x8xf32> to vector<2x8x1xf32>
    %579 = vector.broadcast %578 : vector<2x8x1xf32> to vector<2x8x8xf32>
    %580 = arith.subf %576, %579 : vector<2x8x8xf32>
    %581 = math.exp %580 : vector<2x8x8xf32>
    %cst_228 = arith.constant dense<0.000000e+00> : vector<2x8xf32>
    %582 = vector.multi_reduction <add>, %581, %cst_228 [2] : vector<2x8x8xf32> to vector<2x8xf32>
    %583 = vector.shape_cast %582 : vector<2x8xf32> to vector<2x8x1xf32>
    %584 = tpu.reciprocal %583 {approx = true} : vector<2x8x1xf32> -> vector<2x8x1xf32>
    %585 = vector.broadcast %584 : vector<2x8x1xf32> to vector<2x8x8xf32>
    %586 = arith.mulf %581, %585 : vector<2x8x8xf32>
    %587 = vector.extract_strided_slice %534 {offsets = [0, 0, 32], sizes = [2, 8, 16], strides = [1, 1, 1]} : vector<2x8x128xf32> to vector<2x8x16xf32>
    "tpu.trace_start"() <{level = 10 : i32, message = "bqk,bkd->bqd"}> : () -> ()
    %cst_229 = arith.constant dense<0.000000e+00> : vector<2x8x16xf32>
    %588 = tpu.matmul %586, %587, %cst_229 {dimension_numbers = #tpu.dot_dimension_numbers<[2], [1], [1], [2], [0, 0, 0, 1, 1, 2], [0], [0]>} : vector<2x8x8xf32>, vector<2x8x16xf32>, vector<2x8x16xf32> -> vector<2x8x16xf32>
    "tpu.trace_stop"() : () -> ()
    %589 = vector.extract_strided_slice %532 {offsets = [0, 0, 48], sizes = [2, 8, 16], strides = [1, 1, 1]} : vector<2x8x128xf32> to vector<2x8x16xf32>
    %590 = vector.extract_strided_slice %533 {offsets = [0, 0, 48], sizes = [2, 8, 16], strides = [1, 1, 1]} : vector<2x8x128xf32> to vector<2x8x16xf32>
    "tpu.trace_start"() <{level = 10 : i32, message = "bqd,bkd->bqk"}> : () -> ()
    %cst_230 = arith.constant dense<0.000000e+00> : vector<2x8x8xf32>
    %591 = tpu.matmul %589, %590, %cst_230 {dimension_numbers = #tpu.dot_dimension_numbers<[2], [2], [1], [1], [0, 0, 0, 1, 1, 1], [0], [0]>} : vector<2x8x16xf32>, vector<2x8x16xf32>, vector<2x8x8xf32> -> vector<2x8x8xf32>
    "tpu.trace_stop"() : () -> ()
    %592 = vector.shape_cast %7 : vector<8x8xf32> to vector<1x8x8xf32>
    %593 = vector.broadcast %592 : vector<1x8x8xf32> to vector<2x8x8xf32>
    %594 = arith.addf %591, %593 : vector<2x8x8xf32>
    %cst_231 = arith.constant dense<0xFF800000> : vector<2x8xf32>
    %595 = vector.multi_reduction <maximumf>, %594, %cst_231 [2] : vector<2x8x8xf32> to vector<2x8xf32>
    %596 = vector.shape_cast %595 : vector<2x8xf32> to vector<2x8x1xf32>
    %597 = vector.broadcast %596 : vector<2x8x1xf32> to vector<2x8x8xf32>
    %598 = arith.subf %594, %597 : vector<2x8x8xf32>
    %599 = math.exp %598 : vector<2x8x8xf32>
    %cst_232 = arith.constant dense<0.000000e+00> : vector<2x8xf32>
    %600 = vector.multi_reduction <add>, %599, %cst_232 [2] : vector<2x8x8xf32> to vector<2x8xf32>
    %601 = vector.shape_cast %600 : vector<2x8xf32> to vector<2x8x1xf32>
    %602 = tpu.reciprocal %601 {approx = true} : vector<2x8x1xf32> -> vector<2x8x1xf32>
    %603 = vector.broadcast %602 : vector<2x8x1xf32> to vector<2x8x8xf32>
    %604 = arith.mulf %599, %603 : vector<2x8x8xf32>
    %605 = vector.extract_strided_slice %534 {offsets = [0, 0, 48], sizes = [2, 8, 16], strides = [1, 1, 1]} : vector<2x8x128xf32> to vector<2x8x16xf32>
    "tpu.trace_start"() <{level = 10 : i32, message = "bqk,bkd->bqd"}> : () -> ()
    %cst_233 = arith.constant dense<0.000000e+00> : vector<2x8x16xf32>
    %606 = tpu.matmul %604, %605, %cst_233 {dimension_numbers = #tpu.dot_dimension_numbers<[2], [1], [1], [2], [0, 0, 0, 1, 1, 2], [0], [0]>} : vector<2x8x8xf32>, vector<2x8x16xf32>, vector<2x8x16xf32> -> vector<2x8x16xf32>
    "tpu.trace_stop"() : () -> ()
    %607 = vector.extract_strided_slice %532 {offsets = [0, 0, 64], sizes = [2, 8, 16], strides = [1, 1, 1]} : vector<2x8x128xf32> to vector<2x8x16xf32>
    %608 = vector.extract_strided_slice %533 {offsets = [0, 0, 64], sizes = [2, 8, 16], strides = [1, 1, 1]} : vector<2x8x128xf32> to vector<2x8x16xf32>
    "tpu.trace_start"() <{level = 10 : i32, message = "bqd,bkd->bqk"}> : () -> ()
    %cst_234 = arith.constant dense<0.000000e+00> : vector<2x8x8xf32>
    %609 = tpu.matmul %607, %608, %cst_234 {dimension_numbers = #tpu.dot_dimension_numbers<[2], [2], [1], [1], [0, 0, 0, 1, 1, 1], [0], [0]>} : vector<2x8x16xf32>, vector<2x8x16xf32>, vector<2x8x8xf32> -> vector<2x8x8xf32>
    "tpu.trace_stop"() : () -> ()
    %610 = vector.shape_cast %7 : vector<8x8xf32> to vector<1x8x8xf32>
    %611 = vector.broadcast %610 : vector<1x8x8xf32> to vector<2x8x8xf32>
    %612 = arith.addf %609, %611 : vector<2x8x8xf32>
    %cst_235 = arith.constant dense<0xFF800000> : vector<2x8xf32>
    %613 = vector.multi_reduction <maximumf>, %612, %cst_235 [2] : vector<2x8x8xf32> to vector<2x8xf32>
    %614 = vector.shape_cast %613 : vector<2x8xf32> to vector<2x8x1xf32>
    %615 = vector.broadcast %614 : vector<2x8x1xf32> to vector<2x8x8xf32>
    %616 = arith.subf %612, %615 : vector<2x8x8xf32>
    %617 = math.exp %616 : vector<2x8x8xf32>
    %cst_236 = arith.constant dense<0.000000e+00> : vector<2x8xf32>
    %618 = vector.multi_reduction <add>, %617, %cst_236 [2] : vector<2x8x8xf32> to vector<2x8xf32>
    %619 = vector.shape_cast %618 : vector<2x8xf32> to vector<2x8x1xf32>
    %620 = tpu.reciprocal %619 {approx = true} : vector<2x8x1xf32> -> vector<2x8x1xf32>
    %621 = vector.broadcast %620 : vector<2x8x1xf32> to vector<2x8x8xf32>
    %622 = arith.mulf %617, %621 : vector<2x8x8xf32>
    %623 = vector.extract_strided_slice %534 {offsets = [0, 0, 64], sizes = [2, 8, 16], strides = [1, 1, 1]} : vector<2x8x128xf32> to vector<2x8x16xf32>
    "tpu.trace_start"() <{level = 10 : i32, message = "bqk,bkd->bqd"}> : () -> ()
    %cst_237 = arith.constant dense<0.000000e+00> : vector<2x8x16xf32>
    %624 = tpu.matmul %622, %623, %cst_237 {dimension_numbers = #tpu.dot_dimension_numbers<[2], [1], [1], [2], [0, 0, 0, 1, 1, 2], [0], [0]>} : vector<2x8x8xf32>, vector<2x8x16xf32>, vector<2x8x16xf32> -> vector<2x8x16xf32>
    "tpu.trace_stop"() : () -> ()
    %625 = vector.extract_strided_slice %532 {offsets = [0, 0, 80], sizes = [2, 8, 16], strides = [1, 1, 1]} : vector<2x8x128xf32> to vector<2x8x16xf32>
    %626 = vector.extract_strided_slice %533 {offsets = [0, 0, 80], sizes = [2, 8, 16], strides = [1, 1, 1]} : vector<2x8x128xf32> to vector<2x8x16xf32>
    "tpu.trace_start"() <{level = 10 : i32, message = "bqd,bkd->bqk"}> : () -> ()
    %cst_238 = arith.constant dense<0.000000e+00> : vector<2x8x8xf32>
    %627 = tpu.matmul %625, %626, %cst_238 {dimension_numbers = #tpu.dot_dimension_numbers<[2], [2], [1], [1], [0, 0, 0, 1, 1, 1], [0], [0]>} : vector<2x8x16xf32>, vector<2x8x16xf32>, vector<2x8x8xf32> -> vector<2x8x8xf32>
    "tpu.trace_stop"() : () -> ()
    %628 = vector.shape_cast %7 : vector<8x8xf32> to vector<1x8x8xf32>
    %629 = vector.broadcast %628 : vector<1x8x8xf32> to vector<2x8x8xf32>
    %630 = arith.addf %627, %629 : vector<2x8x8xf32>
    %cst_239 = arith.constant dense<0xFF800000> : vector<2x8xf32>
    %631 = vector.multi_reduction <maximumf>, %630, %cst_239 [2] : vector<2x8x8xf32> to vector<2x8xf32>
    %632 = vector.shape_cast %631 : vector<2x8xf32> to vector<2x8x1xf32>
    %633 = vector.broadcast %632 : vector<2x8x1xf32> to vector<2x8x8xf32>
    %634 = arith.subf %630, %633 : vector<2x8x8xf32>
    %635 = math.exp %634 : vector<2x8x8xf32>
    %cst_240 = arith.constant dense<0.000000e+00> : vector<2x8xf32>
    %636 = vector.multi_reduction <add>, %635, %cst_240 [2] : vector<2x8x8xf32> to vector<2x8xf32>
    %637 = vector.shape_cast %636 : vector<2x8xf32> to vector<2x8x1xf32>
    %638 = tpu.reciprocal %637 {approx = true} : vector<2x8x1xf32> -> vector<2x8x1xf32>
    %639 = vector.broadcast %638 : vector<2x8x1xf32> to vector<2x8x8xf32>
    %640 = arith.mulf %635, %639 : vector<2x8x8xf32>
    %641 = vector.extract_strided_slice %534 {offsets = [0, 0, 80], sizes = [2, 8, 16], strides = [1, 1, 1]} : vector<2x8x128xf32> to vector<2x8x16xf32>
    "tpu.trace_start"() <{level = 10 : i32, message = "bqk,bkd->bqd"}> : () -> ()
    %cst_241 = arith.constant dense<0.000000e+00> : vector<2x8x16xf32>
    %642 = tpu.matmul %640, %641, %cst_241 {dimension_numbers = #tpu.dot_dimension_numbers<[2], [1], [1], [2], [0, 0, 0, 1, 1, 2], [0], [0]>} : vector<2x8x8xf32>, vector<2x8x16xf32>, vector<2x8x16xf32> -> vector<2x8x16xf32>
    "tpu.trace_stop"() : () -> ()
    %643 = vector.extract_strided_slice %532 {offsets = [0, 0, 96], sizes = [2, 8, 16], strides = [1, 1, 1]} : vector<2x8x128xf32> to vector<2x8x16xf32>
    %644 = vector.extract_strided_slice %533 {offsets = [0, 0, 96], sizes = [2, 8, 16], strides = [1, 1, 1]} : vector<2x8x128xf32> to vector<2x8x16xf32>
    "tpu.trace_start"() <{level = 10 : i32, message = "bqd,bkd->bqk"}> : () -> ()
    %cst_242 = arith.constant dense<0.000000e+00> : vector<2x8x8xf32>
    %645 = tpu.matmul %643, %644, %cst_242 {dimension_numbers = #tpu.dot_dimension_numbers<[2], [2], [1], [1], [0, 0, 0, 1, 1, 1], [0], [0]>} : vector<2x8x16xf32>, vector<2x8x16xf32>, vector<2x8x8xf32> -> vector<2x8x8xf32>
    "tpu.trace_stop"() : () -> ()
    %646 = vector.shape_cast %7 : vector<8x8xf32> to vector<1x8x8xf32>
    %647 = vector.broadcast %646 : vector<1x8x8xf32> to vector<2x8x8xf32>
    %648 = arith.addf %645, %647 : vector<2x8x8xf32>
    %cst_243 = arith.constant dense<0xFF800000> : vector<2x8xf32>
    %649 = vector.multi_reduction <maximumf>, %648, %cst_243 [2] : vector<2x8x8xf32> to vector<2x8xf32>
    %650 = vector.shape_cast %649 : vector<2x8xf32> to vector<2x8x1xf32>
    %651 = vector.broadcast %650 : vector<2x8x1xf32> to vector<2x8x8xf32>
    %652 = arith.subf %648, %651 : vector<2x8x8xf32>
    %653 = math.exp %652 : vector<2x8x8xf32>
    %cst_244 = arith.constant dense<0.000000e+00> : vector<2x8xf32>
    %654 = vector.multi_reduction <add>, %653, %cst_244 [2] : vector<2x8x8xf32> to vector<2x8xf32>
    %655 = vector.shape_cast %654 : vector<2x8xf32> to vector<2x8x1xf32>
    %656 = tpu.reciprocal %655 {approx = true} : vector<2x8x1xf32> -> vector<2x8x1xf32>
    %657 = vector.broadcast %656 : vector<2x8x1xf32> to vector<2x8x8xf32>
    %658 = arith.mulf %653, %657 : vector<2x8x8xf32>
    %659 = vector.extract_strided_slice %534 {offsets = [0, 0, 96], sizes = [2, 8, 16], strides = [1, 1, 1]} : vector<2x8x128xf32> to vector<2x8x16xf32>
    "tpu.trace_start"() <{level = 10 : i32, message = "bqk,bkd->bqd"}> : () -> ()
    %cst_245 = arith.constant dense<0.000000e+00> : vector<2x8x16xf32>
    %660 = tpu.matmul %658, %659, %cst_245 {dimension_numbers = #tpu.dot_dimension_numbers<[2], [1], [1], [2], [0, 0, 0, 1, 1, 2], [0], [0]>} : vector<2x8x8xf32>, vector<2x8x16xf32>, vector<2x8x16xf32> -> vector<2x8x16xf32>
    "tpu.trace_stop"() : () -> ()
    %661 = vector.extract_strided_slice %532 {offsets = [0, 0, 112], sizes = [2, 8, 16], strides = [1, 1, 1]} : vector<2x8x128xf32> to vector<2x8x16xf32>
    %662 = vector.extract_strided_slice %533 {offsets = [0, 0, 112], sizes = [2, 8, 16], strides = [1, 1, 1]} : vector<2x8x128xf32> to vector<2x8x16xf32>
    "tpu.trace_start"() <{level = 10 : i32, message = "bqd,bkd->bqk"}> : () -> ()
    %cst_246 = arith.constant dense<0.000000e+00> : vector<2x8x8xf32>
    %663 = tpu.matmul %661, %662, %cst_246 {dimension_numbers = #tpu.dot_dimension_numbers<[2], [2], [1], [1], [0, 0, 0, 1, 1, 1], [0], [0]>} : vector<2x8x16xf32>, vector<2x8x16xf32>, vector<2x8x8xf32> -> vector<2x8x8xf32>
    "tpu.trace_stop"() : () -> ()
    %664 = vector.shape_cast %7 : vector<8x8xf32> to vector<1x8x8xf32>
    %665 = vector.broadcast %664 : vector<1x8x8xf32> to vector<2x8x8xf32>
    %666 = arith.addf %663, %665 : vector<2x8x8xf32>
    %cst_247 = arith.constant dense<0xFF800000> : vector<2x8xf32>
    %667 = vector.multi_reduction <maximumf>, %666, %cst_247 [2] : vector<2x8x8xf32> to vector<2x8xf32>
    %668 = vector.shape_cast %667 : vector<2x8xf32> to vector<2x8x1xf32>
    %669 = vector.broadcast %668 : vector<2x8x1xf32> to vector<2x8x8xf32>
    %670 = arith.subf %666, %669 : vector<2x8x8xf32>
    %671 = math.exp %670 : vector<2x8x8xf32>
    %cst_248 = arith.constant dense<0.000000e+00> : vector<2x8xf32>
    %672 = vector.multi_reduction <add>, %671, %cst_248 [2] : vector<2x8x8xf32> to vector<2x8xf32>
    %673 = vector.shape_cast %672 : vector<2x8xf32> to vector<2x8x1xf32>
    %674 = tpu.reciprocal %673 {approx = true} : vector<2x8x1xf32> -> vector<2x8x1xf32>
    %675 = vector.broadcast %674 : vector<2x8x1xf32> to vector<2x8x8xf32>
    %676 = arith.mulf %671, %675 : vector<2x8x8xf32>
    %677 = vector.extract_strided_slice %534 {offsets = [0, 0, 112], sizes = [2, 8, 16], strides = [1, 1, 1]} : vector<2x8x128xf32> to vector<2x8x16xf32>
    "tpu.trace_start"() <{level = 10 : i32, message = "bqk,bkd->bqd"}> : () -> ()
    %cst_249 = arith.constant dense<0.000000e+00> : vector<2x8x16xf32>
    %678 = tpu.matmul %676, %677, %cst_249 {dimension_numbers = #tpu.dot_dimension_numbers<[2], [1], [1], [2], [0, 0, 0, 1, 1, 2], [0], [0]>} : vector<2x8x8xf32>, vector<2x8x16xf32>, vector<2x8x16xf32> -> vector<2x8x16xf32>
    "tpu.trace_stop"() : () -> ()
    %679 = tpu.concatenate %552, %570, %588, %606, %624, %642, %660, %678 in 2 : vector<2x8x16xf32>, vector<2x8x16xf32>, vector<2x8x16xf32>, vector<2x8x16xf32>, vector<2x8x16xf32>, vector<2x8x16xf32>, vector<2x8x16xf32>, vector<2x8x16xf32> -> vector<2x8x128xf32>
    %680 = vector.shape_cast %679 : vector<2x8x128xf32> to vector<16x128xf32>
    %681 = arith.truncf %680 : vector<16x128xf32> to vector<16x128xbf16>
    %c2_250 = arith.constant 2 : index
    %c0_251 = arith.constant 0 : index
    %c0_252 = arith.constant 0 : index
    %682 = vector.load %arg10[%c2_250, %c0_251, %c0_252] : memref<4x128x128xbf16, #tpu.memory_space<vmem>>, vector<1x128x128xbf16>
    %683 = vector.shape_cast %682 : vector<1x128x128xbf16> to vector<128x128xbf16>
    %cst_253 = arith.constant dense<0.000000e+00> : vector<16x128xf32>
    %684 = tpu.matmul %681, %683, %cst_253 {dimension_numbers = #tpu.dot_dimension_numbers<[1], [0], [0], [1], [0, 0, 1, 1], [], []>} : vector<16x128xbf16>, vector<128x128xbf16>, vector<16x128xf32> -> vector<16x128xf32>
    %c2_254 = arith.constant 2 : index
    %c0_255 = arith.constant 0 : index
    %c0_256 = arith.constant 0 : index
    %685 = vector.load %arg11[%c2_254, %c0_255, %c0_256] : memref<4x1x128xf32, #tpu.memory_space<vmem>>, vector<1x1x128xf32>
    %686 = vector.shape_cast %685 : vector<1x1x128xf32> to vector<1x128xf32>
    %687 = vector.broadcast %686 : vector<1x128xf32> to vector<16x128xf32>
    %688 = arith.addf %684, %687 : vector<16x128xf32>
    %689 = arith.addf %509, %688 : vector<16x128xf32>
    %cst_257 = arith.constant dense<0.000000e+00> : vector<16xf32>
    %690 = vector.multi_reduction <add>, %689, %cst_257 [1] : vector<16x128xf32> to vector<16xf32>
    %691 = vector.shape_cast %690 : vector<16xf32> to vector<16x1xf32>
    %cst_258 = arith.constant 1.280000e+02 : f32
    %692 = vector.broadcast %cst_258 : f32 to vector<16x1xf32>
    %693 = arith.divf %691, %692 : vector<16x1xf32>
    %694 = arith.mulf %689, %689 : vector<16x128xf32>
    %cst_259 = arith.constant dense<0.000000e+00> : vector<16xf32>
    %695 = vector.multi_reduction <add>, %694, %cst_259 [1] : vector<16x128xf32> to vector<16xf32>
    %696 = vector.shape_cast %695 : vector<16xf32> to vector<16x1xf32>
    %cst_260 = arith.constant 1.280000e+02 : f32
    %697 = vector.broadcast %cst_260 : f32 to vector<16x1xf32>
    %698 = arith.divf %696, %697 : vector<16x1xf32>
    %699 = arith.mulf %693, %693 : vector<16x1xf32>
    %700 = arith.subf %698, %699 : vector<16x1xf32>
    %701 = vector.broadcast %693 : vector<16x1xf32> to vector<16x128xf32>
    %702 = arith.subf %689, %701 : vector<16x128xf32>
    %cst_261 = arith.constant 9.99999974E-6 : f32
    %703 = vector.broadcast %cst_261 : f32 to vector<16x1xf32>
    %704 = arith.addf %700, %703 : vector<16x1xf32>
    %705 = math.rsqrt %704 : vector<16x1xf32>
    %706 = vector.broadcast %705 : vector<16x1xf32> to vector<16x128xf32>
    %707 = arith.mulf %702, %706 : vector<16x128xf32>
    %c2_262 = arith.constant 2 : index
    %c0_263 = arith.constant 0 : index
    %c0_264 = arith.constant 0 : index
    %708 = vector.load %arg12[%c2_262, %c0_263, %c0_264] : memref<4x1x128xf32, #tpu.memory_space<vmem>>, vector<1x1x128xf32>
    %709 = vector.shape_cast %708 : vector<1x1x128xf32> to vector<1x128xf32>
    %710 = vector.broadcast %709 : vector<1x128xf32> to vector<16x128xf32>
    %711 = arith.mulf %707, %710 : vector<16x128xf32>
    %c2_265 = arith.constant 2 : index
    %c0_266 = arith.constant 0 : index
    %c0_267 = arith.constant 0 : index
    %712 = vector.load %arg13[%c2_265, %c0_266, %c0_267] : memref<4x1x128xf32, #tpu.memory_space<vmem>>, vector<1x1x128xf32>
    %713 = vector.shape_cast %712 : vector<1x1x128xf32> to vector<1x128xf32>
    %714 = vector.broadcast %713 : vector<1x128xf32> to vector<16x128xf32>
    %715 = arith.addf %711, %714 : vector<16x128xf32>
    %716 = arith.truncf %715 : vector<16x128xf32> to vector<16x128xbf16>
    %c2_268 = arith.constant 2 : index
    %c0_269 = arith.constant 0 : index
    %c0_270 = arith.constant 0 : index
    %717 = vector.load %arg14[%c2_268, %c0_269, %c0_270] : memref<4x128x512xbf16, #tpu.memory_space<vmem>>, vector<1x128x512xbf16>
    %718 = vector.shape_cast %717 : vector<1x128x512xbf16> to vector<128x512xbf16>
    %cst_271 = arith.constant dense<0.000000e+00> : vector<16x512xf32>
    %719 = tpu.matmul %716, %718, %cst_271 {dimension_numbers = #tpu.dot_dimension_numbers<[1], [0], [0], [1], [0, 0, 1, 1], [], []>} : vector<16x128xbf16>, vector<128x512xbf16>, vector<16x512xf32> -> vector<16x512xf32>
    %c2_272 = arith.constant 2 : index
    %c0_273 = arith.constant 0 : index
    %c0_274 = arith.constant 0 : index
    %720 = vector.load %arg15[%c2_272, %c0_273, %c0_274] : memref<4x1x512xf32, #tpu.memory_space<vmem>>, vector<1x1x512xf32>
    %721 = vector.shape_cast %720 : vector<1x1x512xf32> to vector<1x512xf32>
    %722 = vector.broadcast %721 : vector<1x512xf32> to vector<16x512xf32>
    %723 = arith.addf %719, %722 : vector<16x512xf32>
    %cst_275 = arith.constant 0.000000e+00 : f32
    %724 = vector.broadcast %cst_275 : f32 to vector<16x512xf32>
    %725 = arith.maximumf %723, %724 : vector<16x512xf32>
    %726 = arith.truncf %725 : vector<16x512xf32> to vector<16x512xbf16>
    %c2_276 = arith.constant 2 : index
    %c0_277 = arith.constant 0 : index
    %c0_278 = arith.constant 0 : index
    %727 = vector.load %arg16[%c2_276, %c0_277, %c0_278] : memref<4x512x128xbf16, #tpu.memory_space<vmem>>, vector<1x512x128xbf16>
    %728 = vector.shape_cast %727 : vector<1x512x128xbf16> to vector<512x128xbf16>
    %cst_279 = arith.constant dense<0.000000e+00> : vector<16x128xf32>
    %729 = tpu.matmul %726, %728, %cst_279 {dimension_numbers = #tpu.dot_dimension_numbers<[1], [0], [0], [1], [0, 0, 1, 1], [], []>} : vector<16x512xbf16>, vector<512x128xbf16>, vector<16x128xf32> -> vector<16x128xf32>
    %c2_280 = arith.constant 2 : index
    %c0_281 = arith.constant 0 : index
    %c0_282 = arith.constant 0 : index
    %730 = vector.load %arg17[%c2_280, %c0_281, %c0_282] : memref<4x1x128xf32, #tpu.memory_space<vmem>>, vector<1x1x128xf32>
    %731 = vector.shape_cast %730 : vector<1x1x128xf32> to vector<1x128xf32>
    %732 = vector.broadcast %731 : vector<1x128xf32> to vector<16x128xf32>
    %733 = arith.addf %729, %732 : vector<16x128xf32>
    %734 = arith.addf %715, %733 : vector<16x128xf32>
    %cst_283 = arith.constant dense<0.000000e+00> : vector<16xf32>
    %735 = vector.multi_reduction <add>, %734, %cst_283 [1] : vector<16x128xf32> to vector<16xf32>
    %736 = vector.shape_cast %735 : vector<16xf32> to vector<16x1xf32>
    %cst_284 = arith.constant 1.280000e+02 : f32
    %737 = vector.broadcast %cst_284 : f32 to vector<16x1xf32>
    %738 = arith.divf %736, %737 : vector<16x1xf32>
    %739 = arith.mulf %734, %734 : vector<16x128xf32>
    %cst_285 = arith.constant dense<0.000000e+00> : vector<16xf32>
    %740 = vector.multi_reduction <add>, %739, %cst_285 [1] : vector<16x128xf32> to vector<16xf32>
    %741 = vector.shape_cast %740 : vector<16xf32> to vector<16x1xf32>
    %cst_286 = arith.constant 1.280000e+02 : f32
    %742 = vector.broadcast %cst_286 : f32 to vector<16x1xf32>
    %743 = arith.divf %741, %742 : vector<16x1xf32>
    %744 = arith.mulf %738, %738 : vector<16x1xf32>
    %745 = arith.subf %743, %744 : vector<16x1xf32>
    %746 = vector.broadcast %738 : vector<16x1xf32> to vector<16x128xf32>
    %747 = arith.subf %734, %746 : vector<16x128xf32>
    %cst_287 = arith.constant 9.99999974E-6 : f32
    %748 = vector.broadcast %cst_287 : f32 to vector<16x1xf32>
    %749 = arith.addf %745, %748 : vector<16x1xf32>
    %750 = math.rsqrt %749 : vector<16x1xf32>
    %751 = vector.broadcast %750 : vector<16x1xf32> to vector<16x128xf32>
    %752 = arith.mulf %747, %751 : vector<16x128xf32>
    %c2_288 = arith.constant 2 : index
    %c0_289 = arith.constant 0 : index
    %c0_290 = arith.constant 0 : index
    %753 = vector.load %arg18[%c2_288, %c0_289, %c0_290] : memref<4x1x128xf32, #tpu.memory_space<vmem>>, vector<1x1x128xf32>
    %754 = vector.shape_cast %753 : vector<1x1x128xf32> to vector<1x128xf32>
    %755 = vector.broadcast %754 : vector<1x128xf32> to vector<16x128xf32>
    %756 = arith.mulf %752, %755 : vector<16x128xf32>
    %c2_291 = arith.constant 2 : index
    %c0_292 = arith.constant 0 : index
    %c0_293 = arith.constant 0 : index
    %757 = vector.load %arg19[%c2_291, %c0_292, %c0_293] : memref<4x1x128xf32, #tpu.memory_space<vmem>>, vector<1x1x128xf32>
    %758 = vector.shape_cast %757 : vector<1x1x128xf32> to vector<1x128xf32>
    %759 = vector.broadcast %758 : vector<1x128xf32> to vector<16x128xf32>
    %760 = arith.addf %756, %759 : vector<16x128xf32>
    %761 = arith.truncf %760 : vector<16x128xf32> to vector<16x128xbf16>
    %c3 = arith.constant 3 : index
    %c0_294 = arith.constant 0 : index
    %c0_295 = arith.constant 0 : index
    %762 = vector.load %arg4[%c3, %c0_294, %c0_295] : memref<4x128x128xbf16, #tpu.memory_space<vmem>>, vector<1x128x128xbf16>
    %763 = vector.shape_cast %762 : vector<1x128x128xbf16> to vector<128x128xbf16>
    %cst_296 = arith.constant dense<0.000000e+00> : vector<16x128xf32>
    %764 = tpu.matmul %761, %763, %cst_296 {dimension_numbers = #tpu.dot_dimension_numbers<[1], [0], [0], [1], [0, 0, 1, 1], [], []>} : vector<16x128xbf16>, vector<128x128xbf16>, vector<16x128xf32> -> vector<16x128xf32>
    %c3_297 = arith.constant 3 : index
    %c0_298 = arith.constant 0 : index
    %c0_299 = arith.constant 0 : index
    %765 = vector.load %arg5[%c3_297, %c0_298, %c0_299] : memref<4x1x128xf32, #tpu.memory_space<vmem>>, vector<1x1x128xf32>
    %766 = vector.shape_cast %765 : vector<1x1x128xf32> to vector<1x128xf32>
    %767 = vector.broadcast %766 : vector<1x128xf32> to vector<16x128xf32>
    %768 = arith.addf %764, %767 : vector<16x128xf32>
    %c3_300 = arith.constant 3 : index
    %c0_301 = arith.constant 0 : index
    %c0_302 = arith.constant 0 : index
    %769 = vector.load %arg6[%c3_300, %c0_301, %c0_302] : memref<4x128x128xbf16, #tpu.memory_space<vmem>>, vector<1x128x128xbf16>
    %770 = vector.shape_cast %769 : vector<1x128x128xbf16> to vector<128x128xbf16>
    %cst_303 = arith.constant dense<0.000000e+00> : vector<16x128xf32>
    %771 = tpu.matmul %761, %770, %cst_303 {dimension_numbers = #tpu.dot_dimension_numbers<[1], [0], [0], [1], [0, 0, 1, 1], [], []>} : vector<16x128xbf16>, vector<128x128xbf16>, vector<16x128xf32> -> vector<16x128xf32>
    %c3_304 = arith.constant 3 : index
    %c0_305 = arith.constant 0 : index
    %c0_306 = arith.constant 0 : index
    %772 = vector.load %arg7[%c3_304, %c0_305, %c0_306] : memref<4x1x128xf32, #tpu.memory_space<vmem>>, vector<1x1x128xf32>
    %773 = vector.shape_cast %772 : vector<1x1x128xf32> to vector<1x128xf32>
    %774 = vector.broadcast %773 : vector<1x128xf32> to vector<16x128xf32>
    %775 = arith.addf %771, %774 : vector<16x128xf32>
    %c3_307 = arith.constant 3 : index
    %c0_308 = arith.constant 0 : index
    %c0_309 = arith.constant 0 : index
    %776 = vector.load %arg8[%c3_307, %c0_308, %c0_309] : memref<4x128x128xbf16, #tpu.memory_space<vmem>>, vector<1x128x128xbf16>
    %777 = vector.shape_cast %776 : vector<1x128x128xbf16> to vector<128x128xbf16>
    %cst_310 = arith.constant dense<0.000000e+00> : vector<16x128xf32>
    %778 = tpu.matmul %761, %777, %cst_310 {dimension_numbers = #tpu.dot_dimension_numbers<[1], [0], [0], [1], [0, 0, 1, 1], [], []>} : vector<16x128xbf16>, vector<128x128xbf16>, vector<16x128xf32> -> vector<16x128xf32>
    %c3_311 = arith.constant 3 : index
    %c0_312 = arith.constant 0 : index
    %c0_313 = arith.constant 0 : index
    %779 = vector.load %arg9[%c3_311, %c0_312, %c0_313] : memref<4x1x128xf32, #tpu.memory_space<vmem>>, vector<1x1x128xf32>
    %780 = vector.shape_cast %779 : vector<1x1x128xf32> to vector<1x128xf32>
    %781 = vector.broadcast %780 : vector<1x128xf32> to vector<16x128xf32>
    %782 = arith.addf %778, %781 : vector<16x128xf32>
    %783 = vector.shape_cast %768 : vector<16x128xf32> to vector<2x8x128xf32>
    %784 = vector.shape_cast %775 : vector<16x128xf32> to vector<2x8x128xf32>
    %785 = vector.shape_cast %782 : vector<16x128xf32> to vector<2x8x128xf32>
    %786 = vector.extract_strided_slice %783 {offsets = [0, 0, 0], sizes = [2, 8, 16], strides = [1, 1, 1]} : vector<2x8x128xf32> to vector<2x8x16xf32>
    %787 = vector.extract_strided_slice %784 {offsets = [0, 0, 0], sizes = [2, 8, 16], strides = [1, 1, 1]} : vector<2x8x128xf32> to vector<2x8x16xf32>
    "tpu.trace_start"() <{level = 10 : i32, message = "bqd,bkd->bqk"}> : () -> ()
    %cst_314 = arith.constant dense<0.000000e+00> : vector<2x8x8xf32>
    %788 = tpu.matmul %786, %787, %cst_314 {dimension_numbers = #tpu.dot_dimension_numbers<[2], [2], [1], [1], [0, 0, 0, 1, 1, 1], [0], [0]>} : vector<2x8x16xf32>, vector<2x8x16xf32>, vector<2x8x8xf32> -> vector<2x8x8xf32>
    "tpu.trace_stop"() : () -> ()
    %789 = vector.shape_cast %7 : vector<8x8xf32> to vector<1x8x8xf32>
    %790 = vector.broadcast %789 : vector<1x8x8xf32> to vector<2x8x8xf32>
    %791 = arith.addf %788, %790 : vector<2x8x8xf32>
    %cst_315 = arith.constant dense<0xFF800000> : vector<2x8xf32>
    %792 = vector.multi_reduction <maximumf>, %791, %cst_315 [2] : vector<2x8x8xf32> to vector<2x8xf32>
    %793 = vector.shape_cast %792 : vector<2x8xf32> to vector<2x8x1xf32>
    %794 = vector.broadcast %793 : vector<2x8x1xf32> to vector<2x8x8xf32>
    %795 = arith.subf %791, %794 : vector<2x8x8xf32>
    %796 = math.exp %795 : vector<2x8x8xf32>
    %cst_316 = arith.constant dense<0.000000e+00> : vector<2x8xf32>
    %797 = vector.multi_reduction <add>, %796, %cst_316 [2] : vector<2x8x8xf32> to vector<2x8xf32>
    %798 = vector.shape_cast %797 : vector<2x8xf32> to vector<2x8x1xf32>
    %799 = tpu.reciprocal %798 {approx = true} : vector<2x8x1xf32> -> vector<2x8x1xf32>
    %800 = vector.broadcast %799 : vector<2x8x1xf32> to vector<2x8x8xf32>
    %801 = arith.mulf %796, %800 : vector<2x8x8xf32>
    %802 = vector.extract_strided_slice %785 {offsets = [0, 0, 0], sizes = [2, 8, 16], strides = [1, 1, 1]} : vector<2x8x128xf32> to vector<2x8x16xf32>
    "tpu.trace_start"() <{level = 10 : i32, message = "bqk,bkd->bqd"}> : () -> ()
    %cst_317 = arith.constant dense<0.000000e+00> : vector<2x8x16xf32>
    %803 = tpu.matmul %801, %802, %cst_317 {dimension_numbers = #tpu.dot_dimension_numbers<[2], [1], [1], [2], [0, 0, 0, 1, 1, 2], [0], [0]>} : vector<2x8x8xf32>, vector<2x8x16xf32>, vector<2x8x16xf32> -> vector<2x8x16xf32>
    "tpu.trace_stop"() : () -> ()
    %804 = vector.extract_strided_slice %783 {offsets = [0, 0, 16], sizes = [2, 8, 16], strides = [1, 1, 1]} : vector<2x8x128xf32> to vector<2x8x16xf32>
    %805 = vector.extract_strided_slice %784 {offsets = [0, 0, 16], sizes = [2, 8, 16], strides = [1, 1, 1]} : vector<2x8x128xf32> to vector<2x8x16xf32>
    "tpu.trace_start"() <{level = 10 : i32, message = "bqd,bkd->bqk"}> : () -> ()
    %cst_318 = arith.constant dense<0.000000e+00> : vector<2x8x8xf32>
    %806 = tpu.matmul %804, %805, %cst_318 {dimension_numbers = #tpu.dot_dimension_numbers<[2], [2], [1], [1], [0, 0, 0, 1, 1, 1], [0], [0]>} : vector<2x8x16xf32>, vector<2x8x16xf32>, vector<2x8x8xf32> -> vector<2x8x8xf32>
    "tpu.trace_stop"() : () -> ()
    %807 = vector.shape_cast %7 : vector<8x8xf32> to vector<1x8x8xf32>
    %808 = vector.broadcast %807 : vector<1x8x8xf32> to vector<2x8x8xf32>
    %809 = arith.addf %806, %808 : vector<2x8x8xf32>
    %cst_319 = arith.constant dense<0xFF800000> : vector<2x8xf32>
    %810 = vector.multi_reduction <maximumf>, %809, %cst_319 [2] : vector<2x8x8xf32> to vector<2x8xf32>
    %811 = vector.shape_cast %810 : vector<2x8xf32> to vector<2x8x1xf32>
    %812 = vector.broadcast %811 : vector<2x8x1xf32> to vector<2x8x8xf32>
    %813 = arith.subf %809, %812 : vector<2x8x8xf32>
    %814 = math.exp %813 : vector<2x8x8xf32>
    %cst_320 = arith.constant dense<0.000000e+00> : vector<2x8xf32>
    %815 = vector.multi_reduction <add>, %814, %cst_320 [2] : vector<2x8x8xf32> to vector<2x8xf32>
    %816 = vector.shape_cast %815 : vector<2x8xf32> to vector<2x8x1xf32>
    %817 = tpu.reciprocal %816 {approx = true} : vector<2x8x1xf32> -> vector<2x8x1xf32>
    %818 = vector.broadcast %817 : vector<2x8x1xf32> to vector<2x8x8xf32>
    %819 = arith.mulf %814, %818 : vector<2x8x8xf32>
    %820 = vector.extract_strided_slice %785 {offsets = [0, 0, 16], sizes = [2, 8, 16], strides = [1, 1, 1]} : vector<2x8x128xf32> to vector<2x8x16xf32>
    "tpu.trace_start"() <{level = 10 : i32, message = "bqk,bkd->bqd"}> : () -> ()
    %cst_321 = arith.constant dense<0.000000e+00> : vector<2x8x16xf32>
    %821 = tpu.matmul %819, %820, %cst_321 {dimension_numbers = #tpu.dot_dimension_numbers<[2], [1], [1], [2], [0, 0, 0, 1, 1, 2], [0], [0]>} : vector<2x8x8xf32>, vector<2x8x16xf32>, vector<2x8x16xf32> -> vector<2x8x16xf32>
    "tpu.trace_stop"() : () -> ()
    %822 = vector.extract_strided_slice %783 {offsets = [0, 0, 32], sizes = [2, 8, 16], strides = [1, 1, 1]} : vector<2x8x128xf32> to vector<2x8x16xf32>
    %823 = vector.extract_strided_slice %784 {offsets = [0, 0, 32], sizes = [2, 8, 16], strides = [1, 1, 1]} : vector<2x8x128xf32> to vector<2x8x16xf32>
    "tpu.trace_start"() <{level = 10 : i32, message = "bqd,bkd->bqk"}> : () -> ()
    %cst_322 = arith.constant dense<0.000000e+00> : vector<2x8x8xf32>
    %824 = tpu.matmul %822, %823, %cst_322 {dimension_numbers = #tpu.dot_dimension_numbers<[2], [2], [1], [1], [0, 0, 0, 1, 1, 1], [0], [0]>} : vector<2x8x16xf32>, vector<2x8x16xf32>, vector<2x8x8xf32> -> vector<2x8x8xf32>
    "tpu.trace_stop"() : () -> ()
    %825 = vector.shape_cast %7 : vector<8x8xf32> to vector<1x8x8xf32>
    %826 = vector.broadcast %825 : vector<1x8x8xf32> to vector<2x8x8xf32>
    %827 = arith.addf %824, %826 : vector<2x8x8xf32>
    %cst_323 = arith.constant dense<0xFF800000> : vector<2x8xf32>
    %828 = vector.multi_reduction <maximumf>, %827, %cst_323 [2] : vector<2x8x8xf32> to vector<2x8xf32>
    %829 = vector.shape_cast %828 : vector<2x8xf32> to vector<2x8x1xf32>
    %830 = vector.broadcast %829 : vector<2x8x1xf32> to vector<2x8x8xf32>
    %831 = arith.subf %827, %830 : vector<2x8x8xf32>
    %832 = math.exp %831 : vector<2x8x8xf32>
    %cst_324 = arith.constant dense<0.000000e+00> : vector<2x8xf32>
    %833 = vector.multi_reduction <add>, %832, %cst_324 [2] : vector<2x8x8xf32> to vector<2x8xf32>
    %834 = vector.shape_cast %833 : vector<2x8xf32> to vector<2x8x1xf32>
    %835 = tpu.reciprocal %834 {approx = true} : vector<2x8x1xf32> -> vector<2x8x1xf32>
    %836 = vector.broadcast %835 : vector<2x8x1xf32> to vector<2x8x8xf32>
    %837 = arith.mulf %832, %836 : vector<2x8x8xf32>
    %838 = vector.extract_strided_slice %785 {offsets = [0, 0, 32], sizes = [2, 8, 16], strides = [1, 1, 1]} : vector<2x8x128xf32> to vector<2x8x16xf32>
    "tpu.trace_start"() <{level = 10 : i32, message = "bqk,bkd->bqd"}> : () -> ()
    %cst_325 = arith.constant dense<0.000000e+00> : vector<2x8x16xf32>
    %839 = tpu.matmul %837, %838, %cst_325 {dimension_numbers = #tpu.dot_dimension_numbers<[2], [1], [1], [2], [0, 0, 0, 1, 1, 2], [0], [0]>} : vector<2x8x8xf32>, vector<2x8x16xf32>, vector<2x8x16xf32> -> vector<2x8x16xf32>
    "tpu.trace_stop"() : () -> ()
    %840 = vector.extract_strided_slice %783 {offsets = [0, 0, 48], sizes = [2, 8, 16], strides = [1, 1, 1]} : vector<2x8x128xf32> to vector<2x8x16xf32>
    %841 = vector.extract_strided_slice %784 {offsets = [0, 0, 48], sizes = [2, 8, 16], strides = [1, 1, 1]} : vector<2x8x128xf32> to vector<2x8x16xf32>
    "tpu.trace_start"() <{level = 10 : i32, message = "bqd,bkd->bqk"}> : () -> ()
    %cst_326 = arith.constant dense<0.000000e+00> : vector<2x8x8xf32>
    %842 = tpu.matmul %840, %841, %cst_326 {dimension_numbers = #tpu.dot_dimension_numbers<[2], [2], [1], [1], [0, 0, 0, 1, 1, 1], [0], [0]>} : vector<2x8x16xf32>, vector<2x8x16xf32>, vector<2x8x8xf32> -> vector<2x8x8xf32>
    "tpu.trace_stop"() : () -> ()
    %843 = vector.shape_cast %7 : vector<8x8xf32> to vector<1x8x8xf32>
    %844 = vector.broadcast %843 : vector<1x8x8xf32> to vector<2x8x8xf32>
    %845 = arith.addf %842, %844 : vector<2x8x8xf32>
    %cst_327 = arith.constant dense<0xFF800000> : vector<2x8xf32>
    %846 = vector.multi_reduction <maximumf>, %845, %cst_327 [2] : vector<2x8x8xf32> to vector<2x8xf32>
    %847 = vector.shape_cast %846 : vector<2x8xf32> to vector<2x8x1xf32>
    %848 = vector.broadcast %847 : vector<2x8x1xf32> to vector<2x8x8xf32>
    %849 = arith.subf %845, %848 : vector<2x8x8xf32>
    %850 = math.exp %849 : vector<2x8x8xf32>
    %cst_328 = arith.constant dense<0.000000e+00> : vector<2x8xf32>
    %851 = vector.multi_reduction <add>, %850, %cst_328 [2] : vector<2x8x8xf32> to vector<2x8xf32>
    %852 = vector.shape_cast %851 : vector<2x8xf32> to vector<2x8x1xf32>
    %853 = tpu.reciprocal %852 {approx = true} : vector<2x8x1xf32> -> vector<2x8x1xf32>
    %854 = vector.broadcast %853 : vector<2x8x1xf32> to vector<2x8x8xf32>
    %855 = arith.mulf %850, %854 : vector<2x8x8xf32>
    %856 = vector.extract_strided_slice %785 {offsets = [0, 0, 48], sizes = [2, 8, 16], strides = [1, 1, 1]} : vector<2x8x128xf32> to vector<2x8x16xf32>
    "tpu.trace_start"() <{level = 10 : i32, message = "bqk,bkd->bqd"}> : () -> ()
    %cst_329 = arith.constant dense<0.000000e+00> : vector<2x8x16xf32>
    %857 = tpu.matmul %855, %856, %cst_329 {dimension_numbers = #tpu.dot_dimension_numbers<[2], [1], [1], [2], [0, 0, 0, 1, 1, 2], [0], [0]>} : vector<2x8x8xf32>, vector<2x8x16xf32>, vector<2x8x16xf32> -> vector<2x8x16xf32>
    "tpu.trace_stop"() : () -> ()
    %858 = vector.extract_strided_slice %783 {offsets = [0, 0, 64], sizes = [2, 8, 16], strides = [1, 1, 1]} : vector<2x8x128xf32> to vector<2x8x16xf32>
    %859 = vector.extract_strided_slice %784 {offsets = [0, 0, 64], sizes = [2, 8, 16], strides = [1, 1, 1]} : vector<2x8x128xf32> to vector<2x8x16xf32>
    "tpu.trace_start"() <{level = 10 : i32, message = "bqd,bkd->bqk"}> : () -> ()
    %cst_330 = arith.constant dense<0.000000e+00> : vector<2x8x8xf32>
    %860 = tpu.matmul %858, %859, %cst_330 {dimension_numbers = #tpu.dot_dimension_numbers<[2], [2], [1], [1], [0, 0, 0, 1, 1, 1], [0], [0]>} : vector<2x8x16xf32>, vector<2x8x16xf32>, vector<2x8x8xf32> -> vector<2x8x8xf32>
    "tpu.trace_stop"() : () -> ()
    %861 = vector.shape_cast %7 : vector<8x8xf32> to vector<1x8x8xf32>
    %862 = vector.broadcast %861 : vector<1x8x8xf32> to vector<2x8x8xf32>
    %863 = arith.addf %860, %862 : vector<2x8x8xf32>
    %cst_331 = arith.constant dense<0xFF800000> : vector<2x8xf32>
    %864 = vector.multi_reduction <maximumf>, %863, %cst_331 [2] : vector<2x8x8xf32> to vector<2x8xf32>
    %865 = vector.shape_cast %864 : vector<2x8xf32> to vector<2x8x1xf32>
    %866 = vector.broadcast %865 : vector<2x8x1xf32> to vector<2x8x8xf32>
    %867 = arith.subf %863, %866 : vector<2x8x8xf32>
    %868 = math.exp %867 : vector<2x8x8xf32>
    %cst_332 = arith.constant dense<0.000000e+00> : vector<2x8xf32>
    %869 = vector.multi_reduction <add>, %868, %cst_332 [2] : vector<2x8x8xf32> to vector<2x8xf32>
    %870 = vector.shape_cast %869 : vector<2x8xf32> to vector<2x8x1xf32>
    %871 = tpu.reciprocal %870 {approx = true} : vector<2x8x1xf32> -> vector<2x8x1xf32>
    %872 = vector.broadcast %871 : vector<2x8x1xf32> to vector<2x8x8xf32>
    %873 = arith.mulf %868, %872 : vector<2x8x8xf32>
    %874 = vector.extract_strided_slice %785 {offsets = [0, 0, 64], sizes = [2, 8, 16], strides = [1, 1, 1]} : vector<2x8x128xf32> to vector<2x8x16xf32>
    "tpu.trace_start"() <{level = 10 : i32, message = "bqk,bkd->bqd"}> : () -> ()
    %cst_333 = arith.constant dense<0.000000e+00> : vector<2x8x16xf32>
    %875 = tpu.matmul %873, %874, %cst_333 {dimension_numbers = #tpu.dot_dimension_numbers<[2], [1], [1], [2], [0, 0, 0, 1, 1, 2], [0], [0]>} : vector<2x8x8xf32>, vector<2x8x16xf32>, vector<2x8x16xf32> -> vector<2x8x16xf32>
    "tpu.trace_stop"() : () -> ()
    %876 = vector.extract_strided_slice %783 {offsets = [0, 0, 80], sizes = [2, 8, 16], strides = [1, 1, 1]} : vector<2x8x128xf32> to vector<2x8x16xf32>
    %877 = vector.extract_strided_slice %784 {offsets = [0, 0, 80], sizes = [2, 8, 16], strides = [1, 1, 1]} : vector<2x8x128xf32> to vector<2x8x16xf32>
    "tpu.trace_start"() <{level = 10 : i32, message = "bqd,bkd->bqk"}> : () -> ()
    %cst_334 = arith.constant dense<0.000000e+00> : vector<2x8x8xf32>
    %878 = tpu.matmul %876, %877, %cst_334 {dimension_numbers = #tpu.dot_dimension_numbers<[2], [2], [1], [1], [0, 0, 0, 1, 1, 1], [0], [0]>} : vector<2x8x16xf32>, vector<2x8x16xf32>, vector<2x8x8xf32> -> vector<2x8x8xf32>
    "tpu.trace_stop"() : () -> ()
    %879 = vector.shape_cast %7 : vector<8x8xf32> to vector<1x8x8xf32>
    %880 = vector.broadcast %879 : vector<1x8x8xf32> to vector<2x8x8xf32>
    %881 = arith.addf %878, %880 : vector<2x8x8xf32>
    %cst_335 = arith.constant dense<0xFF800000> : vector<2x8xf32>
    %882 = vector.multi_reduction <maximumf>, %881, %cst_335 [2] : vector<2x8x8xf32> to vector<2x8xf32>
    %883 = vector.shape_cast %882 : vector<2x8xf32> to vector<2x8x1xf32>
    %884 = vector.broadcast %883 : vector<2x8x1xf32> to vector<2x8x8xf32>
    %885 = arith.subf %881, %884 : vector<2x8x8xf32>
    %886 = math.exp %885 : vector<2x8x8xf32>
    %cst_336 = arith.constant dense<0.000000e+00> : vector<2x8xf32>
    %887 = vector.multi_reduction <add>, %886, %cst_336 [2] : vector<2x8x8xf32> to vector<2x8xf32>
    %888 = vector.shape_cast %887 : vector<2x8xf32> to vector<2x8x1xf32>
    %889 = tpu.reciprocal %888 {approx = true} : vector<2x8x1xf32> -> vector<2x8x1xf32>
    %890 = vector.broadcast %889 : vector<2x8x1xf32> to vector<2x8x8xf32>
    %891 = arith.mulf %886, %890 : vector<2x8x8xf32>
    %892 = vector.extract_strided_slice %785 {offsets = [0, 0, 80], sizes = [2, 8, 16], strides = [1, 1, 1]} : vector<2x8x128xf32> to vector<2x8x16xf32>
    "tpu.trace_start"() <{level = 10 : i32, message = "bqk,bkd->bqd"}> : () -> ()
    %cst_337 = arith.constant dense<0.000000e+00> : vector<2x8x16xf32>
    %893 = tpu.matmul %891, %892, %cst_337 {dimension_numbers = #tpu.dot_dimension_numbers<[2], [1], [1], [2], [0, 0, 0, 1, 1, 2], [0], [0]>} : vector<2x8x8xf32>, vector<2x8x16xf32>, vector<2x8x16xf32> -> vector<2x8x16xf32>
    "tpu.trace_stop"() : () -> ()
    %894 = vector.extract_strided_slice %783 {offsets = [0, 0, 96], sizes = [2, 8, 16], strides = [1, 1, 1]} : vector<2x8x128xf32> to vector<2x8x16xf32>
    %895 = vector.extract_strided_slice %784 {offsets = [0, 0, 96], sizes = [2, 8, 16], strides = [1, 1, 1]} : vector<2x8x128xf32> to vector<2x8x16xf32>
    "tpu.trace_start"() <{level = 10 : i32, message = "bqd,bkd->bqk"}> : () -> ()
    %cst_338 = arith.constant dense<0.000000e+00> : vector<2x8x8xf32>
    %896 = tpu.matmul %894, %895, %cst_338 {dimension_numbers = #tpu.dot_dimension_numbers<[2], [2], [1], [1], [0, 0, 0, 1, 1, 1], [0], [0]>} : vector<2x8x16xf32>, vector<2x8x16xf32>, vector<2x8x8xf32> -> vector<2x8x8xf32>
    "tpu.trace_stop"() : () -> ()
    %897 = vector.shape_cast %7 : vector<8x8xf32> to vector<1x8x8xf32>
    %898 = vector.broadcast %897 : vector<1x8x8xf32> to vector<2x8x8xf32>
    %899 = arith.addf %896, %898 : vector<2x8x8xf32>
    %cst_339 = arith.constant dense<0xFF800000> : vector<2x8xf32>
    %900 = vector.multi_reduction <maximumf>, %899, %cst_339 [2] : vector<2x8x8xf32> to vector<2x8xf32>
    %901 = vector.shape_cast %900 : vector<2x8xf32> to vector<2x8x1xf32>
    %902 = vector.broadcast %901 : vector<2x8x1xf32> to vector<2x8x8xf32>
    %903 = arith.subf %899, %902 : vector<2x8x8xf32>
    %904 = math.exp %903 : vector<2x8x8xf32>
    %cst_340 = arith.constant dense<0.000000e+00> : vector<2x8xf32>
    %905 = vector.multi_reduction <add>, %904, %cst_340 [2] : vector<2x8x8xf32> to vector<2x8xf32>
    %906 = vector.shape_cast %905 : vector<2x8xf32> to vector<2x8x1xf32>
    %907 = tpu.reciprocal %906 {approx = true} : vector<2x8x1xf32> -> vector<2x8x1xf32>
    %908 = vector.broadcast %907 : vector<2x8x1xf32> to vector<2x8x8xf32>
    %909 = arith.mulf %904, %908 : vector<2x8x8xf32>
    %910 = vector.extract_strided_slice %785 {offsets = [0, 0, 96], sizes = [2, 8, 16], strides = [1, 1, 1]} : vector<2x8x128xf32> to vector<2x8x16xf32>
    "tpu.trace_start"() <{level = 10 : i32, message = "bqk,bkd->bqd"}> : () -> ()
    %cst_341 = arith.constant dense<0.000000e+00> : vector<2x8x16xf32>
    %911 = tpu.matmul %909, %910, %cst_341 {dimension_numbers = #tpu.dot_dimension_numbers<[2], [1], [1], [2], [0, 0, 0, 1, 1, 2], [0], [0]>} : vector<2x8x8xf32>, vector<2x8x16xf32>, vector<2x8x16xf32> -> vector<2x8x16xf32>
    "tpu.trace_stop"() : () -> ()
    %912 = vector.extract_strided_slice %783 {offsets = [0, 0, 112], sizes = [2, 8, 16], strides = [1, 1, 1]} : vector<2x8x128xf32> to vector<2x8x16xf32>
    %913 = vector.extract_strided_slice %784 {offsets = [0, 0, 112], sizes = [2, 8, 16], strides = [1, 1, 1]} : vector<2x8x128xf32> to vector<2x8x16xf32>
    "tpu.trace_start"() <{level = 10 : i32, message = "bqd,bkd->bqk"}> : () -> ()
    %cst_342 = arith.constant dense<0.000000e+00> : vector<2x8x8xf32>
    %914 = tpu.matmul %912, %913, %cst_342 {dimension_numbers = #tpu.dot_dimension_numbers<[2], [2], [1], [1], [0, 0, 0, 1, 1, 1], [0], [0]>} : vector<2x8x16xf32>, vector<2x8x16xf32>, vector<2x8x8xf32> -> vector<2x8x8xf32>
    "tpu.trace_stop"() : () -> ()
    %915 = vector.shape_cast %7 : vector<8x8xf32> to vector<1x8x8xf32>
    %916 = vector.broadcast %915 : vector<1x8x8xf32> to vector<2x8x8xf32>
    %917 = arith.addf %914, %916 : vector<2x8x8xf32>
    %cst_343 = arith.constant dense<0xFF800000> : vector<2x8xf32>
    %918 = vector.multi_reduction <maximumf>, %917, %cst_343 [2] : vector<2x8x8xf32> to vector<2x8xf32>
    %919 = vector.shape_cast %918 : vector<2x8xf32> to vector<2x8x1xf32>
    %920 = vector.broadcast %919 : vector<2x8x1xf32> to vector<2x8x8xf32>
    %921 = arith.subf %917, %920 : vector<2x8x8xf32>
    %922 = math.exp %921 : vector<2x8x8xf32>
    %cst_344 = arith.constant dense<0.000000e+00> : vector<2x8xf32>
    %923 = vector.multi_reduction <add>, %922, %cst_344 [2] : vector<2x8x8xf32> to vector<2x8xf32>
    %924 = vector.shape_cast %923 : vector<2x8xf32> to vector<2x8x1xf32>
    %925 = tpu.reciprocal %924 {approx = true} : vector<2x8x1xf32> -> vector<2x8x1xf32>
    %926 = vector.broadcast %925 : vector<2x8x1xf32> to vector<2x8x8xf32>
    %927 = arith.mulf %922, %926 : vector<2x8x8xf32>
    %928 = vector.extract_strided_slice %785 {offsets = [0, 0, 112], sizes = [2, 8, 16], strides = [1, 1, 1]} : vector<2x8x128xf32> to vector<2x8x16xf32>
    "tpu.trace_start"() <{level = 10 : i32, message = "bqk,bkd->bqd"}> : () -> ()
    %cst_345 = arith.constant dense<0.000000e+00> : vector<2x8x16xf32>
    %929 = tpu.matmul %927, %928, %cst_345 {dimension_numbers = #tpu.dot_dimension_numbers<[2], [1], [1], [2], [0, 0, 0, 1, 1, 2], [0], [0]>} : vector<2x8x8xf32>, vector<2x8x16xf32>, vector<2x8x16xf32> -> vector<2x8x16xf32>
    "tpu.trace_stop"() : () -> ()
    %930 = tpu.concatenate %803, %821, %839, %857, %875, %893, %911, %929 in 2 : vector<2x8x16xf32>, vector<2x8x16xf32>, vector<2x8x16xf32>, vector<2x8x16xf32>, vector<2x8x16xf32>, vector<2x8x16xf32>, vector<2x8x16xf32>, vector<2x8x16xf32> -> vector<2x8x128xf32>
    %931 = vector.shape_cast %930 : vector<2x8x128xf32> to vector<16x128xf32>
    %932 = arith.truncf %931 : vector<16x128xf32> to vector<16x128xbf16>
    %c3_346 = arith.constant 3 : index
    %c0_347 = arith.constant 0 : index
    %c0_348 = arith.constant 0 : index
    %933 = vector.load %arg10[%c3_346, %c0_347, %c0_348] : memref<4x128x128xbf16, #tpu.memory_space<vmem>>, vector<1x128x128xbf16>
    %934 = vector.shape_cast %933 : vector<1x128x128xbf16> to vector<128x128xbf16>
    %cst_349 = arith.constant dense<0.000000e+00> : vector<16x128xf32>
    %935 = tpu.matmul %932, %934, %cst_349 {dimension_numbers = #tpu.dot_dimension_numbers<[1], [0], [0], [1], [0, 0, 1, 1], [], []>} : vector<16x128xbf16>, vector<128x128xbf16>, vector<16x128xf32> -> vector<16x128xf32>
    %c3_350 = arith.constant 3 : index
    %c0_351 = arith.constant 0 : index
    %c0_352 = arith.constant 0 : index
    %936 = vector.load %arg11[%c3_350, %c0_351, %c0_352] : memref<4x1x128xf32, #tpu.memory_space<vmem>>, vector<1x1x128xf32>
    %937 = vector.shape_cast %936 : vector<1x1x128xf32> to vector<1x128xf32>
    %938 = vector.broadcast %937 : vector<1x128xf32> to vector<16x128xf32>
    %939 = arith.addf %935, %938 : vector<16x128xf32>
    %940 = arith.addf %760, %939 : vector<16x128xf32>
    %cst_353 = arith.constant dense<0.000000e+00> : vector<16xf32>
    %941 = vector.multi_reduction <add>, %940, %cst_353 [1] : vector<16x128xf32> to vector<16xf32>
    %942 = vector.shape_cast %941 : vector<16xf32> to vector<16x1xf32>
    %cst_354 = arith.constant 1.280000e+02 : f32
    %943 = vector.broadcast %cst_354 : f32 to vector<16x1xf32>
    %944 = arith.divf %942, %943 : vector<16x1xf32>
    %945 = arith.mulf %940, %940 : vector<16x128xf32>
    %cst_355 = arith.constant dense<0.000000e+00> : vector<16xf32>
    %946 = vector.multi_reduction <add>, %945, %cst_355 [1] : vector<16x128xf32> to vector<16xf32>
    %947 = vector.shape_cast %946 : vector<16xf32> to vector<16x1xf32>
    %cst_356 = arith.constant 1.280000e+02 : f32
    %948 = vector.broadcast %cst_356 : f32 to vector<16x1xf32>
    %949 = arith.divf %947, %948 : vector<16x1xf32>
    %950 = arith.mulf %944, %944 : vector<16x1xf32>
    %951 = arith.subf %949, %950 : vector<16x1xf32>
    %952 = vector.broadcast %944 : vector<16x1xf32> to vector<16x128xf32>
    %953 = arith.subf %940, %952 : vector<16x128xf32>
    %cst_357 = arith.constant 9.99999974E-6 : f32
    %954 = vector.broadcast %cst_357 : f32 to vector<16x1xf32>
    %955 = arith.addf %951, %954 : vector<16x1xf32>
    %956 = math.rsqrt %955 : vector<16x1xf32>
    %957 = vector.broadcast %956 : vector<16x1xf32> to vector<16x128xf32>
    %958 = arith.mulf %953, %957 : vector<16x128xf32>
    %c3_358 = arith.constant 3 : index
    %c0_359 = arith.constant 0 : index
    %c0_360 = arith.constant 0 : index
    %959 = vector.load %arg12[%c3_358, %c0_359, %c0_360] : memref<4x1x128xf32, #tpu.memory_space<vmem>>, vector<1x1x128xf32>
    %960 = vector.shape_cast %959 : vector<1x1x128xf32> to vector<1x128xf32>
    %961 = vector.broadcast %960 : vector<1x128xf32> to vector<16x128xf32>
    %962 = arith.mulf %958, %961 : vector<16x128xf32>
    %c3_361 = arith.constant 3 : index
    %c0_362 = arith.constant 0 : index
    %c0_363 = arith.constant 0 : index
    %963 = vector.load %arg13[%c3_361, %c0_362, %c0_363] : memref<4x1x128xf32, #tpu.memory_space<vmem>>, vector<1x1x128xf32>
    %964 = vector.shape_cast %963 : vector<1x1x128xf32> to vector<1x128xf32>
    %965 = vector.broadcast %964 : vector<1x128xf32> to vector<16x128xf32>
    %966 = arith.addf %962, %965 : vector<16x128xf32>
    %967 = arith.truncf %966 : vector<16x128xf32> to vector<16x128xbf16>
    %c3_364 = arith.constant 3 : index
    %c0_365 = arith.constant 0 : index
    %c0_366 = arith.constant 0 : index
    %968 = vector.load %arg14[%c3_364, %c0_365, %c0_366] : memref<4x128x512xbf16, #tpu.memory_space<vmem>>, vector<1x128x512xbf16>
    %969 = vector.shape_cast %968 : vector<1x128x512xbf16> to vector<128x512xbf16>
    %cst_367 = arith.constant dense<0.000000e+00> : vector<16x512xf32>
    %970 = tpu.matmul %967, %969, %cst_367 {dimension_numbers = #tpu.dot_dimension_numbers<[1], [0], [0], [1], [0, 0, 1, 1], [], []>} : vector<16x128xbf16>, vector<128x512xbf16>, vector<16x512xf32> -> vector<16x512xf32>
    %c3_368 = arith.constant 3 : index
    %c0_369 = arith.constant 0 : index
    %c0_370 = arith.constant 0 : index
    %971 = vector.load %arg15[%c3_368, %c0_369, %c0_370] : memref<4x1x512xf32, #tpu.memory_space<vmem>>, vector<1x1x512xf32>
    %972 = vector.shape_cast %971 : vector<1x1x512xf32> to vector<1x512xf32>
    %973 = vector.broadcast %972 : vector<1x512xf32> to vector<16x512xf32>
    %974 = arith.addf %970, %973 : vector<16x512xf32>
    %cst_371 = arith.constant 0.000000e+00 : f32
    %975 = vector.broadcast %cst_371 : f32 to vector<16x512xf32>
    %976 = arith.maximumf %974, %975 : vector<16x512xf32>
    %977 = arith.truncf %976 : vector<16x512xf32> to vector<16x512xbf16>
    %c3_372 = arith.constant 3 : index
    %c0_373 = arith.constant 0 : index
    %c0_374 = arith.constant 0 : index
    %978 = vector.load %arg16[%c3_372, %c0_373, %c0_374] : memref<4x512x128xbf16, #tpu.memory_space<vmem>>, vector<1x512x128xbf16>
    %979 = vector.shape_cast %978 : vector<1x512x128xbf16> to vector<512x128xbf16>
    %cst_375 = arith.constant dense<0.000000e+00> : vector<16x128xf32>
    %980 = tpu.matmul %977, %979, %cst_375 {dimension_numbers = #tpu.dot_dimension_numbers<[1], [0], [0], [1], [0, 0, 1, 1], [], []>} : vector<16x512xbf16>, vector<512x128xbf16>, vector<16x128xf32> -> vector<16x128xf32>
    %c3_376 = arith.constant 3 : index
    %c0_377 = arith.constant 0 : index
    %c0_378 = arith.constant 0 : index
    %981 = vector.load %arg17[%c3_376, %c0_377, %c0_378] : memref<4x1x128xf32, #tpu.memory_space<vmem>>, vector<1x1x128xf32>
    %982 = vector.shape_cast %981 : vector<1x1x128xf32> to vector<1x128xf32>
    %983 = vector.broadcast %982 : vector<1x128xf32> to vector<16x128xf32>
    %984 = arith.addf %980, %983 : vector<16x128xf32>
    %985 = arith.addf %966, %984 : vector<16x128xf32>
    %cst_379 = arith.constant dense<0.000000e+00> : vector<16xf32>
    %986 = vector.multi_reduction <add>, %985, %cst_379 [1] : vector<16x128xf32> to vector<16xf32>
    %987 = vector.shape_cast %986 : vector<16xf32> to vector<16x1xf32>
    %cst_380 = arith.constant 1.280000e+02 : f32
    %988 = vector.broadcast %cst_380 : f32 to vector<16x1xf32>
    %989 = arith.divf %987, %988 : vector<16x1xf32>
    %990 = arith.mulf %985, %985 : vector<16x128xf32>
    %cst_381 = arith.constant dense<0.000000e+00> : vector<16xf32>
    %991 = vector.multi_reduction <add>, %990, %cst_381 [1] : vector<16x128xf32> to vector<16xf32>
    %992 = vector.shape_cast %991 : vector<16xf32> to vector<16x1xf32>
    %cst_382 = arith.constant 1.280000e+02 : f32
    %993 = vector.broadcast %cst_382 : f32 to vector<16x1xf32>
    %994 = arith.divf %992, %993 : vector<16x1xf32>
    %995 = arith.mulf %989, %989 : vector<16x1xf32>
    %996 = arith.subf %994, %995 : vector<16x1xf32>
    %997 = vector.broadcast %989 : vector<16x1xf32> to vector<16x128xf32>
    %998 = arith.subf %985, %997 : vector<16x128xf32>
    %cst_383 = arith.constant 9.99999974E-6 : f32
    %999 = vector.broadcast %cst_383 : f32 to vector<16x1xf32>
    %1000 = arith.addf %996, %999 : vector<16x1xf32>
    %1001 = math.rsqrt %1000 : vector<16x1xf32>
    %1002 = vector.broadcast %1001 : vector<16x1xf32> to vector<16x128xf32>
    %1003 = arith.mulf %998, %1002 : vector<16x128xf32>
    %c3_384 = arith.constant 3 : index
    %c0_385 = arith.constant 0 : index
    %c0_386 = arith.constant 0 : index
    %1004 = vector.load %arg18[%c3_384, %c0_385, %c0_386] : memref<4x1x128xf32, #tpu.memory_space<vmem>>, vector<1x1x128xf32>
    %1005 = vector.shape_cast %1004 : vector<1x1x128xf32> to vector<1x128xf32>
    %1006 = vector.broadcast %1005 : vector<1x128xf32> to vector<16x128xf32>
    %1007 = arith.mulf %1003, %1006 : vector<16x128xf32>
    %c3_387 = arith.constant 3 : index
    %c0_388 = arith.constant 0 : index
    %c0_389 = arith.constant 0 : index
    %1008 = vector.load %arg19[%c3_387, %c0_388, %c0_389] : memref<4x1x128xf32, #tpu.memory_space<vmem>>, vector<1x1x128xf32>
    %1009 = vector.shape_cast %1008 : vector<1x1x128xf32> to vector<1x128xf32>
    %1010 = vector.broadcast %1009 : vector<1x128xf32> to vector<16x128xf32>
    %1011 = arith.addf %1007, %1010 : vector<16x128xf32>
    %1012 = vector.shape_cast %1011 : vector<16x128xf32> to vector<2x8x128xf32>
    %1013 = vector.extract_strided_slice %1012 {offsets = [0, 7, 0], sizes = [2, 1, 128], strides = [1, 1, 1]} : vector<2x8x128xf32> to vector<2x1x128xf32>
    %1014 = vector.shape_cast %1013 : vector<2x1x128xf32> to vector<2x128xf32>
    %c0_390 = arith.constant 0 : index
    %c0_391 = arith.constant 0 : index
    %1015 = vector.load %arg20[%c0_390, %c0_391] : memref<128x128xf32, #tpu.memory_space<vmem>>, vector<128x128xf32>
    %cst_392 = arith.constant dense<0.000000e+00> : vector<2x128xf32>
    %1016 = tpu.matmul %1014, %1015, %cst_392 {dimension_numbers = #tpu.dot_dimension_numbers<[1], [0], [0], [1], [0, 0, 1, 1], [], []>} : vector<2x128xf32>, vector<128x128xf32>, vector<2x128xf32> -> vector<2x128xf32>
    %c0_393 = arith.constant 0 : index
    %c0_394 = arith.constant 0 : index
    %1017 = vector.load %arg21[%c0_393, %c0_394] : memref<1x128xf32, #tpu.memory_space<vmem>>, vector<1x128xf32>
    %1018 = vector.broadcast %1017 : vector<1x128xf32> to vector<2x128xf32>
    %1019 = arith.addf %1016, %1018 : vector<2x128xf32>
    %1020 = vector.shape_cast %1019 : vector<2x128xf32> to vector<1x2x128xf32>
    %c0_395 = arith.constant 0 : index
    %c0_396 = arith.constant 0 : index
    %c0_397 = arith.constant 0 : index
    %1021 = vector.load %arg22[%c0_395, %c0_396, %c0_397] : memref<1x2x128xf32, #tpu.memory_space<vmem>>, vector<1x2x128xf32>
    tpu.vector_store %arg22[%c0_395, %c0_396, %c0_397], %1020 {strides = array<i32>} : memref<1x2x128xf32, #tpu.memory_space<vmem>>, vector<1x2x128xf32>,
    return
  }
  func.func @transform_0(%arg0: i32) -> (i32, i32, i32) {
    %c0_i32 = arith.constant 0 : i32
    %c0_i32_0 = arith.constant 0 : i32
    %c0_i32_1 = arith.constant 0 : i32
    return %arg0, %c0_i32, %c0_i32_0 : i32, i32, i32
  }
  func.func @transform_1(%arg0: i32) -> (i32, i32) {
    %c0_i32 = arith.constant 0 : i32
    %c0_i32_0 = arith.constant 0 : i32
    %c0_i32_1 = arith.constant 0 : i32
    return %c0_i32, %c0_i32_0 : i32, i32
  }
  func.func @transform_2(%arg0: i32) -> (i32, i32) {
    %c0_i32 = arith.constant 0 : i32
    %c0_i32_0 = arith.constant 0 : i32
    %c0_i32_1 = arith.constant 0 : i32
    return %c0_i32, %c0_i32_0 : i32, i32
  }
  func.func @transform_3(%arg0: i32) -> (i32, i32, i32) {
    %c0_i32 = arith.constant 0 : i32
    %c0_i32_0 = arith.constant 0 : i32
    %c0_i32_1 = arith.constant 0 : i32
    %c0_i32_2 = arith.constant 0 : i32
    return %c0_i32, %c0_i32_0, %c0_i32_1 : i32, i32, i32
  }
  func.func @transform_4(%arg0: i32) -> (i32, i32, i32) {
    %c0_i32 = arith.constant 0 : i32
    %c0_i32_0 = arith.constant 0 : i32
    %c0_i32_1 = arith.constant 0 : i32
    %c0_i32_2 = arith.constant 0 : i32
    return %c0_i32, %c0_i32_0, %c0_i32_1 : i32, i32, i32
  }
  func.func @transform_5(%arg0: i32) -> (i32, i32, i32) {
    %c0_i32 = arith.constant 0 : i32
    %c0_i32_0 = arith.constant 0 : i32
    %c0_i32_1 = arith.constant 0 : i32
    %c0_i32_2 = arith.constant 0 : i32
    return %c0_i32, %c0_i32_0, %c0_i32_1 : i32, i32, i32
  }
  func.func @transform_6(%arg0: i32) -> (i32, i32, i32) {
    %c0_i32 = arith.constant 0 : i32
    %c0_i32_0 = arith.constant 0 : i32
    %c0_i32_1 = arith.constant 0 : i32
    %c0_i32_2 = arith.constant 0 : i32
    return %c0_i32, %c0_i32_0, %c0_i32_1 : i32, i32, i32
  }
  func.func @transform_7(%arg0: i32) -> (i32, i32, i32) {
    %c0_i32 = arith.constant 0 : i32
    %c0_i32_0 = arith.constant 0 : i32
    %c0_i32_1 = arith.constant 0 : i32
    %c0_i32_2 = arith.constant 0 : i32
    return %c0_i32, %c0_i32_0, %c0_i32_1 : i32, i32, i32
  }
  func.func @transform_8(%arg0: i32) -> (i32, i32, i32) {
    %c0_i32 = arith.constant 0 : i32
    %c0_i32_0 = arith.constant 0 : i32
    %c0_i32_1 = arith.constant 0 : i32
    %c0_i32_2 = arith.constant 0 : i32
    return %c0_i32, %c0_i32_0, %c0_i32_1 : i32, i32, i32
  }
  func.func @transform_9(%arg0: i32) -> (i32, i32, i32) {
    %c0_i32 = arith.constant 0 : i32
    %c0_i32_0 = arith.constant 0 : i32
    %c0_i32_1 = arith.constant 0 : i32
    %c0_i32_2 = arith.constant 0 : i32
    return %c0_i32, %c0_i32_0, %c0_i32_1 : i32, i32, i32
  }
  func.func @transform_10(%arg0: i32) -> (i32, i32, i32) {
    %c0_i32 = arith.constant 0 : i32
    %c0_i32_0 = arith.constant 0 : i32
    %c0_i32_1 = arith.constant 0 : i32
    %c0_i32_2 = arith.constant 0 : i32
    return %c0_i32, %c0_i32_0, %c0_i32_1 : i32, i32, i32
  }
  func.func @transform_11(%arg0: i32) -> (i32, i32, i32) {
    %c0_i32 = arith.constant 0 : i32
    %c0_i32_0 = arith.constant 0 : i32
    %c0_i32_1 = arith.constant 0 : i32
    %c0_i32_2 = arith.constant 0 : i32
    return %c0_i32, %c0_i32_0, %c0_i32_1 : i32, i32, i32
  }
  func.func @transform_12(%arg0: i32) -> (i32, i32, i32) {
    %c0_i32 = arith.constant 0 : i32
    %c0_i32_0 = arith.constant 0 : i32
    %c0_i32_1 = arith.constant 0 : i32
    %c0_i32_2 = arith.constant 0 : i32
    return %c0_i32, %c0_i32_0, %c0_i32_1 : i32, i32, i32
  }
  func.func @transform_13(%arg0: i32) -> (i32, i32, i32) {
    %c0_i32 = arith.constant 0 : i32
    %c0_i32_0 = arith.constant 0 : i32
    %c0_i32_1 = arith.constant 0 : i32
    %c0_i32_2 = arith.constant 0 : i32
    return %c0_i32, %c0_i32_0, %c0_i32_1 : i32, i32, i32
  }
  func.func @transform_14(%arg0: i32) -> (i32, i32, i32) {
    %c0_i32 = arith.constant 0 : i32
    %c0_i32_0 = arith.constant 0 : i32
    %c0_i32_1 = arith.constant 0 : i32
    %c0_i32_2 = arith.constant 0 : i32
    return %c0_i32, %c0_i32_0, %c0_i32_1 : i32, i32, i32
  }
  func.func @transform_15(%arg0: i32) -> (i32, i32, i32) {
    %c0_i32 = arith.constant 0 : i32
    %c0_i32_0 = arith.constant 0 : i32
    %c0_i32_1 = arith.constant 0 : i32
    %c0_i32_2 = arith.constant 0 : i32
    return %c0_i32, %c0_i32_0, %c0_i32_1 : i32, i32, i32
  }
  func.func @transform_16(%arg0: i32) -> (i32, i32, i32) {
    %c0_i32 = arith.constant 0 : i32
    %c0_i32_0 = arith.constant 0 : i32
    %c0_i32_1 = arith.constant 0 : i32
    %c0_i32_2 = arith.constant 0 : i32
    return %c0_i32, %c0_i32_0, %c0_i32_1 : i32, i32, i32
  }
  func.func @transform_17(%arg0: i32) -> (i32, i32, i32) {
    %c0_i32 = arith.constant 0 : i32
    %c0_i32_0 = arith.constant 0 : i32
    %c0_i32_1 = arith.constant 0 : i32
    %c0_i32_2 = arith.constant 0 : i32
    return %c0_i32, %c0_i32_0, %c0_i32_1 : i32, i32, i32
  }
  func.func @transform_18(%arg0: i32) -> (i32, i32, i32) {
    %c0_i32 = arith.constant 0 : i32
    %c0_i32_0 = arith.constant 0 : i32
    %c0_i32_1 = arith.constant 0 : i32
    %c0_i32_2 = arith.constant 0 : i32
    return %c0_i32, %c0_i32_0, %c0_i32_1 : i32, i32, i32
  }
  func.func @transform_19(%arg0: i32) -> (i32, i32) {
    %c0_i32 = arith.constant 0 : i32
    %c0_i32_0 = arith.constant 0 : i32
    %c0_i32_1 = arith.constant 0 : i32
    return %c0_i32, %c0_i32_0 : i32, i32
  }
  func.func @transform_20(%arg0: i32) -> (i32, i32) {
    %c0_i32 = arith.constant 0 : i32
    %c0_i32_0 = arith.constant 0 : i32
    %c0_i32_1 = arith.constant 0 : i32
    return %c0_i32, %c0_i32_0 : i32, i32
  }
  func.func @transform_21(%arg0: i32) -> (i32, i32, i32) {
    %c0_i32 = arith.constant 0 : i32
    %c0_i32_0 = arith.constant 0 : i32
    %c0_i32_1 = arith.constant 0 : i32
    return %arg0, %c0_i32, %c0_i32_0 : i32, i32, i32
  }
}

</mosaic_0001>

<bundles_post_ra>
// kernel: transformer_forward.1
= control target key start
LH: loop header
LB: loop body
LE: loop exit
PB: predicated region body
PF: predicated region fallthrough
CT: control target
= control target key end

     0   :  { %s14480_s0 = inlined_call_operand.vmem [shape: f32[4,8,1], index: 0, kind: input, shape index: {}]   ;;  %s14481_s1 = inlined_call_operand.vmem [shape: f32[8,128], index: 1, kind: input, shape index: {}]   ;;  %s14482_s2 = inlined_call_operand.vmem [shape: f32[8,8], index: 2, kind: input, shape index: {}]   ;;  %s14483_s3 = inlined_call_operand.vmem [shape: bf16[4,128,128], index: 3, kind: input, shape index: {}]   ;;  %s14484_s4 = inlined_call_operand.vmem [shape: f32[4,1,128], index: 4, kind: input, shape index: {}]   ;;  %s14485_s5 = inlined_call_operand.hbm [shape: bf16[4,128,128], index: 5, kind: input, shape index: {}]   ;;  %s14486_s6 = inlined_call_operand.vmem [shape: f32[4,1,128], index: 6, kind: input, shape index: {}]   ;;  %s14487_s7 = inlined_call_operand.hbm [shape: bf16[4,128,128], index: 7, kind: input, shape index: {}]   ;;  %s14488_s8 = inlined_call_operand.vmem [shape: f32[4,1,128], index: 8, kind: input, shape index: {}]   ;;  %s14489_s9 = inlined_call_operand.hbm [shape: bf16[4,128,128], index: 9, kind: input, shape index: {}]   ;;  %s14490_s10 = inlined_call_operand.vmem [shape: f32[4,1,128], index: 10, kind: input, shape index: {}]   ;;  %s14491_s11 = inlined_call_operand.vmem [shape: f32[4,1,128], index: 11, kind: input, shape index: {}]   ;;  %s14492_s12 = inlined_call_operand.vmem [shape: f32[4,1,128], index: 12, kind: input, shape index: {}]   ;;  %s14493_s13 = inlined_call_operand.hbm [shape: bf16[4,128,512], index: 13, kind: input, shape index: {}]   ;;  %s14494_s14 = inlined_call_operand.vmem [shape: f32[4,1,512], index: 14, kind: input, shape index: {}]   ;;  %s14495_s15 = inlined_call_operand.hbm [shape: bf16[4,512,128], index: 15, kind: input, shape index: {}]   ;;  %s14496_s16 = inlined_call_operand.vmem [shape: f32[4,1,128], index: 16, kind: input, shape index: {}]   ;;  %s14497_s17 = inlined_call_operand.vmem [shape: f32[4,1,128], index: 17, kind: input, shape index: {}]   ;;  %s14498_s18 = inlined_call_operand.vmem [shape: f32[4,1,128], index: 18, kind: input, shape index: {}]   ;;  %s14499_s19 = inlined_call_operand.vmem [shape: f32[128,128], index: 19, kind: input, shape index: {}]   ;;  %s14500_s20 = inlined_call_operand.vmem [shape: f32[1,128], index: 20, kind: input, shape index: {}]   ;;  %s14501_s21 = inlined_call_operand.vmem [shape: f32[2,2,128], index: 21, kind: output, shape index: {}]  }
   0x1   :  { %14507 = sst [smem:[#allocation14_spill]] %s14480_s0 }
   0x2   :  { %14508 = sst [smem:[#allocation15_spill]] %s14481_s1 }
   0x3   :  { %14509 = sst [smem:[#allocation16_spill]] %s14482_s2 }
   0x4   :  { %14510 = sst [smem:[#allocation17_spill]] %s14483_s3 }
   0x5   :  { %14511 = sst [smem:[#allocation18_spill]] %s14484_s4 }
   0x6   :  { %14512 = sst [smem:[#allocation19_spill]] %s14485_s5 }
   0x7   :  { %14513 = sst [smem:[#allocation20_spill]] %s14487_s7 }
   0x8   :  { %14514 = sst [smem:[#allocation21_spill]] %s14493_s13 }
   0x9   :  { %14515 = sst [smem:[#allocation22_spill]] %s14499_s19 }
   0xa   :  { %14516 = sst [smem:[#allocation23_spill]] %s14500_s20 }
   0xb   :  { %14517 = sst [smem:[#allocation24_spill]] %s14501_s21 }
   0xc   :  { %26 = vsyncpa [#allocation3], 0 }
   0xd   :  { %27 = vsyncpa [#allocation5], 0 }
   0xe   :  { %28 = vsyncpa [#allocation8], 0  ;;  %s12696_s2 = smov 0  }
   0xf LB: > { %14518 = sst [smem:[#allocation13_spill]] %s12566_s2  ;;  %s12702_s25 = sadd.s32 4294967295, %s12566_s2   ;;  %s12566_s2 = sphi %s12696_s2, %s34_s2  }
  0x10   : > { %p9512_p0 = scmp.ge.s32.totalorder %s12566_s2, 1  ;;  %p511_p1 = scmp.lt.s32.totalorder %s12566_s2, 3 }
  0x11   : > { %p11756_p2 = scmp.eq.s32.totalorder %s12702_s25, 0  ;;  %s14519_s7 = sld [smem:[#allocation20_spill]] }
  0x12   : > { %p12710_p3 = pnand %p9512_p0, %p511_p1  ;;  %s14521_s13 = sld [smem:[#allocation21_spill]] }
  0x13   : > { %s12568_s30 = smov [#allocation4]   ;;  %s12569_s23 = smov [#allocation7]  }
  0x14   : > { %p11740_p4 = pneg %p12710_p3  ;;  %s553_s5 = sshll.u32 %s12568_s30, 4  ;;  %s554_s5 = int_to_ptr.vmem [resolvable:$true] %s553_s5 }
  0x15   : > { %s593_s1 = sshll.u32 %s12569_s23, 4  ;;  %s12570_s24 = smov 64   ;;  %s594_s1 = int_to_ptr.vmem [resolvable:$true] %s593_s1 }
  0x16   : > { %p12721_p5 = pnand %p11756_p2, %p11740_p4  ;;  %s12571_s26 = smov 4  }
  0x17   : > { %s551_s3 = sshll.u32 %s14519_s7, 4  ;;  %s14523_s0 = sld [smem:[#allocation19_spill]]  ;;  %s552_s3 = int_to_ptr.hbm [resolvable:$true] %s551_s3 }
  0x18   : > { %s591_s4 = sshll.u32 %s14521_s13, 4  ;;  %s12572_s7 = smov 256   ;;  %s592_s4 = int_to_ptr.hbm [resolvable:$true] %s591_s4 }
  0x19   : > { %11746 = dma.hbm_to_vmem [thread:$0]  (!%p12721_p5), %s552_s3, 4096, %s554_s5, [#allocation5], %s12570_s24, %s12570_s24, %s12571_s26  }
  0x1a   : > { %s12573_s13 = smov 16   ;;  %s12574_s2 = smov [#allocation2]  }
  0x1b   : > { %11752 = dma.hbm_to_vmem [thread:$0]  (!%p12721_p5), %s592_s4, 16384, %s594_s1, [#allocation8], %s12572_s7, %s12572_s7, %s12573_s13  }
  0x1c   : > { %s536_s21 = sshll.u32 %s12574_s2, 4  ;;  %s568_s19 = sshll.u32 %s14489_s9, 4  ;;  %s537_s21 = int_to_ptr.vmem [resolvable:$true] %s536_s21  ;;  %s569_s19 = int_to_ptr.hbm [resolvable:$true] %s568_s19 }
  0x1d   : > { %s534_s30 = sshll.u32 %s14523_s0, 4  ;;  %s608_s27 = sshll.u32 %s14495_s15, 4  ;;  %s535_s30 = int_to_ptr.hbm [resolvable:$true] %s534_s30  ;;  %s609_s27 = int_to_ptr.hbm [resolvable:$true] %s608_s27 }
  0x1e   : > { %11743 = dma.hbm_to_vmem [thread:$0]  (!%p12721_p5), %s535_s30, 4096, %s537_s21, [#allocation3], %s12570_s24, %s12570_s24, %s12571_s26  }
  0x1f   : > { %s12575_s29 = smov [#allocation6]   ;;  %s12576_s7 = smov [#allocation9]  }
  0x20   : > { %s570_s0 = sshll.u32 %s12575_s29, 4  ;;  %s610_s13 = sshll.u32 %s12576_s7, 4  ;;  %s571_s0 = int_to_ptr.vmem [resolvable:$true] %s570_s0  ;;  %s611_s13 = int_to_ptr.vmem [resolvable:$true] %s610_s13 }
  0x21   : > { %11749 = dma.hbm_to_vmem [thread:$0]  (!%p12721_p5), %s569_s19, 4096, %s571_s0, [#allocation5], %s12570_s24, %s12570_s24, %s12571_s26  }
  0x22   : > { %11755 = dma.hbm_to_vmem [thread:$0]  (!%p12721_p5), %s609_s27, 16384, %s611_s13, [#allocation8], %s12570_s24, %s12570_s24, %s12571_s26  }
  0x23   : > { %650 = sbr.rel (%p12710_p3) target bundleno = 7961 (0x1f19), region = 104 }
  0x28   : > { %12553 = dma.done.wait (%p11756_p2), [#allocation3], 4096  }
  0x29   : > { %12555 = vsyncadd (%p11756_p2), [#allocation3], 4294963200 }
  0x2a   : > { %12557 = dma.done.wait (%p11756_p2), [#allocation5], 8192  }
  0x2b   : > { %12559 = vsyncadd (%p11756_p2), [#allocation5], 4294959104 }
  0x2c   : > { %12561 = dma.done.wait (%p11756_p2), [#allocation8], 32768  }
  0x2d   : > { %12563 = vsyncadd (%p11756_p2), [#allocation8], 4294934528  ;;  %s9525_s19 = sshll.u32 %s12702_s25, 1  ;;  %v12577_v0 = vmov 0   ;;  %s14524_s28 = sld [smem:[#allocation14_spill]]  ;;  %v11351_v3 = vld [vmem:[#allocation2 + $0x38] sm:$0xff] }
  0x2e   : > { %11792 = vset.pattern.permute.xlu0 %v12577_v0  ;;  %p731_p6 = scmp.lt.s32.totalorder %s9525_s19, 3  ;;  %s14525_s24 = sld [smem:[#allocation17_spill]]  ;;  %v11359_v4 = vld [vmem:[#allocation4 + $0x38] sm:$0xff]  ;;  %907 = vmatpush.bf16.msra.mxu1 %v11351_v3  ;;  %v11350_v6 = vld [vmem:[#allocation2 + $0x30] sm:$0xff]  ;;  %v11349_v10 = vld [vmem:[#allocation2 + $0x28] sm:$0xff]  ;;  %vm1003_vm0 = vcmask 130048  }
  0x2f   : > { %989 = vmatpush.bf16.msra.mxu2 %v11359_v4  ;;  %v11358_v7 = vld [vmem:[#allocation4 + $0x30] sm:$0xff]  ;;  %v11357_v11 = vld [vmem:[#allocation4 + $0x28] sm:$0xff]  ;;  %v11348_v13 = vld [vmem:[#allocation2 + $0x20] sm:$0xff]  ;;  %s14526_s22 = sld [smem:[#allocation15_spill]]  ;;  %s12578_s5 = smov 112   ;;  %vm1056_vm1 = vcmask 64512  }
  0x30   : > { %s14534_s19 = smov (!%p731_p6, %s9525_s19), 3  ;;  %v11356_v14 = vld [vmem:[#allocation4 + $0x20] sm:$0xff]  ;;  %v11347_v16 = vld [vmem:[#allocation2 + $0x18] sm:$0xff]  ;;  %v11346_v19 = vld [vmem:[#allocation2 + $0x10] sm:$0xff]  ;;  %s14527_s3 = sld [smem:[#allocation18_spill]]  ;;  %vm2095_vm2 = vcmask 261120  }
  0x31   : > { %s9526_s20 = sshll.u32 %s14534_s19, 3  ;;  %v11355_v17 = vld [vmem:[#allocation4 + $0x18] sm:$0xff]  ;;  %v11354_v20 = vld [vmem:[#allocation4 + $0x10] sm:$0xff]  ;;  %v11345_v22 = vld [vmem:[#allocation2 + $0x8] sm:$0xff]  ;;  %s12579_s0 = smov 96   ;;  %vm2098_vm3 = vcmask 392192  }
  0x32   : > { %908 = vmatpush.bf16.msra.mxu1 %v11350_v6  ;;  %v11353_v23 = vld [vmem:[#allocation4 + $0x8] sm:$0xff]  ;;  %v11344_v25 = vld [vmem:[#allocation2] sm:$0xff]  ;;  %s12580_s7 = smov 64   ;;  %s12581_s13 = smov 48   ;;  %vm2101_vm4 = vcmask 523264   ;;  %vm2104_vm5 = vcmask 654336  }
  0x33   : > { %s734_s4 = scalar_lea.vmem %s14524_s28, %s9526_s20  ;;  %990 = vmatpush.bf16.msra.mxu2 %v11358_v7  ;;  %v11352_v26 = vld [vmem:[#allocation4] sm:$0xff]  ;;  %s14528_s21 = sld [smem:[#allocation16_spill]]  ;;  %vm2107_vm6 = vcmask 785408   ;;  %vm2110_vm7 = vcmask 916480  }
  0x34   : > { %v740_v1 = vld [vmem:[%s734_s4] sm:$0xff]  ;;  %v11343_v2 = vld [vmem:[%s14525_s24 + $0x38] sm:$0xff]  ;;  %v11342_v5 = vld [vmem:[%s14525_s24 + $0x30] sm:$0xff]  ;;  %s12582_s2 = smov 80   ;;  %s12583_s28 = smov 32  }
  0x35   : > { %745 = vperm.xlu0 %11792, %v740_v1   ;;  %825 = vmatpush.bf16.msra.mxu0 %v11343_v2  ;;  %v741_v8 = vld [vmem:[%s734_s4 + $0x8] sm:$0xff]  ;;  %v11340_v12 = vld [vmem:[%s14525_s24 + $0x20] sm:$0xff]  ;;  %v11339_v15 = vld [vmem:[%s14525_s24 + $0x18] sm:$0xff]  ;;  %s12584_s4 = smov 16   ;;  %s14529_s26 = sld [smem:[#allocation22_spill]] }
  0x36   : > { %v11341_v9 = vld [vmem:[%s14525_s24 + $0x28] sm:$0xff]  ;;  %909 = vmatpush.bf16.msra.mxu1 %v11349_v10  ;;  %v11338_v18 = vld [vmem:[%s14525_s24 + $0x10] sm:$0xff]  ;;  %v11336_v24 = vld [vmem:[%s14525_s24] sm:$0xff]  ;;  %p736_p7 = scmp.lt.s32.totalorder %s12702_s25, 1  ;;  %s14531_s29 = sld [smem:[#allocation24_spill]] }
  0x37   : > { %991 = vmatpush.bf16.msra.mxu2 %v11357_v11  ;;  %v11337_v21 = vld [vmem:[%s14525_s24 + $0x8] sm:$0xff]  ;;  %v742_v28 = vld [vmem:[%s14526_s22] sm:$0xff] }
  0x38   : > { %v12069_v33 = vld [vmem:[%s14486_s6] ss:$0 sm:$0xff]  ;;  %s14536_s25 = smov (!%p736_p7, %s12702_s25), 1 }
  0x39   : > { %826 = vmatpush.bf16.msra.mxu0 %v11342_v5  ;;  %v12068_v34 = vld [vmem:[%s14527_s3] ss:$0 sm:$0xff] }
  0x3a   : > { %910 = vmatpush.bf16.msra.mxu1 %v11348_v13  ;;  %v12070_v39 = vld [vmem:[%s14488_s8] ss:$0 sm:$0xff] }
  0x3b   : > { %992 = vmatpush.bf16.msra.mxu2 %v11356_v14  ;;  %v12837_v48 = vld [vmem:[%s14528_s21] sm:$0xff] }
  0x3d   : > { %750 = vperm.xlu0 %11792, %v741_v8   ;;  %827 = vmatpush.bf16.msra.mxu0 %v11341_v9 }
  0x3e   : > { %911 = vmatpush.bf16.msra.mxu1 %v11347_v16 }
  0x3f   : > { %993 = vmatpush.bf16.msra.mxu2 %v11355_v17 }
  0x41   : > { %828 = vmatpush.bf16.msra.mxu0 %v11340_v12 }
  0x42   : > { %912 = vmatpush.bf16.msra.mxu1 %v11346_v19 }
  0x43   : > { %994 = vmatpush.bf16.msra.mxu2 %v11354_v20 }
  0x45   : > { %829 = vmatpush.bf16.msra.mxu0 %v11339_v15 }
  0x46   : > { %913 = vmatpush.bf16.msra.mxu1 %v11345_v22 }
  0x47   : > { %995 = vmatpush.bf16.msra.mxu2 %v11353_v23 }
  0x49   : > { %830 = vmatpush.bf16.msra.mxu0 %v11338_v18 }
  0x4a   : > { %914 = vmatpush.bf16.msra.mxu1 %v11344_v25 }
  0x4b   : > { %996 = vmatpush.bf16.msra.mxu2 %v11352_v26 }
  0x4d   : > { %831 = vmatpush.bf16.msra.mxu0 %v11337_v21 }
  0x51   : > { %832 = vmatpush.bf16.msra.mxu0 %v11336_v24 }
  0xa7   : > { %v746_v27 = vpop.permute.xlu0 %745 }
  0xa8   : > { %v12789_v30 = vadd.f32 %v746_v27, %v742_v28 }
  0xaf   : > { %v751_v29 = vpop.permute.xlu0 %750 }
  0xb0   : > { %v12791_v31 = vadd.f32 %v751_v29, %v742_v28 }
  0xb2   : > { %v756_v32 = vpack.c.bf16 %v12791_v31, %v12789_v30 }
  0xb4   : > { %833 = vmatmul.bf16.vlgmr.msra.gmra.mxu0 %v756_v32  ;;  %915 = vmatmul.bf16.vlgmr.msra.gmra.mxu1 %v756_v32 }
  0xb5   : > { %997 = vmatmul.bf16.vlgmr.msra.gmra.mxu2 %v756_v32 }
 0x131   : > { %v834_v35 = vpop.f32.mrf.mxu0  ;;  %v916_v36 = vpop.f32.mrf.mxu1 }
 0x132   : > { %v12801_v37 = vadd.f32 %v12069_v33, %v916_v36  ;;  %v12807_v38 = vadd.f32 %v12068_v34, %v834_v35 }
 0x134   : > { %1127 = vrot.lane.b32.xlu0 %v12801_v37, %s12578_s5  ;;  %9624 = vmatpush.xpose.msk.msrb.mxu1 %vm1003_vm0, %v12801_v37 }
 0x137   : > { %9625 = vmatmul.msk.f32.vlgmr.msrb.gmra.mxu1 %vm1003_vm0, %v12807_v38 }
 0x138   : > { %v998_v40 = vpop.f32.mrf.mxu2 }
 0x139   : > { %v918_v41 = vpop.f32.mrf.mxu1  ;;  %v836_v42 = vpop.f32.mrf.mxu0  ;;  %v12816_v44 = vadd.f32 %v12070_v39, %v998_v40 }
 0x13a   : > { %v12814_v43 = vadd.f32 %v12069_v33, %v918_v41  ;;  %v12822_v45 = vadd.f32 %v12068_v34, %v836_v42 }
 0x13c   : > { %9626 = vmatpush.xpose.msk.msra.mxu3 %vm1003_vm0, %v12814_v43  ;;  %1257 = vrot.lane.b32.xlu0 %v12807_v38, %s12579_s0 }
 0x13f   : > { %9627 = vmatmul.msk.f32.vlgmr.msra.gmra.mxu3 %vm1003_vm0, %v12822_v45 }
 0x140   : > { %1097 = vmatpush.msrb.mxu3 %v12816_v44  ;;  %v1000_v46 = vpop.f32.mrf.mxu2 }
 0x141   : > { %v12827_v47 = vadd.f32 %v12070_v39, %v1000_v46 }
 0x143   : > { %1120 = vmatpush.msra.mxu3 %v12827_v47 }
 0x144   : > { %1517 = vrot.lane.b32.xlu0 %v12807_v38, %s12580_s7 }
 0x14c   : > { %1677 = vrot.lane.b32.xlu0 %v12814_v43, %s12581_s13 }
 0x1a6   : > { %v1128_v5 = vpop.permute.xlu0 %1127 }
 0x1ae   : > { %v1258_v23 = vpop.permute.xlu0 %1257 }
 0x1b4   : > { %v1027_v49 = vpop.f32.mrf.mxu1 }
 0x1b5   : > { %v1028_v50 = vadd.f32 %v1027_v49, %v12837_v48 }
 0x1b6   : > { %v1518_v28 = vpop.permute.xlu0 %1517 }
 0x1b7   : > { %v1057_v51 = vsel %vm1056_vm1, %v1028_v50, -inf }
 0x1b8   : > { %1058 = vmax.xlane.f32.xlu1 %v1057_v51 }
 0x1be   : > { %v1678_v36 = vpop.permute.xlu0 %1677 }
 0x1c2   : > { %v1053_v52 = vpop.f32.mrf.mxu3 }
 0x1c3   : > { %v1054_v53 = vadd.f32 %v1053_v52, %v12837_v48 }
 0x1c5   : > { %v1060_v54 = vsel %vm1056_vm1, %v1054_v53, -inf }
 0x1c6   : > { %1061 = vmax.xlane.f32.xlu1 %v1060_v54 }
 0x1df   : > { %1125 = vrot.lane.b32.xlu1 %v12807_v38, %s12578_s5 }
 0x1e7   : > { %1153 = vrot.lane.b32.xlu1 %v12822_v45, %s12578_s5 }
 0x1ef   : > { %1287 = vrot.lane.b32.xlu1 %v12814_v43, %s12579_s0 }
 0x1f7   : > { %1259 = vrot.lane.b32.xlu1 %v12801_v37, %s12579_s0 }
 0x1ff   : > { %1417 = vrot.lane.b32.xlu1 %v12814_v43, %s12582_s2 }
 0x207   : > { %1415 = vrot.lane.b32.xlu1 %v12822_v45, %s12582_s2 }
 0x20f   : > { %1547 = vrot.lane.b32.xlu1 %v12814_v43, %s12580_s7 }
 0x217   : > { %1649 = vrot.lane.b32.xlu1 %v12801_v37, %s12581_s13 }
 0x21f   : > { %1675 = vrot.lane.b32.xlu1 %v12822_v45, %s12581_s13 }
 0x227   : > { %1777 = vrot.lane.b32.xlu1 %v12807_v38, %s12583_s28 }
 0x22b   : > { %v1059_v55 = vpop.xlane.xlu1 %1058 }
 0x22c   : > { %v1063_v56 = vsub.f32 %v1028_v50, %v1059_v55 }
 0x22e   : > { %v1065_v57 = vmul.f32 1.442695, %v1063_v56 }
 0x22f   : > { %1937 = vrot.lane.b32.xlu1 %v12814_v43, %s12584_s4 }
 0x230   : > { %12105 = vpow2.f32 %v1065_v57 }
 0x236   : > { %v12106_v58 = vpop.eup %12105 }
 0x237   : > { %v1069_v59 = vsel %vm1056_vm1, %v12106_v58, 0.0 }
 0x238   : > { %1070 = vadd.xlane.f32.xlu2 %v1069_v59 }
 0x239   : > { %v1062_v60 = vpop.xlane.xlu1 %1061 }
 0x23a   : > { %v1064_v61 = vsub.f32 %v1054_v53, %v1062_v60 }
 0x23c   : > { %v1067_v62 = vmul.f32 1.442695, %v1064_v61 }
 0x23e   : > { %12107 = vpow2.f32 %v1067_v62 }
 0x244   : > { %v12108_v63 = vpop.eup %12107 }
 0x245   : > { %v1072_v0 = vsel %vm1056_vm1, %v12108_v63, 0.0 }
 0x246   : > { %1073 = vadd.xlane.f32.xlu2 %v1072_v0 }
 0x251   : > { %v1126_v1 = vpop.permute.xlu1 %1125 }
 0x259   : > { %v1154_v6 = vpop.permute.xlu1 %1153 }
 0x25e   : > { %1155 = vrot.lane.b32.xlu2 %v12814_v43, %s12578_s5 }
 0x261   : > { %v1288_v8 = vpop.permute.xlu1 %1287 }
 0x266   : > { %1204 = vrot.lane.b32.xlu2 %v12816_v44, %s12578_s5 }
 0x269   : > { %v1260_v12 = vpop.permute.xlu1 %1259 }
 0x271   : > { %v1418_v14 = vpop.permute.xlu1 %1417 }
 0x279   : > { %v1416_v24 = vpop.permute.xlu1 %1415 }
 0x281   : > { %v1548_v32 = vpop.permute.xlu1 %1547 }
 0x289   : > { %v1650_v40 = vpop.permute.xlu1 %1649 }
 0x291   : > { %v1676_v42 = vpop.permute.xlu1 %1675 }
 0x299   : > { %v1778_v46 = vpop.permute.xlu1 %1777 }
 0x2a1   : > { %v1938_v50 = vpop.permute.xlu1 %1937 }
 0x2ab   : > { %v1071_v2 = vpop.xlane.xlu2 %1070 }
 0x2ac   : > { %12109 = vrcp.f32 %v1071_v2 }
 0x2b2   : > { %v12110_v3 = vpop.eup %12109 }
 0x2b3   : > { %v1077_v4 = vmul.f32 %v12110_v3, %v12106_v58 }
 0x2b5   : > { %9628 = vmatmul.msk.f32.vlgmr.msrb.gmra.mxu3 %vm1056_vm1, %v1077_v4 }
 0x2b6   : > { %9630 = vmatpush.xpose.msk.msrb.mxu3 %vm1003_vm0, %v1128_v5 }
 0x2b9   : > { %v1074_v7 = vpop.xlane.xlu2 %1073 }
 0x2ba   : > { %12111 = vrcp.f32 %v1074_v7 }
 0x2c0   : > { %v12112_v9 = vpop.eup %12111 }
 0x2c1   : > { %v1078_v10 = vmul.f32 %v12112_v9, %v12108_v63  ;;  %v1156_v11 = vpop.permute.xlu2 %1155 }
 0x2c3   : > { %9629 = vmatmul.msk.f32.vlgmr.msra.gmra.mxu3 %vm1056_vm1, %v1078_v10 }
 0x2c4   : > { %9632 = vmatpush.xpose.msk.msra.mxu3 %vm1003_vm0, %v1156_v11 }
 0x2c9   : > { %v1205_v13 = vpop.permute.xlu2 %1204 }
 0x2ca   : > { %1225 = vmatpush.msrb.mxu0 %v1205_v13 }
 0x2cb   : > { %9631 = vmatmul.msk.f32.vlgmr.msrb.gmra.mxu3 %vm1003_vm0, %v1126_v1 }
 0x2cc   : > { %9636 = vmatpush.xpose.msk.msra.mxu0 %vm1003_vm0, %v1260_v12  ;;  %9638 = vmatpush.xpose.msk.msrb.mxu3 %vm1003_vm0, %v1288_v8 }
 0x2d3   : > { %9633 = vmatmul.msk.f32.vlgmr.msra.gmra.mxu3 %vm1003_vm0, %v1154_v6 }
 0x2d4   : > { %9644 = vmatpush.xpose.msk.msra.mxu3 %vm1003_vm0, %v1418_v14 }
 0x338   : > { %v12880_v15 = vpop.f32.mrf.mxu3 }
 0x346   : > { %v12882_v16 = vpop.f32.mrf.mxu3 }
 0x34e   : > { %v1150_v17 = vpop.f32.mrf.mxu3 }
 0x34f   : > { %v1151_v18 = vadd.f32 %v1150_v17, %v12837_v48 }
 0x351   : > { %v1181_v19 = vsel %vm1056_vm1, %v1151_v18, -inf }
 0x352   : > { %1182 = vmax.xlane.f32.xlu2 %v1181_v19 }
 0x356   : > { %v1178_v20 = vpop.f32.mrf.mxu3 }
 0x357   : > { %v12887_v21 = vadd.f32 %v1178_v20, %v12837_v48 }
 0x359   : > { %v1184_v22 = vsel %vm1056_vm1, %v12887_v21, -inf }
 0x35a   : > { %1185 = vmax.xlane.f32.xlu1 %v1184_v22 }
 0x36a   : > { %1285 = vrot.lane.b32.xlu2 %v12822_v45, %s12579_s0 }
 0x372   : > { %1389 = vrot.lane.b32.xlu2 %v12801_v37, %s12582_s2 }
 0x37a   : > { %1387 = vrot.lane.b32.xlu2 %v12807_v38, %s12582_s2 }
 0x382   : > { %1519 = vrot.lane.b32.xlu2 %v12801_v37, %s12580_s7 }
 0x38a   : > { %1545 = vrot.lane.b32.xlu2 %v12822_v45, %s12580_s7 }
 0x392   : > { %1647 = vrot.lane.b32.xlu2 %v12807_v38, %s12581_s13 }
 0x39a   : > { %1807 = vrot.lane.b32.xlu2 %v12814_v43, %s12583_s28 }
 0x3a2   : > { %1909 = vrot.lane.b32.xlu2 %v12801_v37, %s12584_s4 }
 0x3aa   : > { %1935 = vrot.lane.b32.xlu2 %v12822_v45, %s12584_s4 }
 0x3c5   : > { %v1183_v25 = vpop.xlane.xlu2 %1182 }
 0x3c6   : > { %v1187_v26 = vsub.f32 %v1151_v18, %v1183_v25 }
 0x3c8   : > { %v1189_v27 = vmul.f32 1.442695, %v1187_v26 }
 0x3ca   : > { %12113 = vpow2.f32 %v1189_v27 }
 0x3cd   : > { %v1286_v29 = vpop.permute.xlu2 %1285  ;;  %v1186_v14 = vpop.xlane.xlu1 %1185 }
 0x3ce   : > { %9639 = vmatmul.msk.f32.vlgmr.msrb.gmra.mxu3 %vm1003_vm0, %v1286_v29 }
 0x3cf   : > { %9650 = vmatpush.xpose.msk.msrb.mxu3 %vm1003_vm0, %v1548_v32 }
 0x3d0   : > { %v12114_v33 = vpop.eup %12113 }
 0x3d1   : > { %v1193_v34 = vsel %vm1056_vm1, %v12114_v33, 0.0 }
 0x3d2   : > { %1194 = vadd.xlane.f32.xlu0 %v1193_v34 }
 0x3d5   : > { %v1390_v35 = vpop.permute.xlu2 %1389 }
 0x3d6   : > { %9642 = vmatpush.xpose.msk.msrb.mxu2 %vm1003_vm0, %v1390_v35  ;;  %9645 = vmatmul.msk.f32.vlgmr.msra.gmra.mxu3 %vm1003_vm0, %v1416_v24 }
 0x3d7   : > { %9656 = vmatpush.xpose.msk.msra.mxu3 %vm1003_vm0, %v1678_v36 }
 0x3dd   : > { %v1388_v39 = vpop.permute.xlu2 %1387 }
 0x3de   : > { %9643 = vmatmul.msk.f32.vlgmr.msrb.gmra.mxu2 %vm1003_vm0, %v1388_v39 }
 0x3e5   : > { %v1520_v41 = vpop.permute.xlu2 %1519 }
 0x3e6   : > { %1779 = vrot.lane.b32.xlu0 %v12801_v37, %s12583_s28  ;;  %9648 = vmatpush.xpose.msk.msra.mxu2 %vm1003_vm0, %v1520_v41 }
 0x3e9   : > { %9649 = vmatmul.msk.f32.vlgmr.msra.gmra.mxu2 %vm1003_vm0, %v1518_v28 }
 0x3ea   : > { %9654 = vmatpush.xpose.msk.msrb.mxu2 %vm1003_vm0, %v1650_v40 }
 0x3ed   : > { %v1546_v43 = vpop.permute.xlu2 %1545 }
 0x3ee   : > { %1805 = vrot.lane.b32.xlu0 %v12822_v45, %s12583_s28  ;;  %9651 = vmatmul.msk.f32.vlgmr.msrb.gmra.mxu3 %vm1003_vm0, %v1546_v43 }
 0x3f5   : > { %v1648_v49 = vpop.permute.xlu2 %1647 }
 0x3f6   : > { %1907 = vrot.lane.b32.xlu0 %v12807_v38, %s12584_s4  ;;  %9655 = vmatmul.msk.f32.vlgmr.msrb.gmra.mxu2 %vm1003_vm0, %v1648_v49 }
 0x3f7   : > { %9657 = vmatmul.msk.f32.vlgmr.msra.gmra.mxu3 %vm1003_vm0, %v1676_v42 }
 0x3fd   : > { %v1808_v37 = vpop.permute.xlu2 %1807 }
 0x3fe   : > { %9662 = vmatpush.xpose.msk.msrb.mxu3 %vm1003_vm0, %v1808_v37 }
 0x402   : > { %9668 = vmatpush.xpose.msk.msra.mxu3 %vm1003_vm0, %v1938_v50 }
 0x405   : > { %v1910_v56 = vpop.permute.xlu2 %1909 }
 0x40d   : > { %v1936_v0 = vpop.permute.xlu2 %1935 }
 0x445   : > { %v1195_v51 = vpop.xlane.xlu0 %1194 }
 0x446   : > { %12115 = vrcp.f32 %v1195_v51 }
 0x44c   : > { %v12116_v45 = vpop.eup %12115 }
 0x44d   : > { %v1201_v52 = vmul.f32 %v12116_v45, %v12114_v33 }
 0x44f   : > { %9634 = vmatmul.msk.f32.vlgmr.msrb.gmra.mxu0 %vm1056_vm1, %v1201_v52 }
 0x451   : > { %v1310_v53 = vpop.f32.mrf.mxu3 }
 0x452   : > { %v12932_v54 = vadd.f32 %v1310_v53, %v12837_v48 }
 0x454   : > { %v1316_v38 = vsel %vm1056_vm1, %v12932_v54, -inf }
 0x455   : > { %1317 = vmax.xlane.f32.xlu2 %v1316_v38 }
 0x457   : > { %9637 = vmatmul.msk.f32.vlgmr.msra.gmra.mxu0 %vm1003_vm0, %v1258_v23 }
 0x458   : > { %v1780_v55 = vpop.permute.xlu0 %1779 }
 0x459   : > { %v1440_v57 = vpop.f32.mrf.mxu3  ;;  %9660 = vmatpush.xpose.msk.msra.mxu2 %vm1003_vm0, %v1780_v55 }
 0x45a   : > { %v12939_v58 = vadd.f32 %v1440_v57, %v12837_v48 }
 0x45c   : > { %9661 = vmatmul.msk.f32.vlgmr.msra.gmra.mxu2 %vm1003_vm0, %v1778_v46  ;;  %v1446_v59 = vsel %vm1056_vm1, %v12939_v58, -inf }
 0x45d   : > { %9666 = vmatpush.xpose.msk.msrb.mxu2 %vm1003_vm0, %v1910_v56  ;;  %1447 = vmax.xlane.f32.xlu0 %v1446_v59 }
 0x460   : > { %v1806_v60 = vpop.permute.xlu0 %1805 }
 0x461   : > { %v1412_v61 = vpop.f32.mrf.mxu2  ;;  %9663 = vmatmul.msk.f32.vlgmr.msrb.gmra.mxu3 %vm1003_vm0, %v1806_v60 }
 0x462   : > { %v1413_v62 = vadd.f32 %v1412_v61, %v12837_v48 }
 0x464   : > { %v1443_v63 = vsel %vm1056_vm1, %v1413_v62, -inf }
 0x465   : > { %1444 = vmax.xlane.f32.xlu1 %v1443_v63 }
 0x468   : > { %v1908_v1 = vpop.permute.xlu0 %1907 }
 0x469   : > { %9667 = vmatmul.msk.f32.vlgmr.msrb.gmra.mxu2 %vm1003_vm0, %v1908_v1  ;;  %9669 = vmatmul.msk.f32.vlgmr.msra.gmra.mxu3 %vm1003_vm0, %v1936_v0  ;;  %v1188_v1 = vsub.f32 %v12887_v21, %v1186_v14 }
 0x46c   : > { %v1542_v2 = vpop.f32.mrf.mxu2 }
 0x46d   : > { %v1543_v3 = vadd.f32 %v1542_v2, %v12837_v48 }
 0x46f   : > { %v1573_v4 = vsel %vm1056_vm1, %v1543_v3, -inf }
 0x470   : > { %1574 = vmax.xlane.f32.xlu2 %v1573_v4 }
 0x471   : > { %v1570_v5 = vpop.f32.mrf.mxu3 }
 0x472   : > { %v1571_v6 = vadd.f32 %v1570_v5, %v12837_v48 }
 0x474   : > { %v1576_v7 = vsel %vm1056_vm1, %v1571_v6, -inf }
 0x475   : > { %1577 = vmax.xlane.f32.xlu1 %v1576_v7 }
 0x479   : > { %v1672_v8 = vpop.f32.mrf.mxu2 }
 0x47a   : > { %v1673_v9 = vadd.f32 %v1672_v8, %v12837_v48  ;;  %v1700_v10 = vpop.f32.mrf.mxu3 }
 0x47b   : > { %v12956_v11 = vadd.f32 %v1700_v10, %v12837_v48 }
 0x47c   : > { %v1703_v12 = vsel %vm1056_vm1, %v1673_v9, -inf }
 0x47d   : > { %1704 = vmax.xlane.f32.xlu0 %v1703_v12  ;;  %v1706_v13 = vsel %vm1056_vm1, %v12956_v11, -inf }
 0x47e   : > { %1707 = vmax.xlane.f32.xlu2 %v1706_v13 }
 0x4c8   : > { %v1318_v17 = vpop.xlane.xlu2 %1317 }
 0x4c9   : > { %v1320_v39 = vsub.f32 %v12932_v54, %v1318_v17 }
 0x4cb   : > { %v1323_v42 = vmul.f32 1.442695, %v1320_v39 }
 0x4d0   : > { %v1448_v46 = vpop.xlane.xlu0 %1447 }
 0x4d1   : > { %v1450_v37 = vsub.f32 %v12939_v58, %v1448_v46 }
 0x4d3   : > { %v1453_v45 = vmul.f32 1.442695, %v1450_v37 }
 0x4d8   : > { %v1445_v20 = vpop.xlane.xlu1 %1444 }
 0x4d9   : > { %v1449_v25 = vsub.f32 %v1413_v62, %v1445_v20  ;;  %v13005_v62 = vpack.i.bf16 %v12827_v47, %v12816_v44  ;;  %v13018_v44 = vpop.f32.mrf.mxu0 }
 0x4db   : > { %v1451_v29 = vmul.f32 1.442695, %v1449_v25 }
 0x4dd   : > { %12117 = vpow2.f32 %v1451_v29 }
 0x4df   : > { %v1802_v18 = vpop.f32.mrf.mxu2 }
 0x4e0   : > { %v12962_v19 = vadd.f32 %v1802_v18, %v12837_v48 }
 0x4e1   : > { %v1282_v5 = vpop.f32.mrf.mxu0 }
 0x4e2   : > { %v1833_v22 = vsel %vm1056_vm1, %v12962_v19, -inf }
 0x4e3   : > { %v1575_v23 = vpop.xlane.xlu2 %1574  ;;  %1834 = vmax.xlane.f32.xlu1 %v1833_v22  ;;  %v12982_v43 = vpop.eup %12117 }
 0x4e4   : > { %v1830_v24 = vpop.f32.mrf.mxu3  ;;  %v1579_v27 = vsub.f32 %v1543_v3, %v1575_v23  ;;  %v1455_v51 = vsel %vm1056_vm1, %v12982_v43, 0.0  ;;  %v1191_v3 = vmul.f32 1.442695, %v1188_v1 }
 0x4e5   : > { %v12967_v26 = vadd.f32 %v1830_v24, %v12837_v48 }
 0x4e6   : > { %v1581_v32 = vmul.f32 1.442695, %v1579_v27 }
 0x4e7   : > { %v1836_v28 = vsel %vm1056_vm1, %v12967_v26, -inf }
 0x4e8   : > { %1837 = vmax.xlane.f32.xlu0 %v1836_v28  ;;  %12119 = vpow2.f32 %v1581_v32  ;;  %v1578_v52 = vpop.xlane.xlu1 %1577 }
 0x4e9   : > { %12121 = vpow2.f32 %v1323_v42  ;;  %v1580_v54 = vsub.f32 %v1571_v6, %v1578_v52  ;;  %v1283_v6 = vadd.f32 %v1282_v5, %v12837_v48 }
 0x4ea   : > { %12123 = vpow2.f32 %v1453_v45 }
 0x4eb   : > { %v1583_v55 = vmul.f32 1.442695, %v1580_v54  ;;  %v1313_v21 = vsel %vm1056_vm1, %v1283_v6, -inf }
 0x4ec   : > { %v1932_v33 = vpop.f32.mrf.mxu2  ;;  %v1960_v34 = vpop.f32.mrf.mxu3 }
 0x4ed   : > { %v12972_v35 = vadd.f32 %v1932_v33, %v12837_v48  ;;  %v12975_v36 = vadd.f32 %v1960_v34, %v12837_v48  ;;  %12125 = vpow2.f32 %v1583_v55 }
 0x4ee   : > { %v12984_v49 = vpop.eup %12119 }
 0x4ef   : > { %v1963_v40 = vsel %vm1056_vm1, %v12972_v35, -inf  ;;  %v1966_v41 = vsel %vm1056_vm1, %v12975_v36, -inf  ;;  %v1585_v50 = vsel %vm1056_vm1, %v12984_v49, 0.0  ;;  %v12991_v53 = vpop.eup %12121 }
 0x4f0   : > { %1964 = vmax.xlane.f32.xlu2 %v1963_v40  ;;  %1967 = vmax.xlane.f32.xlu1 %v1966_v41  ;;  %v1328_v38 = vsel %vm1056_vm1, %v12991_v53, 0.0  ;;  %v1705_v56 = vpop.xlane.xlu0 %1704  ;;  %v12997_v57 = vpop.eup %12123 }
 0x4f1   : > { %v1709_v58 = vsub.f32 %v1673_v9, %v1705_v56  ;;  %v1458_v59 = vsel %vm1056_vm1, %v12997_v57, 0.0  ;;  %v1708_v8 = vpop.xlane.xlu2 %1707 }
 0x4f2   : > { %v1710_v12 = vsub.f32 %v12956_v11, %v1708_v8 }
 0x4f3   : > { %v1711_v60 = vmul.f32 1.442695, %v1709_v58  ;;  %v13001_v61 = vpop.eup %12125 }
 0x4f4   : > { %v1588_v63 = vsel %vm1056_vm1, %v13001_v61, 0.0  ;;  %v1713_v13 = vmul.f32 1.442695, %v1710_v12 }
 0x4f5   : > { %12127 = vpow2.f32 %v1711_v60 }
 0x4f6   : > { %12129 = vpow2.f32 %v1191_v3 }
 0x4f8   : > { %1586 = vadd.xlane.f32.xlu1 %v1585_v50  ;;  %1456 = vadd.xlane.f32.xlu2 %v1455_v51 }
 0x4fb   : > { %v13011_v0 = vpop.eup %12127 }
 0x4fc   : > { %1231 = vrot.lane.b32.xlu0 %v12827_v47, %s12578_s5  ;;  %v1715_v2 = vsel %vm1056_vm1, %v13011_v0, 0.0  ;;  %v12130_v47 = vpop.eup %12129 }
 0x4fd   : > { %v1196_v4 = vsel %vm1056_vm1, %v12130_v47, 0.0 }
 0x500   : > { %1329 = vadd.xlane.f32.xlu1 %v1328_v38 }
 0x508   : > { %1459 = vadd.xlane.f32.xlu1 %v1458_v59 }
 0x510   : > { %11794 = vrot.lane.b32.xlu2 %v13005_v62, %s12579_s0  ;;  %1589 = vadd.xlane.f32.xlu1 %v1588_v63 }
 0x518   : > { %11804 = vrot.lane.b32.xlu2 %v13005_v62, %s12580_s7  ;;  %1716 = vadd.xlane.f32.xlu1 %v1715_v2 }
 0x526   : > { %1197 = vadd.xlane.f32.xlu0 %v1196_v4 }
 0x52e   : > { %1314 = vmax.xlane.f32.xlu0 %v1313_v21 }
 0x542   : > { %11799 = vrot.lane.b32.xlu0 %v13005_v62, %s12582_s2 }
 0x556   : > { %v1835_v7 = vpop.xlane.xlu1 %1834 }
 0x557   : > { %v1839_v9 = vsub.f32 %v12962_v19, %v1835_v7 }
 0x559   : > { %v1841_v10 = vmul.f32 1.442695, %v1839_v9 }
 0x55b   : > { %12131 = vpow2.f32 %v1841_v10  ;;  %v1838_v22 = vpop.xlane.xlu0 %1837 }
 0x55c   : > { %12133 = vpow2.f32 %v1713_v13  ;;  %v1840_v45 = vsub.f32 %v12967_v26, %v1838_v22 }
 0x55e   : > { %v1843_v38 = vmul.f32 1.442695, %v1840_v45 }
 0x561   : > { %v13027_v14 = vpop.eup %12131 }
 0x562   : > { %v1845_v48 = vsel %vm1056_vm1, %v13027_v14, 0.0  ;;  %v13032_v24 = vpop.eup %12133 }
 0x563   : > { %v1965_v17 = vpop.xlane.xlu2 %1964  ;;  %1846 = vadd.xlane.f32.xlu1 %v1845_v48  ;;  %v1968_v18 = vpop.xlane.xlu1 %1967  ;;  %v1718_v11 = vsel %vm1056_vm1, %v13032_v24, 0.0 }
 0x564   : > { %v1970_v20 = vsub.f32 %v12975_v36, %v1968_v18  ;;  %v1969_v36 = vsub.f32 %v12972_v35, %v1965_v17 }
 0x566   : > { %v1973_v23 = vmul.f32 1.442695, %v1970_v20  ;;  %v1971_v39 = vmul.f32 1.442695, %v1969_v36 }
 0x568   : > { %12135 = vpow2.f32 %v1973_v23 }
 0x56b   : > { %v13034_v19 = vpop.xlane.xlu2 %1456  ;;  %v13046_v34 = vpop.xlane.xlu1 %1586 }
 0x56c   : > { %1719 = vadd.xlane.f32.xlu0 %v1718_v11 }
 0x56e   : > { %v1232_v25 = vpop.permute.xlu0 %1231  ;;  %v13038_v27 = vpop.eup %12135 }
 0x56f   : > { %1252 = vmatpush.msra.mxu1 %v1232_v25  ;;  %v1978_v29 = vsel %vm1056_vm1, %v13038_v27, 0.0 }
 0x573   : > { %v11795_v28 = vpop.permute.xlu2 %11794  ;;  %v1330_v41 = vpop.xlane.xlu1 %1329 }
 0x574   : > { %v11797_v32 = vunpack.i.h.bf16 %v11795_v28  ;;  %v11796_v33 = vunpack.i.l.bf16 %v11795_v28  ;;  %1979 = vadd.xlane.f32.xlu0 %v1978_v29 }
 0x576   : > { %1356 = vmatpush.msrb.mxu0 %v11796_v33  ;;  %1382 = vmatpush.msrb.mxu1 %v11797_v32 }
 0x57b   : > { %v1460_v55 = vpop.xlane.xlu1 %1459  ;;  %v11805_v1 = vpop.permute.xlu2 %11804 }
 0x57c   : > { %11809 = vrot.lane.b32.xlu1 %v13005_v62, %s12581_s13  ;;  %v11807_v5 = vunpack.i.h.bf16 %v11805_v1 }
 0x583   : > { %v1590_v60 = vpop.xlane.xlu1 %1589 }
 0x588   : > { %11814 = vrot.lane.b32.xlu0 %v13005_v62, %s12583_s28 }
 0x58b   : > { %v1717_v7 = vpop.xlane.xlu1 %1716 }
 0x599   : > { %v1198_v40 = vpop.xlane.xlu0 %1197 }
 0x59a   : > { %12137 = vrcp.f32 %v1198_v40 }
 0x59b   : > { %12139 = vpow2.f32 %v1971_v39 }
 0x59c   : > { %12141 = vrcp.f32 %v1330_v41 }
 0x5a0   : > { %v12138_v42 = vpop.eup %12137 }
 0x5a1   : > { %v1202_v46 = vmul.f32 %v12138_v42, %v12130_v47  ;;  %v1315_v37 = vpop.xlane.xlu0 %1314  ;;  %v13049_v50 = vpop.eup %12139 }
 0x5a2   : > { %v1319_v51 = vsub.f32 %v1283_v6, %v1315_v37  ;;  %v1975_v35 = vsel %vm1056_vm1, %v13049_v50, 0.0  ;;  %v12142_v54 = vpop.eup %12141 }
 0x5a3   : > { %9635 = vmatmul.msk.f32.vlgmr.msra.gmra.mxu1 %vm1056_vm1, %v1202_v46  ;;  %v1334_v56 = vmul.f32 %v12142_v54, %v12991_v53 }
 0x5a4   : > { %v1321_v52 = vmul.f32 1.442695, %v1319_v51 }
 0x5a6   : > { %12143 = vpow2.f32 %v1321_v52  ;;  %1976 = vadd.xlane.f32.xlu1 %v1975_v35 }
 0x5a7   : > { %12145 = vpow2.f32 %v1843_v38 }
 0x5a8   : > { %12147 = vrcp.f32 %v1460_v55 }
 0x5a9   : > { %12149 = vrcp.f32 %v1590_v60 }
 0x5ab   : > { %9641 = vmatmul.msk.f32.vlgmr.msrb.gmra.mxu1 %vm1056_vm1, %v1334_v56 }
 0x5ac   : > { %v12144_v58 = vpop.eup %12143 }
 0x5ad   : > { %v1325_v59 = vsel %vm1056_vm1, %v12144_v58, 0.0  ;;  %v12146_v26 = vpop.eup %12145 }
 0x5ae   : > { %1326 = vadd.xlane.f32.xlu2 %v1325_v59  ;;  %v12148_v63 = vpop.eup %12147  ;;  %v1848_v4 = vsel %vm1056_vm1, %v12146_v26, 0.0 }
 0x5af   : > { %v1464_v53 = vmul.f32 %v12148_v63, %v12997_v57  ;;  %v12150_v6 = vpop.eup %12149 }
 0x5b0   : > { %v1594_v21 = vmul.f32 %v12150_v6, %v13001_v61  ;;  %v11364_v6 = vld [vmem:[#allocation6 + $0x20] sm:$0xff] }
 0x5b4   : > { %v11800_v2 = vpop.permute.xlu0 %11799 }
 0x5b5   : > { %v11802_v3 = vunpack.i.h.bf16 %v11800_v2  ;;  %v11801_v47 = vunpack.i.l.bf16 %v11800_v2 }
 0x5b6   : > { %1849 = vadd.xlane.f32.xlu2 %v1848_v4  ;;  %v11367_v4 = vld [vmem:[#allocation6 + $0x38] sm:$0xff] }
 0x5b7   : > { %1486 = vmatpush.msra.mxu0 %v11801_v47  ;;  %1512 = vmatpush.msra.mxu1 %v11802_v3 }
 0x5b8   : > { %9647 = vmatmul.msk.f32.vlgmr.msra.gmra.mxu1 %vm1056_vm1, %v1464_v53  ;;  %2182 = vmatpush.bf16.msra.mxu2 %v11367_v4  ;;  %v11366_v53 = vld [vmem:[#allocation6 + $0x30] sm:$0xff]  ;;  %v11397_v4 = vld [vmem:[#allocation7 + $0xec] sm:$0xf] }
 0x5b9   : > { %1642 = vmatpush.msrb.mxu1 %v11807_v5  ;;  %v11365_v5 = vld [vmem:[#allocation6 + $0x28] sm:$0xff] }
 0x5bc   : > { %2183 = vmatpush.bf16.msra.mxu2 %v11366_v53  ;;  %v9828_v53 = vld [vmem:[#allocation7 + $0xf8] sm:$0xf0] }
 0x5c0   : > { %9653 = vmatmul.msk.f32.vlgmr.msrb.gmra.mxu1 %vm1056_vm1, %v1594_v21  ;;  %2184 = vmatpush.bf16.msra.mxu2 %v11365_v5  ;;  %v11363_v21 = vld [vmem:[#allocation6 + $0x18] sm:$0xff] }
 0x5c4   : > { %2185 = vmatpush.bf16.msra.mxu2 %v11364_v6  ;;  %v9831_v6 = vor.u32 %v11397_v4, %v9828_v53  ;;  %v9740_v4 = vld [vmem:[#allocation7 + $0x50] sm:$0xf0]  ;;  %v9746_v53 = vld [vmem:[#allocation7 + $0x48] sm:$0xf] }
 0x5c8   : > { %2186 = vmatpush.bf16.msra.mxu2 %v11363_v21  ;;  %v9802_v21 = vld [vmem:[#allocation7 + $0xc0] sm:$0xf] }
 0x5ce   : > { %11819 = vrot.lane.b32.xlu2 %v13005_v62, %s12584_s4 }
 0x5d6   : > { %v1847_v9 = vpop.xlane.xlu1 %1846 }
 0x5df   : > { %v1720_v8 = vpop.xlane.xlu0 %1719 }
 0x5e0   : > { %12151 = vrcp.f32 %v1720_v8  ;;  %v11361_v8 = vld [vmem:[#allocation6 + $0x8] sm:$0xff] }
 0x5e6   : > { %v12152_v57 = vpop.eup %12151 }
 0x5e7   : > { %v1724_v13 = vmul.f32 %v12152_v57, %v13032_v24  ;;  %v1980_v48 = vpop.xlane.xlu0 %1979  ;;  %v11806_v24 = vunpack.i.l.bf16 %v11805_v1 }
 0x5ee   : > { %v11810_v10 = vpop.permute.xlu1 %11809 }
 0x5ef   : > { %v11812_v12 = vunpack.i.h.bf16 %v11810_v10  ;;  %v11811_v33 = vunpack.i.l.bf16 %v11810_v10 }
 0x5f1   : > { %1772 = vmatpush.msra.mxu1 %v11812_v12 }
 0x5f2   : > { %9659 = vmatmul.msk.f32.vlgmr.msra.gmra.mxu1 %vm1056_vm1, %v1724_v13 }
 0x5fa   : > { %v11815_v17 = vpop.permute.xlu0 %11814 }
 0x5fb   : > { %v11817_v61 = vunpack.i.h.bf16 %v11815_v17  ;;  %v11816_v41 = vunpack.i.l.bf16 %v11815_v17 }
 0x5fd   : > { %1902 = vmatpush.msrb.mxu1 %v11817_v61 }
 0x619   : > { %v1977_v37 = vpop.xlane.xlu1 %1976 }
 0x620   : > { %v1254_v18 = vpop.f32.mrf.mxu1 }
 0x621   : > { %v11823_v20 = vpack.i.bf16 %v1254_v18, %v13018_v44  ;;  %v1327_v62 = vpop.xlane.xlu2 %1326 }
 0x622   : > { %12153 = vrcp.f32 %v1327_v62 }
 0x623   : > { %11824 = vrot.lane.b32.xlu0 %v11823_v20, %s12584_s4  ;;  %12155 = vrcp.f32 %v13034_v19 }
 0x628   : > { %v12154_v22 = vpop.eup %12153  ;;  %v1384_v52 = vpop.f32.mrf.mxu1 }
 0x629   : > { %v1333_v23 = vmul.f32 %v12154_v22, %v12144_v58  ;;  %v1850_v11 = vpop.xlane.xlu2 %1849  ;;  %v12156_v25 = vpop.eup %12155 }
 0x62a   : > { %12157 = vrcp.f32 %v1850_v11  ;;  %v1463_v44 = vmul.f32 %v12156_v25, %v12982_v43 }
 0x62b   : > { %9640 = vmatmul.msk.f32.vlgmr.msrb.gmra.mxu0 %vm1056_vm1, %v1333_v23  ;;  %12159 = vrcp.f32 %v13046_v34 }
 0x62c   : > { %1616 = vmatpush.msrb.mxu0 %v11806_v24  ;;  %12161 = vrcp.f32 %v1980_v48 }
 0x62d   : > { %12163 = vrcp.f32 %v1717_v7  ;;  %v11362_v7 = vld [vmem:[#allocation6 + $0x10] sm:$0xff] }
 0x62e   : > { %12165 = vrcp.f32 %v1847_v9  ;;  %2187 = vmatpush.bf16.msra.mxu2 %v11362_v7  ;;  %v11360_v9 = vld [vmem:[#allocation6] sm:$0xff]  ;;  %v11394_v7 = vld [vmem:[#allocation7 + $0xcc] sm:$0xf0] }
 0x62f   : > { %12167 = vrcp.f32 %v1977_v37 }
 0x630   : > { %v12158_v28 = vpop.eup %12157 }
 0x631   : > { %v1854_v29 = vmul.f32 %v12158_v28, %v12146_v26  ;;  %v11820_v32 = vpop.permute.xlu2 %11819  ;;  %v12160_v19 = vpop.eup %12159 }
 0x632   : > { %v11822_v36 = vunpack.i.h.bf16 %v11820_v32  ;;  %v12162_v39 = vpop.eup %12161  ;;  %v1593_v40 = vmul.f32 %v12160_v19, %v12984_v49  ;;  %v11821_v46 = vunpack.i.l.bf16 %v11820_v32  ;;  %2188 = vmatpush.bf16.msra.mxu2 %v11361_v8  ;;  %v11392_v8 = vld [vmem:[#allocation7 + $0xc4] sm:$0xf] }
 0x633   : > { %9646 = vmatmul.msk.f32.vlgmr.msra.gmra.mxu0 %vm1056_vm1, %v1463_v44  ;;  %9665 = vmatmul.msk.f32.vlgmr.msrb.gmra.mxu1 %vm1056_vm1, %v1854_v29  ;;  %v1984_v34 = vmul.f32 %v12162_v39, %v13038_v27  ;;  %v12164_v43 = vpop.eup %12163 }
 0x634   : > { %1746 = vmatpush.msra.mxu0 %v11811_v33  ;;  %2032 = vmatpush.msra.mxu1 %v11822_v36  ;;  %v1723_v42 = vmul.f32 %v12164_v43, %v13011_v0  ;;  %v12166_v51 = vpop.eup %12165 }
 0x635   : > { %v1853_v49 = vmul.f32 %v12166_v51, %v13027_v14  ;;  %v12168_v27 = vpop.eup %12167  ;;  %v1514_v0 = vpop.f32.mrf.mxu1 }
 0x636   : > { %v1983_v45 = vmul.f32 %v12168_v27, %v13049_v50  ;;  %2189 = vmatpush.bf16.msra.mxu2 %v11360_v9  ;;  %v9803_v9 = vor.u32 %v11394_v7, %v9802_v21 }
 0x63a   : > { %2506 = vmatpush.bf16.msrb.mxu2 %v9831_v6 }
 0x63b   : > { %9652 = vmatmul.msk.f32.vlgmr.msrb.gmra.mxu0 %vm1056_vm1, %v1593_v40  ;;  %9671 = vmatmul.msk.f32.vlgmr.msra.gmra.mxu1 %vm1056_vm1, %v1984_v34 }
 0x63c   : > { %1876 = vmatpush.msrb.mxu0 %v11816_v41 }
 0x63d   : > { %v1644_v56 = vpop.f32.mrf.mxu1 }
 0x643   : > { %9658 = vmatmul.msk.f32.vlgmr.msra.gmra.mxu0 %vm1056_vm1, %v1723_v42 }
 0x644   : > { %2006 = vmatpush.msra.mxu0 %v11821_v46 }
 0x64b   : > { %9664 = vmatmul.msk.f32.vlgmr.msrb.gmra.mxu0 %vm1056_vm1, %v1853_v49 }
 0x653   : > { %9670 = vmatmul.msk.f32.vlgmr.msra.gmra.mxu0 %vm1056_vm1, %v1983_v45 }
 0x66f   : > { %v1774_v59 = vpop.f32.mrf.mxu1 }
 0x695   : > { %v11825_v57 = vpop.permute.xlu0 %11824 }
 0x696   : > { %v11827_v12 = vunpack.i.h.bf16 %v11825_v57  ;;  %v11826_v13 = vunpack.i.l.bf16 %v11825_v57  ;;  %v9804_v57 = vld [vmem:[#allocation7 + $0xd0] sm:$0xf0] }
 0x698   : > { %v2094_v62 = vsel %vm1003_vm0, %v12882_v16, %v11827_v12  ;;  %v2093_v22 = vsel %vm1003_vm0, %v12880_v15, %v11826_v13  ;;  %v11395_v12 = vld [vmem:[#allocation7 + $0xd4] sm:$0xf0]  ;;  %v9807_v13 = vor.u32 %v11392_v8, %v9804_v57  ;;  %v9748_v8 = vld [vmem:[#allocation7 + $0x58] sm:$0xf0] }
 0x6a8   : > { %v1358_v35 = vpop.f32.mrf.mxu0 }
 0x6a9   : > { %v11828_v54 = vpack.i.bf16 %v1384_v52, %v1358_v35  ;;  %v12071_v52 = vld [vmem:[%s14490_s10] ss:$0 sm:$0xff] }
 0x6ab   : > { %11829 = vrot.lane.b32.xlu0 %v11828_v54, %s12583_s28 }
 0x6b0   : > { %v1488_v38 = vpop.f32.mrf.mxu0  ;;  %v1904_v60 = vpop.f32.mrf.mxu1 }
 0x6b1   : > { %v11833_v55 = vpack.i.bf16 %v1514_v0, %v1488_v38 }
 0x6b3   : > { %11834 = vrot.lane.b32.xlu2 %v11833_v55, %s12581_s13 }
 0x6b8   : > { %v1618_v58 = vpop.f32.mrf.mxu0  ;;  %v2034_v2 = vpop.f32.mrf.mxu1 }
 0x6b9   : > { %v11838_v14 = vpack.i.bf16 %v1644_v56, %v1618_v58 }
 0x6bb   : > { %11839 = vrot.lane.b32.xlu1 %v11838_v14, %s12580_s7 }
 0x6c0   : > { %v1748_v26 = vpop.f32.mrf.mxu0 }
 0x6c1   : > { %v11843_v50 = vpack.i.bf16 %v1774_v59, %v1748_v26  ;;  %v12585_v59 = vmov 128.0   ;;  %v9818_v26 = vld [vmem:[#allocation7 + $0xe0] sm:$0xf] }
 0x6c2   : > { %12169 = vrcp.f32 %v12585_v59 }
 0x6c3   : > { %11844 = vrot.lane.b32.xlu0 %v11843_v50, %s12582_s2  ;;  %v11398_v50 = vld [vmem:[#allocation7 + $0xec] sm:$0xf0] }
 0x6c8   : > { %v1878_v63 = vpop.f32.mrf.mxu0 }
 0x6c9   : > { %v11848_v1 = vpack.i.bf16 %v1904_v60, %v1878_v63  ;;  %v11396_v60 = vld [vmem:[#allocation7 + $0xe4] sm:$0xf]  ;;  %v9819_v63 = vor.u32 %v11398_v50, %v9818_v26  ;;  %v11381_v26 = vld [vmem:[#allocation7 + $0x6c] sm:$0xf]  ;;  %v9764_v50 = vld [vmem:[#allocation7 + $0x78] sm:$0xf0] }
 0x6cb   : > { %11849 = vrot.lane.b32.xlu2 %v11848_v1, %s12579_s0  ;;  %v9820_v1 = vld [vmem:[#allocation7 + $0xf0] sm:$0xf0]  ;;  %2464 = vmatpush.bf16.msrb.mxu3 %v9819_v63  ;;  %v9767_v63 = vor.u32 %v11381_v26, %v9764_v50 }
 0x6cc   : > { %v11430_v26 = vld [vmem:[#allocation9 + $0xf0] sm:$0xff] }
 0x6cf   : > { %2465 = vmatpush.bf16.msrb.mxu3 %v9803_v9 }
 0x6d0   : > { %v2008_v3 = vpop.f32.mrf.mxu0 }
 0x6d1   : > { %v11853_v47 = vpack.i.bf16 %v2034_v2, %v2008_v3  ;;  %v9826_v2 = vld [vmem:[#allocation7 + $0xe8] sm:$0xf]  ;;  %v11399_v3 = vld [vmem:[#allocation7 + $0xf4] sm:$0xf0] }
 0x6d3   : > { %11854 = vrot.lane.b32.xlu0 %v11853_v47, %s12578_s5  ;;  %v9823_v47 = vor.u32 %v11396_v60, %v9820_v1  ;;  %v9738_v1 = vld [vmem:[#allocation7 + $0x40] sm:$0xf] }
 0x6d5   : > { %2478 = vmatpush.bf16.msrb.mxu0 %v9823_v47 }
 0x6d9   : > { %2479 = vmatpush.bf16.msrb.mxu0 %v9807_v13  ;;  %v9722_v13 = vld [vmem:[#allocation7 + $0x20] sm:$0xf] }
 0x70d   : > { %v11835_v48 = vpop.permute.xlu2 %11834 }
 0x70e   : > { %v11837_v28 = vunpack.i.h.bf16 %v11835_v48  ;;  %v11836_v44 = vunpack.i.l.bf16 %v11835_v48 }
 0x71d   : > { %v11830_v10 = vpop.permute.xlu0 %11829 }
 0x71e   : > { %v11832_v17 = vunpack.i.h.bf16 %v11830_v10  ;;  %v11831_v61 = vunpack.i.l.bf16 %v11830_v10  ;;  %v9810_v10 = vld [vmem:[#allocation7 + $0xc8] sm:$0xf] }
 0x71f   : > { %v9811_v48 = vor.u32 %v11395_v12, %v9810_v10 }
 0x720   : > { %v2097_v23 = vsel %vm2095_vm2, %v2094_v62, %v11832_v17  ;;  %v2096_v11 = vsel %vm2095_vm2, %v2093_v22, %v11831_v61  ;;  %v11393_v17 = vld [vmem:[#allocation7 + $0xcc] sm:$0xf]  ;;  %v9812_v61 = vld [vmem:[#allocation7 + $0xd8] sm:$0xf0]  ;;  %v9786_v62 = vld [vmem:[#allocation7 + $0xa0] sm:$0xf] }
 0x721   : > { %v2099_v36 = vsel %vm2098_vm3, %v2096_v11, %v11836_v44  ;;  %v2100_v16 = vsel %vm2098_vm3, %v2097_v23, %v11837_v28  ;;  %v11390_v22 = vld [vmem:[#allocation7 + $0xac] sm:$0xf0]  ;;  %v11388_v23 = vld [vmem:[#allocation7 + $0xa4] sm:$0xf]  ;;  %v11391_v28 = vld [vmem:[#allocation7 + $0xb4] sm:$0xf0] }
 0x722   : > { %v9787_v11 = vor.u32 %v11390_v22, %v9786_v62  ;;  %v11375_v62 = vld [vmem:[#allocation7 + $0x34] sm:$0xf0] }
 0x724   : > { %2466 = vmatpush.bf16.msrb.mxu3 %v9787_v11 }
 0x725   : > { %v11850_v33 = vpop.permute.xlu2 %11849 }
 0x726   : > { %v11852_v34 = vunpack.i.h.bf16 %v11850_v33  ;;  %v11851_v41 = vunpack.i.l.bf16 %v11850_v33  ;;  %v9796_v33 = vld [vmem:[#allocation7 + $0xb8] sm:$0xf0] }
 0x72d   : > { %v11840_v18 = vpop.permute.xlu1 %11839 }
 0x72e   : > { %v11842_v24 = vunpack.i.h.bf16 %v11840_v18  ;;  %v11841_v25 = vunpack.i.l.bf16 %v11840_v18 }
 0x730   : > { %v2103_v15 = vsel %vm2101_vm4, %v2100_v16, %v11842_v24  ;;  %v2102_v19 = vsel %vm2101_vm4, %v2099_v36, %v11841_v25  ;;  %v9788_v24 = vld [vmem:[#allocation7 + $0xb0] sm:$0xf0]  ;;  %v9794_v25 = vld [vmem:[#allocation7 + $0xa8] sm:$0xf] }
 0x731   : > { %v9791_v44 = vor.u32 %v11388_v23, %v9788_v24  ;;  %v11373_v24 = vld [vmem:[#allocation7 + $0x2c] sm:$0xf] }
 0x733   : > { %2480 = vmatpush.bf16.msrb.mxu0 %v9791_v44 }
 0x735   : > { %v11845_v20 = vpop.permute.xlu0 %11844 }
 0x736   : > { %v11847_v29 = vunpack.i.h.bf16 %v11845_v20  ;;  %v11846_v32 = vunpack.i.l.bf16 %v11845_v20  ;;  %v9815_v20 = vor.u32 %v11393_v17, %v9812_v61  ;;  %v11372_v17 = vld [vmem:[#allocation7 + $0x24] sm:$0xf] }
 0x738   : > { %v2106_v39 = vsel %vm2104_vm5, %v2103_v15, %v11847_v29  ;;  %v2105_v40 = vsel %vm2104_vm5, %v2102_v19, %v11846_v32  ;;  %2507 = vmatpush.bf16.msrb.mxu2 %v9815_v20  ;;  %v9795_v29 = vor.u32 %v11391_v28, %v9794_v25  ;;  %v11389_v32 = vld [vmem:[#allocation7 + $0xac] sm:$0xf]  ;;  %v9770_v15 = vld [vmem:[#allocation7 + $0x80] sm:$0xf]  ;;  %v11386_v19 = vld [vmem:[#allocation7 + $0x8c] sm:$0xf0] }
 0x739   : > { %v2108_v37 = vsel %vm2107_vm6, %v2105_v40, %v11851_v41  ;;  %v2109_v51 = vsel %vm2107_vm6, %v2106_v39, %v11852_v34  ;;  %v9799_v16 = vor.u32 %v11389_v32, %v9796_v33  ;;  %v11384_v39 = vld [vmem:[#allocation7 + $0x84] sm:$0xf]  ;;  %v9771_v40 = vor.u32 %v11386_v19, %v9770_v15  ;;  %v9772_v34 = vld [vmem:[#allocation7 + $0x90] sm:$0xf0]  ;;  %v9778_v41 = vld [vmem:[#allocation7 + $0x88] sm:$0xf] }
 0x73a   : > { %v9730_v20 = vld [vmem:[#allocation7 + $0x28] sm:$0xf]  ;;  %v9732_v25 = vld [vmem:[#allocation7 + $0x38] sm:$0xf0]  ;;  %v9706_v28 = vld [vmem:[#allocation7] sm:$0xf] }
 0x73b   : > { %2467 = vmatpush.bf16.msrb.mxu3 %v9771_v40  ;;  %v9731_v11 = vor.u32 %v11375_v62, %v9730_v20  ;;  %v9735_v44 = vor.u32 %v11373_v24, %v9732_v25  ;;  %v11368_v32 = vld [vmem:[#allocation7 + $0x4] sm:$0xf]  ;;  %v9708_v33 = vld [vmem:[#allocation7 + $0x10] sm:$0xf0]  ;;  %v9714_v19 = vld [vmem:[#allocation7 + $0x8] sm:$0xf] }
 0x73c   : > { %2508 = vmatpush.bf16.msrb.mxu2 %v9799_v16  ;;  %v9711_v15 = vor.u32 %v11368_v32, %v9708_v33  ;;  %v11419_v24 = vld [vmem:[#allocation9 + $0x98] sm:$0xff]  ;;  %v11404_v25 = vld [vmem:[#allocation9 + $0x20] sm:$0xff] }
 0x73d   : > { %v11403_v32 = vld [vmem:[#allocation9 + $0x18] sm:$0xff] }
 0x73e   : > { %v11427_v33 = vld [vmem:[#allocation9 + $0xd8] sm:$0xff] }
 0x745   : > { %v11855_v43 = vpop.permute.xlu0 %11854 }
 0x746   : > { %v11857_v42 = vunpack.i.h.bf16 %v11855_v43  ;;  %v11856_v46 = vunpack.i.l.bf16 %v11855_v43  ;;  %v11387_v43 = vld [vmem:[#allocation7 + $0x94] sm:$0xf0] }
 0x748   : > { %v2112_v49 = vsel %vm2110_vm7, %v2109_v51, %v11857_v42  ;;  %v2111_v27 = vsel %vm2110_vm7, %v2108_v37, %v11856_v46  ;;  %v9775_v42 = vor.u32 %v11384_v39, %v9772_v34  ;;  %v9779_v46 = vor.u32 %v11387_v43, %v9778_v41  ;;  %v11385_v37 = vld [vmem:[#allocation7 + $0x8c] sm:$0xf]  ;;  %v9780_v51 = vld [vmem:[#allocation7 + $0x98] sm:$0xf0]  ;;  %v11371_v39 = vld [vmem:[#allocation7 + $0x14] sm:$0xf0] }
 0x749   : > { %v2113_v45 = vpack.c.bf16 %v2112_v49, %v2111_v27  ;;  %v9783_v27 = vor.u32 %v11385_v37, %v9780_v51  ;;  %v9715_v34 = vor.u32 %v11371_v39, %v9714_v19  ;;  %v11369_v41 = vld [vmem:[#allocation7 + $0xc] sm:$0xf]  ;;  %v9716_v43 = vld [vmem:[#allocation7 + $0x18] sm:$0xf0]  ;;  %v11426_v19 = vld [vmem:[#allocation9 + $0xd0] sm:$0xff] }
 0x74a   : > { %2481 = vmatpush.bf16.msrb.mxu0 %v9775_v42  ;;  %v11408_v39 = vld [vmem:[#allocation9 + $0x40] sm:$0xff] }
 0x74b   : > { %2190 = vmatmul.bf16.vlgmr.msra.gmra.mxu2 %v2113_v45  ;;  %v9754_v45 = vld [vmem:[#allocation7 + $0x60] sm:$0xf] }
 0x74c   : > { %2509 = vmatpush.bf16.msrb.mxu2 %v9783_v27  ;;  %v11415_v27 = vld [vmem:[#allocation9 + $0x78] sm:$0xff] }
 0x750   : > { %2510 = vmatpush.bf16.msrb.mxu2 %v9767_v63 }
 0x7ce   : > { %v2191_v35 = vpop.f32.mrf.mxu2 }
 0x7cf   : > { %v2192_v54 = vadd.f32 %v12071_v52, %v2191_v35  ;;  %v11380_v35 = vld [vmem:[#allocation7 + $0x64] sm:$0xf] }
 0x7d1   : > { %v13111_v0 = vadd.f32 %v2192_v54, %v12789_v30  ;;  %v13122_v30 = vpop.eup %12169 }
 0x7d2   : > { %v2203_v5 = vmul.f32 128.0, %v13122_v30  ;;  %vm2207_vm8 = vweird.f32 %v13122_v30 }
 0x7d3   : > { %2198 = vadd.xlane.f32.xlu2 %v13111_v0  ;;  %v2211_v38 = vmul.f32 %v13111_v0, %v13111_v0 }
 0x7d4   : > { %v2204_v18 = vsub.f32 1.0, %v2203_v5  ;;  %v11379_v5 = vld [vmem:[#allocation7 + $0x54] sm:$0xf0] }
 0x7d5   : > { %2213 = vadd.xlane.f32.xlu1 %v2211_v38  ;;  %v9756_v38 = vld [vmem:[#allocation7 + $0x70] sm:$0xf0]  ;;  %v9747_v7 = vor.u32 %v11379_v5, %v9746_v53  ;;  %v11412_v53 = vld [vmem:[#allocation9 + $0x60] sm:$0xff] }
 0x7d6   : > { %v2193_v55 = vpop.f32.mrf.mxu2  ;;  %v2205_v36 = vmul.f32 %v13122_v30, %v2204_v18  ;;  %v9724_v18 = vld [vmem:[#allocation7 + $0x30] sm:$0xf0]  ;;  %v11420_v5 = vld [vmem:[#allocation9 + $0xa0] sm:$0xff] }
 0x7d7   : > { %v2194_v56 = vadd.f32 %v12071_v52, %v2193_v55  ;;  %v11382_v52 = vld [vmem:[#allocation7 + $0x6c] sm:$0xf0]  ;;  %v9762_v55 = vld [vmem:[#allocation7 + $0x68] sm:$0xf]  ;;  %v9727_v23 = vor.u32 %v11372_v17, %v9724_v18 }
 0x7d8   : > { %v2206_v49 = vadd.f32 %v13122_v30, %v2205_v36  ;;  %v9755_v54 = vor.u32 %v11382_v52, %v9754_v45  ;;  %v11423_v45 = vld [vmem:[#allocation9 + $0xb8] sm:$0xff] }
 0x7d9   : > { %v13117_v58 = vadd.f32 %v2194_v56, %v12791_v31  ;;  %v9827_v31 = vor.u32 %v11399_v3, %v9826_v2  ;;  %v11383_v56 = vld [vmem:[#allocation7 + $0x74] sm:$0xf0]  ;;  %v11378_v2 = vld [vmem:[#allocation7 + $0x4c] sm:$0xf0]  ;;  %v11376_v3 = vld [vmem:[#allocation7 + $0x44] sm:$0xf] }
 0x7da   : > { %v9763_v59 = vor.u32 %v11383_v56, %v9762_v55  ;;  %v13129_v60 = vsel %vm2207_vm8, %v13122_v30, %v2206_v49  ;;  %2468 = vmatpush.bf16.msrb.mxu3 %v9755_v54  ;;  %v9743_v21 = vor.u32 %v11376_v3, %v9740_v4  ;;  %v11377_v30 = vld [vmem:[#allocation7 + $0x4c] sm:$0xf]  ;;  %v11431_v54 = vld [vmem:[#allocation9 + $0xf8] sm:$0xff]  ;;  %v11422_v55 = vld [vmem:[#allocation9 + $0xb0] sm:$0xff] }
 0x7db   : > { %2200 = vadd.xlane.f32.xlu0 %v13117_v58  ;;  %v2212_v14 = vmul.f32 %v13117_v58, %v13117_v58  ;;  %2492 = vmatpush.bf16.msrb.mxu1 %v9827_v31  ;;  %v9739_v31 = vor.u32 %v11378_v2, %v9738_v1  ;;  %v9751_v57 = vor.u32 %v11377_v30, %v9748_v8  ;;  %v11413_v1 = vld [vmem:[#allocation9 + $0x68] sm:$0xff] }
 0x7dc   : > { %v11421_v2 = vld [vmem:[#allocation9 + $0xa8] sm:$0xff] }
 0x7dd   : > { %2215 = vadd.xlane.f32.xlu2 %v2212_v14  ;;  %v9759_v14 = vor.u32 %v11380_v35, %v9756_v38  ;;  %2511 = vmatpush.bf16.msrb.mxu2 %v9751_v57  ;;  %v11407_v35 = vld [vmem:[#allocation9 + $0x38] sm:$0xff]  ;;  %v11414_v38 = vld [vmem:[#allocation9 + $0x70] sm:$0xff]  ;;  %v11405_v3 = vld [vmem:[#allocation9 + $0x28] sm:$0xff] }
 0x7de   : > { %2469 = vmatpush.bf16.msrb.mxu3 %v9739_v31 }
 0x7df   : > { %2493 = vmatpush.bf16.msrb.mxu1 %v9811_v48  ;;  %2482 = vmatpush.bf16.msrb.mxu0 %v9759_v14  ;;  %v11374_v48 = vld [vmem:[#allocation7 + $0x2c] sm:$0xf0] }
 0x7e0   : > { %v9723_v61 = vor.u32 %v11374_v48, %v9722_v13  ;;  %v12072_v48 = vld [vmem:[%s14491_s11] ss:$0 sm:$0xff] }
 0x7e1   : > { %2512 = vmatpush.bf16.msrb.mxu2 %v9735_v44  ;;  %v11410_v44 = vld [vmem:[#allocation9 + $0x50] sm:$0xff] }
 0x7e2   : > { %2470 = vmatpush.bf16.msrb.mxu3 %v9723_v61 }
 0x7e3   : > { %2494 = vmatpush.bf16.msrb.mxu1 %v9795_v29  ;;  %2483 = vmatpush.bf16.msrb.mxu0 %v9743_v21  ;;  %v11370_v29 = vld [vmem:[#allocation7 + $0xc] sm:$0xf0] }
 0x7e4   : > { %v9707_v16 = vor.u32 %v11370_v29, %v9706_v28  ;;  %v11428_v28 = vld [vmem:[#allocation9 + $0xe0] sm:$0xff]  ;;  %v11418_v29 = vld [vmem:[#allocation9 + $0x90] sm:$0xff] }
 0x7e6   : > { %2471 = vmatpush.bf16.msrb.mxu3 %v9707_v16  ;;  %v11417_v16 = vld [vmem:[#allocation9 + $0x88] sm:$0xff] }
 0x7e7   : > { %2495 = vmatpush.bf16.msrb.mxu1 %v9779_v46  ;;  %2484 = vmatpush.bf16.msrb.mxu0 %v9727_v23  ;;  %v9719_v46 = vor.u32 %v11369_v41, %v9716_v43  ;;  %v11425_v41 = vld [vmem:[#allocation9 + $0xc8] sm:$0xff]  ;;  %v11400_v43 = vld [vmem:[#allocation9] sm:$0xff] }
 0x7e9   : > { %2513 = vmatpush.bf16.msrb.mxu2 %v9719_v46  ;;  %v2294_v46 = vld [vmem:[%s14494_s14] sm:$0xf] }
 0x7ea   : > { %2792 = vmatpush.bf16.msra.mxu3 %v11407_v35 }
 0x7eb   : > { %2496 = vmatpush.bf16.msrb.mxu1 %v9763_v59  ;;  %2485 = vmatpush.bf16.msrb.mxu0 %v9711_v15  ;;  %v11406_v59 = vld [vmem:[#allocation9 + $0x30] sm:$0xff] }
 0x7ec   : > { %v11402_v15 = vld [vmem:[#allocation9 + $0x10] sm:$0xff] }
 0x7ed   : > { %2834 = vmatpush.bf16.msra.mxu2 %v11431_v54 }
 0x7ee   : > { %2793 = vmatpush.bf16.msra.mxu3 %v11406_v59  ;;  %v2299_v59 = vperm.slane %v2294_v46, 3 }
 0x7ef   : > { %2497 = vmatpush.bf16.msrb.mxu1 %v9747_v7  ;;  %2806 = vmatpush.bf16.msra.mxu0 %v11415_v27  ;;  %v2298_v27 = vperm.slane %v2294_v46, 2 }
 0x7f1   : > { %2835 = vmatpush.bf16.msra.mxu2 %v11430_v26 }
 0x7f2   : > { %2794 = vmatpush.bf16.msra.mxu3 %v11405_v3 }
 0x7f3   : > { %2498 = vmatpush.bf16.msrb.mxu1 %v9731_v11  ;;  %2807 = vmatpush.bf16.msra.mxu0 %v11414_v38 }
 0x7f6   : > { %2795 = vmatpush.bf16.msra.mxu3 %v11404_v25 }
 0x7f7   : > { %2499 = vmatpush.bf16.msrb.mxu1 %v9715_v34  ;;  %2808 = vmatpush.bf16.msra.mxu0 %v11413_v1  ;;  %v11401_v34 = vld [vmem:[#allocation9 + $0x8] sm:$0xff] }
 0x7fa   : > { %2796 = vmatpush.bf16.msra.mxu3 %v11403_v32 }
 0x7fb   : > { %2820 = vmatpush.bf16.msra.mxu1 %v11423_v45  ;;  %2809 = vmatpush.bf16.msra.mxu0 %v11412_v53 }
 0x7fe   : > { %2797 = vmatpush.bf16.msra.mxu3 %v11402_v15  ;;  %v11439_v15 = vld [vmem:[%s14525_s24 + $0x78] sm:$0xff] }
 0x7ff   : > { %2821 = vmatpush.bf16.msra.mxu1 %v11422_v55  ;;  %v2296_v55 = vperm.slane %v2294_v46, 0 }
 0x802   : > { %2798 = vmatpush.bf16.msra.mxu3 %v11401_v34  ;;  %v11454_v34 = vld [vmem:[#allocation4 + $0x70] sm:$0xff] }
 0x803   : > { %2822 = vmatpush.bf16.msra.mxu1 %v11421_v2 }
 0x806   : > { %2799 = vmatpush.bf16.msra.mxu3 %v11400_v43  ;;  %v11445_v43 = vld [vmem:[#allocation2 + $0x68] sm:$0xff] }
 0x807   : > { %2823 = vmatpush.bf16.msra.mxu1 %v11420_v5 }
 0x80b   : > { %2824 = vmatpush.bf16.msra.mxu1 %v11419_v24 }
 0x80f   : > { %2825 = vmatpush.bf16.msra.mxu1 %v11418_v29 }
 0x813   : > { %2826 = vmatpush.bf16.msra.mxu1 %v11417_v16 }
 0x846   : > { %v2199_v47 = vpop.xlane.xlu2 %2198 }
 0x847   : > { %v13132_v6 = vmul.f32 %v13129_v60, %v2199_v47  ;;  %v11429_v47 = vld [vmem:[#allocation9 + $0xe8] sm:$0xff] }
 0x848   : > { %v2214_v9 = vpop.xlane.xlu1 %2213  ;;  %2836 = vmatpush.bf16.msra.mxu2 %v11429_v47 }
 0x849   : > { %v2219_v10 = vmul.f32 %v13132_v6, %v13132_v6  ;;  %v2217_v12 = vmul.f32 %v2214_v9, %v13129_v60 }
 0x84b   : > { %v2221_v22 = vsub.f32 %v2217_v12, %v2219_v10  ;;  %v2223_v10 = vsub.f32 %v13111_v0, %v13132_v6  ;;  %v12073_v0 = vld [vmem:[%s14492_s12] ss:$0 sm:$0xff] }
 0x84c   : > { %2837 = vmatpush.bf16.msra.mxu2 %v11428_v28 }
 0x84d   : > { %v13137_v36 = vadd.f32 1e-05, %v2221_v22 }
 0x84e   : > { %v2201_v40 = vpop.xlane.xlu0 %2200 }
 0x84f   : > { %12171 = vrsqrt.f32 %v13137_v36  ;;  %v13141_v42 = vmul.f32 %v13129_v60, %v2201_v40  ;;  %vm2233_vm10 = vweird.f32 %v13137_v36  ;;  %v11416_v40 = vld [vmem:[#allocation9 + $0x80] sm:$0xff] }
 0x850   : > { %v2216_v37 = vpop.xlane.xlu2 %2215  ;;  %2838 = vmatpush.bf16.msra.mxu2 %v11427_v33  ;;  %2827 = vmatpush.bf16.msra.mxu1 %v11416_v40  ;;  %v11446_v40 = vld [vmem:[#allocation2 + $0x70] sm:$0xff] }
 0x851   : > { %v2220_v51 = vmul.f32 %v13141_v42, %v13141_v42  ;;  %v2218_v49 = vmul.f32 %v2216_v37, %v13129_v60  ;;  %v2224_v61 = vsub.f32 %v13117_v58, %v13141_v42  ;;  %v11411_v58 = vld [vmem:[#allocation9 + $0x58] sm:$0xff]  ;;  %v11424_v42 = vld [vmem:[#allocation9 + $0xc0] sm:$0xff] }
 0x852   : > { %2810 = vmatpush.bf16.msra.mxu0 %v11411_v58 }
 0x853   : > { %v2222_v52 = vsub.f32 %v2218_v49, %v2220_v51  ;;  %v2297_v49 = vperm.slane %v2294_v46, 1  ;;  %v11436_v46 = vld [vmem:[%s14525_s24 + $0x60] sm:$0xff] }
 0x854   : > { %2839 = vmatpush.bf16.msra.mxu2 %v11426_v19  ;;  %v11447_v19 = vld [vmem:[#allocation2 + $0x78] sm:$0xff] }
 0x855   : > { %v12172_v56 = vpop.eup %12171  ;;  %v2226_v14 = vadd.f32 1e-05, %v2222_v52 }
 0x856   : > { %v2228_v50 = vmul.f32 %v12172_v56, %v13137_v36  ;;  %vm2234_vm9 = vweird.f32 %v12172_v56  ;;  %2811 = vmatpush.bf16.msra.mxu0 %v11410_v44  ;;  %v11409_v36 = vld [vmem:[#allocation9 + $0x48] sm:$0xff] }
 0x857   : > { %12173 = vrsqrt.f32 %v2226_v14  ;;  %vm2235_vm11 = vmor %vm2233_vm10, %vm2234_vm9  ;;  %vm2243_vm13 = vweird.f32 %v2226_v14 }
 0x858   : > { %v2229_v63 = vmul.f32 %v12172_v56, %v2228_v50  ;;  %2840 = vmatpush.bf16.msra.mxu2 %v11425_v41  ;;  %v11437_v41 = vld [vmem:[%s14525_s24 + $0x68] sm:$0xff] }
 0x85a   : > { %v2230_v31 = vmul.f32 0.5, %v2229_v63  ;;  %2812 = vmatpush.bf16.msra.mxu0 %v11409_v36 }
 0x85c   : > { %v2231_v4 = vsub.f32 1.5, %v2230_v31  ;;  %2841 = vmatpush.bf16.msra.mxu2 %v11424_v42  ;;  %v11453_v42 = vld [vmem:[#allocation4 + $0x68] sm:$0xff] }
 0x85d   : > { %v12174_v21 = vpop.eup %12173 }
 0x85e   : > { %v2232_v7 = vmul.f32 %v12172_v56, %v2231_v4  ;;  %v2238_v30 = vmul.f32 %v12174_v21, %v2226_v14  ;;  %vm2244_vm12 = vweird.f32 %v12174_v21  ;;  %2813 = vmatpush.bf16.msra.mxu0 %v11408_v39  ;;  %v11455_v39 = vld [vmem:[#allocation4 + $0x78] sm:$0xff] }
 0x85f   : > { %vm2245_vm14 = vmor %vm2243_vm13, %vm2244_vm12 }
 0x860   : > { %v2239_v8 = vmul.f32 %v12174_v21, %v2238_v30  ;;  %v2236_v9 = vsel %vm2235_vm11, %v12172_v56, %v2232_v7 }
 0x861   : > { %v2247_v13 = vmul.f32 %v2236_v9, %v2223_v10 }
 0x862   : > { %v2240_v57 = vmul.f32 0.5, %v2239_v8 }
 0x863   : > { %v2253_v62 = vmul.f32 %v12072_v48, %v2247_v13  ;;  %v12074_v13 = vld [vmem:[%s14496_s16] ss:$0 sm:$0xff] }
 0x864   : > { %v2241_v12 = vsub.f32 1.5, %v2240_v57 }
 0x865   : > { %v13158_v22 = vadd.f32 %v12073_v0, %v2253_v62 }
 0x866   : > { %v2242_v17 = vmul.f32 %v12174_v21, %v2241_v12 }
 0x868   : > { %v2246_v18 = vsel %vm2245_vm14, %v12174_v21, %v2242_v17 }
 0x869   : > { %v2248_v20 = vmul.f32 %v2246_v18, %v2224_v61 }
 0x86b   : > { %v2254_v6 = vmul.f32 %v12072_v48, %v2248_v20 }
 0x86d   : > { %v13160_v23 = vadd.f32 %v12073_v0, %v2254_v6 }
 0x86f   : > { %v2261_v11 = vpack.c.bf16 %v13160_v23, %v13158_v22 }
 0x871   : > { %2472 = vmatmul.bf16.vlgmr.msrb.gmra.mxu3 %v2261_v11  ;;  %2486 = vmatmul.bf16.vlgmr.msrb.gmra.mxu0 %v2261_v11 }
 0x872   : > { %2500 = vmatmul.bf16.vlgmr.msrb.gmra.mxu1 %v2261_v11  ;;  %2514 = vmatmul.bf16.vlgmr.msrb.gmra.mxu2 %v2261_v11 }
 0x873   : > { %2977 = vmatpush.bf16.msrb.mxu3 %v11439_v15  ;;  %3061 = vmatpush.bf16.msrb.mxu0 %v11447_v19  ;;  %v12078_v19 = vld [vmem:[%s14488_s8 + $0x1] ss:$0 sm:$0xff] }
 0x874   : > { %3145 = vmatpush.bf16.msrb.mxu1 %v11455_v39 }
 0x877   : > { %3062 = vmatpush.bf16.msrb.mxu0 %v11446_v40 }
 0x878   : > { %3146 = vmatpush.bf16.msrb.mxu1 %v11454_v34 }
 0x87b   : > { %3063 = vmatpush.bf16.msrb.mxu0 %v11445_v43 }
 0x87c   : > { %3147 = vmatpush.bf16.msrb.mxu1 %v11453_v42 }
 0x8ee   : > { %v2487_v37 = vpop.f32.mrf.mxu0 }
 0x8ef   : > { %v2501_v51 = vpop.f32.mrf.mxu1  ;;  %v2488_v52 = vadd.f32 %v2487_v37, %v2297_v49  ;;  %v11444_v37 = vld [vmem:[#allocation2 + $0x60] sm:$0xff] }
 0x8f0   : > { %v2502_v54 = vadd.f32 %v2501_v51, %v2298_v27  ;;  %v11452_v51 = vld [vmem:[#allocation4 + $0x60] sm:$0xff]  ;;  %3064 = vmatpush.bf16.msrb.mxu0 %v11444_v37 }
 0x8f1   : > { %v2521_v50 = vmax.f32 %v2488_v52, 0.0  ;;  %3148 = vmatpush.bf16.msrb.mxu1 %v11452_v51 }
 0x8f2   : > { %v2522_v1 = vmax.f32 %v2502_v54, 0.0  ;;  %v11442_v54 = vld [vmem:[#allocation2 + $0x50] sm:$0xff] }
 0x8f4   : > { %v2473_v45 = vpop.f32.mrf.mxu3 }
 0x8f5   : > { %v2515_v35 = vpop.f32.mrf.mxu2  ;;  %v2474_v3 = vadd.f32 %v2473_v45, %v2296_v55  ;;  %v11451_v45 = vld [vmem:[#allocation4 + $0x58] sm:$0xff] }
 0x8f6   : > { %v2489_v38 = vpop.f32.mrf.mxu0  ;;  %v2516_v31 = vadd.f32 %v2515_v35, %v2299_v59  ;;  %3149 = vmatpush.bf16.msrb.mxu1 %v11451_v45  ;;  %v11434_v35 = vld [vmem:[%s14525_s24 + $0x50] sm:$0xff] }
 0x8f7   : > { %v2490_v56 = vadd.f32 %v2489_v38, %v2297_v49  ;;  %v2503_v14 = vpop.f32.mrf.mxu1  ;;  %v2520_v30 = vmax.f32 %v2474_v3, 0.0  ;;  %v11435_v49 = vld [vmem:[%s14525_s24 + $0x58] sm:$0xff]  ;;  %v11450_v38 = vld [vmem:[#allocation4 + $0x50] sm:$0xff]  ;;  %v11440_v3 = vld [vmem:[#allocation2 + $0x40] sm:$0xff] }
 0x8f8   : > { %v2504_v26 = vadd.f32 %v2503_v14, %v2298_v27  ;;  %v2523_v9 = vmax.f32 %v2516_v31, 0.0  ;;  %v11443_v27 = vld [vmem:[#allocation2 + $0x58] sm:$0xff]  ;;  %v11448_v31 = vld [vmem:[#allocation4 + $0x40] sm:$0xff] }
 0x8f9   : > { %v2525_v63 = vmax.f32 %v2490_v56, 0.0  ;;  %3065 = vmatpush.bf16.msrb.mxu0 %v11443_v27 }
 0x8fa   : > { %v2526_v2 = vmax.f32 %v2504_v26, 0.0  ;;  %3150 = vmatpush.bf16.msrb.mxu1 %v11450_v38  ;;  %v11433_v26 = vld [vmem:[%s14525_s24 + $0x48] sm:$0xff] }
 0x8fb   : > { %v2529_v47 = vpack.c.bf16 %v2525_v63, %v2521_v50  ;;  %v11441_v50 = vld [vmem:[#allocation2 + $0x48] sm:$0xff] }
 0x8fc   : > { %v2530_v4 = vpack.c.bf16 %v2526_v2, %v2522_v1  ;;  %v2475_v53 = vpop.f32.mrf.mxu3  ;;  %v11449_v63 = vld [vmem:[#allocation4 + $0x48] sm:$0xff]  ;;  %v11432_v2 = vld [vmem:[%s14525_s24 + $0x40] sm:$0xff] }
 0x8fd   : > { %v2476_v5 = vadd.f32 %v2475_v53, %v2296_v55  ;;  %v2517_v21 = vpop.f32.mrf.mxu2  ;;  %2814 = vmatmul.bf16.vlgmr.msra.gmra.mxu0 %v2529_v47 }
 0x8fe   : > { %v2518_v7 = vadd.f32 %v2517_v21, %v2299_v59  ;;  %2828 = vmatmul.bf16.vlgmr.msra.gmra.mxu1 %v2530_v4  ;;  %3066 = vmatpush.bf16.msrb.mxu0 %v11442_v54 }
 0x8ff   : > { %v2524_v8 = vmax.f32 %v2476_v5, 0.0  ;;  %3151 = vmatpush.bf16.msrb.mxu1 %v11449_v63 }
 0x900   : > { %v2527_v57 = vmax.f32 %v2518_v7, 0.0 }
 0x901   : > { %v2528_v10 = vpack.c.bf16 %v2524_v8, %v2520_v30 }
 0x902   : > { %v2531_v12 = vpack.c.bf16 %v2527_v57, %v2523_v9  ;;  %3067 = vmatpush.bf16.msrb.mxu0 %v11441_v50 }
 0x903   : > { %2800 = vmatmul.bf16.vlgmr.msra.gmra.mxu3 %v2528_v10  ;;  %3152 = vmatpush.bf16.msrb.mxu1 %v11448_v31 }
 0x904   : > { %2842 = vmatmul.bf16.vlgmr.msra.gmra.mxu2 %v2531_v12 }
 0x906   : > { %3068 = vmatpush.bf16.msrb.mxu0 %v11440_v3  ;;  %v13285_v3 = vld [vmem:[%s14528_s21] sm:$0xff] }
 0x97a   : > { %v2815_v48 = vpop.f32.mrf.mxu0 }
 0x97b   : > { %v2829_v18 = vpop.f32.mrf.mxu1 }
 0x982   : > { %v2817_v25 = vpop.f32.mrf.mxu0 }
 0x983   : > { %v2831_v29 = vpop.f32.mrf.mxu1 }
 0x986   : > { %v2801_v17 = vpop.f32.mrf.mxu3 }
 0x987   : > { %v2802_v61 = vadd.f32 %v12074_v13, %v2801_v17  ;;  %v2843_v62 = vpop.f32.mrf.mxu2 }
 0x989   : > { %v2816_v20 = vadd.f32 %v2815_v48, %v2802_v61 }
 0x98b   : > { %v2830_v0 = vadd.f32 %v2829_v18, %v2816_v20 }
 0x98d   : > { %v2844_v6 = vadd.f32 %v2843_v62, %v2830_v0 }
 0x98e   : > { %v2803_v11 = vpop.f32.mrf.mxu3 }
 0x98f   : > { %v13171_v58 = vadd.f32 %v2844_v6, %v13158_v22  ;;  %v2804_v24 = vadd.f32 %v12074_v13, %v2803_v11  ;;  %v2845_v33 = vpop.f32.mrf.mxu2 }
 0x991   : > { %v2818_v28 = vadd.f32 %v2817_v25, %v2804_v24  ;;  %2850 = vadd.xlane.f32.xlu2 %v13171_v58  ;;  %v2856_v44 = vmul.f32 %v13171_v58, %v13171_v58  ;;  %v12075_v24 = vld [vmem:[%s14497_s17] ss:$0 sm:$0xff] }
 0x993   : > { %v2832_v32 = vadd.f32 %v2831_v29, %v2818_v28  ;;  %2858 = vadd.xlane.f32.xlu1 %v2856_v44 }
 0x995   : > { %v2846_v36 = vadd.f32 %v2845_v33, %v2832_v32  ;;  %v12076_v33 = vld [vmem:[%s14498_s18] ss:$0 sm:$0xff] }
 0x997   : > { %v13177_v16 = vadd.f32 %v2846_v36, %v13160_v23  ;;  %v11438_v23 = vld [vmem:[%s14525_s24 + $0x70] sm:$0xff] }
 0x998   : > { %2978 = vmatpush.bf16.msrb.mxu3 %v11438_v23 }
 0x999   : > { %2852 = vadd.xlane.f32.xlu0 %v13177_v16  ;;  %v2857_v22 = vmul.f32 %v13177_v16, %v13177_v16 }
 0x99b   : > { %2860 = vadd.xlane.f32.xlu2 %v2857_v22 }
 0x99c   : > { %2979 = vmatpush.bf16.msrb.mxu3 %v11437_v41  ;;  %v12079_v41 = vld [vmem:[%s14527_s3 + $0x1] ss:$0 sm:$0xff] }
 0x9a0   : > { %2980 = vmatpush.bf16.msrb.mxu3 %v11436_v46 }
 0x9a4   : > { %2981 = vmatpush.bf16.msrb.mxu3 %v11435_v49 }
 0x9a8   : > { %2982 = vmatpush.bf16.msrb.mxu3 %v11434_v35 }
 0x9ac   : > { %2983 = vmatpush.bf16.msrb.mxu3 %v11433_v26 }
 0x9b0   : > { %2984 = vmatpush.bf16.msrb.mxu3 %v11432_v2 }
 0xa04   : > { %v2851_v52 = vpop.xlane.xlu2 %2850 }
 0xa05   : > { %v2854_v55 = vmul.f32 %v2851_v52, %v13129_v60 }
 0xa06   : > { %v2859_v56 = vpop.xlane.xlu1 %2858 }
 0xa07   : > { %v2864_v14 = vmul.f32 %v2854_v55, %v2854_v55  ;;  %v2862_v59 = vmul.f32 %v2859_v56, %v13129_v60  ;;  %v2868_v0 = vsub.f32 %v13171_v58, %v2854_v55 }
 0xa09   : > { %v2866_v1 = vsub.f32 %v2862_v59, %v2864_v14 }
 0xa0b   : > { %v2870_v47 = vadd.f32 1e-05, %v2866_v1 }
 0xa0c   : > { %v2853_v4 = vpop.xlane.xlu0 %2852 }
 0xa0d   : > { %12175 = vrsqrt.f32 %v2870_v47  ;;  %v2855_v53 = vmul.f32 %v2853_v4, %v13129_v60  ;;  %vm2878_vm8 = vweird.f32 %v2870_v47 }
 0xa0e   : > { %v2861_v5 = vpop.xlane.xlu2 %2860 }
 0xa0f   : > { %v2865_v21 = vmul.f32 %v2855_v53, %v2855_v53  ;;  %v2863_v7 = vmul.f32 %v2861_v5, %v13129_v60  ;;  %v2869_v28 = vsub.f32 %v13177_v16, %v2855_v53  ;;  %v12077_v16 = vld [vmem:[%s14486_s6 + $0x1] ss:$0 sm:$0xff] }
 0xa11   : > { %v2867_v30 = vsub.f32 %v2863_v7, %v2865_v21 }
 0xa13   : > { %v12176_v8 = vpop.eup %12175  ;;  %v2871_v9 = vadd.f32 1e-05, %v2867_v30 }
 0xa14   : > { %v2873_v57 = vmul.f32 %v12176_v8, %v2870_v47  ;;  %vm2879_vm15 = vweird.f32 %v12176_v8 }
 0xa15   : > { %12177 = vrsqrt.f32 %v2871_v9  ;;  %vm2880_vm9 = vmor %vm2878_vm8, %vm2879_vm15  ;;  %vm2888_vm11 = vweird.f32 %v2871_v9 }
 0xa16   : > { %v2874_v10 = vmul.f32 %v12176_v8, %v2873_v57 }
 0xa18   : > { %v2875_v12 = vmul.f32 0.5, %v2874_v10 }
 0xa1a   : > { %v2876_v13 = vsub.f32 1.5, %v2875_v12 }
 0xa1b   : > { %v12178_v48 = vpop.eup %12177 }
 0xa1c   : > { %v2877_v17 = vmul.f32 %v12176_v8, %v2876_v13  ;;  %v2883_v61 = vmul.f32 %v12178_v48, %v2871_v9  ;;  %vm2889_vm10 = vweird.f32 %v12178_v48 }
 0xa1d   : > { %vm2890_vm12 = vmor %vm2888_vm11, %vm2889_vm10 }
 0xa1e   : > { %v2884_v18 = vmul.f32 %v12178_v48, %v2883_v61  ;;  %v2881_v20 = vsel %vm2880_vm9, %v12176_v8, %v2877_v17 }
 0xa1f   : > { %v2892_v11 = vmul.f32 %v2881_v20, %v2868_v0 }
 0xa20   : > { %v2885_v62 = vmul.f32 0.5, %v2884_v18 }
 0xa21   : > { %v2898_v32 = vmul.f32 %v12075_v24, %v2892_v11 }
 0xa22   : > { %v2886_v6 = vsub.f32 1.5, %v2885_v62 }
 0xa23   : > { %v13218_v36 = vadd.f32 %v12076_v33, %v2898_v32 }
 0xa24   : > { %v2887_v25 = vmul.f32 %v12178_v48, %v2886_v6 }
 0xa26   : > { %v2891_v44 = vsel %vm2890_vm12, %v12178_v48, %v2887_v25 }
 0xa27   : > { %v2893_v29 = vmul.f32 %v2891_v44, %v2869_v28 }
 0xa29   : > { %v2899_v58 = vmul.f32 %v12075_v24, %v2893_v29 }
 0xa2b   : > { %v13220_v22 = vadd.f32 %v12076_v33, %v2899_v58 }
 0xa2d   : > { %v2906_v15 = vpack.c.bf16 %v13220_v22, %v13218_v36 }
 0xa2f   : > { %2985 = vmatmul.bf16.vlgmr.msrb.gmra.mxu3 %v2906_v15  ;;  %3069 = vmatmul.bf16.vlgmr.msrb.gmra.mxu0 %v2906_v15 }
 0xa30   : > { %3153 = vmatmul.bf16.vlgmr.msrb.gmra.mxu1 %v2906_v15 }
 0xaac   : > { %v3070_v39 = vpop.f32.mrf.mxu0 }
 0xaad   : > { %v3071_v23 = vadd.f32 %v12077_v16, %v3070_v39  ;;  %v3154_v40 = vpop.f32.mrf.mxu1 }
 0xaae   : > { %v3155_v34 = vadd.f32 %v12078_v19, %v3154_v40 }
 0xaaf   : > { %3673 = vrot.lane.b32.xlu2 %v3071_v23, %s12580_s7  ;;  %3543 = vrot.lane.b32.xlu1 %v3071_v23, %s12582_s2 }
 0xab0   : > { %3251 = vmatpush.msra.mxu0 %v3155_v34  ;;  %3281 = vrot.lane.b32.xlu0 %v3071_v23, %s12578_s5 }
 0xab1   : > { %10075 = vmatpush.xpose.msk.msrb.mxu2 %vm1003_vm0, %v3071_v23 }
 0xab2   : > { %v2986_v43 = vpop.f32.mrf.mxu3 }
 0xab3   : > { %v2987_v42 = vadd.f32 %v12079_v41, %v2986_v43 }
 0xab4   : > { %v3072_v46 = vpop.f32.mrf.mxu0 }
 0xab5   : > { %v3073_v37 = vadd.f32 %v12077_v16, %v3072_v46  ;;  %v3156_v51 = vpop.f32.mrf.mxu1  ;;  %10076 = vmatmul.msk.f32.vlgmr.msrb.gmra.mxu2 %vm1003_vm0, %v2987_v42 }
 0xab6   : > { %v3157_v49 = vadd.f32 %v12078_v19, %v3156_v51 }
 0xab7   : > { %10077 = vmatpush.xpose.msk.msra.mxu3 %vm1003_vm0, %v3073_v37  ;;  %3309 = vrot.lane.b32.xlu1 %v3073_v37, %s12578_s5 }
 0xab8   : > { %3274 = vmatpush.msra.mxu1 %v3157_v49  ;;  %3413 = vrot.lane.b32.xlu0 %v3071_v23, %s12579_s0  ;;  %v13241_v27 = vpack.i.bf16 %v3157_v49, %v3155_v34 }
 0xab9   : > { %3279 = vrot.lane.b32.xlu2 %v2987_v42, %s12578_s5 }
 0xaba   : > { %v2988_v45 = vpop.f32.mrf.mxu3 }
 0xabb   : > { %v2989_v52 = vadd.f32 %v12079_v41, %v2988_v45 }
 0xabd   : > { %10078 = vmatmul.msk.f32.vlgmr.msra.gmra.mxu3 %vm1003_vm0, %v2989_v52 }
 0xabf   : > { %3441 = vrot.lane.b32.xlu1 %v3073_v37, %s12579_s0 }
 0xac0   : > { %3541 = vrot.lane.b32.xlu0 %v2987_v42, %s12582_s2 }
 0xac1   : > { %3411 = vrot.lane.b32.xlu2 %v2987_v42, %s12579_s0 }
 0xac7   : > { %3671 = vrot.lane.b32.xlu1 %v2987_v42, %s12580_s7 }
 0xac8   : > { %3307 = vrot.lane.b32.xlu0 %v2989_v52, %s12578_s5 }
 0xac9   : > { %3571 = vrot.lane.b32.xlu2 %v3073_v37, %s12582_s2 }
 0xacf   : > { %3569 = vrot.lane.b32.xlu1 %v2989_v52, %s12582_s2 }
 0xad0   : > { %3439 = vrot.lane.b32.xlu0 %v2989_v52, %s12579_s0 }
 0xad1   : > { %3801 = vrot.lane.b32.xlu2 %v2987_v42, %s12581_s13 }
 0xad7   : > { %3831 = vrot.lane.b32.xlu1 %v3073_v37, %s12581_s13 }
 0xad8   : > { %3701 = vrot.lane.b32.xlu0 %v3073_v37, %s12580_s7 }
 0xad9   : > { %3699 = vrot.lane.b32.xlu2 %v2989_v52, %s12580_s7 }
 0xadf   : > { %3933 = vrot.lane.b32.xlu1 %v3071_v23, %s12583_s28 }
 0xae0   : > { %3803 = vrot.lane.b32.xlu0 %v3071_v23, %s12581_s13 }
 0xae1   : > { %3961 = vrot.lane.b32.xlu2 %v3073_v37, %s12583_s28 }
 0xae7   : > { %3959 = vrot.lane.b32.xlu1 %v2989_v52, %s12583_s28 }
 0xae8   : > { %3829 = vrot.lane.b32.xlu0 %v2989_v52, %s12581_s13 }
 0xae9   : > { %4063 = vrot.lane.b32.xlu2 %v3071_v23, %s12584_s4 }
 0xaef   : > { %4061 = vrot.lane.b32.xlu1 %v2987_v42, %s12584_s4 }
 0xaf0   : > { %3931 = vrot.lane.b32.xlu0 %v2987_v42, %s12583_s28 }
 0xaf1   : > { %4089 = vrot.lane.b32.xlu2 %v2989_v52, %s12584_s4 }
 0xaf7   : > { %11859 = vrot.lane.b32.xlu1 %v13241_v27, %s12578_s5 }
 0xaf8   : > { %4091 = vrot.lane.b32.xlu0 %v3073_v37, %s12584_s4 }
 0xaf9   : > { %11864 = vrot.lane.b32.xlu2 %v13241_v27, %s12579_s0 }
 0xaff   : > { %11869 = vrot.lane.b32.xlu1 %v13241_v27, %s12582_s2 }
 0xb09   : > { %v3674_v35 = vpop.permute.xlu2 %3673 }
 0xb13   : > { %v3280_v54 = vpop.permute.xlu2 %3279 }
 0xb1b   : > { %v3412_v56 = vpop.permute.xlu2 %3411 }
 0xb21   : > { %v3544_v38 = vpop.permute.xlu1 %3543 }
 0xb22   : > { %v3282_v55 = vpop.permute.xlu0 %3281 }
 0xb23   : > { %10081 = vmatpush.xpose.msk.msra.mxu2 %vm1003_vm0, %v3282_v55  ;;  %v3572_v26 = vpop.permute.xlu2 %3571 }
 0xb26   : > { %10082 = vmatmul.msk.f32.vlgmr.msra.gmra.mxu2 %vm1003_vm0, %v3280_v54 }
 0xb29   : > { %v3310_v14 = vpop.permute.xlu1 %3309 }
 0xb2a   : > { %v3414_v59 = vpop.permute.xlu0 %3413  ;;  %10083 = vmatpush.xpose.msk.msrb.mxu3 %vm1003_vm0, %v3310_v14 }
 0xb2b   : > { %10087 = vmatpush.xpose.msk.msrb.mxu2 %vm1003_vm0, %v3414_v59  ;;  %v3802_v1 = vpop.permute.xlu2 %3801 }
 0xb2e   : > { %10088 = vmatmul.msk.f32.vlgmr.msrb.gmra.mxu2 %vm1003_vm0, %v3412_v56 }
 0xb2f   : > { %10093 = vmatpush.xpose.msk.msra.mxu2 %vm1003_vm0, %v3544_v38 }
 0xb31   : > { %v3442_v50 = vpop.permute.xlu1 %3441 }
 0xb32   : > { %v3542_v63 = vpop.permute.xlu0 %3541  ;;  %10089 = vmatpush.xpose.msk.msra.mxu3 %vm1003_vm0, %v3442_v50 }
 0xb33   : > { %10099 = vmatpush.xpose.msk.msrb.mxu2 %vm1003_vm0, %v3674_v35  ;;  %v3700_v30 = vpop.permute.xlu2 %3699 }
 0xb36   : > { %10094 = vmatmul.msk.f32.vlgmr.msra.gmra.mxu2 %vm1003_vm0, %v3542_v63 }
 0xb38   : > { %v3182_v2 = vpop.f32.mrf.mxu2 }
 0xb39   : > { %v3183_v47 = vadd.f32 %v13285_v3, %v3182_v2  ;;  %v3672_v31 = vpop.permute.xlu1 %3671 }
 0xb3a   : > { %v3308_v4 = vpop.permute.xlu0 %3307 }
 0xb3b   : > { %10084 = vmatmul.msk.f32.vlgmr.msrb.gmra.mxu3 %vm1003_vm0, %v3308_v4  ;;  %v3211_v53 = vsel %vm1056_vm1, %v3183_v47, -inf  ;;  %v3962_v12 = vpop.permute.xlu2 %3961 }
 0xb3c   : > { %10095 = vmatpush.xpose.msk.msrb.mxu3 %vm1003_vm0, %v3572_v26  ;;  %3212 = vmax.xlane.f32.xlu0 %v3211_v53 }
 0xb3e   : > { %10100 = vmatmul.msk.f32.vlgmr.msrb.gmra.mxu2 %vm1003_vm0, %v3672_v31 }
 0xb40   : > { %v3208_v5 = vpop.f32.mrf.mxu3 }
 0xb41   : > { %v3209_v21 = vadd.f32 %v13285_v3, %v3208_v5  ;;  %v3570_v7 = vpop.permute.xlu1 %3569 }
 0xb42   : > { %v3440_v8 = vpop.permute.xlu0 %3439 }
 0xb43   : > { %10090 = vmatmul.msk.f32.vlgmr.msra.gmra.mxu3 %vm1003_vm0, %v3440_v8  ;;  %v3214_v9 = vsel %vm1056_vm1, %v3209_v21, -inf  ;;  %v4064_v17 = vpop.permute.xlu2 %4063 }
 0xb44   : > { %3215 = vmax.xlane.f32.xlu1 %v3214_v9 }
 0xb49   : > { %v3832_v57 = vpop.permute.xlu1 %3831 }
 0xb4a   : > { %v3702_v10 = vpop.permute.xlu0 %3701 }
 0xb4b   : > { %10096 = vmatmul.msk.f32.vlgmr.msrb.gmra.mxu3 %vm1003_vm0, %v3570_v7  ;;  %v4090_v25 = vpop.permute.xlu2 %4089 }
 0xb4c   : > { %10101 = vmatpush.xpose.msk.msra.mxu3 %vm1003_vm0, %v3702_v10 }
 0xb50   : > { %10107 = vmatpush.xpose.msk.msrb.mxu3 %vm1003_vm0, %v3832_v57 }
 0xb51   : > { %v3934_v13 = vpop.permute.xlu1 %3933 }
 0xb52   : > { %v3804_v48 = vpop.permute.xlu0 %3803 }
 0xb53   : > { %10102 = vmatmul.msk.f32.vlgmr.msra.gmra.mxu3 %vm1003_vm0, %v3700_v30  ;;  %10105 = vmatpush.xpose.msk.msra.mxu2 %vm1003_vm0, %v3804_v48 }
 0xb54   : > { %10113 = vmatpush.xpose.msk.msra.mxu3 %vm1003_vm0, %v3962_v12 }
 0xb56   : > { %10106 = vmatmul.msk.f32.vlgmr.msra.gmra.mxu2 %vm1003_vm0, %v3802_v1 }
 0xb57   : > { %10111 = vmatpush.xpose.msk.msrb.mxu2 %vm1003_vm0, %v3934_v13 }
 0xb59   : > { %v3960_v61 = vpop.permute.xlu1 %3959 }
 0xb5a   : > { %v3830_v18 = vpop.permute.xlu0 %3829 }
 0xb5b   : > { %10117 = vmatpush.xpose.msk.msra.mxu2 %vm1003_vm0, %v4064_v17  ;;  %10108 = vmatmul.msk.f32.vlgmr.msrb.gmra.mxu3 %vm1003_vm0, %v3830_v18 }
 0xb61   : > { %v4062_v20 = vpop.permute.xlu1 %4061 }
 0xb62   : > { %v3932_v62 = vpop.permute.xlu0 %3931 }
 0xb63   : > { %10112 = vmatmul.msk.f32.vlgmr.msrb.gmra.mxu2 %vm1003_vm0, %v3932_v62  ;;  %10114 = vmatmul.msk.f32.vlgmr.msra.gmra.mxu3 %vm1003_vm0, %v3960_v61  ;;  %v11865_v62 = vpop.permute.xlu2 %11864 }
 0xb69   : > { %v11860_v0 = vpop.permute.xlu1 %11859 }
 0xb6a   : > { %v11862_v6 = vunpack.i.h.bf16 %v11860_v0  ;;  %v11861_v11 = vunpack.i.l.bf16 %v11860_v0  ;;  %v4092_v24 = vpop.permute.xlu0 %4091 }
 0xb6b   : > { %10118 = vmatmul.msk.f32.vlgmr.msra.gmra.mxu2 %vm1003_vm0, %v4062_v20  ;;  %10119 = vmatpush.xpose.msk.msrb.mxu3 %vm1003_vm0, %v4092_v24 }
 0xb6c   : > { %3379 = vmatpush.msrb.mxu0 %v11861_v11  ;;  %3406 = vmatpush.msrb.mxu1 %v11862_v6 }
 0xb6e   : > { %10120 = vmatmul.msk.f32.vlgmr.msrb.gmra.mxu3 %vm1003_vm0, %v4090_v25 }
 0xb71   : > { %v13320_v39 = vpop.permute.xlu1 %11869 }
 0xba9   : > { %v3304_v28 = vpop.f32.mrf.mxu2 }
 0xbaa   : > { %v13311_v44 = vadd.f32 %v13285_v3, %v3304_v28 }
 0xbac   : > { %v3335_v29 = vsel %vm1056_vm1, %v13311_v44, -inf }
 0xbad   : > { %3336 = vmax.xlane.f32.xlu2 %v3335_v29 }
 0xbaf   : > { %v3213_v32 = vpop.xlane.xlu0 %3212 }
 0xbb0   : > { %v3217_v33 = vsub.f32 %v3183_v47, %v3213_v32 }
 0xbb1   : > { %v3436_v58 = vpop.f32.mrf.mxu2 }
 0xbb2   : > { %v3219_v15 = vmul.f32 1.442695, %v3217_v33  ;;  %v13316_v16 = vadd.f32 %v13285_v3, %v3436_v58 }
 0xbb4   : > { %12179 = vpow2.f32 %v3219_v15  ;;  %v3467_v19 = vsel %vm1056_vm1, %v13316_v16, -inf }
 0xbb5   : > { %3468 = vmax.xlane.f32.xlu1 %v3467_v19 }
 0xbb7   : > { %v3216_v34 = vpop.xlane.xlu1 %3215 }
 0xbb8   : > { %v3218_v42 = vsub.f32 %v3209_v21, %v3216_v34 }
 0xbb9   : > { %v3566_v46 = vpop.f32.mrf.mxu2 }
 0xbba   : > { %v13322_v23 = vpop.eup %12179  ;;  %v3221_v51 = vmul.f32 1.442695, %v3218_v42  ;;  %v13332_v49 = vadd.f32 %v13285_v3, %v3566_v46 }
 0xbbb   : > { %v3223_v40 = vsel %vm1056_vm1, %v13322_v23, 0.0 }
 0xbbc   : > { %3224 = vadd.xlane.f32.xlu2 %v3223_v40  ;;  %12181 = vpow2.f32 %v3221_v51  ;;  %v3597_v35 = vsel %vm1056_vm1, %v13332_v49, -inf  ;;  %v11866_v40 = vunpack.i.l.bf16 %v11865_v62 }
 0xbbe   : > { %v3332_v41 = vpop.f32.mrf.mxu3 }
 0xbbf   : > { %v13327_v43 = vadd.f32 %v13285_v3, %v3332_v41 }
 0xbc1   : > { %v3338_v37 = vsel %vm1056_vm1, %v13327_v43, -inf  ;;  %v3696_v38 = vpop.f32.mrf.mxu2 }
 0xbc2   : > { %3339 = vmax.xlane.f32.xlu0 %v3338_v37  ;;  %v13341_v55 = vpop.eup %12181  ;;  %v13344_v56 = vadd.f32 %v13285_v3, %v3696_v38 }
 0xbc3   : > { %v3226_v50 = vsel %vm1056_vm1, %v13341_v55, 0.0 }
 0xbc4   : > { %v3727_v63 = vsel %vm1056_vm1, %v13344_v56, -inf }
 0xbc6   : > { %v3464_v45 = vpop.f32.mrf.mxu3 }
 0xbc7   : > { %v13335_v52 = vadd.f32 %v13285_v3, %v3464_v45 }
 0xbc9   : > { %v3470_v54 = vsel %vm1056_vm1, %v13335_v52, -inf }
 0xbca   : > { %3598 = vmax.xlane.f32.xlu0 %v3597_v35  ;;  %3471 = vmax.xlane.f32.xlu2 %v3470_v54 }
 0xbce   : > { %v3594_v14 = vpop.f32.mrf.mxu3 }
 0xbcf   : > { %v13347_v59 = vadd.f32 %v13285_v3, %v3594_v14  ;;  %v11867_v14 = vunpack.i.h.bf16 %v11865_v62 }
 0xbd1   : > { %v3600_v26 = vsel %vm1056_vm1, %v13347_v59, -inf }
 0xbd2   : > { %3601 = vmax.xlane.f32.xlu1 %v3600_v26  ;;  %3227 = vadd.xlane.f32.xlu0 %v3226_v50 }
 0xbd3   : > { %3728 = vmax.xlane.f32.xlu2 %v3727_v63 }
 0xbd6   : > { %v3724_v1 = vpop.f32.mrf.mxu3 }
 0xbd7   : > { %v13356_v2 = vadd.f32 %v13285_v3, %v3724_v1 }
 0xbd9   : > { %v3826_v47 = vpop.f32.mrf.mxu2  ;;  %v3730_v31 = vsel %vm1056_vm1, %v13356_v2, -inf }
 0xbda   : > { %v13361_v4 = vadd.f32 %v13285_v3, %v3826_v47  ;;  %3731 = vmax.xlane.f32.xlu0 %v3730_v31 }
 0xbdc   : > { %v3857_v53 = vsel %vm1056_vm1, %v13361_v4, -inf }
 0xbdd   : > { %3858 = vmax.xlane.f32.xlu1 %v3857_v53 }
 0xbde   : > { %v3854_v5 = vpop.f32.mrf.mxu3 }
 0xbdf   : > { %v13366_v21 = vadd.f32 %v13285_v3, %v3854_v5 }
 0xbe1   : > { %v3860_v7 = vsel %vm1056_vm1, %v13366_v21, -inf }
 0xbe2   : > { %3861 = vmax.xlane.f32.xlu2 %v3860_v7 }
 0xbe6   : > { %v3956_v30 = vpop.f32.mrf.mxu2  ;;  %v3984_v8 = vpop.f32.mrf.mxu3 }
 0xbe7   : > { %v13371_v9 = vadd.f32 %v13285_v3, %v3956_v30  ;;  %v13374_v57 = vadd.f32 %v13285_v3, %v3984_v8 }
 0xbe9   : > { %v3990_v10 = vsel %vm1056_vm1, %v13374_v57, -inf  ;;  %v3987_v12 = vsel %vm1056_vm1, %v13371_v9, -inf }
 0xbea   : > { %3991 = vmax.xlane.f32.xlu1 %v3990_v10  ;;  %3988 = vmax.xlane.f32.xlu0 %v3987_v12 }
 0xbee   : > { %v4086_v13 = vpop.f32.mrf.mxu2 }
 0xbef   : > { %v13381_v48 = vadd.f32 %v13285_v3, %v4086_v13 }
 0xbf1   : > { %v4114_v17 = vpop.f32.mrf.mxu3  ;;  %v4117_v61 = vsel %vm1056_vm1, %v13381_v48, -inf }
 0xbf2   : > { %v13386_v18 = vadd.f32 %v13285_v3, %v4114_v17  ;;  %4118 = vmax.xlane.f32.xlu1 %v4117_v61 }
 0xbf4   : > { %v4120_v20 = vsel %vm1056_vm1, %v13386_v18, -inf }
 0xbf5   : > { %4121 = vmax.xlane.f32.xlu2 %v4120_v20 }
 0xc20   : > { %v3337_v0 = vpop.xlane.xlu2 %3336 }
 0xc21   : > { %v3341_v6 = vsub.f32 %v13311_v44, %v3337_v0 }
 0xc23   : > { %v3343_v11 = vmul.f32 1.442695, %v3341_v6 }
 0xc25   : > { %12183 = vpow2.f32 %v3343_v11 }
 0xc28   : > { %v3469_v24 = vpop.xlane.xlu1 %3468 }
 0xc29   : > { %v3473_v25 = vsub.f32 %v13316_v16, %v3469_v24 }
 0xc2b   : > { %v13392_v28 = vpop.eup %12183  ;;  %v3475_v29 = vmul.f32 1.442695, %v3473_v25 }
 0xc2c   : > { %v3347_v3 = vsel %vm1056_vm1, %v13392_v28, 0.0 }
 0xc2d   : > { %12185 = vpow2.f32 %v3475_v29  ;;  %3348 = vadd.xlane.f32.xlu0 %v3347_v3 }
 0xc2f   : > { %v3225_v32 = vpop.xlane.xlu2 %3224 }
 0xc30   : > { %12187 = vrcp.f32 %v3225_v32 }
 0xc33   : > { %v13396_v33 = vpop.eup %12185 }
 0xc34   : > { %v3479_v44 = vsel %vm1056_vm1, %v13396_v33, 0.0 }
 0xc35   : > { %3480 = vadd.xlane.f32.xlu2 %v3479_v44  ;;  %v3340_v58 = vpop.xlane.xlu0 %3339 }
 0xc36   : > { %v12188_v15 = vpop.eup %12187  ;;  %v3342_v16 = vsub.f32 %v13327_v43, %v3340_v58 }
 0xc37   : > { %v3231_v19 = vmul.f32 %v12188_v15, %v13322_v23 }
 0xc38   : > { %v3345_v34 = vmul.f32 1.442695, %v3342_v16 }
 0xc39   : > { %10079 = vmatmul.msk.f32.vlgmr.msra.gmra.mxu0 %vm1056_vm1, %v3231_v19 }
 0xc3a   : > { %12189 = vpow2.f32 %v3345_v34  ;;  %3510 = vmatpush.msra.mxu0 %v11866_v40 }
 0xc3d   : > { %v3599_v41 = vpop.xlane.xlu0 %3598  ;;  %v3472_v23 = vpop.xlane.xlu2 %3471 }
 0xc3e   : > { %v3603_v42 = vsub.f32 %v13332_v49, %v3599_v41  ;;  %v3474_v1 = vsub.f32 %v13335_v52, %v3472_v23 }
 0xc40   : > { %v13404_v46 = vpop.eup %12189  ;;  %v3605_v37 = vmul.f32 1.442695, %v3603_v42  ;;  %v3477_v47 = vmul.f32 1.442695, %v3474_v1 }
 0xc41   : > { %11879 = vrot.lane.b32.xlu0 %v13241_v27, %s12581_s13  ;;  %v3350_v43 = vsel %vm1056_vm1, %v13404_v46, 0.0 }
 0xc42   : > { %3351 = vadd.xlane.f32.xlu1 %v3350_v43  ;;  %12191 = vpow2.f32 %v3605_v37 }
 0xc45   : > { %v3228_v51 = vpop.xlane.xlu0 %3227  ;;  %v3602_v31 = vpop.xlane.xlu1 %3601 }
 0xc46   : > { %12193 = vrcp.f32 %v3228_v51  ;;  %v3729_v54 = vpop.xlane.xlu2 %3728 }
 0xc47   : > { %v3733_v8 = vsub.f32 %v13344_v56, %v3729_v54  ;;  %v11871_v54 = vunpack.i.l.bf16 %v13320_v39 }
 0xc48   : > { %v13410_v45 = vpop.eup %12191 }
 0xc49   : > { %v3609_v35 = vsel %vm1056_vm1, %v13410_v45, 0.0 }
 0xc4a   : > { %3610 = vadd.xlane.f32.xlu2 %v3609_v35 }
 0xc4c   : > { %v12194_v49 = vpop.eup %12193 }
 0xc4d   : > { %v3232_v38 = vmul.f32 %v12194_v49, %v13341_v55  ;;  %v3604_v55 = vsub.f32 %v13347_v59, %v3602_v31  ;;  %v3735_v59 = vmul.f32 1.442695, %v3733_v8  ;;  %v3732_v17 = vpop.xlane.xlu0 %3731 }
 0xc4e   : > { %v3734_v62 = vsub.f32 %v13356_v2, %v3732_v17 }
 0xc4f   : > { %10080 = vmatmul.msk.f32.vlgmr.msra.gmra.mxu1 %vm1056_vm1, %v3232_v38  ;;  %v3607_v7 = vmul.f32 1.442695, %v3604_v55 }
 0xc50   : > { %3536 = vmatpush.msra.mxu1 %v11867_v14  ;;  %v3859_v30 = vpop.xlane.xlu1 %3858  ;;  %v3737_v11 = vmul.f32 1.442695, %v3734_v62 }
 0xc51   : > { %v3863_v29 = vsub.f32 %v13361_v4, %v3859_v30 }
 0xc53   : > { %v3865_v3 = vmul.f32 1.442695, %v3863_v29 }
 0xc55   : > { %v3862_v26 = vpop.xlane.xlu2 %3861 }
 0xc56   : > { %v3864_v50 = vsub.f32 %v13366_v21, %v3862_v26 }
 0xc58   : > { %v3867_v63 = vmul.f32 1.442695, %v3864_v50 }
 0xc5a   : > { %12195 = vpow2.f32 %v3867_v63  ;;  %v11872_v63 = vunpack.i.h.bf16 %v13320_v39 }
 0xc5b   : > { %11874 = vrot.lane.b32.xlu1 %v13241_v27, %s12580_s7  ;;  %12197 = vpow2.f32 %v3477_v47 }
 0xc5c   : > { %12199 = vpow2.f32 %v3607_v7 }
 0xc5d   : > { %v3992_v20 = vpop.xlane.xlu1 %3991  ;;  %v3989_v32 = vpop.xlane.xlu0 %3988 }
 0xc5e   : > { %v3993_v58 = vsub.f32 %v13371_v9, %v3989_v32 }
 0xc60   : > { %v13420_v53 = vpop.eup %12195  ;;  %v3995_v16 = vmul.f32 1.442695, %v3993_v58 }
 0xc61   : > { %v3872_v5 = vsel %vm1056_vm1, %v13420_v53, 0.0  ;;  %v13425_v21 = vpop.eup %12197 }
 0xc62   : > { %3873 = vadd.xlane.f32.xlu2 %v3872_v5  ;;  %v3482_v12 = vsel %vm1056_vm1, %v13425_v21, 0.0  ;;  %v13431_v61 = vpop.eup %12199 }
 0xc63   : > { %v3612_v0 = vsel %vm1056_vm1, %v13431_v61, 0.0 }
 0xc65   : > { %v4119_v19 = vpop.xlane.xlu1 %4118 }
 0xc66   : > { %v4123_v34 = vsub.f32 %v13381_v48, %v4119_v19 }
 0xc68   : > { %v4122_v52 = vpop.xlane.xlu2 %4121  ;;  %v4125_v9 = vmul.f32 1.442695, %v4123_v34 }
 0xc69   : > { %v4124_v10 = vsub.f32 %v13386_v18, %v4122_v52  ;;  %v3994_v18 = vsub.f32 %v13374_v57, %v3992_v20 }
 0xc6b   : > { %v4127_v13 = vmul.f32 1.442695, %v4124_v10  ;;  %3483 = vadd.xlane.f32.xlu0 %v3482_v12  ;;  %v3997_v25 = vmul.f32 1.442695, %v3994_v18 }
 0xc6d   : > { %12201 = vpow2.f32 %v4127_v13 }
 0xc6e   : > { %12203 = vpow2.f32 %v3735_v59 }
 0xc6f   : > { %12205 = vpow2.f32 %v3737_v11 }
 0xc70   : > { %12207 = vpow2.f32 %v3997_v25 }
 0xc71   : > { %12209 = vpow2.f32 %v3865_v3 }
 0xc72   : > { %12211 = vpow2.f32 %v3995_v16 }
 0xc73   : > { %v13436_v56 = vpop.eup %12201  ;;  %3613 = vadd.xlane.f32.xlu0 %v3612_v0  ;;  %12213 = vpow2.f32 %v4125_v9 }
 0xc74   : > { %v4132_v6 = vsel %vm1056_vm1, %v13436_v56, 0.0  ;;  %v13441_v24 = vpop.eup %12203 }
 0xc75   : > { %4133 = vadd.xlane.f32.xlu2 %v4132_v6  ;;  %v3739_v2 = vsel %vm1056_vm1, %v13441_v24, 0.0  ;;  %v13446_v57 = vpop.eup %12205 }
 0xc76   : > { %v13448_v44 = vpop.eup %12207  ;;  %v3742_v15 = vsel %vm1056_vm1, %v13446_v57, 0.0 }
 0xc77   : > { %v4002_v4 = vsel %vm1056_vm1, %v13448_v44, 0.0  ;;  %v13455_v40 = vpop.eup %12209 }
 0xc78   : > { %v3869_v41 = vsel %vm1056_vm1, %v13455_v40, 0.0  ;;  %v13462_v42 = vpop.eup %12211 }
 0xc79   : > { %v3999_v37 = vsel %vm1056_vm1, %v13462_v42, 0.0  ;;  %v13466_v43 = vpop.eup %12213 }
 0xc7a   : > { %v4129_v48 = vsel %vm1056_vm1, %v13466_v43, 0.0 }
 0xc7b   : > { %3740 = vadd.xlane.f32.xlu0 %v3739_v2 }
 0xc83   : > { %3743 = vadd.xlane.f32.xlu0 %v3742_v15 }
 0xc85   : > { %4003 = vadd.xlane.f32.xlu1 %v4002_v4 }
 0xc8b   : > { %3870 = vadd.xlane.f32.xlu0 %v3869_v41 }
 0xc8d   : > { %11884 = vrot.lane.b32.xlu2 %v13241_v27, %s12583_s28 }
 0xc93   : > { %4000 = vadd.xlane.f32.xlu0 %v3999_v37 }
 0xc9b   : > { %4130 = vadd.xlane.f32.xlu0 %v4129_v48 }
 0xc9e   : > { %11889 = vrot.lane.b32.xlu1 %v13241_v27, %s12584_s4 }
 0xca0   : > { %v3349_v23 = vpop.xlane.xlu0 %3348 }
 0xca1   : > { %12215 = vrcp.f32 %v3349_v23 }
 0xca7   : > { %v12216_v51 = vpop.eup %12215 }
 0xca8   : > { %v3355_v35 = vmul.f32 %v12216_v51, %v13392_v28  ;;  %v3481_v49 = vpop.xlane.xlu2 %3480 }
 0xca9   : > { %12217 = vrcp.f32 %v3481_v49 }
 0xcaa   : > { %10085 = vmatmul.msk.f32.vlgmr.msrb.gmra.mxu0 %vm1056_vm1, %v3355_v35 }
 0xcab   : > { %3640 = vmatpush.msrb.mxu0 %v11871_v54 }
 0xcaf   : > { %v12218_v38 = vpop.eup %12217 }
 0xcb0   : > { %v3487_v14 = vmul.f32 %v12218_v38, %v13396_v33 }
 0xcb2   : > { %10091 = vmatmul.msk.f32.vlgmr.msra.gmra.mxu0 %vm1056_vm1, %v3487_v14 }
 0xcb3   : > { %v11880_v33 = vpop.permute.xlu0 %11879 }
 0xcb4   : > { %v11881_v5 = vunpack.i.l.bf16 %v11880_v33  ;;  %v11882_v59 = vunpack.i.h.bf16 %v11880_v33 }
 0xcb5   : > { %v3352_v26 = vpop.xlane.xlu1 %3351 }
 0xcb6   : > { %12219 = vrcp.f32 %v3352_v26 }
 0xcbc   : > { %v12220_v27 = vpop.eup %12219 }
 0xcbd   : > { %v3356_v50 = vmul.f32 %v12220_v27, %v13404_v46  ;;  %v3611_v28 = vpop.xlane.xlu2 %3610 }
 0xcbe   : > { %12221 = vrcp.f32 %v3611_v28 }
 0xcbf   : > { %10086 = vmatmul.msk.f32.vlgmr.msrb.gmra.mxu1 %vm1056_vm1, %v3356_v50 }
 0xcc0   : > { %3666 = vmatpush.msrb.mxu1 %v11872_v63 }
 0xcc4   : > { %v12222_v1 = vpop.eup %12221 }
 0xcc5   : > { %v3617_v47 = vmul.f32 %v12222_v1, %v13410_v45 }
 0xcc7   : > { %10097 = vmatmul.msk.f32.vlgmr.msrb.gmra.mxu0 %vm1056_vm1, %v3617_v47 }
 0xccd   : > { %v11875_v31 = vpop.permute.xlu1 %11874 }
 0xcce   : > { %v11876_v55 = vunpack.i.l.bf16 %v11875_v31  ;;  %v11877_v8 = vunpack.i.h.bf16 %v11875_v31 }
 0xcd0   : > { %3770 = vmatpush.msra.mxu0 %v11876_v55 }
 0xcd2   : > { %3900 = vmatpush.msrb.mxu0 %v11881_v5 }
 0xcd5   : > { %v3874_v46 = vpop.xlane.xlu2 %3873 }
 0xcde   : > { %v3484_v7 = vpop.xlane.xlu0 %3483 }
 0xcdf   : > { %12223 = vrcp.f32 %v3484_v7  ;;  %v11463_v7 = vld [vmem:[#allocation6 + $0x78] sm:$0xff] }
 0xce0   : > { %4332 = vmatpush.bf16.msrb.mxu2 %v11463_v7  ;;  %v11493_v7 = vld [vmem:[#allocation7 + $0x1ec] sm:$0xf] }
 0xce5   : > { %v12224_v39 = vpop.eup %12223 }
 0xce6   : > { %v3488_v30 = vmul.f32 %v12224_v39, %v13425_v21  ;;  %v3614_v52 = vpop.xlane.xlu0 %3613  ;;  %v11461_v39 = vld [vmem:[#allocation6 + $0x68] sm:$0xff] }
 0xce7   : > { %12225 = vrcp.f32 %v3614_v52  ;;  %v11459_v52 = vld [vmem:[#allocation6 + $0x58] sm:$0xff] }
 0xce8   : > { %10092 = vmatmul.msk.f32.vlgmr.msra.gmra.mxu1 %vm1056_vm1, %v3488_v30  ;;  %v4134_v45 = vpop.xlane.xlu2 %4133  ;;  %v11460_v30 = vld [vmem:[#allocation6 + $0x60] sm:$0xff] }
 0xce9   : > { %3796 = vmatpush.msra.mxu1 %v11877_v8  ;;  %v11458_v8 = vld [vmem:[#allocation6 + $0x50] sm:$0xff] }
 0xced   : > { %v12226_v10 = vpop.eup %12225 }
 0xcee   : > { %v3618_v12 = vmul.f32 %v12226_v10, %v13431_v61  ;;  %v3741_v13 = vpop.xlane.xlu0 %3740  ;;  %v11456_v10 = vld [vmem:[#allocation6 + $0x40] sm:$0xff] }
 0xcef   : > { %12227 = vrcp.f32 %v3741_v13 }
 0xcf0   : > { %10098 = vmatmul.msk.f32.vlgmr.msrb.gmra.mxu1 %vm1056_vm1, %v3618_v12  ;;  %v11885_v17 = vpop.permute.xlu2 %11884 }
 0xcf1   : > { %3926 = vmatpush.msrb.mxu1 %v11882_v59  ;;  %v11886_v0 = vunpack.i.l.bf16 %v11885_v17  ;;  %v11887_v11 = vunpack.i.h.bf16 %v11885_v17 }
 0xcf5   : > { %v12228_v20 = vpop.eup %12227 }
 0xcf6   : > { %v3747_v21 = vmul.f32 %v12228_v20, %v13441_v24  ;;  %v3744_v62 = vpop.xlane.xlu0 %3743 }
 0xcf7   : > { %12229 = vrcp.f32 %v3744_v62 }
 0xcf8   : > { %10103 = vmatmul.msk.f32.vlgmr.msra.gmra.mxu0 %vm1056_vm1, %v3747_v21  ;;  %12231 = vrcp.f32 %v3874_v46  ;;  %v4004_v25 = vpop.xlane.xlu1 %4003  ;;  %v11462_v46 = vld [vmem:[#allocation6 + $0x70] sm:$0xff] }
 0xcf9   : > { %4030 = vmatpush.msra.mxu0 %v11886_v0  ;;  %4333 = vmatpush.bf16.msrb.mxu2 %v11462_v46  ;;  %v10283_v46 = vld [vmem:[#allocation7 + $0x1f8] sm:$0xf0] }
 0xcfd   : > { %v12230_v18 = vpop.eup %12229  ;;  %4334 = vmatpush.bf16.msrb.mxu2 %v11461_v39  ;;  %v10257_v39 = vld [vmem:[#allocation7 + $0x1c0] sm:$0xf] }
 0xcfe   : > { %v3748_v61 = vmul.f32 %v12230_v18, %v13446_v57  ;;  %v3871_v6 = vpop.xlane.xlu0 %3870  ;;  %v12232_v29 = vpop.eup %12231 }
 0xcff   : > { %12233 = vrcp.f32 %v3871_v6  ;;  %v3878_v24 = vmul.f32 %v12232_v29, %v13420_v53 }
 0xd00   : > { %10104 = vmatmul.msk.f32.vlgmr.msra.gmra.mxu1 %vm1056_vm1, %v3748_v61  ;;  %12235 = vrcp.f32 %v4004_v25 }
 0xd01   : > { %4056 = vmatpush.msra.mxu1 %v11887_v11  ;;  %4335 = vmatpush.bf16.msrb.mxu2 %v11460_v30  ;;  %v11490_v30 = vld [vmem:[#allocation7 + $0x1cc] sm:$0xf0] }
 0xd05   : > { %v12234_v2 = vpop.eup %12233  ;;  %4336 = vmatpush.bf16.msrb.mxu2 %v11459_v52  ;;  %v11488_v52 = vld [vmem:[#allocation7 + $0x1c4] sm:$0xf] }
 0xd06   : > { %v3877_v3 = vmul.f32 %v12234_v2, %v13455_v40  ;;  %v4001_v32 = vpop.xlane.xlu0 %4000  ;;  %v12236_v57 = vpop.eup %12235 }
 0xd07   : > { %12237 = vrcp.f32 %v4001_v32  ;;  %v4008_v15 = vmul.f32 %v12236_v57, %v13448_v44  ;;  %v3253_v44 = vpop.f32.mrf.mxu0 }
 0xd08   : > { %10109 = vmatmul.msk.f32.vlgmr.msrb.gmra.mxu0 %vm1056_vm1, %v3877_v3  ;;  %10110 = vmatmul.msk.f32.vlgmr.msrb.gmra.mxu1 %vm1056_vm1, %v3878_v24  ;;  %12239 = vrcp.f32 %v4134_v45  ;;  %v11457_v45 = vld [vmem:[#allocation6 + $0x48] sm:$0xff] }
 0xd09   : > { %4337 = vmatpush.bf16.msrb.mxu2 %v11458_v8  ;;  %v10258_v8 = vor.u32 %v11490_v30, %v10257_v39 }
 0xd0d   : > { %v12238_v58 = vpop.eup %12237  ;;  %4338 = vmatpush.bf16.msrb.mxu2 %v11457_v45  ;;  %v10259_v45 = vld [vmem:[#allocation7 + $0x1d0] sm:$0xf0] }
 0xd0e   : > { %v4007_v4 = vmul.f32 %v12238_v58, %v13462_v42  ;;  %v4131_v16 = vpop.xlane.xlu0 %4130  ;;  %v12240_v34 = vpop.eup %12239 }
 0xd0f   : > { %12241 = vrcp.f32 %v4131_v16  ;;  %v4138_v9 = vmul.f32 %v12240_v34, %v13436_v56  ;;  %v3276_v42 = vpop.f32.mrf.mxu1 }
 0xd10   : > { %v11890_v19 = vpop.permute.xlu1 %11889  ;;  %10115 = vmatmul.msk.f32.vlgmr.msra.gmra.mxu0 %vm1056_vm1, %v4007_v4  ;;  %10116 = vmatmul.msk.f32.vlgmr.msra.gmra.mxu1 %vm1056_vm1, %v4008_v15 }
 0xd11   : > { %v11892_v53 = vunpack.i.h.bf16 %v11890_v19  ;;  %v11891_v40 = vunpack.i.l.bf16 %v11890_v19  ;;  %4339 = vmatpush.bf16.msrb.mxu2 %v11456_v10  ;;  %v10265_v10 = vld [vmem:[#allocation7 + $0x1c8] sm:$0xf] }
 0xd13   : > { %4160 = vmatpush.msrb.mxu0 %v11891_v40  ;;  %4186 = vmatpush.msrb.mxu1 %v11892_v53 }
 0xd15   : > { %v12242_v41 = vpop.eup %12241 }
 0xd16   : > { %v4137_v37 = vmul.f32 %v12242_v41, %v13466_v43 }
 0xd18   : > { %10121 = vmatmul.msk.f32.vlgmr.msrb.gmra.mxu0 %vm1056_vm1, %v4137_v37  ;;  %10122 = vmatmul.msk.f32.vlgmr.msrb.gmra.mxu1 %vm1056_vm1, %v4138_v9 }
 0xd27   : > { %v3381_v48 = vpop.f32.mrf.mxu0 }
 0xd2f   : > { %v3512_v35 = vpop.f32.mrf.mxu0 }
 0xd3c   : > { %v3408_v23 = vpop.f32.mrf.mxu1 }
 0xd3d   : > { %v11893_v51 = vpack.i.bf16 %v3408_v23, %v3381_v48 }
 0xd3f   : > { %11894 = vrot.lane.b32.xlu2 %v11893_v51, %s12584_s4 }
 0xd44   : > { %v3642_v38 = vpop.f32.mrf.mxu0 }
 0xd65   : > { %v3538_v49 = vpop.f32.mrf.mxu1 }
 0xd66   : > { %v11898_v54 = vpack.i.bf16 %v3538_v49, %v3512_v35  ;;  %v12080_v49 = vld [vmem:[%s14490_s10 + $0x1] ss:$0 sm:$0xff] }
 0xd68   : > { %11899 = vrot.lane.b32.xlu0 %v11898_v54, %s12583_s28 }
 0xd6d   : > { %v3668_v56 = vpop.f32.mrf.mxu1 }
 0xd6e   : > { %v11903_v14 = vpack.i.bf16 %v3668_v56, %v3642_v38 }
 0xd70   : > { %11904 = vrot.lane.b32.xlu1 %v11903_v14, %s12581_s13 }
 0xd75   : > { %v3772_v43 = vpop.f32.mrf.mxu0 }
 0xd7d   : > { %v3798_v26 = vpop.f32.mrf.mxu1 }
 0xd7e   : > { %v11908_v27 = vpack.i.bf16 %v3798_v26, %v3772_v43 }
 0xd80   : > { %11909 = vrot.lane.b32.xlu2 %v11908_v27, %s12580_s7 }
 0xd85   : > { %v3902_v50 = vpop.f32.mrf.mxu0  ;;  %v3928_v63 = vpop.f32.mrf.mxu1 }
 0xd86   : > { %v11913_v28 = vpack.i.bf16 %v3928_v63, %v3902_v50  ;;  %v10273_v63 = vld [vmem:[#allocation7 + $0x1e0] sm:$0xf] }
 0xd88   : > { %11914 = vrot.lane.b32.xlu1 %v11913_v28, %s12582_s2  ;;  %v11492_v28 = vld [vmem:[#allocation7 + $0x1e4] sm:$0xf] }
 0xd8d   : > { %v4032_v1 = vpop.f32.mrf.mxu0  ;;  %v4058_v47 = vpop.f32.mrf.mxu1 }
 0xd8e   : > { %v11918_v33 = vpack.i.bf16 %v4058_v47, %v4032_v1  ;;  %v10275_v47 = vld [vmem:[#allocation7 + $0x1f0] sm:$0xf0] }
 0xd90   : > { %11919 = vrot.lane.b32.xlu2 %v11918_v33, %s12579_s0  ;;  %v10281_v33 = vld [vmem:[#allocation7 + $0x1e8] sm:$0xf] }
 0xd95   : > { %v4162_v31 = vpop.f32.mrf.mxu0  ;;  %v4188_v55 = vpop.f32.mrf.mxu1 }
 0xd96   : > { %v11923_v5 = vpack.i.bf16 %v4188_v55, %v4162_v31  ;;  %v11495_v31 = vld [vmem:[#allocation7 + $0x1f4] sm:$0xf0]  ;;  %v10278_v55 = vor.u32 %v11492_v28, %v10275_v47  ;;  %v10201_v47 = vld [vmem:[#allocation7 + $0x148] sm:$0xf] }
 0xd98   : > { %11924 = vrot.lane.b32.xlu1 %v11923_v5, %s12578_s5  ;;  %v10282_v5 = vor.u32 %v11495_v31, %v10281_v33  ;;  %4625 = vmatpush.bf16.msra.mxu0 %v10278_v55  ;;  %v11475_v33 = vld [vmem:[#allocation7 + $0x154] sm:$0xf0] }
 0xd99   : > { %v11895_v12 = vpop.permute.xlu2 %11894 }
 0xd9a   : > { %v11897_v17 = vunpack.i.h.bf16 %v11895_v12  ;;  %v11896_v20 = vunpack.i.l.bf16 %v11895_v12  ;;  %4639 = vmatpush.bf16.msra.mxu1 %v10282_v5  ;;  %v11491_v12 = vld [vmem:[#allocation7 + $0x1d4] sm:$0xf0]  ;;  %v10202_v5 = vor.u32 %v11475_v33, %v10201_v47  ;;  %v11508_v33 = vld [vmem:[#allocation9 + $0x160] sm:$0xff] }
 0xd9c   : > { %v4248_v11 = vsel %vm1003_vm0, %v3276_v42, %v11897_v17  ;;  %v4247_v25 = vsel %vm1003_vm0, %v3253_v44, %v11896_v20  ;;  %v11489_v17 = vld [vmem:[#allocation7 + $0x1cc] sm:$0xf]  ;;  %v10267_v20 = vld [vmem:[#allocation7 + $0x1d8] sm:$0xf0] }
 0xdda   : > { %v11900_v59 = vpop.permute.xlu0 %11899  ;;  %v11910_v21 = vpop.permute.xlu2 %11909 }
 0xddb   : > { %v11902_v62 = vunpack.i.h.bf16 %v11900_v59  ;;  %v11901_v0 = vunpack.i.l.bf16 %v11900_v59  ;;  %v11912_v58 = vunpack.i.h.bf16 %v11910_v21  ;;  %v11911_v15 = vunpack.i.l.bf16 %v11910_v21 }
 0xddc   : > { %v10266_v59 = vor.u32 %v11491_v12, %v10265_v10  ;;  %v10270_v21 = vor.u32 %v11489_v17, %v10267_v20  ;;  %v10185_v17 = vld [vmem:[#allocation7 + $0x128] sm:$0xf]  ;;  %v11471_v20 = vld [vmem:[#allocation7 + $0x134] sm:$0xf0] }
 0xddd   : > { %v4250_v29 = vsel %vm2095_vm2, %v4248_v11, %v11902_v62  ;;  %v4249_v2 = vsel %vm2095_vm2, %v4247_v25, %v11901_v0  ;;  %v10241_v62 = vld [vmem:[#allocation7 + $0x1a0] sm:$0xf]  ;;  %v11486_v0 = vld [vmem:[#allocation7 + $0x1ac] sm:$0xf0]  ;;  %v10249_v11 = vld [vmem:[#allocation7 + $0x1a8] sm:$0xf] }
 0xdde   : > { %4640 = vmatpush.bf16.msra.mxu1 %v10266_v59  ;;  %v11487_v25 = vld [vmem:[#allocation7 + $0x1b4] sm:$0xf0]  ;;  %v10179_v59 = vld [vmem:[#allocation7 + $0x130] sm:$0xf0] }
 0xde2   : > { %v11905_v13 = vpop.permute.xlu1 %11904 }
 0xde3   : > { %v11907_v18 = vunpack.i.h.bf16 %v11905_v13  ;;  %v11906_v61 = vunpack.i.l.bf16 %v11905_v13  ;;  %v10262_v13 = vor.u32 %v11488_v52, %v10259_v45  ;;  %v10177_v52 = vld [vmem:[#allocation7 + $0x120] sm:$0xf]  ;;  %v11468_v45 = vld [vmem:[#allocation7 + $0x124] sm:$0xf] }
 0xde5   : > { %v4251_v24 = vsel %vm2098_vm3, %v4249_v2, %v11906_v61  ;;  %v4252_v3 = vsel %vm2098_vm3, %v4250_v29, %v11907_v18  ;;  %4626 = vmatpush.bf16.msra.mxu0 %v10262_v13  ;;  %v11484_v18 = vld [vmem:[#allocation7 + $0x1a4] sm:$0xf]  ;;  %v10242_v61 = vor.u32 %v11486_v0, %v10241_v62  ;;  %v10250_v2 = vor.u32 %v11487_v25, %v10249_v11  ;;  %v11469_v0 = vld [vmem:[#allocation7 + $0x12c] sm:$0xf]  ;;  %v10161_v11 = vld [vmem:[#allocation7 + $0x100] sm:$0xf] }
 0xde6   : > { %v4253_v16 = vsel %vm2101_vm4, %v4251_v24, %v11911_v15  ;;  %v4254_v19 = vsel %vm2101_vm4, %v4252_v3, %v11912_v58  ;;  %v11485_v24 = vld [vmem:[#allocation7 + $0x1ac] sm:$0xf]  ;;  %v10251_v3 = vld [vmem:[#allocation7 + $0x1b8] sm:$0xf0]  ;;  %v11482_v58 = vld [vmem:[#allocation7 + $0x18c] sm:$0xf0]  ;;  %v10186_v62 = vor.u32 %v11471_v20, %v10185_v17 }
 0xde7   : > { %4641 = vmatpush.bf16.msra.mxu1 %v10250_v2  ;;  %v11480_v15 = vld [vmem:[#allocation7 + $0x184] sm:$0xf]  ;;  %v11466_v25 = vld [vmem:[#allocation7 + $0x10c] sm:$0xf0] }
 0xde8   : > { %v10162_v2 = vor.u32 %v11466_v25, %v10161_v11  ;;  %v11506_v11 = vld [vmem:[#allocation9 + $0x150] sm:$0xff] }
 0xde9   : > { %v11514_v25 = vld [vmem:[#allocation9 + $0x190] sm:$0xff] }
 0xdea   : > { %v11920_v4 = vpop.permute.xlu2 %11919 }
 0xdeb   : > { %v11922_v34 = vunpack.i.h.bf16 %v11920_v4  ;;  %v11921_v41 = vunpack.i.l.bf16 %v11920_v4 }
 0xdfa   : > { %v11915_v6 = vpop.permute.xlu1 %11914 }
 0xdfb   : > { %v11917_v32 = vunpack.i.h.bf16 %v11915_v6  ;;  %v11916_v57 = vunpack.i.l.bf16 %v11915_v6  ;;  %v10243_v6 = vld [vmem:[#allocation7 + $0x1b0] sm:$0xf0] }
 0xdfc   : > { %v10246_v29 = vor.u32 %v11484_v18, %v10243_v6  ;;  %v10187_v18 = vld [vmem:[#allocation7 + $0x138] sm:$0xf0] }
 0xdfd   : > { %v4256_v53 = vsel %vm2104_vm5, %v4254_v19, %v11917_v32  ;;  %v4255_v40 = vsel %vm2104_vm5, %v4253_v16, %v11916_v57  ;;  %v10254_v32 = vor.u32 %v11485_v24, %v10251_v3  ;;  %v10225_v57 = vld [vmem:[#allocation7 + $0x180] sm:$0xf]  ;;  %v10227_v16 = vld [vmem:[#allocation7 + $0x190] sm:$0xf0]  ;;  %v10233_v19 = vld [vmem:[#allocation7 + $0x188] sm:$0xf]  ;;  %v10190_v6 = vor.u32 %v11469_v0, %v10187_v18 }
 0xdfe   : > { %v4257_v42 = vsel %vm2107_vm6, %v4255_v40, %v11921_v41  ;;  %v4258_v48 = vsel %vm2107_vm6, %v4256_v53, %v11922_v34  ;;  %4627 = vmatpush.bf16.msra.mxu0 %v10246_v29  ;;  %v10226_v4 = vor.u32 %v11482_v58, %v10225_v57  ;;  %v11483_v53 = vld [vmem:[#allocation7 + $0x194] sm:$0xf0]  ;;  %v10230_v40 = vor.u32 %v11480_v15, %v10227_v16  ;;  %v11481_v41 = vld [vmem:[#allocation7 + $0x18c] sm:$0xf]  ;;  %v11464_v29 = vld [vmem:[#allocation7 + $0x104] sm:$0xf] }
 0xdff   : > { %v10234_v34 = vor.u32 %v11483_v53, %v10233_v19  ;;  %v10163_v24 = vld [vmem:[#allocation7 + $0x110] sm:$0xf0]  ;;  %v10169_v3 = vld [vmem:[#allocation7 + $0x108] sm:$0xf]  ;;  %v10171_v16 = vld [vmem:[#allocation7 + $0x118] sm:$0xf0] }
 0xe00   : > { %v10166_v58 = vor.u32 %v11464_v29, %v10163_v24  ;;  %v11515_v18 = vld [vmem:[#allocation9 + $0x198] sm:$0xff]  ;;  %v11505_v24 = vld [vmem:[#allocation9 + $0x148] sm:$0xff] }
 0xe01   : > { %4642 = vmatpush.bf16.msra.mxu1 %v10234_v34  ;;  %v11499_v29 = vld [vmem:[#allocation9 + $0x118] sm:$0xff] }
 0xe02   : > { %4628 = vmatpush.bf16.msra.mxu0 %v10230_v40 }
 0xe0a   : > { %v11925_v9 = vpop.permute.xlu1 %11924 }
 0xe0b   : > { %v11927_v37 = vunpack.i.h.bf16 %v11925_v9  ;;  %v11926_v44 = vunpack.i.l.bf16 %v11925_v9  ;;  %v10235_v9 = vld [vmem:[#allocation7 + $0x198] sm:$0xf0] }
 0xe0d   : > { %v4260_v23 = vsel %vm2110_vm7, %v4258_v48, %v11927_v37  ;;  %v4259_v51 = vsel %vm2110_vm7, %v4257_v42, %v11926_v44  ;;  %v10238_v37 = vor.u32 %v11481_v41, %v10235_v9  ;;  %v10209_v44 = vld [vmem:[#allocation7 + $0x160] sm:$0xf]  ;;  %v11478_v42 = vld [vmem:[#allocation7 + $0x16c] sm:$0xf0]  ;;  %v11476_v48 = vld [vmem:[#allocation7 + $0x164] sm:$0xf] }
 0xe0e   : > { %v4261_v35 = vpack.c.bf16 %v4260_v23, %v4259_v51  ;;  %v10210_v23 = vor.u32 %v11478_v42, %v10209_v44  ;;  %v10211_v51 = vld [vmem:[#allocation7 + $0x170] sm:$0xf0]  ;;  %v11519_v44 = vld [vmem:[#allocation9 + $0x1b8] sm:$0xff] }
 0xe10   : > { %4340 = vmatmul.bf16.vlgmr.msrb.gmra.mxu2 %v4261_v35  ;;  %v10217_v35 = vld [vmem:[#allocation7 + $0x168] sm:$0xf] }
 0xe93   : > { %v4341_v54 = vpop.f32.mrf.mxu2 }
 0xe94   : > { %v4342_v38 = vadd.f32 %v12080_v49, %v4341_v54  ;;  %v10214_v54 = vor.u32 %v11476_v48, %v10211_v51  ;;  %v11503_v48 = vld [vmem:[#allocation9 + $0x138] sm:$0xff]  ;;  %v11510_v51 = vld [vmem:[#allocation9 + $0x170] sm:$0xff] }
 0xe96   : > { %v13527_v56 = vadd.f32 %v4342_v38, %v13218_v36  ;;  %v11494_v36 = vld [vmem:[#allocation7 + $0x1ec] sm:$0xf0]  ;;  %4629 = vmatpush.bf16.msra.mxu0 %v10214_v54 }
 0xe97   : > { %v10274_v1 = vor.u32 %v11494_v36, %v10273_v63  ;;  %v11474_v63 = vld [vmem:[#allocation7 + $0x14c] sm:$0xf0]  ;;  %v11472_v36 = vld [vmem:[#allocation7 + $0x144] sm:$0xf] }
 0xe98   : > { %4348 = vadd.xlane.f32.xlu0 %v13527_v56  ;;  %v4354_v14 = vmul.f32 %v13527_v56, %v13527_v56 }
 0xe99   : > { %4611 = vmatpush.bf16.msra.mxu3 %v10274_v1  ;;  %v10195_v1 = vld [vmem:[#allocation7 + $0x150] sm:$0xf0] }
 0xe9a   : > { %4356 = vadd.xlane.f32.xlu1 %v4354_v14  ;;  %v11477_v14 = vld [vmem:[#allocation7 + $0x16c] sm:$0xf]  ;;  %v10198_v55 = vor.u32 %v11472_v36, %v10195_v1 }
 0xe9b   : > { %v4343_v43 = vpop.f32.mrf.mxu2  ;;  %v11501_v36 = vld [vmem:[#allocation9 + $0x128] sm:$0xff] }
 0xe9c   : > { %v4344_v26 = vadd.f32 %v12080_v49, %v4343_v43  ;;  %v11479_v49 = vld [vmem:[#allocation7 + $0x174] sm:$0xf0]  ;;  %v10219_v43 = vld [vmem:[#allocation7 + $0x178] sm:$0xf0]  ;;  %4630 = vmatpush.bf16.msra.mxu0 %v10198_v55 }
 0xe9d   : > { %4612 = vmatpush.bf16.msra.mxu3 %v10258_v8  ;;  %v10218_v38 = vor.u32 %v11479_v49, %v10217_v35  ;;  %v11470_v8 = vld [vmem:[#allocation7 + $0x12c] sm:$0xf0] }
 0xe9e   : > { %v13533_v27 = vadd.f32 %v4344_v26, %v13220_v22  ;;  %v10286_v22 = vor.u32 %v11493_v7, %v10283_v46  ;;  %v10222_v26 = vor.u32 %v11477_v14, %v10219_v43  ;;  %v11473_v7 = vld [vmem:[#allocation7 + $0x14c] sm:$0xf]  ;;  %v10203_v46 = vld [vmem:[#allocation7 + $0x158] sm:$0xf0]  ;;  %v10178_v13 = vor.u32 %v11470_v8, %v10177_v52  ;;  %v11518_v35 = vld [vmem:[#allocation9 + $0x1b0] sm:$0xff] }
 0xe9f   : > { %4643 = vmatpush.bf16.msra.mxu1 %v10218_v38  ;;  %v10206_v39 = vor.u32 %v11473_v7, %v10203_v46  ;;  %v11502_v38 = vld [vmem:[#allocation9 + $0x130] sm:$0xff] }
 0xea0   : > { %4350 = vadd.xlane.f32.xlu2 %v13533_v27  ;;  %v4355_v50 = vmul.f32 %v13533_v27, %v13533_v27  ;;  %4653 = vmatpush.bf16.msra.mxu2 %v10286_v22  ;;  %v11526_v14 = vld [vmem:[#allocation9 + $0x1f0] sm:$0xff] }
 0xea1   : > { %4613 = vmatpush.bf16.msra.mxu3 %v10242_v61 }
 0xea2   : > { %4358 = vadd.xlane.f32.xlu0 %v4355_v50  ;;  %v10193_v50 = vld [vmem:[#allocation7 + $0x140] sm:$0xf] }
 0xea3   : > { %v10194_v28 = vor.u32 %v11474_v63, %v10193_v50  ;;  %4644 = vmatpush.bf16.msra.mxu1 %v10202_v5  ;;  %v11509_v50 = vld [vmem:[#allocation9 + $0x168] sm:$0xff] }
 0xea4   : > { %4654 = vmatpush.bf16.msra.mxu2 %v10270_v21  ;;  %v10182_v21 = vor.u32 %v11468_v45, %v10179_v59  ;;  %v11517_v63 = vld [vmem:[#allocation9 + $0x1a8] sm:$0xff]  ;;  %v12081_v45 = vld [vmem:[%s14491_s11 + $0x1] ss:$0 sm:$0xff] }
 0xea5   : > { %4614 = vmatpush.bf16.msra.mxu3 %v10226_v4  ;;  %v11465_v4 = vld [vmem:[#allocation7 + $0x10c] sm:$0xf] }
 0xea6   : > { %4631 = vmatpush.bf16.msra.mxu0 %v10182_v21  ;;  %v10174_v53 = vor.u32 %v11465_v4, %v10171_v16  ;;  %v11497_v4 = vld [vmem:[#allocation9 + $0x108] sm:$0xff] }
 0xea7   : > { %4645 = vmatpush.bf16.msra.mxu1 %v10186_v62  ;;  %v11521_v16 = vld [vmem:[#allocation9 + $0x1c8] sm:$0xff] }
 0xea8   : > { %4655 = vmatpush.bf16.msra.mxu2 %v10254_v32  ;;  %v11467_v32 = vld [vmem:[#allocation7 + $0x114] sm:$0xf0] }
 0xea9   : > { %4615 = vmatpush.bf16.msra.mxu3 %v10210_v23  ;;  %v10170_v15 = vor.u32 %v11467_v32, %v10169_v3  ;;  %v11527_v23 = vld [vmem:[#allocation9 + $0x1f8] sm:$0xff]  ;;  %v11513_v3 = vld [vmem:[#allocation9 + $0x188] sm:$0xff]  ;;  %v11498_v32 = vld [vmem:[#allocation9 + $0x110] sm:$0xff] }
 0xeaa   : > { %4632 = vmatpush.bf16.msra.mxu0 %v10166_v58  ;;  %v11504_v58 = vld [vmem:[#allocation9 + $0x140] sm:$0xff] }
 0xeab   : > { %4646 = vmatpush.bf16.msra.mxu1 %v10170_v15  ;;  %v11512_v15 = vld [vmem:[#allocation9 + $0x180] sm:$0xff] }
 0xeac   : > { %4656 = vmatpush.bf16.msra.mxu2 %v10238_v37  ;;  %v11511_v37 = vld [vmem:[#allocation9 + $0x178] sm:$0xff] }
 0xead   : > { %4616 = vmatpush.bf16.msra.mxu3 %v10194_v28  ;;  %v11525_v28 = vld [vmem:[#allocation9 + $0x1e8] sm:$0xff] }
 0xeae   : > { %4955 = vmatpush.bf16.msrb.mxu0 %v11511_v37 }
 0xeaf   : > { %4969 = vmatpush.bf16.msrb.mxu1 %v11519_v44 }
 0xeb0   : > { %4657 = vmatpush.bf16.msra.mxu2 %v10222_v26 }
 0xeb1   : > { %4617 = vmatpush.bf16.msra.mxu3 %v10178_v13 }
 0xeb2   : > { %4956 = vmatpush.bf16.msrb.mxu0 %v11510_v51 }
 0xeb3   : > { %4970 = vmatpush.bf16.msrb.mxu1 %v11518_v35 }
 0xeb4   : > { %4658 = vmatpush.bf16.msra.mxu2 %v10206_v39 }
 0xeb5   : > { %4618 = vmatpush.bf16.msra.mxu3 %v10162_v2  ;;  %v11523_v2 = vld [vmem:[#allocation9 + $0x1d8] sm:$0xff] }
 0xeb6   : > { %4957 = vmatpush.bf16.msrb.mxu0 %v11509_v50 }
 0xeb7   : > { %4971 = vmatpush.bf16.msrb.mxu1 %v11517_v63 }
 0xeb8   : > { %4659 = vmatpush.bf16.msra.mxu2 %v10190_v6  ;;  %v11524_v6 = vld [vmem:[#allocation9 + $0x1e0] sm:$0xff] }
 0xeb9   : > { %4941 = vmatpush.bf16.msrb.mxu3 %v11503_v48 }
 0xeba   : > { %4958 = vmatpush.bf16.msrb.mxu0 %v11508_v33 }
 0xebc   : > { %4660 = vmatpush.bf16.msra.mxu2 %v10174_v53  ;;  %v11520_v53 = vld [vmem:[#allocation9 + $0x1c0] sm:$0xff] }
 0xebd   : > { %4942 = vmatpush.bf16.msrb.mxu3 %v11502_v38 }
 0xec0   : > { %4983 = vmatpush.bf16.msrb.mxu2 %v11527_v23 }
 0xec1   : > { %4943 = vmatpush.bf16.msrb.mxu3 %v11501_v36 }
 0xec4   : > { %4984 = vmatpush.bf16.msrb.mxu2 %v11526_v14 }
 0xec8   : > { %4985 = vmatpush.bf16.msrb.mxu2 %v11525_v28 }
 0xecc   : > { %4986 = vmatpush.bf16.msrb.mxu2 %v11524_v6 }
 0xed0   : > { %4987 = vmatpush.bf16.msrb.mxu2 %v11523_v2 }
 0xf0b   : > { %v4349_v31 = vpop.xlane.xlu0 %4348 }
 0xf0c   : > { %v13539_v22 = vmul.f32 %v4349_v31, %v13129_v60  ;;  %v11516_v31 = vld [vmem:[#allocation9 + $0x1a0] sm:$0xff] }
 0xf0d   : > { %v4357_v30 = vpop.xlane.xlu1 %4356  ;;  %4972 = vmatpush.bf16.msrb.mxu1 %v11516_v31 }
 0xf0e   : > { %v4362_v10 = vmul.f32 %v13539_v22, %v13539_v22  ;;  %v4360_v12 = vmul.f32 %v4357_v30, %v13129_v60  ;;  %v4366_v52 = vsub.f32 %v13527_v56, %v13539_v22  ;;  %v12082_v56 = vld [vmem:[%s14492_s12 + $0x1] ss:$0 sm:$0xff] }
 0xf10   : > { %v4364_v61 = vsub.f32 %v4360_v12, %v4362_v10 }
 0xf11   : > { %4973 = vmatpush.bf16.msrb.mxu1 %v11515_v18 }
 0xf12   : > { %v4368_v57 = vadd.f32 1e-05, %v4364_v61  ;;  %v11500_v61 = vld [vmem:[#allocation9 + $0x120] sm:$0xff] }
 0xf13   : > { %v4351_v19 = vpop.xlane.xlu2 %4350  ;;  %4944 = vmatpush.bf16.msrb.mxu3 %v11500_v61 }
 0xf14   : > { %12243 = vrsqrt.f32 %v4368_v57  ;;  %v13545_v40 = vmul.f32 %v4351_v19, %v13129_v60  ;;  %vm4376_vm14 = vweird.f32 %v4368_v57  ;;  %v11496_v19 = vld [vmem:[#allocation9 + $0x100] sm:$0xff] }
 0xf15   : > { %v4359_v34 = vpop.xlane.xlu0 %4358  ;;  %4974 = vmatpush.bf16.msrb.mxu1 %v11514_v25 }
 0xf16   : > { %v4363_v41 = vmul.f32 %v13545_v40, %v13545_v40  ;;  %v4361_v9 = vmul.f32 %v4359_v34, %v13129_v60  ;;  %v4367_v13 = vsub.f32 %v13533_v27, %v13545_v40  ;;  %v11507_v27 = vld [vmem:[#allocation9 + $0x158] sm:$0xff]  ;;  %v10158_v40 = vld [vmem:[%s14494_s14 + $0x4] sm:$0xf] }
 0xf17   : > { %4959 = vmatpush.bf16.msrb.mxu0 %v11507_v27  ;;  %4945 = vmatpush.bf16.msrb.mxu3 %v11499_v29  ;;  %v4445_v37 = vperm.slane %v10158_v40, 2  ;;  %v4443_v35 = vperm.slane %v10158_v40, 0  ;;  %v4446_v38 = vperm.slane %v10158_v40, 3 }
 0xf18   : > { %v4365_v42 = vsub.f32 %v4361_v9, %v4363_v41  ;;  %v4444_v9 = vperm.slane %v10158_v40, 1  ;;  %v11532_v40 = vld [vmem:[%s14525_s24 + $0xa0] sm:$0xff] }
 0xf19   : > { %4975 = vmatpush.bf16.msrb.mxu1 %v11513_v3 }
 0xf1a   : > { %v12244_v49 = vpop.eup %12243  ;;  %v4369_v54 = vadd.f32 1e-05, %v4365_v42 }
 0xf1b   : > { %v4371_v43 = vmul.f32 %v12244_v49, %v4368_v57  ;;  %vm4377_vm13 = vweird.f32 %v12244_v49  ;;  %4960 = vmatpush.bf16.msrb.mxu0 %v11506_v11  ;;  %v11522_v57 = vld [vmem:[#allocation9 + $0x1d0] sm:$0xff]  ;;  %4946 = vmatpush.bf16.msrb.mxu3 %v11498_v32  ;;  %v11535_v32 = vld [vmem:[%s14525_s24 + $0xb8] sm:$0xff] }
 0xf1c   : > { %12245 = vrsqrt.f32 %v4369_v54  ;;  %vm4378_vm15 = vmor %vm4376_vm14, %vm4377_vm13  ;;  %vm4386_vm9 = vweird.f32 %v4369_v54  ;;  %4988 = vmatpush.bf16.msrb.mxu2 %v11522_v57  ;;  %v11543_v57 = vld [vmem:[#allocation2 + $0xb8] sm:$0xff] }
 0xf1d   : > { %v4372_v26 = vmul.f32 %v12244_v49, %v4371_v43  ;;  %4976 = vmatpush.bf16.msrb.mxu1 %v11512_v15  ;;  %v11542_v15 = vld [vmem:[#allocation2 + $0xb0] sm:$0xff] }
 0xf1f   : > { %v4373_v1 = vmul.f32 0.5, %v4372_v26  ;;  %4961 = vmatpush.bf16.msrb.mxu0 %v11505_v24  ;;  %4947 = vmatpush.bf16.msrb.mxu3 %v11497_v4  ;;  %v11550_v4 = vld [vmem:[#allocation4 + $0xb0] sm:$0xff] }
 0xf20   : > { %4989 = vmatpush.bf16.msrb.mxu2 %v11521_v16  ;;  %v11533_v16 = vld [vmem:[%s14525_s24 + $0xa8] sm:$0xff] }
 0xf21   : > { %v4374_v47 = vsub.f32 1.5, %v4373_v1 }
 0xf22   : > { %v12246_v55 = vpop.eup %12245 }
 0xf23   : > { %v4375_v5 = vmul.f32 %v12244_v49, %v4374_v47  ;;  %v4381_v7 = vmul.f32 %v12246_v55, %v4369_v54  ;;  %vm4387_vm8 = vweird.f32 %v12246_v55  ;;  %4962 = vmatpush.bf16.msrb.mxu0 %v11504_v58  ;;  %4948 = vmatpush.bf16.msrb.mxu3 %v11496_v19  ;;  %v11551_v58 = vld [vmem:[#allocation4 + $0xb8] sm:$0xff]  ;;  %v11541_v19 = vld [vmem:[#allocation2 + $0xa8] sm:$0xff] }
 0xf24   : > { %vm4388_vm10 = vmor %vm4386_vm9, %vm4387_vm8  ;;  %4990 = vmatpush.bf16.msrb.mxu2 %v11520_v53  ;;  %v11549_v53 = vld [vmem:[#allocation4 + $0xa8] sm:$0xff] }
 0xf25   : > { %v4382_v46 = vmul.f32 %v12246_v55, %v4381_v7  ;;  %v4379_v39 = vsel %vm4378_vm15, %v12244_v49, %v4375_v5 }
 0xf26   : > { %v4390_v10 = vmul.f32 %v4379_v39, %v4366_v52 }
 0xf27   : > { %v4383_v30 = vmul.f32 0.5, %v4382_v46 }
 0xf28   : > { %v4397_v17 = vmul.f32 %v12081_v45, %v4390_v10 }
 0xf29   : > { %v4384_v8 = vsub.f32 1.5, %v4383_v30 }
 0xf2a   : > { %v13560_v21 = vadd.f32 %v12082_v56, %v4397_v17 }
 0xf2b   : > { %v4385_v12 = vmul.f32 %v12246_v55, %v4384_v8 }
 0xf2d   : > { %v4389_v59 = vsel %vm4388_vm10, %v12246_v55, %v4385_v12 }
 0xf2e   : > { %v4391_v20 = vmul.f32 %v4389_v59, %v4367_v13 }
 0xf30   : > { %v4398_v22 = vmul.f32 %v12081_v45, %v4391_v20  ;;  %v12083_v45 = vld [vmem:[%s14496_s16 + $0x1] ss:$0 sm:$0xff] }
 0xf32   : > { %v13562_v62 = vadd.f32 %v12082_v56, %v4398_v22 }
 0xf34   : > { %v4406_v0 = vpack.c.bf16 %v13562_v62, %v13560_v21 }
 0xf36   : > { %4619 = vmatmul.bf16.vlgmr.msra.gmra.mxu3 %v4406_v0  ;;  %4633 = vmatmul.bf16.vlgmr.msra.gmra.mxu0 %v4406_v0 }
 0xf37   : > { %4647 = vmatmul.bf16.vlgmr.msra.gmra.mxu1 %v4406_v0  ;;  %4661 = vmatmul.bf16.vlgmr.msra.gmra.mxu2 %v4406_v0 }
 0xf38   : > { %5128 = vmatpush.bf16.msra.mxu3 %v11535_v32  ;;  %5212 = vmatpush.bf16.msra.mxu0 %v11543_v57  ;;  %v12087_v57 = vld [vmem:[%s14488_s8 + $0x2] ss:$0 sm:$0xff] }
 0xf39   : > { %5296 = vmatpush.bf16.msra.mxu1 %v11551_v58 }
 0xf3c   : > { %5213 = vmatpush.bf16.msra.mxu0 %v11542_v15 }
 0xf3d   : > { %5297 = vmatpush.bf16.msra.mxu1 %v11550_v4 }
 0xf40   : > { %5214 = vmatpush.bf16.msra.mxu0 %v11541_v19 }
 0xf41   : > { %5298 = vmatpush.bf16.msra.mxu1 %v11549_v53 }
 0xfb3   : > { %v4634_v34 = vpop.f32.mrf.mxu0 }
 0xfb4   : > { %v4648_v41 = vpop.f32.mrf.mxu1  ;;  %v4635_v42 = vadd.f32 %v4634_v34, %v4444_v9  ;;  %v11540_v34 = vld [vmem:[#allocation2 + $0xa0] sm:$0xff] }
 0xfb5   : > { %v4649_v23 = vadd.f32 %v4648_v41, %v4445_v37  ;;  %v11548_v41 = vld [vmem:[#allocation4 + $0xa0] sm:$0xff]  ;;  %5215 = vmatpush.bf16.msra.mxu0 %v11540_v34 }
 0xfb6   : > { %v4668_v43 = vmax.f32 %v4635_v42, 0.0  ;;  %5299 = vmatpush.bf16.msra.mxu1 %v11548_v41  ;;  %v11530_v42 = vld [vmem:[%s14525_s24 + $0x90] sm:$0xff] }
 0xfb7   : > { %v4669_v50 = vmax.f32 %v4649_v23, 0.0  ;;  %v11546_v23 = vld [vmem:[#allocation4 + $0x90] sm:$0xff] }
 0xfb9   : > { %v4620_v44 = vpop.f32.mrf.mxu3 }
 0xfba   : > { %v4662_v48 = vpop.f32.mrf.mxu2  ;;  %v4621_v36 = vadd.f32 %v4620_v44, %v4443_v35  ;;  %v11547_v44 = vld [vmem:[#allocation4 + $0x98] sm:$0xff] }
 0xfbb   : > { %v4636_v51 = vpop.f32.mrf.mxu0  ;;  %v4663_v1 = vadd.f32 %v4662_v48, %v4446_v38  ;;  %5300 = vmatpush.bf16.msra.mxu1 %v11547_v44  ;;  %v11538_v48 = vld [vmem:[#allocation2 + $0x90] sm:$0xff] }
 0xfbc   : > { %v4637_v49 = vadd.f32 %v4636_v51, %v4444_v9  ;;  %v4650_v54 = vpop.f32.mrf.mxu1  ;;  %v4667_v7 = vmax.f32 %v4621_v36, 0.0  ;;  %v11531_v9 = vld [vmem:[%s14525_s24 + $0x98] sm:$0xff]  ;;  %v11536_v36 = vld [vmem:[#allocation2 + $0x80] sm:$0xff] }
 0xfbd   : > { %v4651_v14 = vadd.f32 %v4650_v54, %v4445_v37  ;;  %v4670_v39 = vmax.f32 %v4663_v1, 0.0  ;;  %v11539_v37 = vld [vmem:[#allocation2 + $0x98] sm:$0xff] }
 0xfbe   : > { %v4672_v26 = vmax.f32 %v4637_v49, 0.0  ;;  %5216 = vmatpush.bf16.msra.mxu0 %v11539_v37 }
 0xfbf   : > { %v4673_v63 = vmax.f32 %v4651_v14, 0.0  ;;  %5301 = vmatpush.bf16.msra.mxu1 %v11546_v23  ;;  %v11529_v14 = vld [vmem:[%s14525_s24 + $0x88] sm:$0xff] }
 0xfc0   : > { %v4676_v28 = vpack.c.bf16 %v4672_v26, %v4668_v43  ;;  %v11537_v43 = vld [vmem:[#allocation2 + $0x88] sm:$0xff] }
 0xfc1   : > { %v4677_v47 = vpack.c.bf16 %v4673_v63, %v4669_v50  ;;  %v4622_v33 = vpop.f32.mrf.mxu3  ;;  %v11545_v26 = vld [vmem:[#allocation4 + $0x88] sm:$0xff]  ;;  %v11528_v63 = vld [vmem:[%s14525_s24 + $0x80] sm:$0xff] }
 0xfc2   : > { %v4623_v31 = vadd.f32 %v4622_v33, %v4443_v35  ;;  %v4664_v55 = vpop.f32.mrf.mxu2  ;;  %4963 = vmatmul.bf16.vlgmr.msrb.gmra.mxu0 %v4676_v28  ;;  %v11544_v28 = vld [vmem:[#allocation4 + $0x80] sm:$0xff] }
 0xfc3   : > { %v4665_v5 = vadd.f32 %v4664_v55, %v4446_v38  ;;  %4977 = vmatmul.bf16.vlgmr.msrb.gmra.mxu1 %v4677_v47  ;;  %5217 = vmatpush.bf16.msra.mxu0 %v11538_v48 }
 0xfc4   : > { %v4671_v46 = vmax.f32 %v4623_v31, 0.0  ;;  %5302 = vmatpush.bf16.msra.mxu1 %v11545_v26 }
 0xfc5   : > { %v4674_v30 = vmax.f32 %v4665_v5, 0.0 }
 0xfc6   : > { %v4675_v52 = vpack.c.bf16 %v4671_v46, %v4667_v7 }
 0xfc7   : > { %v4678_v8 = vpack.c.bf16 %v4674_v30, %v4670_v39  ;;  %5218 = vmatpush.bf16.msra.mxu0 %v11537_v43 }
 0xfc8   : > { %4949 = vmatmul.bf16.vlgmr.msrb.gmra.mxu3 %v4675_v52  ;;  %5303 = vmatpush.bf16.msra.mxu1 %v11544_v28  ;;  %v13684_v28 = vld [vmem:[%s14528_s21] sm:$0xff] }
 0xfc9   : > { %4991 = vmatmul.bf16.vlgmr.msrb.gmra.mxu2 %v4678_v8 }
 0xfcb   : > { %5219 = vmatpush.bf16.msra.mxu0 %v11536_v36 }
0x103f   : > { %v4964_v10 = vpop.f32.mrf.mxu0 }
0x1040   : > { %v4978_v59 = vpop.f32.mrf.mxu1 }
0x1047   : > { %v4966_v61 = vpop.f32.mrf.mxu0 }
0x1048   : > { %v4980_v25 = vpop.f32.mrf.mxu1 }
0x104b   : > { %v4950_v12 = vpop.f32.mrf.mxu3 }
0x104c   : > { %v4951_v13 = vadd.f32 %v12083_v45, %v4950_v12  ;;  %v4992_v20 = vpop.f32.mrf.mxu2 }
0x104e   : > { %v4965_v17 = vadd.f32 %v4964_v10, %v4951_v13 }
0x1050   : > { %v4979_v56 = vadd.f32 %v4978_v59, %v4965_v17 }
0x1052   : > { %v4993_v22 = vadd.f32 %v4992_v20, %v4979_v56 }
0x1053   : > { %v4952_v0 = vpop.f32.mrf.mxu3 }
0x1054   : > { %v13573_v27 = vadd.f32 %v4993_v22, %v13560_v21  ;;  %v4953_v18 = vadd.f32 %v12083_v45, %v4952_v0  ;;  %v4994_v2 = vpop.f32.mrf.mxu2  ;;  %v12084_v0 = vld [vmem:[%s14497_s17 + $0x1] ss:$0 sm:$0xff] }
0x1056   : > { %v4967_v6 = vadd.f32 %v4966_v61, %v4953_v18  ;;  %4999 = vadd.xlane.f32.xlu2 %v13573_v27  ;;  %v5005_v11 = vmul.f32 %v13573_v27, %v13573_v27 }
0x1058   : > { %v4981_v29 = vadd.f32 %v4980_v25, %v4967_v6  ;;  %5007 = vadd.xlane.f32.xlu0 %v5005_v11 }
0x105a   : > { %v4995_v24 = vadd.f32 %v4994_v2, %v4981_v29  ;;  %v12085_v2 = vld [vmem:[%s14498_s18 + $0x1] ss:$0 sm:$0xff] }
0x105c   : > { %v13579_v3 = vadd.f32 %v4995_v24, %v13562_v62  ;;  %v11534_v62 = vld [vmem:[%s14525_s24 + $0xb0] sm:$0xff] }
0x105d   : > { %5129 = vmatpush.bf16.msra.mxu3 %v11534_v62 }
0x105e   : > { %5001 = vadd.xlane.f32.xlu1 %v13579_v3  ;;  %v5006_v21 = vmul.f32 %v13579_v3, %v13579_v3 }
0x1060   : > { %5009 = vadd.xlane.f32.xlu2 %v5006_v21 }
0x1061   : > { %5130 = vmatpush.bf16.msra.mxu3 %v11533_v16  ;;  %v12088_v16 = vld [vmem:[%s14527_s3 + $0x2] ss:$0 sm:$0xff] }
0x1065   : > { %5131 = vmatpush.bf16.msra.mxu3 %v11532_v40 }
0x1069   : > { %5132 = vmatpush.bf16.msra.mxu3 %v11531_v9 }
0x106d   : > { %5133 = vmatpush.bf16.msra.mxu3 %v11530_v42 }
0x1071   : > { %5134 = vmatpush.bf16.msra.mxu3 %v11529_v14 }
0x1075   : > { %5135 = vmatpush.bf16.msra.mxu3 %v11528_v63 }
0x10c9   : > { %v5000_v51 = vpop.xlane.xlu2 %4999 }
0x10ca   : > { %v5003_v35 = vmul.f32 %v5000_v51, %v13129_v60 }
0x10cb   : > { %v5008_v49 = vpop.xlane.xlu0 %5007 }
0x10cc   : > { %v5013_v54 = vmul.f32 %v5003_v35, %v5003_v35  ;;  %v5011_v38 = vmul.f32 %v5008_v49, %v13129_v60  ;;  %v5017_v56 = vsub.f32 %v13573_v27, %v5003_v35 }
0x10ce   : > { %v5015_v50 = vsub.f32 %v5011_v38, %v5013_v54 }
0x10d0   : > { %v5019_v1 = vadd.f32 1e-05, %v5015_v50 }
0x10d1   : > { %v5002_v47 = vpop.xlane.xlu1 %5001 }
0x10d2   : > { %12247 = vrsqrt.f32 %v5019_v1  ;;  %v5004_v33 = vmul.f32 %v5002_v47, %v13129_v60  ;;  %vm5027_vm12 = vweird.f32 %v5019_v1 }
0x10d3   : > { %v5010_v31 = vpop.xlane.xlu2 %5009 }
0x10d4   : > { %v5014_v55 = vmul.f32 %v5004_v33, %v5004_v33  ;;  %v5012_v5 = vmul.f32 %v5010_v31, %v13129_v60  ;;  %v5018_v6 = vsub.f32 %v13579_v3, %v5004_v33  ;;  %v12086_v3 = vld [vmem:[%s14486_s6 + $0x2] ss:$0 sm:$0xff] }
0x10d6   : > { %v5016_v7 = vsub.f32 %v5012_v5, %v5014_v55 }
0x10d8   : > { %v12248_v46 = vpop.eup %12247  ;;  %v5020_v39 = vadd.f32 1e-05, %v5016_v7 }
0x10d9   : > { %v5022_v30 = vmul.f32 %v12248_v46, %v5019_v1  ;;  %vm5028_vm11 = vweird.f32 %v12248_v46 }
0x10da   : > { %12249 = vrsqrt.f32 %v5020_v39  ;;  %vm5029_vm13 = vmor %vm5027_vm12, %vm5028_vm11  ;;  %vm5037_vm15 = vweird.f32 %v5020_v39 }
0x10db   : > { %v5023_v52 = vmul.f32 %v12248_v46, %v5022_v30 }
0x10dd   : > { %v5024_v8 = vmul.f32 0.5, %v5023_v52 }
0x10df   : > { %v5025_v45 = vsub.f32 1.5, %v5024_v8 }
0x10e0   : > { %v12250_v10 = vpop.eup %12249 }
0x10e1   : > { %v5026_v12 = vmul.f32 %v12248_v46, %v5025_v45  ;;  %v5032_v13 = vmul.f32 %v12250_v10, %v5020_v39  ;;  %vm5038_vm14 = vweird.f32 %v12250_v10 }
0x10e2   : > { %vm5039_vm8 = vmor %vm5037_vm15, %vm5038_vm14 }
0x10e3   : > { %v5033_v59 = vmul.f32 %v12250_v10, %v5032_v13  ;;  %v5030_v17 = vsel %vm5029_vm13, %v12248_v46, %v5026_v12 }
0x10e4   : > { %v5041_v18 = vmul.f32 %v5030_v17, %v5017_v56 }
0x10e5   : > { %v5034_v20 = vmul.f32 0.5, %v5033_v59 }
0x10e6   : > { %v5048_v25 = vmul.f32 %v12084_v0, %v5041_v18 }
0x10e7   : > { %v5035_v22 = vsub.f32 1.5, %v5034_v20 }
0x10e8   : > { %v13620_v24 = vadd.f32 %v12085_v2, %v5048_v25 }
0x10e9   : > { %v5036_v61 = vmul.f32 %v12250_v10, %v5035_v22 }
0x10eb   : > { %v5040_v11 = vsel %vm5039_vm8, %v12250_v10, %v5036_v61 }
0x10ec   : > { %v5042_v29 = vmul.f32 %v5040_v11, %v5018_v6 }
0x10ee   : > { %v5049_v27 = vmul.f32 %v12084_v0, %v5042_v29 }
0x10f0   : > { %v13622_v21 = vadd.f32 %v12085_v2, %v5049_v27 }
0x10f2   : > { %v5057_v32 = vpack.c.bf16 %v13622_v21, %v13620_v24 }
0x10f4   : > { %5136 = vmatmul.bf16.vlgmr.msra.gmra.mxu3 %v5057_v32  ;;  %5220 = vmatmul.bf16.vlgmr.msra.gmra.mxu0 %v5057_v32 }
0x10f5   : > { %5304 = vmatmul.bf16.vlgmr.msra.gmra.mxu1 %v5057_v32 }
0x1171   : > { %v5221_v58 = vpop.f32.mrf.mxu0 }
0x1172   : > { %v5222_v62 = vadd.f32 %v12086_v3, %v5221_v58  ;;  %v5305_v15 = vpop.f32.mrf.mxu1 }
0x1173   : > { %v5306_v4 = vadd.f32 %v12087_v57, %v5305_v15 }
0x1174   : > { %5694 = vrot.lane.b32.xlu2 %v5222_v62, %s12582_s2  ;;  %5432 = vrot.lane.b32.xlu1 %v5222_v62, %s12578_s5 }
0x1175   : > { %5402 = vmatpush.msrb.mxu0 %v5306_v4  ;;  %10533 = vmatpush.xpose.msk.msra.mxu2 %vm1003_vm0, %v5222_v62 }
0x1177   : > { %v5137_v19 = vpop.f32.mrf.mxu3 }
0x1178   : > { %v5138_v53 = vadd.f32 %v12088_v16, %v5137_v19 }
0x1179   : > { %v5223_v40 = vpop.f32.mrf.mxu0 }
0x117a   : > { %v5224_v34 = vadd.f32 %v12086_v3, %v5223_v40  ;;  %v5307_v41 = vpop.f32.mrf.mxu1  ;;  %5562 = vrot.lane.b32.xlu0 %v5138_v53, %s12579_s0  ;;  %10534 = vmatmul.msk.f32.vlgmr.msra.gmra.mxu2 %vm1003_vm0, %v5138_v53 }
0x117b   : > { %v5308_v9 = vadd.f32 %v12087_v57, %v5307_v41 }
0x117c   : > { %10535 = vmatpush.xpose.msk.msrb.mxu3 %vm1003_vm0, %v5224_v34  ;;  %5564 = vrot.lane.b32.xlu1 %v5222_v62, %s12579_s0 }
0x117d   : > { %5425 = vmatpush.msrb.mxu1 %v5308_v9  ;;  %5430 = vrot.lane.b32.xlu2 %v5138_v53, %s12578_s5  ;;  %v13643_v37 = vpack.i.bf16 %v5308_v9, %v5306_v4 }
0x117f   : > { %v5139_v44 = vpop.f32.mrf.mxu3 }
0x1180   : > { %v5140_v42 = vadd.f32 %v12088_v16, %v5139_v44 }
0x1182   : > { %10536 = vmatmul.msk.f32.vlgmr.msrb.gmra.mxu3 %vm1003_vm0, %v5140_v42  ;;  %5460 = vrot.lane.b32.xlu0 %v5224_v34, %s12578_s5 }
0x1184   : > { %5692 = vrot.lane.b32.xlu1 %v5138_v53, %s12582_s2 }
0x1185   : > { %5592 = vrot.lane.b32.xlu2 %v5224_v34, %s12579_s0 }
0x118a   : > { %5722 = vrot.lane.b32.xlu0 %v5224_v34, %s12582_s2 }
0x118c   : > { %5590 = vrot.lane.b32.xlu1 %v5140_v42, %s12579_s0 }
0x118d   : > { %5822 = vrot.lane.b32.xlu2 %v5138_v53, %s12580_s7 }
0x1192   : > { %5458 = vrot.lane.b32.xlu0 %v5140_v42, %s12578_s5 }
0x1194   : > { %5852 = vrot.lane.b32.xlu1 %v5224_v34, %s12580_s7 }
0x1195   : > { %5720 = vrot.lane.b32.xlu2 %v5140_v42, %s12582_s2 }
0x119a   : > { %5824 = vrot.lane.b32.xlu0 %v5222_v62, %s12580_s7 }
0x119c   : > { %5954 = vrot.lane.b32.xlu1 %v5222_v62, %s12581_s13 }
0x119d   : > { %5982 = vrot.lane.b32.xlu2 %v5224_v34, %s12581_s13 }
0x11a2   : > { %5952 = vrot.lane.b32.xlu0 %v5138_v53, %s12581_s13 }
0x11a4   : > { %5980 = vrot.lane.b32.xlu1 %v5140_v42, %s12581_s13 }
0x11a5   : > { %6084 = vrot.lane.b32.xlu2 %v5222_v62, %s12583_s28 }
0x11aa   : > { %5850 = vrot.lane.b32.xlu0 %v5140_v42, %s12580_s7 }
0x11ac   : > { %6082 = vrot.lane.b32.xlu1 %v5138_v53, %s12583_s28 }
0x11ad   : > { %6110 = vrot.lane.b32.xlu2 %v5140_v42, %s12583_s28 }
0x11b2   : > { %6112 = vrot.lane.b32.xlu0 %v5224_v34, %s12583_s28 }
0x11b4   : > { %6242 = vrot.lane.b32.xlu1 %v5224_v34, %s12584_s4 }
0x11b5   : > { %6212 = vrot.lane.b32.xlu2 %v5138_v53, %s12584_s4 }
0x11ba   : > { %6214 = vrot.lane.b32.xlu0 %v5222_v62, %s12584_s4 }
0x11bd   : > { %11929 = vrot.lane.b32.xlu2 %v13643_v37, %s12578_s5 }
0x11c2   : > { %6240 = vrot.lane.b32.xlu0 %v5140_v42, %s12584_s4 }
0x11ca   : > { %11934 = vrot.lane.b32.xlu0 %v13643_v37, %s12579_s0 }
0x11ce   : > { %v5695_v48 = vpop.permute.xlu2 %5694 }
0x11d7   : > { %v5431_v23 = vpop.permute.xlu2 %5430 }
0x11df   : > { %v5593_v51 = vpop.permute.xlu2 %5592 }
0x11e6   : > { %v5433_v35 = vpop.permute.xlu1 %5432 }
0x11e7   : > { %v5823_v49 = vpop.permute.xlu2 %5822  ;;  %10539 = vmatpush.xpose.msk.msrb.mxu2 %vm1003_vm0, %v5433_v35 }
0x11ea   : > { %10540 = vmatmul.msk.f32.vlgmr.msrb.gmra.mxu2 %vm1003_vm0, %v5431_v23 }
0x11ec   : > { %v5563_v54 = vpop.permute.xlu0 %5562 }
0x11ee   : > { %v5565_v38 = vpop.permute.xlu1 %5564 }
0x11ef   : > { %v5721_v14 = vpop.permute.xlu2 %5720  ;;  %10545 = vmatpush.xpose.msk.msra.mxu2 %vm1003_vm0, %v5565_v38 }
0x11f2   : > { %10546 = vmatmul.msk.f32.vlgmr.msra.gmra.mxu2 %vm1003_vm0, %v5563_v54 }
0x11f3   : > { %10551 = vmatpush.xpose.msk.msrb.mxu2 %vm1003_vm0, %v5695_v48 }
0x11f4   : > { %v5461_v43 = vpop.permute.xlu0 %5460 }
0x11f5   : > { %10541 = vmatpush.xpose.msk.msra.mxu3 %vm1003_vm0, %v5461_v43 }
0x11f6   : > { %v5693_v26 = vpop.permute.xlu1 %5692 }
0x11f7   : > { %v5983_v50 = vpop.permute.xlu2 %5982 }
0x11f9   : > { %10547 = vmatpush.xpose.msk.msrb.mxu3 %vm1003_vm0, %v5593_v51 }
0x11fa   : > { %10552 = vmatmul.msk.f32.vlgmr.msrb.gmra.mxu2 %vm1003_vm0, %v5693_v26 }
0x11fc   : > { %v5723_v63 = vpop.permute.xlu0 %5722 }
0x11fd   : > { %v5333_v36 = vpop.f32.mrf.mxu2 }
0x11fe   : > { %v5334_v1 = vadd.f32 %v13684_v28, %v5333_v36  ;;  %v5591_v47 = vpop.permute.xlu1 %5590 }
0x11ff   : > { %v6085_v33 = vpop.permute.xlu2 %6084 }
0x1200   : > { %v5362_v31 = vsel %vm1056_vm1, %v5334_v1, -inf }
0x1201   : > { %5363 = vmax.xlane.f32.xlu1 %v5362_v31 }
0x1204   : > { %v5459_v55 = vpop.permute.xlu0 %5458 }
0x1205   : > { %v5359_v5 = vpop.f32.mrf.mxu3  ;;  %10542 = vmatmul.msk.f32.vlgmr.msra.gmra.mxu3 %vm1003_vm0, %v5459_v55 }
0x1206   : > { %v13690_v7 = vadd.f32 %v13684_v28, %v5359_v5  ;;  %10553 = vmatpush.xpose.msk.msra.mxu3 %vm1003_vm0, %v5723_v63  ;;  %v5853_v46 = vpop.permute.xlu1 %5852 }
0x1207   : > { %v6111_v39 = vpop.permute.xlu2 %6110 }
0x1208   : > { %v5365_v30 = vsel %vm1056_vm1, %v13690_v7, -inf }
0x1209   : > { %5366 = vmax.xlane.f32.xlu2 %v5365_v30 }
0x120c   : > { %v5825_v52 = vpop.permute.xlu0 %5824 }
0x120d   : > { %10548 = vmatmul.msk.f32.vlgmr.msrb.gmra.mxu3 %vm1003_vm0, %v5591_v47  ;;  %10557 = vmatpush.xpose.msk.msra.mxu2 %vm1003_vm0, %v5825_v52 }
0x120e   : > { %10559 = vmatpush.xpose.msk.msrb.mxu3 %vm1003_vm0, %v5853_v46  ;;  %v5955_v8 = vpop.permute.xlu1 %5954 }
0x120f   : > { %v6213_v45 = vpop.permute.xlu2 %6212 }
0x1210   : > { %10558 = vmatmul.msk.f32.vlgmr.msra.gmra.mxu2 %vm1003_vm0, %v5823_v49 }
0x1211   : > { %10563 = vmatpush.xpose.msk.msrb.mxu2 %vm1003_vm0, %v5955_v8 }
0x1214   : > { %v5953_v10 = vpop.permute.xlu0 %5952 }
0x1215   : > { %10569 = vmatpush.xpose.msk.msra.mxu2 %vm1003_vm0, %v6085_v33  ;;  %10554 = vmatmul.msk.f32.vlgmr.msra.gmra.mxu3 %vm1003_vm0, %v5721_v14 }
0x1216   : > { %10565 = vmatpush.xpose.msk.msra.mxu3 %vm1003_vm0, %v5983_v50  ;;  %v5981_v12 = vpop.permute.xlu1 %5980 }
0x1217   : > { %v11930_v13 = vpop.permute.xlu2 %11929 }
0x1218   : > { %v11932_v59 = vunpack.i.h.bf16 %v11930_v13  ;;  %v11931_v17 = vunpack.i.l.bf16 %v11930_v13  ;;  %10564 = vmatmul.msk.f32.vlgmr.msrb.gmra.mxu2 %vm1003_vm0, %v5953_v10 }
0x121a   : > { %5530 = vmatpush.msra.mxu0 %v11931_v17  ;;  %5557 = vmatpush.msra.mxu1 %v11932_v59 }
0x121c   : > { %v5851_v20 = vpop.permute.xlu0 %5850 }
0x121d   : > { %10560 = vmatmul.msk.f32.vlgmr.msrb.gmra.mxu3 %vm1003_vm0, %v5851_v20 }
0x121e   : > { %v6083_v56 = vpop.permute.xlu1 %6082 }
0x1220   : > { %10570 = vmatmul.msk.f32.vlgmr.msra.gmra.mxu2 %vm1003_vm0, %v6083_v56 }
0x1221   : > { %11939 = vrot.lane.b32.xlu2 %v13643_v37, %s12582_s2 }
0x1224   : > { %v6113_v22 = vpop.permute.xlu0 %6112 }
0x1225   : > { %10566 = vmatmul.msk.f32.vlgmr.msra.gmra.mxu3 %vm1003_vm0, %v5981_v12 }
0x1226   : > { %10571 = vmatpush.xpose.msk.msrb.mxu3 %vm1003_vm0, %v6113_v22  ;;  %v6243_v0 = vpop.permute.xlu1 %6242 }
0x122a   : > { %10577 = vmatpush.xpose.msk.msra.mxu3 %vm1003_vm0, %v6243_v0 }
0x122c   : > { %v6215_v18 = vpop.permute.xlu0 %6214 }
0x122d   : > { %10572 = vmatmul.msk.f32.vlgmr.msrb.gmra.mxu3 %vm1003_vm0, %v6111_v39  ;;  %10575 = vmatpush.xpose.msk.msrb.mxu2 %vm1003_vm0, %v6215_v18 }
0x1230   : > { %10576 = vmatmul.msk.f32.vlgmr.msrb.gmra.mxu2 %vm1003_vm0, %v6213_v45 }
0x1234   : > { %v6241_v61 = vpop.permute.xlu0 %6240 }
0x1235   : > { %10578 = vmatmul.msk.f32.vlgmr.msra.gmra.mxu3 %vm1003_vm0, %v6241_v61 }
0x123c   : > { %v13788_v45 = vpop.permute.xlu0 %11934 }
0x126d   : > { %v5455_v6 = vpop.f32.mrf.mxu2 }
0x126e   : > { %v13716_v11 = vadd.f32 %v13684_v28, %v5455_v6 }
0x1270   : > { %v5486_v25 = vsel %vm1056_vm1, %v13716_v11, -inf }
0x1271   : > { %5487 = vmax.xlane.f32.xlu0 %v5486_v25 }
0x1274   : > { %v5364_v29 = vpop.xlane.xlu1 %5363 }
0x1275   : > { %v5368_v2 = vsub.f32 %v5334_v1, %v5364_v29  ;;  %v5587_v27 = vpop.f32.mrf.mxu2 }
0x1276   : > { %v13721_v32 = vadd.f32 %v13684_v28, %v5587_v27 }
0x1277   : > { %v5370_v3 = vmul.f32 1.442695, %v5368_v2 }
0x1278   : > { %v5618_v57 = vsel %vm1056_vm1, %v13721_v32, -inf }
0x1279   : > { %12251 = vpow2.f32 %v5370_v3  ;;  %5619 = vmax.xlane.f32.xlu2 %v5618_v57 }
0x127c   : > { %v5367_v15 = vpop.xlane.xlu2 %5366 }
0x127d   : > { %v5369_v19 = vsub.f32 %v13690_v7, %v5367_v15  ;;  %v5717_v53 = vpop.f32.mrf.mxu2 }
0x127e   : > { %v13736_v41 = vadd.f32 %v13684_v28, %v5717_v53 }
0x127f   : > { %v13725_v58 = vpop.eup %12251  ;;  %v5372_v34 = vmul.f32 1.442695, %v5369_v19 }
0x1280   : > { %v5374_v62 = vsel %vm1056_vm1, %v13725_v58, 0.0  ;;  %v5748_v48 = vsel %vm1056_vm1, %v13736_v41, -inf }
0x1281   : > { %5375 = vadd.xlane.f32.xlu0 %v5374_v62  ;;  %12253 = vpow2.f32 %v5372_v34 }
0x1284   : > { %v13793_v13 = vpop.permute.xlu2 %11939 }
0x1287   : > { %v13745_v51 = vpop.eup %12253 }
0x1288   : > { %v5483_v4 = vpop.f32.mrf.mxu3  ;;  %v5377_v14 = vsel %vm1056_vm1, %v13745_v51, 0.0 }
0x1289   : > { %v13730_v16 = vadd.f32 %v13684_v28, %v5483_v4 }
0x128b   : > { %v5489_v40 = vsel %vm1056_vm1, %v13730_v16, -inf }
0x128c   : > { %5490 = vmax.xlane.f32.xlu1 %v5489_v40 }
0x1290   : > { %v5615_v9 = vpop.f32.mrf.mxu3 }
0x1291   : > { %v13739_v44 = vadd.f32 %v13684_v28, %v5615_v9 }
0x1293   : > { %v5847_v42 = vpop.f32.mrf.mxu2  ;;  %v5621_v23 = vsel %vm1056_vm1, %v13739_v44, -inf }
0x1294   : > { %5749 = vmax.xlane.f32.xlu1 %v5748_v48  ;;  %5622 = vmax.xlane.f32.xlu0 %v5621_v23  ;;  %v13748_v35 = vadd.f32 %v13684_v28, %v5847_v42 }
0x1296   : > { %v5878_v26 = vsel %vm1056_vm1, %v13748_v35, -inf }
0x1298   : > { %v5745_v49 = vpop.f32.mrf.mxu3 }
0x1299   : > { %v13751_v54 = vadd.f32 %v13684_v28, %v5745_v49 }
0x129b   : > { %v5751_v38 = vsel %vm1056_vm1, %v13751_v54, -inf  ;;  %v5977_v43 = vpop.f32.mrf.mxu2 }
0x129c   : > { %5752 = vmax.xlane.f32.xlu2 %v5751_v38  ;;  %5378 = vadd.xlane.f32.xlu1 %v5377_v14  ;;  %v13760_v50 = vadd.f32 %v13684_v28, %v5977_v43 }
0x129d   : > { %5879 = vmax.xlane.f32.xlu0 %v5878_v26 }
0x129e   : > { %v6008_v1 = vsel %vm1056_vm1, %v13760_v50, -inf }
0x12a0   : > { %v5875_v63 = vpop.f32.mrf.mxu3 }
0x12a1   : > { %v13763_v36 = vadd.f32 %v13684_v28, %v5875_v63 }
0x12a3   : > { %v5881_v47 = vsel %vm1056_vm1, %v13763_v36, -inf  ;;  %v6107_v5 = vpop.f32.mrf.mxu2 }
0x12a4   : > { %6009 = vmax.xlane.f32.xlu2 %v6008_v1  ;;  %5882 = vmax.xlane.f32.xlu1 %v5881_v47  ;;  %v13791_v10 = vadd.f32 %v13684_v28, %v6107_v5 }
0x12a6   : > { %v6138_v56 = vsel %vm1056_vm1, %v13791_v10, -inf }
0x12a8   : > { %v6005_v33 = vpop.f32.mrf.mxu3 }
0x12a9   : > { %v13770_v31 = vadd.f32 %v13684_v28, %v6005_v33  ;;  %v11937_v33 = vunpack.i.h.bf16 %v13788_v45 }
0x12ab   : > { %v6011_v55 = vsel %vm1056_vm1, %v13770_v31, -inf }
0x12ac   : > { %6012 = vmax.xlane.f32.xlu0 %v6011_v55 }
0x12b0   : > { %v6135_v7 = vpop.f32.mrf.mxu3 }
0x12b1   : > { %v13775_v46 = vadd.f32 %v13684_v28, %v6135_v7 }
0x12b3   : > { %v6141_v39 = vsel %vm1056_vm1, %v13775_v46, -inf  ;;  %v6237_v30 = vpop.f32.mrf.mxu2 }
0x12b4   : > { %6142 = vmax.xlane.f32.xlu2 %v6141_v39  ;;  %v13780_v52 = vadd.f32 %v13684_v28, %v6237_v30 }
0x12b6   : > { %v6268_v8 = vsel %vm1056_vm1, %v13780_v52, -inf }
0x12b8   : > { %v6265_v12 = vpop.f32.mrf.mxu3 }
0x12b9   : > { %v13796_v17 = vadd.f32 %v13684_v28, %v6265_v12 }
0x12bb   : > { %v6271_v0 = vsel %vm1056_vm1, %v13796_v17, -inf }
0x12bc   : > { %6269 = vmax.xlane.f32.xlu2 %v6268_v8 }
0x12bd   : > { %11949 = vrot.lane.b32.xlu1 %v13643_v37, %s12581_s13 }
0x12c0   : > { %11944 = vrot.lane.b32.xlu0 %v13643_v37, %s12580_s7 }
0x12e4   : > { %v5488_v59 = vpop.xlane.xlu0 %5487 }
0x12e5   : > { %v5492_v20 = vsub.f32 %v13716_v11, %v5488_v59 }
0x12e7   : > { %v5494_v22 = vmul.f32 1.442695, %v5492_v20  ;;  %6139 = vmax.xlane.f32.xlu1 %v6138_v56 }
0x12e9   : > { %12255 = vpow2.f32 %v5494_v22 }
0x12ea   : > { %6272 = vmax.xlane.f32.xlu0 %v6271_v0 }
0x12ec   : > { %v5620_v18 = vpop.xlane.xlu2 %5619 }
0x12ed   : > { %v5624_v61 = vsub.f32 %v13721_v32, %v5620_v18  ;;  %v11936_v32 = vunpack.i.l.bf16 %v13788_v45 }
0x12ef   : > { %v13804_v6 = vpop.eup %12255  ;;  %v5626_v25 = vmul.f32 1.442695, %v5624_v61 }
0x12f0   : > { %v5498_v28 = vsel %vm1056_vm1, %v13804_v6, 0.0 }
0x12f1   : > { %12257 = vpow2.f32 %v5626_v25  ;;  %5499 = vadd.xlane.f32.xlu1 %v5498_v28 }
0x12f4   : > { %v5376_v11 = vpop.xlane.xlu0 %5375 }
0x12f5   : > { %12259 = vrcp.f32 %v5376_v11 }
0x12f7   : > { %v13808_v29 = vpop.eup %12257 }
0x12f8   : > { %v5630_v2 = vsel %vm1056_vm1, %v13808_v29, 0.0 }
0x12f9   : > { %5631 = vadd.xlane.f32.xlu0 %v5630_v2 }
0x12fb   : > { %v12260_v27 = vpop.eup %12259 }
0x12fc   : > { %v5382_v3 = vmul.f32 %v12260_v27, %v13725_v58 }
0x12fe   : > { %10537 = vmatmul.msk.f32.vlgmr.msrb.gmra.mxu0 %vm1056_vm1, %v5382_v3 }
0x12ff   : > { %5661 = vmatpush.msrb.mxu0 %v11936_v32  ;;  %v5491_v57 = vpop.xlane.xlu1 %5490 }
0x1300   : > { %v5493_v62 = vsub.f32 %v13730_v16, %v5491_v57 }
0x1302   : > { %v5496_v15 = vmul.f32 1.442695, %v5493_v62 }
0x1304   : > { %12261 = vpow2.f32 %v5496_v15 }
0x1307   : > { %v5623_v4 = vpop.xlane.xlu0 %5622  ;;  %v5750_v19 = vpop.xlane.xlu1 %5749 }
0x1308   : > { %v5625_v53 = vsub.f32 %v13739_v44, %v5623_v4  ;;  %v5754_v40 = vsub.f32 %v13736_v41, %v5750_v19 }
0x130a   : > { %v13818_v34 = vpop.eup %12261  ;;  %v5628_v9 = vmul.f32 1.442695, %v5625_v53  ;;  %v5756_v58 = vmul.f32 1.442695, %v5754_v40 }
0x130b   : > { %v5501_v42 = vsel %vm1056_vm1, %v13818_v34, 0.0 }
0x130c   : > { %12263 = vpow2.f32 %v5628_v9  ;;  %5502 = vadd.xlane.f32.xlu2 %v5501_v42 }
0x130d   : > { %12265 = vpow2.f32 %v5756_v58 }
0x130f   : > { %v5753_v48 = vpop.xlane.xlu2 %5752  ;;  %v5379_v16 = vpop.xlane.xlu1 %5378 }
0x1310   : > { %v5755_v23 = vsub.f32 %v13751_v54, %v5753_v48  ;;  %v5880_v49 = vpop.xlane.xlu0 %5879  ;;  %12267 = vrcp.f32 %v5379_v16 }
0x1311   : > { %v5884_v41 = vsub.f32 %v13748_v35, %v5880_v49 }
0x1312   : > { %v13823_v38 = vpop.eup %12263  ;;  %v5758_v44 = vmul.f32 1.442695, %v5755_v23  ;;  %v11941_v23 = vunpack.i.l.bf16 %v13793_v13 }
0x1313   : > { %v13826_v14 = vpop.eup %12265  ;;  %v5633_v43 = vsel %vm1056_vm1, %v13823_v38, 0.0  ;;  %v5886_v54 = vmul.f32 1.442695, %v5884_v41 }
0x1314   : > { %12269 = vpow2.f32 %v5758_v44  ;;  %5634 = vadd.xlane.f32.xlu1 %v5633_v43  ;;  %v5760_v26 = vsel %vm1056_vm1, %v13826_v14, 0.0 }
0x1315   : > { %5761 = vadd.xlane.f32.xlu0 %v5760_v26  ;;  %12271 = vpow2.f32 %v5886_v54 }
0x1316   : > { %v12268_v63 = vpop.eup %12267 }
0x1317   : > { %v5383_v1 = vmul.f32 %v12268_v63, %v13745_v51  ;;  %v5883_v47 = vpop.xlane.xlu1 %5882  ;;  %v6010_v39 = vpop.xlane.xlu2 %6009 }
0x1318   : > { %v5885_v55 = vsub.f32 %v13763_v36, %v5883_v47  ;;  %v6014_v45 = vsub.f32 %v13760_v50, %v6010_v39 }
0x1319   : > { %10538 = vmatmul.msk.f32.vlgmr.msrb.gmra.mxu1 %vm1056_vm1, %v5383_v1  ;;  %v11942_v1 = vunpack.i.h.bf16 %v13793_v13 }
0x131a   : > { %v13835_v35 = vpop.eup %12269  ;;  %5687 = vmatpush.msrb.mxu1 %v11937_v33  ;;  %v5888_v7 = vmul.f32 1.442695, %v5885_v55  ;;  %v6016_v36 = vmul.f32 1.442695, %v6014_v45 }
0x131b   : > { %v5763_v5 = vsel %vm1056_vm1, %v13835_v35, 0.0  ;;  %v13840_v8 = vpop.eup %12271 }
0x131c   : > { %5764 = vadd.xlane.f32.xlu1 %v5763_v5  ;;  %12273 = vpow2.f32 %v5888_v7  ;;  %v5890_v59 = vsel %vm1056_vm1, %v13840_v8, 0.0 }
0x131f   : > { %v6013_v30 = vpop.xlane.xlu0 %6012 }
0x1320   : > { %v6015_v51 = vsub.f32 %v13770_v31, %v6013_v30 }
0x1322   : > { %v6018_v12 = vmul.f32 1.442695, %v6015_v51  ;;  %v13846_v56 = vpop.eup %12273 }
0x1323   : > { %v5893_v31 = vsel %vm1056_vm1, %v13846_v56, 0.0 }
0x1324   : > { %12275 = vpow2.f32 %v6018_v12  ;;  %5891 = vadd.xlane.f32.xlu1 %v5890_v59 }
0x1325   : > { %12277 = vpow2.f32 %v6016_v36 }
0x1327   : > { %v6143_v20 = vpop.xlane.xlu2 %6142 }
0x1328   : > { %v6145_v22 = vsub.f32 %v13775_v46, %v6143_v20 }
0x132a   : > { %v13849_v0 = vpop.eup %12275  ;;  %v6148_v18 = vmul.f32 1.442695, %v6145_v22 }
0x132b   : > { %v6023_v50 = vsel %vm1056_vm1, %v13849_v0, 0.0  ;;  %v13855_v61 = vpop.eup %12277 }
0x132c   : > { %12279 = vpow2.f32 %v6148_v18  ;;  %6024 = vadd.xlane.f32.xlu2 %v6023_v50  ;;  %5894 = vadd.xlane.f32.xlu1 %v5893_v31  ;;  %v6020_v28 = vsel %vm1056_vm1, %v13855_v61, 0.0 }
0x132f   : > { %v13865_v11 = vpop.permute.xlu1 %11949  ;;  %v6270_v27 = vpop.xlane.xlu2 %6269 }
0x1330   : > { %v6274_v57 = vsub.f32 %v13780_v52, %v6270_v27  ;;  %v11952_v51 = vunpack.i.h.bf16 %v13865_v11 }
0x1332   : > { %v13857_v25 = vpop.eup %12279  ;;  %v11945_v2 = vpop.permute.xlu0 %11944  ;;  %v6276_v19 = vmul.f32 1.442695, %v6274_v57 }
0x1333   : > { %v6153_v46 = vsel %vm1056_vm1, %v13857_v25, 0.0  ;;  %v11946_v43 = vunpack.i.l.bf16 %v11945_v2  ;;  %v11947_v7 = vunpack.i.h.bf16 %v11945_v2 }
0x1334   : > { %6154 = vadd.xlane.f32.xlu0 %v6153_v46  ;;  %6021 = vadd.xlane.f32.xlu1 %v6020_v28 }
0x1348   : > { %11959 = vrot.lane.b32.xlu0 %v13643_v37, %s12584_s4 }
0x135a   : > { %v6140_v3 = vpop.xlane.xlu1 %6139 }
0x135b   : > { %v6144_v32 = vsub.f32 %v13791_v10, %v6140_v3 }
0x135d   : > { %v6146_v62 = vmul.f32 1.442695, %v6144_v32  ;;  %v6273_v15 = vpop.xlane.xlu0 %6272 }
0x135e   : > { %v6275_v4 = vsub.f32 %v13796_v17, %v6273_v15 }
0x135f   : > { %12281 = vpow2.f32 %v6146_v62 }
0x1360   : > { %v6278_v53 = vmul.f32 1.442695, %v6275_v4 }
0x1362   : > { %12283 = vpow2.f32 %v6278_v53 }
0x1363   : > { %12285 = vpow2.f32 %v6276_v19 }
0x1364   : > { %v5500_v40 = vpop.xlane.xlu1 %5499 }
0x1365   : > { %v13870_v9 = vpop.eup %12281  ;;  %12287 = vrcp.f32 %v5500_v40 }
0x1366   : > { %v6150_v58 = vsel %vm1056_vm1, %v13870_v9, 0.0 }
0x1367   : > { %6151 = vadd.xlane.f32.xlu1 %v6150_v58 }
0x1368   : > { %v13874_v10 = vpop.eup %12283 }
0x1369   : > { %v6283_v52 = vsel %vm1056_vm1, %v13874_v10, 0.0  ;;  %v13878_v42 = vpop.eup %12285 }
0x136a   : > { %6284 = vadd.xlane.f32.xlu2 %v6283_v52  ;;  %v6280_v49 = vsel %vm1056_vm1, %v13878_v42, 0.0 }
0x136b   : > { %v12288_v17 = vpop.eup %12287 }
0x136c   : > { %v5506_v48 = vmul.f32 %v12288_v17, %v13804_v6  ;;  %v5632_v16 = vpop.xlane.xlu0 %5631 }
0x136d   : > { %12289 = vrcp.f32 %v5632_v16 }
0x136e   : > { %10543 = vmatmul.msk.f32.vlgmr.msra.gmra.mxu0 %vm1056_vm1, %v5506_v48 }
0x136f   : > { %5791 = vmatpush.msra.mxu0 %v11941_v23  ;;  %6281 = vadd.xlane.f32.xlu1 %v6280_v49 }
0x1373   : > { %v12290_v44 = vpop.eup %12289 }
0x1374   : > { %v5638_v41 = vmul.f32 %v12290_v44, %v13808_v29 }
0x1376   : > { %10549 = vmatmul.msk.f32.vlgmr.msrb.gmra.mxu0 %vm1056_vm1, %v5638_v41 }
0x1377   : > { %5921 = vmatpush.msrb.mxu0 %v11946_v43 }
0x137f   : > { %v5503_v26 = vpop.xlane.xlu2 %5502 }
0x1380   : > { %12291 = vrcp.f32 %v5503_v26 }
0x1382   : > { %11954 = vrot.lane.b32.xlu2 %v13643_v37, %s12583_s28 }
0x1386   : > { %v12292_v6 = vpop.eup %12291 }
0x1387   : > { %v5507_v63 = vmul.f32 %v12292_v6, %v13818_v34  ;;  %v5635_v54 = vpop.xlane.xlu1 %5634  ;;  %v11951_v34 = vunpack.i.l.bf16 %v13865_v11 }
0x1388   : > { %v5762_v47 = vpop.xlane.xlu0 %5761  ;;  %12293 = vrcp.f32 %v5635_v54 }
0x1389   : > { %12295 = vrcp.f32 %v5762_v47  ;;  %10544 = vmatmul.msk.f32.vlgmr.msra.gmra.mxu1 %vm1056_vm1, %v5507_v63 }
0x138a   : > { %5817 = vmatpush.msra.mxu1 %v11942_v1 }
0x138e   : > { %v12294_v29 = vpop.eup %12293 }
0x138f   : > { %v12296_v33 = vpop.eup %12295  ;;  %v5639_v55 = vmul.f32 %v12294_v29, %v13823_v38  ;;  %v5765_v5 = vpop.xlane.xlu1 %5764 }
0x1390   : > { %v5768_v37 = vmul.f32 %v12296_v33, %v13826_v14  ;;  %12297 = vrcp.f32 %v5765_v5  ;;  %v11558_v5 = vld [vmem:[#allocation6 + $0xb0] sm:$0xff] }
0x1391   : > { %10550 = vmatmul.msk.f32.vlgmr.msrb.gmra.mxu1 %vm1056_vm1, %v5639_v55  ;;  %v11559_v55 = vld [vmem:[#allocation6 + $0xb8] sm:$0xff] }
0x1392   : > { %10555 = vmatmul.msk.f32.vlgmr.msra.gmra.mxu0 %vm1056_vm1, %v5768_v37  ;;  %5947 = vmatpush.msrb.mxu1 %v11947_v7  ;;  %v11557_v7 = vld [vmem:[#allocation6 + $0xa8] sm:$0xff]  ;;  %v11556_v37 = vld [vmem:[#allocation6 + $0xa0] sm:$0xff] }
0x1393   : > { %6051 = vmatpush.msra.mxu0 %v11951_v34  ;;  %6483 = vmatpush.bf16.msra.mxu2 %v11559_v55  ;;  %v11555_v34 = vld [vmem:[#allocation6 + $0x98] sm:$0xff]  ;;  %v11589_v55 = vld [vmem:[#allocation7 + $0x2ec] sm:$0xf] }
0x1396   : > { %v12298_v13 = vpop.eup %12297  ;;  %v5427_v40 = vpop.f32.mrf.mxu1 }
0x1397   : > { %v5769_v39 = vmul.f32 %v12298_v13, %v13835_v35  ;;  %v5892_v30 = vpop.xlane.xlu1 %5891  ;;  %6484 = vmatpush.bf16.msra.mxu2 %v11558_v5  ;;  %v11554_v13 = vld [vmem:[#allocation6 + $0x90] sm:$0xff]  ;;  %v10741_v5 = vld [vmem:[#allocation7 + $0x2f8] sm:$0xf0] }
0x1398   : > { %12299 = vrcp.f32 %v5892_v30  ;;  %v11552_v30 = vld [vmem:[#allocation6 + $0x80] sm:$0xff] }
0x1399   : > { %10556 = vmatmul.msk.f32.vlgmr.msra.gmra.mxu1 %vm1056_vm1, %v5769_v39  ;;  %v11553_v39 = vld [vmem:[#allocation6 + $0x88] sm:$0xff] }
0x139a   : > { %6077 = vmatpush.msra.mxu1 %v11952_v51 }
0x139b   : > { %6485 = vmatpush.bf16.msra.mxu2 %v11557_v7  ;;  %v10715_v7 = vld [vmem:[#allocation7 + $0x2c0] sm:$0xf] }
0x139e   : > { %v12300_v38 = vpop.eup %12299 }
0x139f   : > { %v5898_v14 = vmul.f32 %v12300_v38, %v13840_v8  ;;  %v5895_v45 = vpop.xlane.xlu1 %5894  ;;  %v6025_v12 = vpop.xlane.xlu2 %6024  ;;  %6486 = vmatpush.bf16.msra.mxu2 %v11556_v37  ;;  %v11586_v37 = vld [vmem:[#allocation7 + $0x2cc] sm:$0xf0] }
0x13a0   : > { %12301 = vrcp.f32 %v5895_v45 }
0x13a1   : > { %10561 = vmatmul.msk.f32.vlgmr.msrb.gmra.mxu0 %vm1056_vm1, %v5898_v14  ;;  %12303 = vrcp.f32 %v6025_v12 }
0x13a3   : > { %6487 = vmatpush.bf16.msra.mxu2 %v11555_v34  ;;  %v11584_v34 = vld [vmem:[#allocation7 + $0x2c4] sm:$0xf] }
0x13a6   : > { %v12302_v59 = vpop.eup %12301 }
0x13a7   : > { %v6022_v36 = vpop.xlane.xlu1 %6021  ;;  %v5899_v35 = vmul.f32 %v12302_v59, %v13846_v56  ;;  %v12304_v20 = vpop.eup %12303  ;;  %6488 = vmatpush.bf16.msra.mxu2 %v11554_v13  ;;  %v10716_v13 = vor.u32 %v11586_v37, %v10715_v7 }
0x13a8   : > { %12305 = vrcp.f32 %v6022_v36  ;;  %v6029_v18 = vmul.f32 %v12304_v20, %v13849_v0  ;;  %v6155_v8 = vpop.xlane.xlu0 %6154 }
0x13a9   : > { %10562 = vmatmul.msk.f32.vlgmr.msrb.gmra.mxu1 %vm1056_vm1, %v5899_v35  ;;  %12307 = vrcp.f32 %v6155_v8 }
0x13ab   : > { %6489 = vmatpush.bf16.msra.mxu2 %v11553_v39  ;;  %v10717_v39 = vld [vmem:[#allocation7 + $0x2d0] sm:$0xf0] }
0x13ae   : > { %v12306_v22 = vpop.eup %12305 }
0x13af   : > { %v6028_v50 = vmul.f32 %v12306_v22, %v13855_v61  ;;  %v12308_v28 = vpop.eup %12307  ;;  %6490 = vmatpush.bf16.msra.mxu2 %v11552_v30  ;;  %v10723_v30 = vld [vmem:[#allocation7 + $0x2c8] sm:$0xf] }
0x13b0   : > { %v6159_v61 = vmul.f32 %v12308_v28, %v13857_v25  ;;  %v5404_v25 = vpop.f32.mrf.mxu0 }
0x13b1   : > { %10567 = vmatmul.msk.f32.vlgmr.msra.gmra.mxu0 %vm1056_vm1, %v6028_v50  ;;  %10568 = vmatmul.msk.f32.vlgmr.msra.gmra.mxu1 %vm1056_vm1, %v6029_v18 }
0x13ba   : > { %v11960_v2 = vpop.permute.xlu0 %11959 }
0x13bb   : > { %v11962_v57 = vunpack.i.h.bf16 %v11960_v2  ;;  %v11961_v62 = vunpack.i.l.bf16 %v11960_v2 }
0x13da   : > { %v6152_v31 = vpop.xlane.xlu1 %6151 }
0x13db   : > { %12309 = vrcp.f32 %v6152_v31 }
0x13dd   : > { %v6285_v46 = vpop.xlane.xlu2 %6284 }
0x13de   : > { %12311 = vrcp.f32 %v6285_v46 }
0x13e1   : > { %v12310_v11 = vpop.eup %12309 }
0x13e2   : > { %v6282_v56 = vpop.xlane.xlu1 %6281  ;;  %v6158_v32 = vmul.f32 %v12310_v11, %v13870_v9 }
0x13e3   : > { %12313 = vrcp.f32 %v6282_v56 }
0x13e4   : > { %v12312_v15 = vpop.eup %12311 }
0x13e5   : > { %v11955_v27 = vpop.permute.xlu2 %11954  ;;  %v6289_v19 = vmul.f32 %v12312_v15, %v13874_v10 }
0x13e6   : > { %v11957_v3 = vunpack.i.h.bf16 %v11955_v27  ;;  %v11956_v0 = vunpack.i.l.bf16 %v11955_v27 }
0x13e8   : > { %6181 = vmatpush.msrb.mxu0 %v11956_v0  ;;  %6207 = vmatpush.msrb.mxu1 %v11957_v3 }
0x13e9   : > { %10573 = vmatmul.msk.f32.vlgmr.msrb.gmra.mxu0 %vm1056_vm1, %v6158_v32  ;;  %10574 = vmatmul.msk.f32.vlgmr.msrb.gmra.mxu1 %vm1056_vm1, %v6159_v61  ;;  %v12314_v4 = vpop.eup %12313 }
0x13ea   : > { %6311 = vmatpush.msra.mxu0 %v11961_v62  ;;  %6337 = vmatpush.msra.mxu1 %v11962_v57  ;;  %v6288_v53 = vmul.f32 %v12314_v4, %v13878_v42 }
0x13eb   : > { %v5532_v9 = vpop.f32.mrf.mxu0 }
0x13f1   : > { %10579 = vmatmul.msk.f32.vlgmr.msra.gmra.mxu0 %vm1056_vm1, %v6288_v53  ;;  %10580 = vmatmul.msk.f32.vlgmr.msra.gmra.mxu1 %vm1056_vm1, %v6289_v19 }
0x13f3   : > { %v5663_v17 = vpop.f32.mrf.mxu0 }
0x1406   : > { %v5559_v58 = vpop.f32.mrf.mxu1 }
0x1407   : > { %v11963_v52 = vpack.i.bf16 %v5559_v58, %v5532_v9 }
0x1409   : > { %11964 = vrot.lane.b32.xlu0 %v11963_v52, %s12584_s4 }
0x140e   : > { %v5689_v48 = vpop.f32.mrf.mxu1 }
0x140f   : > { %v11968_v16 = vpack.i.bf16 %v5689_v48, %v5663_v17  ;;  %v5793_v23 = vpop.f32.mrf.mxu0  ;;  %v12089_v48 = vld [vmem:[%s14490_s10 + $0x2] ss:$0 sm:$0xff] }
0x1411   : > { %11969 = vrot.lane.b32.xlu2 %v11968_v16, %s12583_s28 }
0x1416   : > { %v5819_v10 = vpop.f32.mrf.mxu1 }
0x1417   : > { %v11973_v49 = vpack.i.bf16 %v5819_v10, %v5793_v23 }
0x1419   : > { %11974 = vrot.lane.b32.xlu0 %v11973_v49, %s12581_s13 }
0x141e   : > { %v5923_v42 = vpop.f32.mrf.mxu0 }
0x1426   : > { %v5949_v44 = vpop.f32.mrf.mxu1 }
0x1427   : > { %v11978_v41 = vpack.i.bf16 %v5949_v44, %v5923_v42 }
0x1429   : > { %11979 = vrot.lane.b32.xlu1 %v11978_v41, %s12580_s7 }
0x142e   : > { %v6053_v43 = vpop.f32.mrf.mxu0  ;;  %v6079_v26 = vpop.f32.mrf.mxu1 }
0x142f   : > { %v11983_v6 = vpack.i.bf16 %v6079_v26, %v6053_v43  ;;  %v10731_v26 = vld [vmem:[#allocation7 + $0x2e0] sm:$0xf] }
0x1431   : > { %11984 = vrot.lane.b32.xlu2 %v11983_v6, %s12582_s2  ;;  %v11588_v6 = vld [vmem:[#allocation7 + $0x2e4] sm:$0xf] }
0x1466   : > { %v6183_v63 = vpop.f32.mrf.mxu0  ;;  %v6209_v54 = vpop.f32.mrf.mxu1 }
0x1467   : > { %v11988_v1 = vpack.i.bf16 %v6209_v54, %v6183_v63  ;;  %v10733_v54 = vld [vmem:[#allocation7 + $0x2f0] sm:$0xf0] }
0x1469   : > { %11989 = vrot.lane.b32.xlu0 %v11988_v1, %s12579_s0  ;;  %v10739_v1 = vld [vmem:[#allocation7 + $0x2e8] sm:$0xf] }
0x146b   : > { %v11970_v51 = vpop.permute.xlu2 %11969 }
0x146c   : > { %v11972_v50 = vunpack.i.h.bf16 %v11970_v51  ;;  %v11971_v8 = vunpack.i.l.bf16 %v11970_v51  ;;  %v11587_v51 = vld [vmem:[#allocation7 + $0x2d4] sm:$0xf0] }
0x146e   : > { %v6313_v47 = vpop.f32.mrf.mxu0  ;;  %v6339_v29 = vpop.f32.mrf.mxu1 }
0x146f   : > { %v11993_v33 = vpack.i.bf16 %v6339_v29, %v6313_v47  ;;  %v11591_v47 = vld [vmem:[#allocation7 + $0x2f4] sm:$0xf0]  ;;  %v10736_v29 = vor.u32 %v11588_v6, %v10733_v54  ;;  %v10653_v54 = vld [vmem:[#allocation7 + $0x250] sm:$0xf0] }
0x1471   : > { %11994 = vrot.lane.b32.xlu2 %v11993_v33, %s12578_s5  ;;  %v10740_v33 = vor.u32 %v11591_v47, %v10739_v1  ;;  %6776 = vmatpush.bf16.msrb.mxu0 %v10736_v29  ;;  %v10659_v1 = vld [vmem:[#allocation7 + $0x248] sm:$0xf]  ;;  %v11571_v47 = vld [vmem:[#allocation7 + $0x254] sm:$0xf0] }
0x1473   : > { %6790 = vmatpush.bf16.msrb.mxu1 %v10740_v33 }
0x147b   : > { %v11965_v38 = vpop.permute.xlu0 %11964 }
0x147c   : > { %v11967_v14 = vunpack.i.h.bf16 %v11965_v38  ;;  %v11966_v45 = vunpack.i.l.bf16 %v11965_v38  ;;  %v10720_v38 = vor.u32 %v11584_v34, %v10717_v39  ;;  %v10635_v39 = vld [vmem:[#allocation7 + $0x220] sm:$0xf] }
0x147e   : > { %v6399_v35 = vsel %vm1003_vm0, %v5427_v40, %v11967_v14  ;;  %v6398_v20 = vsel %vm1003_vm0, %v5404_v25, %v11966_v45  ;;  %v10724_v14 = vor.u32 %v11587_v51, %v10723_v30  ;;  %v11585_v45 = vld [vmem:[#allocation7 + $0x2cc] sm:$0xf]  ;;  %6777 = vmatpush.bf16.msrb.mxu0 %v10720_v38  ;;  %v11566_v30 = vld [vmem:[#allocation7 + $0x22c] sm:$0xf0]  ;;  %v11564_v51 = vld [vmem:[#allocation7 + $0x224] sm:$0xf] }
0x147f   : > { %v6400_v28 = vsel %vm2095_vm2, %v6398_v20, %v11971_v8  ;;  %v6401_v56 = vsel %vm2095_vm2, %v6399_v35, %v11972_v50  ;;  %v11582_v35 = vld [vmem:[#allocation7 + $0x2ac] sm:$0xf0]  ;;  %v11580_v20 = vld [vmem:[#allocation7 + $0x2a4] sm:$0xf]  ;;  %v10707_v50 = vld [vmem:[#allocation7 + $0x2a8] sm:$0xf]  ;;  %v10636_v38 = vor.u32 %v11566_v30, %v10635_v39 }
0x1480   : > { %6791 = vmatpush.bf16.msrb.mxu1 %v10724_v14  ;;  %v11583_v8 = vld [vmem:[#allocation7 + $0x2b4] sm:$0xf0]  ;;  %v10637_v14 = vld [vmem:[#allocation7 + $0x230] sm:$0xf0]  ;;  %v12090_v39 = vld [vmem:[%s14491_s11 + $0x2] ss:$0 sm:$0xff] }
0x148b   : > { %v11975_v12 = vpop.permute.xlu0 %11974  ;;  %v11985_v59 = vpop.permute.xlu2 %11984 }
0x148c   : > { %v11977_v22 = vunpack.i.h.bf16 %v11975_v12  ;;  %v11976_v18 = vunpack.i.l.bf16 %v11975_v12  ;;  %v11987_v61 = vunpack.i.h.bf16 %v11985_v59  ;;  %v11986_v32 = vunpack.i.l.bf16 %v11985_v59  ;;  %v10725_v12 = vld [vmem:[#allocation7 + $0x2d8] sm:$0xf0] }
0x148d   : > { %v10728_v59 = vor.u32 %v11585_v45, %v10725_v12  ;;  %v10643_v45 = vld [vmem:[#allocation7 + $0x228] sm:$0xf]  ;;  %v11567_v12 = vld [vmem:[#allocation7 + $0x234] sm:$0xf0] }
0x148e   : > { %v6403_v11 = vsel %vm2098_vm3, %v6401_v56, %v11977_v22  ;;  %v6402_v2 = vsel %vm2098_vm3, %v6400_v28, %v11976_v18  ;;  %v10701_v18 = vld [vmem:[#allocation7 + $0x2b0] sm:$0xf0]  ;;  %v11581_v28 = vld [vmem:[#allocation7 + $0x2ac] sm:$0xf]  ;;  %v10709_v56 = vld [vmem:[#allocation7 + $0x2b8] sm:$0xf0] }
0x149b   : > { %v11980_v36 = vpop.permute.xlu1 %11979 }
0x149c   : > { %v11982_v31 = vunpack.i.h.bf16 %v11980_v36  ;;  %v11981_v46 = vunpack.i.l.bf16 %v11980_v36  ;;  %v10699_v36 = vld [vmem:[#allocation7 + $0x2a0] sm:$0xf] }
0x149d   : > { %v10700_v22 = vor.u32 %v11582_v35, %v10699_v36  ;;  %v10640_v36 = vor.u32 %v11564_v51, %v10637_v14  ;;  %v10644_v35 = vor.u32 %v11567_v12, %v10643_v45 }
0x149e   : > { %v6405_v27 = vsel %vm2101_vm4, %v6403_v11, %v11982_v31  ;;  %v6404_v3 = vsel %vm2101_vm4, %v6402_v2, %v11981_v46  ;;  %v10704_v31 = vor.u32 %v11580_v20, %v10701_v18  ;;  %v10708_v46 = vor.u32 %v11583_v8, %v10707_v50  ;;  %v10683_v2 = vld [vmem:[#allocation7 + $0x280] sm:$0xf]  ;;  %v11565_v20 = vld [vmem:[#allocation7 + $0x22c] sm:$0xf]  ;;  %v11562_v8 = vld [vmem:[#allocation7 + $0x20c] sm:$0xf0] }
0x149f   : > { %v6406_v53 = vsel %vm2104_vm5, %v6404_v3, %v11986_v32  ;;  %v6407_v25 = vsel %vm2104_vm5, %v6405_v27, %v11987_v61  ;;  %v10712_v11 = vor.u32 %v11581_v28, %v10709_v56  ;;  %v11578_v27 = vld [vmem:[#allocation7 + $0x28c] sm:$0xf0]  ;;  %v11576_v3 = vld [vmem:[#allocation7 + $0x284] sm:$0xf]  ;;  %v10685_v61 = vld [vmem:[#allocation7 + $0x290] sm:$0xf0] }
0x14a0   : > { %6778 = vmatpush.bf16.msrb.mxu0 %v10704_v31  ;;  %6792 = vmatpush.bf16.msrb.mxu1 %v10708_v46  ;;  %v10691_v32 = vld [vmem:[#allocation7 + $0x288] sm:$0xf]  ;;  %v10619_v18 = vld [vmem:[#allocation7 + $0x200] sm:$0xf]  ;;  %v11560_v31 = vld [vmem:[#allocation7 + $0x204] sm:$0xf] }
0x14a1   : > { %v10621_v46 = vld [vmem:[#allocation7 + $0x210] sm:$0xf0]  ;;  %v10620_v56 = vor.u32 %v11562_v8, %v10619_v18  ;;  %v11620_v18 = vld [vmem:[#allocation9 + $0x2e0] sm:$0xff] }
0x14a2   : > { %v11610_v8 = vld [vmem:[#allocation9 + $0x290] sm:$0xff] }
0x14cb   : > { %v11995_v0 = vpop.permute.xlu2 %11994 }
0x14cc   : > { %v11997_v4 = vunpack.i.h.bf16 %v11995_v0  ;;  %v11996_v19 = vunpack.i.l.bf16 %v11995_v0  ;;  %v10684_v0 = vor.u32 %v11578_v27, %v10683_v2  ;;  %v10627_v2 = vld [vmem:[#allocation7 + $0x208] sm:$0xf]  ;;  %v11563_v27 = vld [vmem:[#allocation7 + $0x214] sm:$0xf0] }
0x14db   : > { %v11990_v57 = vpop.permute.xlu0 %11989 }
0x14dc   : > { %v11992_v62 = vunpack.i.h.bf16 %v11990_v57  ;;  %v11991_v15 = vunpack.i.l.bf16 %v11990_v57  ;;  %v11579_v57 = vld [vmem:[#allocation7 + $0x294] sm:$0xf0] }
0x14de   : > { %v6409_v40 = vsel %vm2107_vm6, %v6407_v25, %v11992_v62  ;;  %v6408_v9 = vsel %vm2107_vm6, %v6406_v53, %v11991_v15  ;;  %v10688_v62 = vor.u32 %v11576_v3, %v10685_v61  ;;  %v10692_v15 = vor.u32 %v11579_v57, %v10691_v32  ;;  %v10667_v25 = vld [vmem:[#allocation7 + $0x260] sm:$0xf]  ;;  %v11561_v61 = vld [vmem:[#allocation7 + $0x20c] sm:$0xf]  ;;  %v10629_v32 = vld [vmem:[#allocation7 + $0x218] sm:$0xf0] }
0x14df   : > { %v6410_v58 = vsel %vm2110_vm7, %v6408_v9, %v11996_v19  ;;  %v6411_v52 = vsel %vm2110_vm7, %v6409_v40, %v11997_v4  ;;  %v11577_v4 = vld [vmem:[#allocation7 + $0x28c] sm:$0xf]  ;;  %v10693_v19 = vld [vmem:[#allocation7 + $0x298] sm:$0xf0]  ;;  %v11574_v40 = vld [vmem:[#allocation7 + $0x26c] sm:$0xf0] }
0x14e0   : > { %v6412_v17 = vpack.c.bf16 %v6411_v52, %v6410_v58  ;;  %v10696_v53 = vor.u32 %v11577_v4, %v10693_v19  ;;  %6779 = vmatpush.bf16.msrb.mxu0 %v10688_v62  ;;  %6793 = vmatpush.bf16.msrb.mxu1 %v10692_v15  ;;  %v11572_v9 = vld [vmem:[#allocation7 + $0x264] sm:$0xf]  ;;  %v10668_v58 = vor.u32 %v11574_v40, %v10667_v25  ;;  %v10669_v52 = vld [vmem:[#allocation7 + $0x270] sm:$0xf0]  ;;  %v11615_v25 = vld [vmem:[#allocation9 + $0x2b8] sm:$0xff] }
0x14e1   : > { %v10632_v62 = vor.u32 %v11561_v61, %v10629_v32  ;;  %v11617_v61 = vld [vmem:[#allocation9 + $0x2c8] sm:$0xff]  ;;  %v11592_v32 = vld [vmem:[#allocation9 + $0x200] sm:$0xff] }
0x14e2   : > { %6491 = vmatmul.bf16.vlgmr.msra.gmra.mxu2 %v6412_v17  ;;  %v10675_v17 = vld [vmem:[#allocation7 + $0x268] sm:$0xf] }
0x1565   : > { %v6492_v16 = vpop.f32.mrf.mxu2 }
0x1566   : > { %v6493_v23 = vadd.f32 %v12089_v48, %v6492_v16  ;;  %v10672_v16 = vor.u32 %v11572_v9, %v10669_v52  ;;  %v11599_v9 = vld [vmem:[#allocation9 + $0x238] sm:$0xff]  ;;  %v11606_v52 = vld [vmem:[#allocation9 + $0x270] sm:$0xff] }
0x1568   : > { %v13941_v10 = vadd.f32 %v6493_v23, %v13620_v24  ;;  %v11590_v24 = vld [vmem:[#allocation7 + $0x2ec] sm:$0xf0]  ;;  %6780 = vmatpush.bf16.msrb.mxu0 %v10672_v16 }
0x1569   : > { %v10732_v63 = vor.u32 %v11590_v24, %v10731_v26  ;;  %v11570_v26 = vld [vmem:[#allocation7 + $0x24c] sm:$0xf0]  ;;  %v11568_v24 = vld [vmem:[#allocation7 + $0x244] sm:$0xf] }
0x156a   : > { %6499 = vadd.xlane.f32.xlu0 %v13941_v10  ;;  %v6505_v49 = vmul.f32 %v13941_v10, %v13941_v10  ;;  %v10656_v33 = vor.u32 %v11568_v24, %v10653_v54  ;;  %v11597_v24 = vld [vmem:[#allocation9 + $0x228] sm:$0xff] }
0x156b   : > { %6762 = vmatpush.bf16.msrb.mxu3 %v10732_v63 }
0x156c   : > { %6507 = vadd.xlane.f32.xlu1 %v6505_v49  ;;  %v11573_v49 = vld [vmem:[#allocation7 + $0x26c] sm:$0xf]  ;;  %6781 = vmatpush.bf16.msrb.mxu0 %v10656_v33 }
0x156d   : > { %v6494_v42 = vpop.f32.mrf.mxu2 }
0x156e   : > { %v6495_v44 = vadd.f32 %v12089_v48, %v6494_v42  ;;  %v11575_v48 = vld [vmem:[#allocation7 + $0x274] sm:$0xf0]  ;;  %v10677_v42 = vld [vmem:[#allocation7 + $0x278] sm:$0xf0] }
0x156f   : > { %6763 = vmatpush.bf16.msrb.mxu3 %v10716_v13  ;;  %v10676_v23 = vor.u32 %v11575_v48, %v10675_v17  ;;  %v11614_v17 = vld [vmem:[#allocation9 + $0x2b0] sm:$0xff] }
0x1570   : > { %v13947_v41 = vadd.f32 %v6495_v44, %v13622_v21  ;;  %v10744_v21 = vor.u32 %v11589_v55, %v10741_v5  ;;  %v10680_v44 = vor.u32 %v11573_v49, %v10677_v42  ;;  %v10660_v55 = vor.u32 %v11571_v47, %v10659_v1  ;;  %v11569_v5 = vld [vmem:[#allocation7 + $0x24c] sm:$0xf]  ;;  %6782 = vmatpush.bf16.msrb.mxu0 %v10640_v36  ;;  %v11622_v49 = vld [vmem:[#allocation9 + $0x2f0] sm:$0xff]  ;;  %v11604_v1 = vld [vmem:[#allocation9 + $0x260] sm:$0xff] }
0x1571   : > { %6794 = vmatpush.bf16.msrb.mxu1 %v10676_v23  ;;  %v11598_v23 = vld [vmem:[#allocation9 + $0x230] sm:$0xff]  ;;  %v11612_v47 = vld [vmem:[#allocation9 + $0x2a0] sm:$0xff] }
0x1572   : > { %6501 = vadd.xlane.f32.xlu2 %v13947_v41  ;;  %v6506_v43 = vmul.f32 %v13947_v41, %v13947_v41  ;;  %6804 = vmatpush.bf16.msrb.mxu2 %v10744_v21  ;;  %v10661_v21 = vld [vmem:[#allocation7 + $0x258] sm:$0xf0] }
0x1573   : > { %6764 = vmatpush.bf16.msrb.mxu3 %v10700_v22  ;;  %v10664_v37 = vor.u32 %v11569_v5, %v10661_v21  ;;  %v10645_v22 = vld [vmem:[#allocation7 + $0x238] sm:$0xf0] }
0x1574   : > { %6509 = vadd.xlane.f32.xlu0 %v6506_v43  ;;  %v10651_v43 = vld [vmem:[#allocation7 + $0x240] sm:$0xf]  ;;  %v10648_v50 = vor.u32 %v11565_v20, %v10645_v22  ;;  %v11611_v20 = vld [vmem:[#allocation9 + $0x298] sm:$0xff] }
0x1575   : > { %v10652_v63 = vor.u32 %v11570_v26, %v10651_v43  ;;  %6795 = vmatpush.bf16.msrb.mxu1 %v10660_v55  ;;  %v11605_v43 = vld [vmem:[#allocation9 + $0x268] sm:$0xff]  ;;  %v11596_v22 = vld [vmem:[#allocation9 + $0x220] sm:$0xff] }
0x1576   : > { %6805 = vmatpush.bf16.msrb.mxu2 %v10728_v59  ;;  %v11613_v26 = vld [vmem:[#allocation9 + $0x2a8] sm:$0xff] }
0x1577   : > { %6765 = vmatpush.bf16.msrb.mxu3 %v10684_v0  ;;  %v10628_v0 = vor.u32 %v11563_v27, %v10627_v2  ;;  %v11618_v2 = vld [vmem:[#allocation9 + $0x2d0] sm:$0xff]  ;;  %v11600_v27 = vld [vmem:[#allocation9 + $0x240] sm:$0xff] }
0x1579   : > { %6796 = vmatpush.bf16.msrb.mxu1 %v10644_v35 }
0x157a   : > { %6806 = vmatpush.bf16.msrb.mxu2 %v10712_v11  ;;  %v10624_v11 = vor.u32 %v11560_v31, %v10621_v46  ;;  %v11595_v31 = vld [vmem:[#allocation9 + $0x218] sm:$0xff] }
0x157b   : > { %6766 = vmatpush.bf16.msrb.mxu3 %v10668_v58  ;;  %v11623_v58 = vld [vmem:[#allocation9 + $0x2f8] sm:$0xff] }
0x157c   : > { %6783 = vmatpush.bf16.msrb.mxu0 %v10624_v11  ;;  %v11619_v46 = vld [vmem:[#allocation9 + $0x2d8] sm:$0xff]  ;;  %v11594_v11 = vld [vmem:[#allocation9 + $0x210] sm:$0xff] }
0x157d   : > { %6797 = vmatpush.bf16.msrb.mxu1 %v10628_v0  ;;  %v11593_v0 = vld [vmem:[#allocation9 + $0x208] sm:$0xff] }
0x157e   : > { %6807 = vmatpush.bf16.msrb.mxu2 %v10696_v53  ;;  %v11607_v53 = vld [vmem:[#allocation9 + $0x278] sm:$0xff] }
0x157f   : > { %6767 = vmatpush.bf16.msrb.mxu3 %v10652_v63 }
0x1580   : > { %7106 = vmatpush.bf16.msra.mxu0 %v11607_v53 }
0x1581   : > { %7120 = vmatpush.bf16.msra.mxu1 %v11615_v25 }
0x1582   : > { %6808 = vmatpush.bf16.msrb.mxu2 %v10680_v44 }
0x1583   : > { %6768 = vmatpush.bf16.msrb.mxu3 %v10636_v38 }
0x1584   : > { %7107 = vmatpush.bf16.msra.mxu0 %v11606_v52 }
0x1585   : > { %7121 = vmatpush.bf16.msra.mxu1 %v11614_v17 }
0x1586   : > { %6809 = vmatpush.bf16.msrb.mxu2 %v10664_v37 }
0x1587   : > { %6769 = vmatpush.bf16.msrb.mxu3 %v10620_v56  ;;  %v11609_v56 = vld [vmem:[#allocation9 + $0x288] sm:$0xff] }
0x1588   : > { %7108 = vmatpush.bf16.msra.mxu0 %v11605_v43 }
0x1589   : > { %7122 = vmatpush.bf16.msra.mxu1 %v11613_v26 }
0x158a   : > { %6810 = vmatpush.bf16.msrb.mxu2 %v10648_v50  ;;  %v11602_v50 = vld [vmem:[#allocation9 + $0x250] sm:$0xff] }
0x158b   : > { %7092 = vmatpush.bf16.msra.mxu3 %v11599_v9 }
0x158c   : > { %7109 = vmatpush.bf16.msra.mxu0 %v11604_v1 }
0x158d   : > { %7123 = vmatpush.bf16.msra.mxu1 %v11612_v47 }
0x158e   : > { %6811 = vmatpush.bf16.msrb.mxu2 %v10632_v62  ;;  %v10616_v62 = vld [vmem:[%s14494_s14 + $0x8] sm:$0xf] }
0x158f   : > { %7093 = vmatpush.bf16.msra.mxu3 %v11598_v23  ;;  %v6596_v53 = vperm.slane %v10616_v62, 2  ;;  %v6594_v17 = vperm.slane %v10616_v62, 0  ;;  %v6597_v23 = vperm.slane %v10616_v62, 3 }
0x1591   : > { %7124 = vmatpush.bf16.msra.mxu1 %v11611_v20 }
0x1592   : > { %7134 = vmatpush.bf16.msra.mxu2 %v11623_v58 }
0x1593   : > { %7094 = vmatpush.bf16.msra.mxu3 %v11597_v24 }
0x1595   : > { %7125 = vmatpush.bf16.msra.mxu1 %v11610_v8 }
0x1596   : > { %7135 = vmatpush.bf16.msra.mxu2 %v11622_v49 }
0x1597   : > { %7095 = vmatpush.bf16.msra.mxu3 %v11596_v22 }
0x1599   : > { %7126 = vmatpush.bf16.msra.mxu1 %v11609_v56 }
0x159b   : > { %7096 = vmatpush.bf16.msra.mxu3 %v11595_v31 }
0x159f   : > { %7097 = vmatpush.bf16.msra.mxu3 %v11594_v11  ;;  %v11631_v11 = vld [vmem:[%s14525_s24 + $0xf8] sm:$0xff] }
0x15a3   : > { %7098 = vmatpush.bf16.msra.mxu3 %v11593_v0  ;;  %v11646_v0 = vld [vmem:[#allocation4 + $0xf0] sm:$0xff] }
0x15a7   : > { %7099 = vmatpush.bf16.msra.mxu3 %v11592_v32  ;;  %v11637_v32 = vld [vmem:[#allocation2 + $0xe8] sm:$0xff] }
0x15dd   : > { %v6500_v6 = vpop.xlane.xlu0 %6499 }
0x15de   : > { %v13953_v29 = vmul.f32 %v6500_v6, %v13129_v60  ;;  %v11621_v6 = vld [vmem:[#allocation9 + $0x2e8] sm:$0xff] }
0x15df   : > { %v6508_v7 = vpop.xlane.xlu1 %6507  ;;  %7136 = vmatpush.bf16.msra.mxu2 %v11621_v6 }
0x15e0   : > { %v6513_v34 = vmul.f32 %v13953_v29, %v13953_v29  ;;  %v6511_v13 = vmul.f32 %v6508_v7, %v13129_v60 }
0x15e2   : > { %v6515_v59 = vsub.f32 %v6511_v13, %v6513_v34  ;;  %v6517_v34 = vsub.f32 %v13941_v10, %v13953_v29  ;;  %v12091_v10 = vld [vmem:[%s14492_s12 + $0x2] ss:$0 sm:$0xff] }
0x15e3   : > { %7137 = vmatpush.bf16.msra.mxu2 %v11620_v18 }
0x15e4   : > { %v13958_v28 = vadd.f32 1e-05, %v6515_v59 }
0x15e5   : > { %v6502_v3 = vpop.xlane.xlu2 %6501 }
0x15e6   : > { %12315 = vrsqrt.f32 %v13958_v28  ;;  %v13962_v57 = vmul.f32 %v6502_v3, %v13129_v60  ;;  %vm6527_vm10 = vweird.f32 %v13958_v28  ;;  %v11608_v3 = vld [vmem:[#allocation9 + $0x280] sm:$0xff] }
0x15e7   : > { %v6510_v15 = vpop.xlane.xlu0 %6509  ;;  %7138 = vmatpush.bf16.msra.mxu2 %v11619_v46  ;;  %7127 = vmatpush.bf16.msra.mxu1 %v11608_v3  ;;  %v11638_v3 = vld [vmem:[#allocation2 + $0xf0] sm:$0xff] }
0x15e8   : > { %v6514_v4 = vmul.f32 %v13962_v57, %v13962_v57  ;;  %v6512_v19 = vmul.f32 %v6510_v15, %v13129_v60  ;;  %v6518_v38 = vsub.f32 %v13947_v41, %v13962_v57  ;;  %v11603_v41 = vld [vmem:[#allocation9 + $0x258] sm:$0xff]  ;;  %v11616_v57 = vld [vmem:[#allocation9 + $0x2c0] sm:$0xff] }
0x15e9   : > { %7110 = vmatpush.bf16.msra.mxu0 %v11603_v41 }
0x15ea   : > { %v6516_v40 = vsub.f32 %v6512_v19, %v6514_v4  ;;  %v6595_v19 = vperm.slane %v10616_v62, 1  ;;  %v11628_v62 = vld [vmem:[%s14525_s24 + $0xe0] sm:$0xff] }
0x15eb   : > { %7139 = vmatpush.bf16.msra.mxu2 %v11618_v2  ;;  %v11639_v2 = vld [vmem:[#allocation2 + $0xf8] sm:$0xff] }
0x15ec   : > { %v12316_v48 = vpop.eup %12315  ;;  %v6520_v16 = vadd.f32 1e-05, %v6516_v40 }
0x15ed   : > { %v6522_v42 = vmul.f32 %v12316_v48, %v13958_v28  ;;  %vm6528_vm9 = vweird.f32 %v12316_v48  ;;  %7111 = vmatpush.bf16.msra.mxu0 %v11602_v50  ;;  %v11601_v28 = vld [vmem:[#allocation9 + $0x248] sm:$0xff] }
0x15ee   : > { %12317 = vrsqrt.f32 %v6520_v16  ;;  %vm6529_vm11 = vmor %vm6527_vm10, %vm6528_vm9  ;;  %vm6537_vm13 = vweird.f32 %v6520_v16 }
0x15ef   : > { %v6523_v44 = vmul.f32 %v12316_v48, %v6522_v42  ;;  %7140 = vmatpush.bf16.msra.mxu2 %v11617_v61  ;;  %v11629_v61 = vld [vmem:[%s14525_s24 + $0xe8] sm:$0xff] }
0x15f1   : > { %v6524_v63 = vmul.f32 0.5, %v6523_v44  ;;  %7112 = vmatpush.bf16.msra.mxu0 %v11601_v28 }
0x15f3   : > { %v6525_v54 = vsub.f32 1.5, %v6524_v63  ;;  %7141 = vmatpush.bf16.msra.mxu2 %v11616_v57  ;;  %v11645_v57 = vld [vmem:[#allocation4 + $0xe8] sm:$0xff] }
0x15f4   : > { %v12318_v33 = vpop.eup %12317 }
0x15f5   : > { %v6526_v55 = vmul.f32 %v12316_v48, %v6525_v54  ;;  %v6532_v5 = vmul.f32 %v12318_v33, %v6520_v16  ;;  %vm6538_vm12 = vweird.f32 %v12318_v33  ;;  %7113 = vmatpush.bf16.msra.mxu0 %v11600_v27  ;;  %v11647_v27 = vld [vmem:[#allocation4 + $0xf8] sm:$0xff] }
0x15f6   : > { %vm6539_vm14 = vmor %vm6537_vm13, %vm6538_vm12 }
0x15f7   : > { %v6533_v21 = vmul.f32 %v12318_v33, %v6532_v5  ;;  %v6530_v7 = vsel %vm6529_vm11, %v12316_v48, %v6526_v55 }
0x15f8   : > { %v6541_v30 = vmul.f32 %v6530_v7, %v6517_v34 }
0x15f9   : > { %v6534_v37 = vmul.f32 0.5, %v6533_v21 }
0x15fa   : > { %v6548_v45 = vmul.f32 %v12090_v39, %v6541_v30 }
0x15fb   : > { %v6535_v13 = vsub.f32 1.5, %v6534_v37 }
0x15fc   : > { %v13979_v59 = vadd.f32 %v12091_v10, %v6548_v45 }
0x15fd   : > { %v6536_v51 = vmul.f32 %v12318_v33, %v6535_v13 }
0x15ff   : > { %v6540_v14 = vsel %vm6539_vm14, %v12318_v33, %v6536_v51 }
0x1600   : > { %v6542_v12 = vmul.f32 %v6540_v14, %v6518_v38 }
0x1602   : > { %v6549_v29 = vmul.f32 %v12090_v39, %v6542_v12  ;;  %v12092_v39 = vld [vmem:[%s14496_s16 + $0x2] ss:$0 sm:$0xff] }
0x1604   : > { %v13981_v36 = vadd.f32 %v12091_v10, %v6549_v29 }
0x1606   : > { %v6557_v35 = vpack.c.bf16 %v13981_v36, %v13979_v59 }
0x1608   : > { %6770 = vmatmul.bf16.vlgmr.msrb.gmra.mxu3 %v6557_v35  ;;  %6784 = vmatmul.bf16.vlgmr.msrb.gmra.mxu0 %v6557_v35 }
0x1609   : > { %6798 = vmatmul.bf16.vlgmr.msrb.gmra.mxu1 %v6557_v35  ;;  %6812 = vmatmul.bf16.vlgmr.msrb.gmra.mxu2 %v6557_v35 }
0x160a   : > { %7279 = vmatpush.bf16.msrb.mxu3 %v11631_v11  ;;  %7363 = vmatpush.bf16.msrb.mxu0 %v11639_v2  ;;  %v12096_v2 = vld [vmem:[%s14488_s8 + $0x3] ss:$0 sm:$0xff] }
0x160b   : > { %7447 = vmatpush.bf16.msrb.mxu1 %v11647_v27 }
0x160e   : > { %7364 = vmatpush.bf16.msrb.mxu0 %v11638_v3 }
0x160f   : > { %7448 = vmatpush.bf16.msrb.mxu1 %v11646_v0 }
0x1612   : > { %7365 = vmatpush.bf16.msrb.mxu0 %v11637_v32 }
0x1613   : > { %7449 = vmatpush.bf16.msrb.mxu1 %v11645_v57 }
0x1685   : > { %v6785_v15 = vpop.f32.mrf.mxu0 }
0x1686   : > { %v6799_v4 = vpop.f32.mrf.mxu1  ;;  %v6786_v40 = vadd.f32 %v6785_v15, %v6595_v19  ;;  %v11636_v15 = vld [vmem:[#allocation2 + $0xe0] sm:$0xff] }
0x1687   : > { %v6800_v58 = vadd.f32 %v6799_v4, %v6596_v53  ;;  %v11644_v4 = vld [vmem:[#allocation4 + $0xe0] sm:$0xff]  ;;  %7366 = vmatpush.bf16.msrb.mxu0 %v11636_v15 }
0x1688   : > { %v6819_v42 = vmax.f32 %v6786_v40, 0.0  ;;  %7450 = vmatpush.bf16.msrb.mxu1 %v11644_v4 }
0x1689   : > { %v6820_v43 = vmax.f32 %v6800_v58, 0.0  ;;  %v11634_v58 = vld [vmem:[#allocation2 + $0xd0] sm:$0xff] }
0x168b   : > { %v6771_v25 = vpop.f32.mrf.mxu3 }
0x168c   : > { %v6813_v9 = vpop.f32.mrf.mxu2  ;;  %v6772_v24 = vadd.f32 %v6771_v25, %v6594_v17  ;;  %v11643_v25 = vld [vmem:[#allocation4 + $0xd8] sm:$0xff] }
0x168d   : > { %v6787_v52 = vpop.f32.mrf.mxu0  ;;  %v6814_v63 = vadd.f32 %v6813_v9, %v6597_v23  ;;  %7451 = vmatpush.bf16.msrb.mxu1 %v11643_v25  ;;  %v11626_v9 = vld [vmem:[%s14525_s24 + $0xd0] sm:$0xff] }
0x168e   : > { %v6788_v48 = vadd.f32 %v6787_v52, %v6595_v19  ;;  %v6801_v16 = vpop.f32.mrf.mxu1  ;;  %v6818_v5 = vmax.f32 %v6772_v24, 0.0  ;;  %v11627_v19 = vld [vmem:[%s14525_s24 + $0xd8] sm:$0xff]  ;;  %v11642_v52 = vld [vmem:[#allocation4 + $0xd0] sm:$0xff] }
0x168f   : > { %v6802_v49 = vadd.f32 %v6801_v16, %v6596_v53  ;;  %v6821_v7 = vmax.f32 %v6814_v63, 0.0  ;;  %v11635_v53 = vld [vmem:[#allocation2 + $0xd8] sm:$0xff]  ;;  %v11641_v16 = vld [vmem:[#allocation4 + $0xc8] sm:$0xff] }
0x1690   : > { %v6823_v44 = vmax.f32 %v6788_v48, 0.0  ;;  %7367 = vmatpush.bf16.msrb.mxu0 %v11635_v53  ;;  %v11633_v48 = vld [vmem:[#allocation2 + $0xc8] sm:$0xff] }
0x1691   : > { %v6824_v26 = vmax.f32 %v6802_v49, 0.0  ;;  %7452 = vmatpush.bf16.msrb.mxu1 %v11642_v52  ;;  %v11624_v49 = vld [vmem:[%s14525_s24 + $0xc0] sm:$0xff] }
0x1692   : > { %v6827_v6 = vpack.c.bf16 %v6823_v44, %v6819_v42  ;;  %v11632_v42 = vld [vmem:[#allocation2 + $0xc0] sm:$0xff] }
0x1693   : > { %v6828_v54 = vpack.c.bf16 %v6824_v26, %v6820_v43  ;;  %v6773_v1 = vpop.f32.mrf.mxu3  ;;  %v11640_v44 = vld [vmem:[#allocation4 + $0xc0] sm:$0xff] }
0x1694   : > { %v6774_v47 = vadd.f32 %v6773_v1, %v6594_v17  ;;  %v6815_v33 = vpop.f32.mrf.mxu2  ;;  %7114 = vmatmul.bf16.vlgmr.msra.gmra.mxu0 %v6827_v6  ;;  %v11625_v17 = vld [vmem:[%s14525_s24 + $0xc8] sm:$0xff] }
0x1695   : > { %v6816_v55 = vadd.f32 %v6815_v33, %v6597_v23  ;;  %7128 = vmatmul.bf16.vlgmr.msra.gmra.mxu1 %v6828_v54  ;;  %7368 = vmatpush.bf16.msrb.mxu0 %v11634_v58 }
0x1696   : > { %v6822_v21 = vmax.f32 %v6774_v47, 0.0  ;;  %7453 = vmatpush.bf16.msrb.mxu1 %v11641_v16 }
0x1697   : > { %v6825_v37 = vmax.f32 %v6816_v55, 0.0 }
0x1698   : > { %v6826_v34 = vpack.c.bf16 %v6822_v21, %v6818_v5 }
0x1699   : > { %v6829_v13 = vpack.c.bf16 %v6825_v37, %v6821_v7  ;;  %7369 = vmatpush.bf16.msrb.mxu0 %v11633_v48 }
0x169a   : > { %7100 = vmatmul.bf16.vlgmr.msra.gmra.mxu3 %v6826_v34  ;;  %7454 = vmatpush.bf16.msrb.mxu1 %v11640_v44 }
0x169b   : > { %7142 = vmatmul.bf16.vlgmr.msra.gmra.mxu2 %v6829_v13 }
0x169d   : > { %7370 = vmatpush.bf16.msrb.mxu0 %v11632_v42 }
0x1711   : > { %v7115_v30 = vpop.f32.mrf.mxu0 }
0x1712   : > { %v7129_v14 = vpop.f32.mrf.mxu1 }
0x1719   : > { %v7117_v22 = vpop.f32.mrf.mxu0 }
0x171a   : > { %v7131_v50 = vpop.f32.mrf.mxu1 }
0x171d   : > { %v7101_v51 = vpop.f32.mrf.mxu3 }
0x171e   : > { %v7102_v38 = vadd.f32 %v12092_v39, %v7101_v51  ;;  %v7143_v12 = vpop.f32.mrf.mxu2 }
0x1720   : > { %v7116_v45 = vadd.f32 %v7115_v30, %v7102_v38 }
0x1722   : > { %v7130_v10 = vadd.f32 %v7129_v14, %v7116_v45 }
0x1724   : > { %v7144_v29 = vadd.f32 %v7143_v12, %v7130_v10 }
0x1725   : > { %v7103_v35 = vpop.f32.mrf.mxu3 }
0x1726   : > { %v13992_v41 = vadd.f32 %v7144_v29, %v13979_v59  ;;  %v7104_v20 = vadd.f32 %v12092_v39, %v7103_v35  ;;  %v7145_v31 = vpop.f32.mrf.mxu2  ;;  %v12093_v29 = vld [vmem:[%s14497_s17 + $0x2] ss:$0 sm:$0xff] }
0x1728   : > { %v7118_v18 = vadd.f32 %v7117_v22, %v7104_v20  ;;  %7150 = vadd.xlane.f32.xlu2 %v13992_v41  ;;  %v7156_v56 = vmul.f32 %v13992_v41, %v13992_v41 }
0x172a   : > { %v7132_v8 = vadd.f32 %v7131_v50, %v7118_v18 }
0x172c   : > { %v7146_v46 = vadd.f32 %v7145_v31, %v7132_v8 }
0x172e   : > { %v13996_v28 = vadd.f32 %v7146_v46, %v13981_v36  ;;  %v11630_v36 = vld [vmem:[%s14525_s24 + $0xf0] sm:$0xff]  ;;  %v12094_v46 = vld [vmem:[%s14498_s18 + $0x2] ss:$0 sm:$0xff] }
0x172f   : > { %7280 = vmatpush.bf16.msrb.mxu3 %v11630_v36 }
0x1730   : > { %7152 = vadd.xlane.f32.xlu0 %v13996_v28  ;;  %7158 = vadd.xlane.f32.xlu2 %v7156_v56  ;;  %v7157_v59 = vmul.f32 %v13996_v28, %v13996_v28 }
0x1732   : > { %7160 = vadd.xlane.f32.xlu1 %v7157_v59 }
0x1733   : > { %7281 = vmatpush.bf16.msrb.mxu3 %v11629_v61  ;;  %v12097_v61 = vld [vmem:[%s14527_s3 + $0x3] ss:$0 sm:$0xff] }
0x1737   : > { %7282 = vmatpush.bf16.msrb.mxu3 %v11628_v62 }
0x173b   : > { %7283 = vmatpush.bf16.msrb.mxu3 %v11627_v19 }
0x173f   : > { %7284 = vmatpush.bf16.msrb.mxu3 %v11626_v9 }
0x1743   : > { %7285 = vmatpush.bf16.msrb.mxu3 %v11625_v17 }
0x1747   : > { %7286 = vmatpush.bf16.msrb.mxu3 %v11624_v49 }
0x179b   : > { %v7151_v40 = vpop.xlane.xlu2 %7150 }
0x179c   : > { %v7154_v23 = vmul.f32 %v7151_v40, %v13129_v60 }
0x179e   : > { %v7164_v24 = vmul.f32 %v7154_v23, %v7154_v23  ;;  %v7168_v10 = vsub.f32 %v13992_v41, %v7154_v23 }
0x17a3   : > { %v7153_v43 = vpop.xlane.xlu0 %7152  ;;  %v7159_v26 = vpop.xlane.xlu2 %7158 }
0x17a4   : > { %v7155_v6 = vmul.f32 %v7153_v43, %v13129_v60  ;;  %v7162_v63 = vmul.f32 %v7159_v26, %v13129_v60 }
0x17a5   : > { %v7161_v54 = vpop.xlane.xlu1 %7160 }
0x17a6   : > { %v7165_v1 = vmul.f32 %v7155_v6, %v7155_v6  ;;  %v7166_v47 = vsub.f32 %v7162_v63, %v7164_v24  ;;  %v7163_v33 = vmul.f32 %v7161_v54, %v13129_v60  ;;  %v7169_v22 = vsub.f32 %v13996_v28, %v7155_v6  ;;  %v12095_v28 = vld [vmem:[%s14486_s6 + $0x3] ss:$0 sm:$0xff] }
0x17a7   : > { %v14105_v24 = vld [vmem:[%s14528_s21] sm:$0xff] }
0x17a8   : > { %v7170_v55 = vadd.f32 1e-05, %v7166_v47  ;;  %v7167_v5 = vsub.f32 %v7163_v33, %v7165_v1 }
0x17aa   : > { %12319 = vrsqrt.f32 %v7170_v55  ;;  %v7171_v21 = vadd.f32 1e-05, %v7167_v5  ;;  %vm7178_vm8 = vweird.f32 %v7170_v55 }
0x17ac   : > { %12321 = vrsqrt.f32 %v7171_v21  ;;  %vm7188_vm11 = vweird.f32 %v7171_v21 }
0x17b0   : > { %v12320_v7 = vpop.eup %12319 }
0x17b1   : > { %v7173_v37 = vmul.f32 %v12320_v7, %v7170_v55  ;;  %vm7179_vm15 = vweird.f32 %v12320_v7 }
0x17b2   : > { %v12322_v34 = vpop.eup %12321  ;;  %vm7180_vm10 = vmor %vm7178_vm8, %vm7179_vm15 }
0x17b3   : > { %v7174_v13 = vmul.f32 %v12320_v7, %v7173_v37  ;;  %v7183_v39 = vmul.f32 %v12322_v34, %v7171_v21  ;;  %vm7189_vm9 = vweird.f32 %v12322_v34 }
0x17b4   : > { %vm7190_vm12 = vmor %vm7188_vm11, %vm7189_vm9  ;;  %vm9383_vm9 = vcmask 1041409  }
0x17b5   : > { %v7175_v30 = vmul.f32 0.5, %v7174_v13  ;;  %v7184_v51 = vmul.f32 %v12322_v34, %v7183_v39 }
0x17b7   : > { %v7176_v38 = vsub.f32 1.5, %v7175_v30  ;;  %v7185_v14 = vmul.f32 0.5, %v7184_v51 }
0x17b9   : > { %v7177_v45 = vmul.f32 %v12320_v7, %v7176_v38  ;;  %v7186_v12 = vsub.f32 1.5, %v7185_v14 }
0x17bb   : > { %v7181_v35 = vsel %vm7180_vm10, %v12320_v7, %v7177_v45  ;;  %v7187_v20 = vmul.f32 %v12322_v34, %v7186_v12 }
0x17bc   : > { %v7192_v18 = vmul.f32 %v7181_v35, %v7168_v10 }
0x17bd   : > { %v7191_v50 = vsel %vm7190_vm12, %v12322_v34, %v7187_v20 }
0x17be   : > { %v7199_v8 = vmul.f32 %v12093_v29, %v7192_v18  ;;  %v7193_v31 = vmul.f32 %v7191_v50, %v7169_v22 }
0x17c0   : > { %v7200_v41 = vmul.f32 %v12093_v29, %v7193_v31  ;;  %v14039_v56 = vadd.f32 %v12094_v46, %v7199_v8 }
0x17c2   : > { %v14041_v59 = vadd.f32 %v12094_v46, %v7200_v41 }
0x17c4   : > { %v7208_v11 = vpack.c.bf16 %v14041_v59, %v14039_v56 }
0x17c6   : > { %7287 = vmatmul.bf16.vlgmr.msrb.gmra.mxu3 %v7208_v11  ;;  %7371 = vmatmul.bf16.vlgmr.msrb.gmra.mxu0 %v7208_v11 }
0x17c7   : > { %7455 = vmatmul.bf16.vlgmr.msrb.gmra.mxu1 %v7208_v11 }
0x1843   : > { %v7372_v27 = vpop.f32.mrf.mxu0 }
0x1844   : > { %v7373_v36 = vadd.f32 %v12095_v28, %v7372_v27  ;;  %v7456_v3 = vpop.f32.mrf.mxu1 }
0x1845   : > { %v7457_v0 = vadd.f32 %v12096_v2, %v7456_v3 }
0x1846   : > { %7975 = vrot.lane.b32.xlu1 %v7373_v36, %s12580_s7  ;;  %7715 = vrot.lane.b32.xlu2 %v7373_v36, %s12579_s0 }
0x1847   : > { %7553 = vmatpush.msra.mxu0 %v7457_v0  ;;  %7583 = vrot.lane.b32.xlu0 %v7373_v36, %s12578_s5 }
0x1848   : > { %10991 = vmatpush.xpose.msk.msrb.mxu2 %vm1003_vm0, %v7373_v36 }
0x1849   : > { %v7288_v32 = vpop.f32.mrf.mxu3 }
0x184a   : > { %v7289_v57 = vadd.f32 %v12097_v61, %v7288_v32 }
0x184b   : > { %v7374_v62 = vpop.f32.mrf.mxu0 }
0x184c   : > { %v7375_v15 = vadd.f32 %v12095_v28, %v7374_v62  ;;  %v7458_v4 = vpop.f32.mrf.mxu1  ;;  %10992 = vmatmul.msk.f32.vlgmr.msrb.gmra.mxu2 %vm1003_vm0, %v7289_v57 }
0x184d   : > { %v7459_v19 = vadd.f32 %v12096_v2, %v7458_v4 }
0x184e   : > { %10993 = vmatpush.xpose.msk.msra.mxu3 %vm1003_vm0, %v7375_v15  ;;  %7843 = vrot.lane.b32.xlu2 %v7289_v57, %s12582_s2 }
0x184f   : > { %7576 = vmatpush.msra.mxu1 %v7459_v19  ;;  %7845 = vrot.lane.b32.xlu0 %v7373_v36, %s12582_s2  ;;  %v14062_v53 = vpack.i.bf16 %v7459_v19, %v7457_v0 }
0x1850   : > { %7581 = vrot.lane.b32.xlu1 %v7289_v57, %s12578_s5 }
0x1851   : > { %v7290_v25 = vpop.f32.mrf.mxu3 }
0x1852   : > { %v7291_v40 = vadd.f32 %v12097_v61, %v7290_v25 }
0x1854   : > { %10994 = vmatmul.msk.f32.vlgmr.msra.gmra.mxu3 %vm1003_vm0, %v7291_v40 }
0x1856   : > { %7611 = vrot.lane.b32.xlu2 %v7375_v15, %s12578_s5 }
0x1857   : > { %7743 = vrot.lane.b32.xlu0 %v7375_v15, %s12579_s0 }
0x1858   : > { %7713 = vrot.lane.b32.xlu1 %v7289_v57, %s12579_s0 }
0x185e   : > { %7741 = vrot.lane.b32.xlu2 %v7291_v40, %s12579_s0 }
0x185f   : > { %7609 = vrot.lane.b32.xlu0 %v7291_v40, %s12578_s5 }
0x1860   : > { %7873 = vrot.lane.b32.xlu1 %v7375_v15, %s12582_s2 }
0x1866   : > { %8003 = vrot.lane.b32.xlu2 %v7375_v15, %s12580_s7 }
0x1867   : > { %7973 = vrot.lane.b32.xlu0 %v7289_v57, %s12580_s7 }
0x1868   : > { %8103 = vrot.lane.b32.xlu1 %v7289_v57, %s12581_s13 }
0x186e   : > { %8105 = vrot.lane.b32.xlu2 %v7373_v36, %s12581_s13 }
0x186f   : > { %7871 = vrot.lane.b32.xlu0 %v7291_v40, %s12582_s2 }
0x1870   : > { %8001 = vrot.lane.b32.xlu1 %v7291_v40, %s12580_s7 }
0x1876   : > { %8131 = vrot.lane.b32.xlu2 %v7291_v40, %s12581_s13 }
0x1877   : > { %8133 = vrot.lane.b32.xlu0 %v7375_v15, %s12581_s13 }
0x1878   : > { %8263 = vrot.lane.b32.xlu1 %v7375_v15, %s12583_s28 }
0x187e   : > { %8233 = vrot.lane.b32.xlu2 %v7289_v57, %s12583_s28 }
0x187f   : > { %8235 = vrot.lane.b32.xlu0 %v7373_v36, %s12583_s28 }
0x1880   : > { %8365 = vrot.lane.b32.xlu1 %v7373_v36, %s12584_s4 }
0x1886   : > { %8393 = vrot.lane.b32.xlu2 %v7375_v15, %s12584_s4 }
0x1887   : > { %8261 = vrot.lane.b32.xlu0 %v7291_v40, %s12583_s28 }
0x1888   : > { %8391 = vrot.lane.b32.xlu1 %v7291_v40, %s12584_s4 }
0x188e   : > { %12009 = vrot.lane.b32.xlu2 %v14062_v53, %s12582_s2 }
0x188f   : > { %8363 = vrot.lane.b32.xlu0 %v7289_v57, %s12584_s4 }
0x1890   : > { %12004 = vrot.lane.b32.xlu1 %v14062_v53, %s12579_s0 }
0x1897   : > { %11999 = vrot.lane.b32.xlu0 %v14062_v53, %s12578_s5 }
0x18a0   : > { %v7716_v9 = vpop.permute.xlu2 %7715 }
0x18a8   : > { %v7844_v58 = vpop.permute.xlu2 %7843 }
0x18b0   : > { %v7612_v52 = vpop.permute.xlu2 %7611 }
0x18b1   : > { %10999 = vmatpush.xpose.msk.msrb.mxu3 %vm1003_vm0, %v7612_v52 }
0x18b8   : > { %v7976_v17 = vpop.permute.xlu1 %7975  ;;  %v7742_v16 = vpop.permute.xlu2 %7741 }
0x18b9   : > { %v7584_v48 = vpop.permute.xlu0 %7583 }
0x18ba   : > { %10997 = vmatpush.xpose.msk.msra.mxu2 %vm1003_vm0, %v7584_v48 }
0x18be   : > { %11003 = vmatpush.xpose.msk.msrb.mxu2 %vm1003_vm0, %v7716_v9 }
0x18c0   : > { %v8004_v42 = vpop.permute.xlu2 %8003 }
0x18c1   : > { %v7846_v23 = vpop.permute.xlu0 %7845 }
0x18c2   : > { %v7582_v49 = vpop.permute.xlu1 %7581 }
0x18c3   : > { %10998 = vmatmul.msk.f32.vlgmr.msra.gmra.mxu2 %vm1003_vm0, %v7582_v49 }
0x18c4   : > { %11009 = vmatpush.xpose.msk.msra.mxu2 %vm1003_vm0, %v7846_v23 }
0x18c8   : > { %v8106_v47 = vpop.permute.xlu2 %8105 }
0x18c9   : > { %v7744_v44 = vpop.permute.xlu0 %7743 }
0x18ca   : > { %v7714_v43 = vpop.permute.xlu1 %7713  ;;  %11005 = vmatpush.xpose.msk.msra.mxu3 %vm1003_vm0, %v7744_v44 }
0x18cb   : > { %11004 = vmatmul.msk.f32.vlgmr.msrb.gmra.mxu2 %vm1003_vm0, %v7714_v43 }
0x18cc   : > { %11015 = vmatpush.xpose.msk.msrb.mxu2 %vm1003_vm0, %v7976_v17 }
0x18cf   : > { %v7484_v26 = vpop.f32.mrf.mxu2 }
0x18d0   : > { %v7485_v6 = vadd.f32 %v14105_v24, %v7484_v26  ;;  %v8132_v37 = vpop.permute.xlu2 %8131 }
0x18d1   : > { %v7610_v63 = vpop.permute.xlu0 %7609 }
0x18d2   : > { %v7874_v54 = vpop.permute.xlu1 %7873  ;;  %11000 = vmatmul.msk.f32.vlgmr.msrb.gmra.mxu3 %vm1003_vm0, %v7610_v63  ;;  %v7513_v1 = vsel %vm1056_vm1, %v7485_v6, -inf }
0x18d3   : > { %11010 = vmatmul.msk.f32.vlgmr.msra.gmra.mxu2 %vm1003_vm0, %v7844_v58  ;;  %11011 = vmatpush.xpose.msk.msrb.mxu3 %vm1003_vm0, %v7874_v54 }
0x18d4   : > { %11021 = vmatpush.xpose.msk.msra.mxu2 %vm1003_vm0, %v8106_v47  ;;  %7514 = vmax.xlane.f32.xlu2 %v7513_v1 }
0x18d7   : > { %v7510_v33 = vpop.f32.mrf.mxu3 }
0x18d8   : > { %v7511_v55 = vadd.f32 %v14105_v24, %v7510_v33  ;;  %v8234_v39 = vpop.permute.xlu2 %8233 }
0x18d9   : > { %v7974_v5 = vpop.permute.xlu0 %7973 }
0x18da   : > { %v8104_v21 = vpop.permute.xlu1 %8103  ;;  %11006 = vmatmul.msk.f32.vlgmr.msra.gmra.mxu3 %vm1003_vm0, %v7742_v16  ;;  %v7516_v7 = vsel %vm1056_vm1, %v7511_v55, -inf }
0x18db   : > { %11016 = vmatmul.msk.f32.vlgmr.msrb.gmra.mxu2 %vm1003_vm0, %v7974_v5  ;;  %11017 = vmatpush.xpose.msk.msra.mxu3 %vm1003_vm0, %v8004_v42 }
0x18dc   : > { %7517 = vmax.xlane.f32.xlu0 %v7516_v7 }
0x18e0   : > { %v8394_v14 = vpop.permute.xlu2 %8393 }
0x18e1   : > { %v7872_v34 = vpop.permute.xlu0 %7871 }
0x18e2   : > { %v8002_v13 = vpop.permute.xlu1 %8001  ;;  %11012 = vmatmul.msk.f32.vlgmr.msrb.gmra.mxu3 %vm1003_vm0, %v7872_v34 }
0x18e3   : > { %11022 = vmatmul.msk.f32.vlgmr.msra.gmra.mxu2 %vm1003_vm0, %v8104_v21 }
0x18e8   : > { %v14131_v18 = vpop.permute.xlu2 %12009 }
0x18e9   : > { %v8134_v30 = vpop.permute.xlu0 %8133 }
0x18ea   : > { %v8264_v51 = vpop.permute.xlu1 %8263  ;;  %11018 = vmatmul.msk.f32.vlgmr.msra.gmra.mxu3 %vm1003_vm0, %v8002_v13 }
0x18eb   : > { %11023 = vmatpush.xpose.msk.msrb.mxu3 %vm1003_vm0, %v8134_v30 }
0x18ef   : > { %11029 = vmatpush.xpose.msk.msra.mxu3 %vm1003_vm0, %v8264_v51 }
0x18f1   : > { %v8236_v38 = vpop.permute.xlu0 %8235 }
0x18f2   : > { %v8366_v45 = vpop.permute.xlu1 %8365  ;;  %11024 = vmatmul.msk.f32.vlgmr.msrb.gmra.mxu3 %vm1003_vm0, %v8132_v37  ;;  %11027 = vmatpush.xpose.msk.msrb.mxu2 %vm1003_vm0, %v8236_v38 }
0x18f3   : > { %11035 = vmatpush.xpose.msk.msrb.mxu3 %vm1003_vm0, %v8394_v14 }
0x18f5   : > { %11028 = vmatmul.msk.f32.vlgmr.msrb.gmra.mxu2 %vm1003_vm0, %v8234_v39 }
0x18f6   : > { %11033 = vmatpush.xpose.msk.msra.mxu2 %vm1003_vm0, %v8366_v45 }
0x18f9   : > { %v8262_v12 = vpop.permute.xlu0 %8261 }
0x18fa   : > { %11030 = vmatmul.msk.f32.vlgmr.msra.gmra.mxu3 %vm1003_vm0, %v8262_v12  ;;  %v8392_v10 = vpop.permute.xlu1 %8391 }
0x1901   : > { %v8364_v29 = vpop.permute.xlu0 %8363 }
0x1902   : > { %11034 = vmatmul.msk.f32.vlgmr.msra.gmra.mxu2 %vm1003_vm0, %v8364_v29  ;;  %11036 = vmatmul.msk.f32.vlgmr.msrb.gmra.mxu3 %vm1003_vm0, %v8392_v10  ;;  %v14211_v12 = vpop.permute.xlu1 %12004 }
0x1909   : > { %v12000_v35 = vpop.permute.xlu0 %11999 }
0x190a   : > { %v12002_v20 = vunpack.i.h.bf16 %v12000_v35  ;;  %v12001_v22 = vunpack.i.l.bf16 %v12000_v35 }
0x190c   : > { %7681 = vmatpush.msrb.mxu0 %v12001_v22  ;;  %7708 = vmatpush.msrb.mxu1 %v12002_v20 }
0x1946   : > { %v7606_v50 = vpop.f32.mrf.mxu2 }
0x1947   : > { %v14134_v8 = vadd.f32 %v14105_v24, %v7606_v50  ;;  %v7515_v31 = vpop.xlane.xlu2 %7514 }
0x1948   : > { %v7519_v46 = vsub.f32 %v7485_v6, %v7515_v31 }
0x1949   : > { %v7637_v41 = vsel %vm1056_vm1, %v14134_v8, -inf }
0x194a   : > { %v7521_v11 = vmul.f32 1.442695, %v7519_v46  ;;  %7638 = vmax.xlane.f32.xlu1 %v7637_v41 }
0x194c   : > { %12323 = vpow2.f32 %v7521_v11 }
0x194e   : > { %v7738_v28 = vpop.f32.mrf.mxu2 }
0x194f   : > { %v14139_v2 = vadd.f32 %v14105_v24, %v7738_v28  ;;  %v7518_v0 = vpop.xlane.xlu0 %7517 }
0x1950   : > { %v7520_v62 = vsub.f32 %v7511_v55, %v7518_v0 }
0x1951   : > { %v7769_v27 = vsel %vm1056_vm1, %v14139_v2, -inf }
0x1952   : > { %v14143_v36 = vpop.eup %12323  ;;  %7770 = vmax.xlane.f32.xlu0 %v7769_v27  ;;  %v7523_v4 = vmul.f32 1.442695, %v7520_v62 }
0x1953   : > { %v7525_v3 = vsel %vm1056_vm1, %v14143_v36, 0.0 }
0x1954   : > { %7526 = vadd.xlane.f32.xlu1 %v7525_v3  ;;  %12325 = vpow2.f32 %v7523_v4 }
0x1955   : > { %v7634_v61 = vpop.f32.mrf.mxu3 }
0x1956   : > { %v14148_v32 = vadd.f32 %v14105_v24, %v7634_v61  ;;  %v7868_v57 = vpop.f32.mrf.mxu2 }
0x1957   : > { %v14153_v19 = vadd.f32 %v14105_v24, %v7868_v57 }
0x1958   : > { %v7640_v15 = vsel %vm1056_vm1, %v14148_v32, -inf }
0x1959   : > { %7641 = vmax.xlane.f32.xlu2 %v7640_v15  ;;  %v7899_v58 = vsel %vm1056_vm1, %v14153_v19, -inf }
0x195a   : > { %v14162_v17 = vpop.eup %12325 }
0x195b   : > { %v7528_v42 = vsel %vm1056_vm1, %v14162_v17, 0.0 }
0x195d   : > { %v7766_v25 = vpop.f32.mrf.mxu3 }
0x195e   : > { %v14156_v40 = vadd.f32 %v14105_v24, %v7766_v25  ;;  %v7998_v9 = vpop.f32.mrf.mxu2 }
0x195f   : > { %v14165_v48 = vadd.f32 %v14105_v24, %v7998_v9 }
0x1960   : > { %v7772_v52 = vsel %vm1056_vm1, %v14156_v40, -inf }
0x1961   : > { %7900 = vmax.xlane.f32.xlu2 %v7899_v58  ;;  %7773 = vmax.xlane.f32.xlu1 %v7772_v52  ;;  %v8029_v43 = vsel %vm1056_vm1, %v14165_v48, -inf }
0x1965   : > { %v7896_v16 = vpop.f32.mrf.mxu3 }
0x1966   : > { %v14168_v23 = vadd.f32 %v14105_v24, %v7896_v16  ;;  %v8128_v44 = vpop.f32.mrf.mxu2 }
0x1967   : > { %v14177_v26 = vadd.f32 %v14105_v24, %v8128_v44 }
0x1968   : > { %v7902_v49 = vsel %vm1056_vm1, %v14168_v23, -inf }
0x1969   : > { %7903 = vmax.xlane.f32.xlu0 %v7902_v49  ;;  %7529 = vadd.xlane.f32.xlu2 %v7528_v42  ;;  %v8159_v54 = vsel %vm1056_vm1, %v14177_v26, -inf }
0x196a   : > { %8030 = vmax.xlane.f32.xlu1 %v8029_v43 }
0x196d   : > { %v8026_v6 = vpop.f32.mrf.mxu3 }
0x196e   : > { %v14180_v63 = vadd.f32 %v14105_v24, %v8026_v6 }
0x1970   : > { %v8032_v1 = vsel %vm1056_vm1, %v14180_v63, -inf }
0x1971   : > { %8160 = vmax.xlane.f32.xlu0 %v8159_v54  ;;  %8033 = vmax.xlane.f32.xlu2 %v8032_v1 }
0x1975   : > { %v8156_v47 = vpop.f32.mrf.mxu3 }
0x1976   : > { %v14187_v33 = vadd.f32 %v14105_v24, %v8156_v47 }
0x1978   : > { %v8258_v55 = vpop.f32.mrf.mxu2  ;;  %v8162_v5 = vsel %vm1056_vm1, %v14187_v33, -inf }
0x1979   : > { %v14192_v21 = vadd.f32 %v14105_v24, %v8258_v55  ;;  %8163 = vmax.xlane.f32.xlu1 %v8162_v5  ;;  %v12007_v55 = vunpack.i.h.bf16 %v14211_v12 }
0x197b   : > { %v8289_v7 = vsel %vm1056_vm1, %v14192_v21, -inf }
0x197c   : > { %8290 = vmax.xlane.f32.xlu2 %v8289_v7 }
0x197d   : > { %v8286_v37 = vpop.f32.mrf.mxu3 }
0x197e   : > { %v14197_v34 = vadd.f32 %v14105_v24, %v8286_v37 }
0x1980   : > { %v8292_v13 = vsel %vm1056_vm1, %v14197_v34, -inf }
0x1981   : > { %8293 = vmax.xlane.f32.xlu0 %v8292_v13 }
0x1985   : > { %v8388_v39 = vpop.f32.mrf.mxu2  ;;  %v8416_v30 = vpop.f32.mrf.mxu3 }
0x1986   : > { %v14202_v51 = vadd.f32 %v14105_v24, %v8388_v39  ;;  %v14205_v38 = vadd.f32 %v14105_v24, %v8416_v30 }
0x1988   : > { %v8419_v14 = vsel %vm1056_vm1, %v14202_v51, -inf  ;;  %v8422_v45 = vsel %vm1056_vm1, %v14205_v38, -inf }
0x1989   : > { %8420 = vmax.xlane.f32.xlu0 %v8419_v14  ;;  %8423 = vmax.xlane.f32.xlu1 %v8422_v45 }
0x19bd   : > { %v7639_v10 = vpop.xlane.xlu1 %7638 }
0x19be   : > { %v7643_v29 = vsub.f32 %v14134_v8, %v7639_v10 }
0x19c0   : > { %v7645_v35 = vmul.f32 1.442695, %v7643_v29 }
0x19c2   : > { %12327 = vpow2.f32 %v7645_v35 }
0x19c5   : > { %v7771_v20 = vpop.xlane.xlu0 %7770 }
0x19c6   : > { %v7775_v22 = vsub.f32 %v14139_v2, %v7771_v20  ;;  %v12006_v2 = vunpack.i.l.bf16 %v14211_v12 }
0x19c7   : > { %v7527_v24 = vpop.xlane.xlu1 %7526 }
0x19c8   : > { %v14215_v50 = vpop.eup %12327  ;;  %v7777_v31 = vmul.f32 1.442695, %v7775_v22  ;;  %12329 = vrcp.f32 %v7527_v24 }
0x19c9   : > { %v7649_v46 = vsel %vm1056_vm1, %v14215_v50, 0.0 }
0x19ca   : > { %12331 = vpow2.f32 %v7777_v31  ;;  %7650 = vadd.xlane.f32.xlu2 %v7649_v46 }
0x19cc   : > { %v7642_v41 = vpop.xlane.xlu2 %7641 }
0x19cd   : > { %v7644_v11 = vsub.f32 %v14148_v32, %v7642_v41 }
0x19ce   : > { %v12330_v28 = vpop.eup %12329 }
0x19cf   : > { %v7533_v8 = vmul.f32 %v12330_v28, %v14143_v36  ;;  %v7647_v27 = vmul.f32 1.442695, %v7644_v11 }
0x19d0   : > { %v14221_v3 = vpop.eup %12331 }
0x19d1   : > { %12333 = vpow2.f32 %v7647_v27  ;;  %v7781_v0 = vsel %vm1056_vm1, %v14221_v3, 0.0  ;;  %10995 = vmatmul.msk.f32.vlgmr.msra.gmra.mxu0 %vm1056_vm1, %v7533_v8 }
0x19d2   : > { %7782 = vadd.xlane.f32.xlu1 %v7781_v0  ;;  %7812 = vmatpush.msra.mxu0 %v12006_v2 }
0x19d4   : > { %v7774_v61 = vpop.xlane.xlu1 %7773  ;;  %v7901_v57 = vpop.xlane.xlu2 %7900 }
0x19d5   : > { %v7776_v32 = vsub.f32 %v14156_v40, %v7774_v61  ;;  %v7905_v62 = vsub.f32 %v14153_v19, %v7901_v57 }
0x19d7   : > { %v14229_v36 = vpop.eup %12333  ;;  %v7779_v15 = vmul.f32 1.442695, %v7776_v32  ;;  %v7907_v4 = vmul.f32 1.442695, %v7905_v62 }
0x19d8   : > { %v7652_v25 = vsel %vm1056_vm1, %v14229_v36, 0.0 }
0x19d9   : > { %12335 = vpow2.f32 %v7779_v15  ;;  %7653 = vadd.xlane.f32.xlu0 %v7652_v25 }
0x19da   : > { %12337 = vpow2.f32 %v7907_v4 }
0x19dc   : > { %v7904_v9 = vpop.xlane.xlu0 %7903  ;;  %v7530_v58 = vpop.xlane.xlu2 %7529 }
0x19dd   : > { %v7906_v52 = vsub.f32 %v14168_v23, %v7904_v9  ;;  %v8031_v16 = vpop.xlane.xlu1 %8030  ;;  %12339 = vrcp.f32 %v7530_v58 }
0x19de   : > { %v8035_v19 = vsub.f32 %v14165_v48, %v8031_v16 }
0x19df   : > { %v14234_v49 = vpop.eup %12335  ;;  %v7909_v40 = vmul.f32 1.442695, %v7906_v52  ;;  %v12011_v52 = vunpack.i.l.bf16 %v14131_v18 }
0x19e0   : > { %v14237_v42 = vpop.eup %12337  ;;  %v7784_v44 = vsel %vm1056_vm1, %v14234_v49, 0.0  ;;  %v8037_v23 = vmul.f32 1.442695, %v8035_v19 }
0x19e1   : > { %12341 = vpow2.f32 %v7909_v40  ;;  %7785 = vadd.xlane.f32.xlu2 %v7784_v44  ;;  %v7911_v43 = vsel %vm1056_vm1, %v14237_v42, 0.0 }
0x19e2   : > { %7912 = vadd.xlane.f32.xlu1 %v7911_v43  ;;  %12343 = vpow2.f32 %v8037_v23 }
0x19e3   : > { %v12340_v6 = vpop.eup %12339 }
0x19e4   : > { %v7534_v54 = vmul.f32 %v12340_v6, %v14162_v17  ;;  %v8161_v1 = vpop.xlane.xlu0 %8160  ;;  %v8034_v47 = vpop.xlane.xlu2 %8033 }
0x19e5   : > { %v8165_v48 = vsub.f32 %v14177_v26, %v8161_v1  ;;  %v8036_v5 = vsub.f32 %v14180_v63, %v8034_v47 }
0x19e6   : > { %10996 = vmatmul.msk.f32.vlgmr.msra.gmra.mxu1 %vm1056_vm1, %v7534_v54 }
0x19e7   : > { %v14248_v7 = vpop.eup %12341  ;;  %v8167_v37 = vmul.f32 1.442695, %v8165_v48  ;;  %v8039_v13 = vmul.f32 1.442695, %v8036_v5  ;;  %7838 = vmatpush.msra.mxu1 %v12007_v55 }
0x19e8   : > { %v7914_v39 = vsel %vm1056_vm1, %v14248_v7, 0.0  ;;  %v14252_v30 = vpop.eup %12343 }
0x19e9   : > { %12345 = vpow2.f32 %v8167_v37  ;;  %7915 = vadd.xlane.f32.xlu2 %v7914_v39  ;;  %v8041_v29 = vsel %vm1056_vm1, %v14252_v30, 0.0 }
0x19ea   : > { %12347 = vpow2.f32 %v8039_v13 }
0x19ec   : > { %v8164_v17 = vpop.xlane.xlu1 %8163 }
0x19ed   : > { %v8166_v26 = vsub.f32 %v14187_v33, %v8164_v17 }
0x19ef   : > { %v14255_v63 = vpop.eup %12345  ;;  %v8169_v14 = vmul.f32 1.442695, %v8166_v26  ;;  %v8291_v45 = vpop.xlane.xlu2 %8290 }
0x19f0   : > { %v14257_v12 = vpop.eup %12347  ;;  %v8295_v10 = vsub.f32 %v14192_v21, %v8291_v45  ;;  %v8171_v35 = vsel %vm1056_vm1, %v14255_v63, 0.0 }
0x19f1   : > { %12349 = vpow2.f32 %v8169_v14  ;;  %8042 = vadd.xlane.f32.xlu2 %v8041_v29  ;;  %8172 = vadd.xlane.f32.xlu1 %v8171_v35  ;;  %v8044_v33 = vsel %vm1056_vm1, %v14257_v12, 0.0 }
0x19f2   : > { %v8297_v20 = vmul.f32 1.442695, %v8295_v10  ;;  %8045 = vadd.xlane.f32.xlu0 %v8044_v33 }
0x19f4   : > { %12351 = vpow2.f32 %v8297_v20  ;;  %v8294_v22 = vpop.xlane.xlu0 %8293 }
0x19f7   : > { %v14266_v24 = vpop.eup %12349 }
0x19f8   : > { %v8174_v21 = vsel %vm1056_vm1, %v14266_v24, 0.0 }
0x19f9   : > { %8175 = vadd.xlane.f32.xlu2 %v8174_v21 }
0x19fa   : > { %v14270_v31 = vpop.eup %12351 }
0x19fb   : > { %v8301_v46 = vsel %vm1056_vm1, %v14270_v31, 0.0 }
0x19fc   : > { %v8421_v41 = vpop.xlane.xlu0 %8420  ;;  %v8424_v11 = vpop.xlane.xlu1 %8423  ;;  %8302 = vadd.xlane.f32.xlu1 %v8301_v46 }
0x19fd   : > { %v8425_v28 = vsub.f32 %v14202_v51, %v8421_v41  ;;  %v8426_v27 = vsub.f32 %v14205_v38, %v8424_v11  ;;  %v8296_v38 = vsub.f32 %v14197_v34, %v8294_v22 }
0x19ff   : > { %v8427_v8 = vmul.f32 1.442695, %v8425_v28  ;;  %v8429_v2 = vmul.f32 1.442695, %v8426_v27  ;;  %v8299_v32 = vmul.f32 1.442695, %v8296_v38 }
0x1a01   : > { %12353 = vpow2.f32 %v8427_v8 }
0x1a02   : > { %12355 = vpow2.f32 %v8429_v2 }
0x1a03   : > { %12357 = vpow2.f32 %v8299_v32 }
0x1a06   : > { %12014 = vrot.lane.b32.xlu0 %v14062_v53, %s12580_s7 }
0x1a07   : > { %v14278_v0 = vpop.eup %12353 }
0x1a08   : > { %v8431_v61 = vsel %vm1056_vm1, %v14278_v0, 0.0  ;;  %v14282_v57 = vpop.eup %12355 }
0x1a09   : > { %8432 = vadd.xlane.f32.xlu2 %v8431_v61  ;;  %v8434_v51 = vsel %vm1056_vm1, %v14282_v57, 0.0  ;;  %v14293_v62 = vpop.eup %12357 }
0x1a0a   : > { %v8304_v15 = vsel %vm1056_vm1, %v14293_v62, 0.0 }
0x1a11   : > { %8435 = vadd.xlane.f32.xlu2 %v8434_v51 }
0x1a15   : > { %12019 = vrot.lane.b32.xlu1 %v14062_v53, %s12581_s13 }
0x1a1d   : > { %12029 = vrot.lane.b32.xlu1 %v14062_v53, %s12584_s4 }
0x1a29   : > { %12024 = vrot.lane.b32.xlu2 %v14062_v53, %s12583_s28 }
0x1a30   : > { %8305 = vadd.xlane.f32.xlu0 %v8304_v15 }
0x1a3d   : > { %v7651_v4 = vpop.xlane.xlu2 %7650 }
0x1a3e   : > { %12359 = vrcp.f32 %v7651_v4 }
0x1a44   : > { %v12360_v25 = vpop.eup %12359 }
0x1a45   : > { %v7657_v9 = vmul.f32 %v12360_v25, %v14215_v50  ;;  %v7783_v58 = vpop.xlane.xlu1 %7782  ;;  %v12012_v50 = vunpack.i.h.bf16 %v14131_v18 }
0x1a46   : > { %12361 = vrcp.f32 %v7783_v58 }
0x1a47   : > { %11001 = vmatmul.msk.f32.vlgmr.msrb.gmra.mxu0 %vm1056_vm1, %v7657_v9 }
0x1a48   : > { %7942 = vmatpush.msrb.mxu0 %v12011_v52 }
0x1a4c   : > { %v12362_v34 = vpop.eup %12361  ;;  %v7654_v53 = vpop.xlane.xlu0 %7653 }
0x1a4d   : > { %v7789_v16 = vmul.f32 %v12362_v34, %v14221_v3  ;;  %12363 = vrcp.f32 %v7654_v53 }
0x1a4e   : > { %v7555_v32 = vpop.f32.mrf.mxu0 }
0x1a4f   : > { %11007 = vmatmul.msk.f32.vlgmr.msra.gmra.mxu0 %vm1056_vm1, %v7789_v16 }
0x1a53   : > { %v12364_v40 = vpop.eup %12363 }
0x1a54   : > { %v7658_v19 = vmul.f32 %v12364_v40, %v14229_v36  ;;  %v7786_v44 = vpop.xlane.xlu2 %7785 }
0x1a55   : > { %v7913_v43 = vpop.xlane.xlu1 %7912  ;;  %12365 = vrcp.f32 %v7786_v44 }
0x1a56   : > { %12367 = vrcp.f32 %v7913_v43  ;;  %11002 = vmatmul.msk.f32.vlgmr.msrb.gmra.mxu1 %vm1056_vm1, %v7658_v19 }
0x1a57   : > { %7968 = vmatpush.msrb.mxu1 %v12012_v50 }
0x1a5b   : > { %v12366_v6 = vpop.eup %12365 }
0x1a5c   : > { %v12368_v23 = vpop.eup %12367  ;;  %v7790_v54 = vmul.f32 %v12366_v6, %v14234_v49  ;;  %v7916_v3 = vpop.xlane.xlu2 %7915 }
0x1a5d   : > { %v7919_v1 = vmul.f32 %v12368_v23, %v14237_v42  ;;  %12369 = vrcp.f32 %v7916_v3 }
0x1a5e   : > { %11008 = vmatmul.msk.f32.vlgmr.msra.gmra.mxu1 %vm1056_vm1, %v7790_v54 }
0x1a5f   : > { %11013 = vmatmul.msk.f32.vlgmr.msrb.gmra.mxu0 %vm1056_vm1, %v7919_v1 }
0x1a63   : > { %v12370_v36 = vpop.eup %12369  ;;  %v7578_v15 = vpop.f32.mrf.mxu1 }
0x1a64   : > { %v7920_v18 = vmul.f32 %v12370_v36, %v14248_v7  ;;  %v8043_v47 = vpop.xlane.xlu2 %8042  ;;  %v8173_v37 = vpop.xlane.xlu1 %8172  ;;  %v11655_v36 = vld [vmem:[#allocation6 + $0xf8] sm:$0xff] }
0x1a65   : > { %v8046_v55 = vpop.xlane.xlu0 %8045  ;;  %8634 = vmatpush.bf16.msrb.mxu2 %v11655_v36  ;;  %v11685_v36 = vld [vmem:[#allocation7 + $0x3ec] sm:$0xf] }
0x1a66   : > { %11014 = vmatmul.msk.f32.vlgmr.msrb.gmra.mxu1 %vm1056_vm1, %v7920_v18  ;;  %12371 = vrcp.f32 %v8046_v55  ;;  %v11654_v18 = vld [vmem:[#allocation6 + $0xf0] sm:$0xff]  ;;  %v11652_v55 = vld [vmem:[#allocation6 + $0xe0] sm:$0xff] }
0x1a67   : > { %12373 = vrcp.f32 %v8043_v47  ;;  %v11653_v47 = vld [vmem:[#allocation6 + $0xe8] sm:$0xff] }
0x1a68   : > { %12375 = vrcp.f32 %v8173_v37  ;;  %v11648_v37 = vld [vmem:[#allocation6 + $0xc0] sm:$0xff] }
0x1a69   : > { %8635 = vmatpush.bf16.msrb.mxu2 %v11654_v18  ;;  %v11199_v18 = vld [vmem:[#allocation7 + $0x3f8] sm:$0xf0] }
0x1a6c   : > { %v8176_v48 = vpop.xlane.xlu2 %8175  ;;  %v12372_v5 = vpop.eup %12371 }
0x1a6d   : > { %v12374_v49 = vpop.eup %12373  ;;  %v8050_v17 = vmul.f32 %v12372_v5, %v14257_v12  ;;  %12377 = vrcp.f32 %v8176_v48  ;;  %8636 = vmatpush.bf16.msrb.mxu2 %v11653_v47  ;;  %v11651_v48 = vld [vmem:[#allocation6 + $0xd8] sm:$0xff]  ;;  %v11650_v5 = vld [vmem:[#allocation6 + $0xd0] sm:$0xff]  ;;  %v11173_v47 = vld [vmem:[#allocation7 + $0x3c0] sm:$0xf] }
0x1a6e   : > { %v8049_v26 = vmul.f32 %v12374_v49, %v14252_v30  ;;  %v12376_v10 = vpop.eup %12375  ;;  %v11649_v49 = vld [vmem:[#allocation6 + $0xc8] sm:$0xff] }
0x1a6f   : > { %v8303_v14 = vpop.xlane.xlu1 %8302  ;;  %v8179_v12 = vmul.f32 %v12376_v10, %v14255_v63 }
0x1a70   : > { %12379 = vrcp.f32 %v8303_v14 }
0x1a71   : > { %8637 = vmatpush.bf16.msrb.mxu2 %v11652_v55  ;;  %v11682_v55 = vld [vmem:[#allocation7 + $0x3cc] sm:$0xf0] }
0x1a73   : > { %v12378_v29 = vpop.eup %12377 }
0x1a74   : > { %v8180_v30 = vmul.f32 %v12378_v29, %v14266_v24 }
0x1a75   : > { %8638 = vmatpush.bf16.msrb.mxu2 %v11651_v48  ;;  %v11680_v48 = vld [vmem:[#allocation7 + $0x3c4] sm:$0xf] }
0x1a76   : > { %v12380_v41 = vpop.eup %12379 }
0x1a77   : > { %v8309_v63 = vmul.f32 %v12380_v41, %v14270_v31 }
0x1a78   : > { %v12015_v13 = vpop.permute.xlu0 %12014 }
0x1a79   : > { %v12017_v42 = vunpack.i.h.bf16 %v12015_v13  ;;  %v12016_v39 = vunpack.i.l.bf16 %v12015_v13  ;;  %8639 = vmatpush.bf16.msrb.mxu2 %v11650_v5  ;;  %v11174_v5 = vor.u32 %v11682_v55, %v11173_v47 }
0x1a7b   : > { %8072 = vmatpush.msra.mxu0 %v12016_v39  ;;  %8098 = vmatpush.msra.mxu1 %v12017_v42 }
0x1a7c   : > { %11019 = vmatmul.msk.f32.vlgmr.msra.gmra.mxu0 %vm1056_vm1, %v8049_v26  ;;  %11020 = vmatmul.msk.f32.vlgmr.msra.gmra.mxu1 %vm1056_vm1, %v8050_v17  ;;  %v8433_v7 = vpop.xlane.xlu2 %8432 }
0x1a7d   : > { %12381 = vrcp.f32 %v8433_v7  ;;  %8640 = vmatpush.bf16.msrb.mxu2 %v11649_v49  ;;  %v11175_v49 = vld [vmem:[#allocation7 + $0x3d0] sm:$0xf0] }
0x1a81   : > { %8641 = vmatpush.bf16.msrb.mxu2 %v11648_v37  ;;  %v11181_v37 = vld [vmem:[#allocation7 + $0x3c8] sm:$0xf] }
0x1a83   : > { %v12382_v24 = vpop.eup %12381 }
0x1a84   : > { %v8436_v45 = vpop.xlane.xlu2 %8435  ;;  %v8439_v27 = vmul.f32 %v12382_v24, %v14278_v0 }
0x1a87   : > { %v12020_v35 = vpop.permute.xlu1 %12019 }
0x1a88   : > { %v12022_v33 = vunpack.i.h.bf16 %v12020_v35  ;;  %v12021_v20 = vunpack.i.l.bf16 %v12020_v35 }
0x1a8a   : > { %8202 = vmatpush.msrb.mxu0 %v12021_v20  ;;  %8228 = vmatpush.msrb.mxu1 %v12022_v33 }
0x1a8b   : > { %11025 = vmatmul.msk.f32.vlgmr.msrb.gmra.mxu0 %vm1056_vm1, %v8179_v12  ;;  %11026 = vmatmul.msk.f32.vlgmr.msrb.gmra.mxu1 %vm1056_vm1, %v8180_v30 }
0x1a8c   : > { %v12025_v22 = vpop.permute.xlu2 %12024 }
0x1a8d   : > { %v12027_v21 = vunpack.i.h.bf16 %v12025_v22  ;;  %v12026_v46 = vunpack.i.l.bf16 %v12025_v22 }
0x1a8f   : > { %v12030_v11 = vpop.permute.xlu1 %12029  ;;  %8332 = vmatpush.msra.mxu0 %v12026_v46  ;;  %8358 = vmatpush.msra.mxu1 %v12027_v21 }
0x1a90   : > { %v12032_v28 = vunpack.i.h.bf16 %v12030_v11  ;;  %v12031_v8 = vunpack.i.l.bf16 %v12030_v11 }
0x1a92   : > { %8462 = vmatpush.msrb.mxu0 %v12031_v8  ;;  %8488 = vmatpush.msrb.mxu1 %v12032_v28 }
0x1a93   : > { %11031 = vmatmul.msk.f32.vlgmr.msra.gmra.mxu0 %vm1056_vm1, %v8309_v63 }
0x1a9b   : > { %11037 = vmatmul.msk.f32.vlgmr.msrb.gmra.mxu0 %vm1056_vm1, %v8439_v27 }
0x1aa3   : > { %v8306_v2 = vpop.xlane.xlu0 %8305 }
0x1aa4   : > { %12383 = vrcp.f32 %v8306_v2 }
0x1aa5   : > { %12385 = vrcp.f32 %v8436_v45 }
0x1aaa   : > { %v12384_v61 = vpop.eup %12383 }
0x1aab   : > { %v8310_v51 = vmul.f32 %v12384_v61, %v14293_v62  ;;  %v12386_v38 = vpop.eup %12385 }
0x1aac   : > { %v8440_v31 = vmul.f32 %v12386_v38, %v14282_v57 }
0x1aad   : > { %11032 = vmatmul.msk.f32.vlgmr.msra.gmra.mxu1 %vm1056_vm1, %v8310_v51 }
0x1ab5   : > { %11038 = vmatmul.msk.f32.vlgmr.msrb.gmra.mxu1 %vm1056_vm1, %v8440_v31 }
0x1ac4   : > { %v7683_v4 = vpop.f32.mrf.mxu0 }
0x1acc   : > { %v7814_v9 = vpop.f32.mrf.mxu0 }
0x1ad3   : > { %v7710_v25 = vpop.f32.mrf.mxu1 }
0x1ad4   : > { %v12033_v0 = vpack.i.bf16 %v7710_v25, %v7683_v4 }
0x1ad6   : > { %12034 = vrot.lane.b32.xlu1 %v12033_v0, %s12584_s4 }
0x1adb   : > { %v7840_v58 = vpop.f32.mrf.mxu1 }
0x1adc   : > { %v12038_v52 = vpack.i.bf16 %v7840_v58, %v7814_v9  ;;  %v7944_v62 = vpop.f32.mrf.mxu0  ;;  %v12098_v58 = vld [vmem:[%s14490_s10 + $0x3] ss:$0 sm:$0xff] }
0x1ade   : > { %12039 = vrot.lane.b32.xlu0 %v12038_v52, %s12583_s28 }
0x1ae3   : > { %v7970_v34 = vpop.f32.mrf.mxu1 }
0x1ae4   : > { %v12043_v53 = vpack.i.bf16 %v7970_v34, %v7944_v62 }
0x1ae6   : > { %12044 = vrot.lane.b32.xlu1 %v12043_v53, %s12581_s13 }
0x1af9   : > { %v8074_v57 = vpop.f32.mrf.mxu0  ;;  %v8100_v16 = vpop.f32.mrf.mxu1 }
0x1afa   : > { %v12048_v40 = vpack.i.bf16 %v8100_v16, %v8074_v57 }
0x1afc   : > { %12049 = vrot.lane.b32.xlu2 %v12048_v40, %s12580_s7 }
0x1b08   : > { %v8204_v19 = vpop.f32.mrf.mxu0  ;;  %v8230_v44 = vpop.f32.mrf.mxu1 }
0x1b09   : > { %v12053_v50 = vpack.i.bf16 %v8230_v44, %v8204_v19  ;;  %v11189_v44 = vld [vmem:[#allocation7 + $0x3e0] sm:$0xf] }
0x1b0b   : > { %12054 = vrot.lane.b32.xlu1 %v12053_v50, %s12582_s2  ;;  %v11684_v50 = vld [vmem:[#allocation7 + $0x3e4] sm:$0xf]  ;;  %s14530_s2 = sld [smem:[#allocation23_spill]] }
0x1b10   : > { %v8334_v43 = vpop.f32.mrf.mxu0 }
0x1b18   : > { %v8464_v54 = vpop.f32.mrf.mxu0 }
0x1b2a   : > { %v8360_v6 = vpop.f32.mrf.mxu1 }
0x1b2b   : > { %v12058_v23 = vpack.i.bf16 %v8360_v6, %v8334_v43  ;;  %v11191_v6 = vld [vmem:[#allocation7 + $0x3f0] sm:$0xf0] }
0x1b2d   : > { %12059 = vrot.lane.b32.xlu2 %v12058_v23, %s12579_s0  ;;  %v11197_v23 = vld [vmem:[#allocation7 + $0x3e8] sm:$0xf]  ;;  %s9527_s0 = sshll.u32 %s14536_s25, 1 }
0x1b2e   : > { %s739_s19 = scalar_lea.vmem %s14531_s29, %s9527_s0 }
0x1b32   : > { %v8490_v3 = vpop.f32.mrf.mxu1 }
0x1b33   : > { %v12063_v1 = vpack.i.bf16 %v8490_v3, %v8464_v54  ;;  %v11687_v54 = vld [vmem:[#allocation7 + $0x3f4] sm:$0xf0]  ;;  %v11194_v3 = vor.u32 %v11684_v50, %v11191_v6  ;;  %v11117_v6 = vld [vmem:[#allocation7 + $0x348] sm:$0xf] }
0x1b35   : > { %12064 = vrot.lane.b32.xlu1 %v12063_v1, %s12578_s5  ;;  %v11198_v1 = vor.u32 %v11687_v54, %v11197_v23  ;;  %8927 = vmatpush.bf16.msra.mxu0 %v11194_v3  ;;  %v11667_v23 = vld [vmem:[#allocation7 + $0x354] sm:$0xf0] }
0x1b37   : > { %8941 = vmatpush.bf16.msra.mxu1 %v11198_v1  ;;  %v11118_v1 = vor.u32 %v11667_v23, %v11117_v6  ;;  %v11700_v23 = vld [vmem:[#allocation9 + $0x360] sm:$0xff] }
0x1b48   : > { %v12035_v13 = vpop.permute.xlu1 %12034 }
0x1b49   : > { %v12037_v26 = vunpack.i.h.bf16 %v12035_v13  ;;  %v12036_v7 = vunpack.i.l.bf16 %v12035_v13  ;;  %v11683_v13 = vld [vmem:[#allocation7 + $0x3d4] sm:$0xf0] }
0x1b4b   : > { %v8550_v33 = vsel %vm1003_vm0, %v7578_v15, %v12037_v26  ;;  %v8549_v20 = vsel %vm1003_vm0, %v7555_v32, %v12036_v7  ;;  %v11183_v26 = vld [vmem:[#allocation7 + $0x3d8] sm:$0xf0] }
0x1b50   : > { %v12040_v17 = vpop.permute.xlu0 %12039 }
0x1b51   : > { %v12042_v14 = vunpack.i.h.bf16 %v12040_v17  ;;  %v12041_v45 = vunpack.i.l.bf16 %v12040_v17  ;;  %v11681_v17 = vld [vmem:[#allocation7 + $0x3cc] sm:$0xf] }
0x1b52   : > { %v11186_v7 = vor.u32 %v11681_v17, %v11183_v26  ;;  %v11101_v17 = vld [vmem:[#allocation7 + $0x328] sm:$0xf]  ;;  %v11663_v26 = vld [vmem:[#allocation7 + $0x334] sm:$0xf0] }
0x1b53   : > { %v8552_v30 = vsel %vm2095_vm2, %v8550_v33, %v12042_v14  ;;  %v8551_v22 = vsel %vm2095_vm2, %v8549_v20, %v12041_v45  ;;  %v11157_v14 = vld [vmem:[#allocation7 + $0x3a0] sm:$0xf]  ;;  %v11678_v45 = vld [vmem:[#allocation7 + $0x3ac] sm:$0xf0]  ;;  %v11165_v33 = vld [vmem:[#allocation7 + $0x3a8] sm:$0xf] }
0x1b54   : > { %v11679_v20 = vld [vmem:[#allocation7 + $0x3b4] sm:$0xf0] }
0x1b56   : > { %v12050_v39 = vpop.permute.xlu2 %12049 }
0x1b57   : > { %v12052_v28 = vunpack.i.h.bf16 %v12050_v39  ;;  %v12051_v8 = vunpack.i.l.bf16 %v12050_v39  ;;  %v11182_v39 = vor.u32 %v11683_v13, %v11181_v37 }
0x1b58   : > { %v12045_v42 = vpop.permute.xlu1 %12044 }
0x1b59   : > { %v12047_v29 = vunpack.i.h.bf16 %v12045_v42  ;;  %v12046_v35 = vunpack.i.l.bf16 %v12045_v42  ;;  %v11178_v42 = vor.u32 %v11680_v48, %v11175_v49  ;;  %8942 = vmatpush.bf16.msra.mxu1 %v11182_v39  ;;  %v11093_v48 = vld [vmem:[#allocation7 + $0x320] sm:$0xf]  ;;  %v11660_v49 = vld [vmem:[#allocation7 + $0x324] sm:$0xf]  ;;  %v11095_v39 = vld [vmem:[#allocation7 + $0x330] sm:$0xf0] }
0x1b5b   : > { %v8554_v21 = vsel %vm2098_vm3, %v8552_v30, %v12047_v29  ;;  %v8553_v46 = vsel %vm2098_vm3, %v8551_v22, %v12046_v35  ;;  %8928 = vmatpush.bf16.msra.mxu0 %v11178_v42  ;;  %v11158_v29 = vor.u32 %v11678_v45, %v11157_v14  ;;  %v11159_v35 = vld [vmem:[#allocation7 + $0x3b0] sm:$0xf0]  ;;  %v11166_v30 = vor.u32 %v11679_v20, %v11165_v33  ;;  %v11677_v22 = vld [vmem:[#allocation7 + $0x3ac] sm:$0xf]  ;;  %v11077_v33 = vld [vmem:[#allocation7 + $0x300] sm:$0xf] }
0x1b5c   : > { %v8555_v27 = vsel %vm2101_vm4, %v8553_v46, %v12051_v8  ;;  %v8556_v2 = vsel %vm2101_vm4, %v8554_v21, %v12052_v28  ;;  %v11167_v21 = vld [vmem:[#allocation7 + $0x3b8] sm:$0xf0]  ;;  %v11672_v28 = vld [vmem:[#allocation7 + $0x384] sm:$0xf]  ;;  %v11102_v14 = vor.u32 %v11663_v26, %v11101_v17  ;;  %v11661_v45 = vld [vmem:[#allocation7 + $0x32c] sm:$0xf] }
0x1b5d   : > { %v11170_v46 = vor.u32 %v11677_v22, %v11167_v21  ;;  %8943 = vmatpush.bf16.msra.mxu1 %v11166_v30  ;;  %v11658_v20 = vld [vmem:[#allocation7 + $0x30c] sm:$0xf0]  ;;  %v11079_v22 = vld [vmem:[#allocation7 + $0x310] sm:$0xf0]  ;;  %v11085_v21 = vld [vmem:[#allocation7 + $0x308] sm:$0xf] }
0x1b5e   : > { %v11078_v30 = vor.u32 %v11658_v20, %v11077_v33  ;;  %v11698_v33 = vld [vmem:[#allocation9 + $0x350] sm:$0xff] }
0x1b5f   : > { %v11706_v20 = vld [vmem:[#allocation9 + $0x390] sm:$0xff] }
0x1b7d   : > { %v12055_v10 = vpop.permute.xlu1 %12054 }
0x1b7e   : > { %v12057_v41 = vunpack.i.h.bf16 %v12055_v10  ;;  %v12056_v11 = vunpack.i.l.bf16 %v12055_v10  ;;  %v11676_v10 = vld [vmem:[#allocation7 + $0x3a4] sm:$0xf] }
0x1b80   : > { %v8557_v51 = vsel %vm2104_vm5, %v8555_v27, %v12056_v11  ;;  %v8558_v38 = vsel %vm2104_vm5, %v8556_v2, %v12057_v41  ;;  %v11141_v41 = vld [vmem:[#allocation7 + $0x380] sm:$0xf]  ;;  %v11674_v11 = vld [vmem:[#allocation7 + $0x38c] sm:$0xf0]  ;;  %v11675_v27 = vld [vmem:[#allocation7 + $0x394] sm:$0xf0] }
0x1b81   : > { %v11142_v8 = vor.u32 %v11674_v11, %v11141_v41 }
0x1b87   : > { %v12060_v12 = vpop.permute.xlu2 %12059 }
0x1b88   : > { %v12062_v63 = vunpack.i.h.bf16 %v12060_v12  ;;  %v12061_v24 = vunpack.i.l.bf16 %v12060_v12  ;;  %v11162_v12 = vor.u32 %v11676_v10, %v11159_v35  ;;  %v11103_v10 = vld [vmem:[#allocation7 + $0x338] sm:$0xf0] }
0x1b89   : > { %v11106_v35 = vor.u32 %v11661_v45, %v11103_v10  ;;  %v11707_v10 = vld [vmem:[#allocation9 + $0x398] sm:$0xff] }
0x1b8a   : > { %v8560_v15 = vsel %vm2107_vm6, %v8558_v38, %v12062_v63  ;;  %v8559_v4 = vsel %vm2107_vm6, %v8557_v51, %v12061_v24  ;;  %8929 = vmatpush.bf16.msra.mxu0 %v11162_v12  ;;  %v11143_v63 = vld [vmem:[#allocation7 + $0x390] sm:$0xf0]  ;;  %v11149_v24 = vld [vmem:[#allocation7 + $0x388] sm:$0xf]  ;;  %v11673_v51 = vld [vmem:[#allocation7 + $0x38c] sm:$0xf] }
0x1b8b   : > { %v11146_v2 = vor.u32 %v11672_v28, %v11143_v63  ;;  %v11151_v38 = vld [vmem:[#allocation7 + $0x398] sm:$0xf0]  ;;  %v11656_v12 = vld [vmem:[#allocation7 + $0x304] sm:$0xf] }
0x1b8c   : > { %v11082_v11 = vor.u32 %v11656_v12, %v11079_v22  ;;  %v11087_v63 = vld [vmem:[#allocation7 + $0x318] sm:$0xf0]  ;;  %v11697_v22 = vld [vmem:[#allocation9 + $0x348] sm:$0xff] }
0x1b8d   : > { %v11691_v12 = vld [vmem:[#allocation9 + $0x318] sm:$0xff] }
0x1b8e   : > { %8930 = vmatpush.bf16.msra.mxu0 %v11146_v2 }
0x1ba7   : > { %v12065_v61 = vpop.permute.xlu1 %12064 }
0x1ba8   : > { %v12067_v31 = vunpack.i.h.bf16 %v12065_v61  ;;  %v12066_v32 = vunpack.i.l.bf16 %v12065_v61  ;;  %v11150_v61 = vor.u32 %v11675_v27, %v11149_v24 }
0x1baa   : > { %v8562_v25 = vsel %vm2110_vm7, %v8560_v15, %v12067_v31  ;;  %v8561_v0 = vsel %vm2110_vm7, %v8559_v4, %v12066_v32  ;;  %v11154_v31 = vor.u32 %v11673_v51, %v11151_v38  ;;  %8944 = vmatpush.bf16.msra.mxu1 %v11150_v61  ;;  %v11125_v32 = vld [vmem:[#allocation7 + $0x360] sm:$0xf]  ;;  %v11670_v15 = vld [vmem:[#allocation7 + $0x36c] sm:$0xf0]  ;;  %v11668_v4 = vld [vmem:[#allocation7 + $0x364] sm:$0xf] }
0x1bab   : > { %v8563_v9 = vpack.c.bf16 %v8562_v25, %v8561_v0  ;;  %v11126_v25 = vor.u32 %v11670_v15, %v11125_v32  ;;  %v11127_v0 = vld [vmem:[#allocation7 + $0x370] sm:$0xf0]  ;;  %v11711_v32 = vld [vmem:[#allocation9 + $0x3b8] sm:$0xff] }
0x1bad   : > { %8642 = vmatmul.bf16.vlgmr.msrb.gmra.mxu2 %v8563_v9  ;;  %v11133_v9 = vld [vmem:[#allocation7 + $0x368] sm:$0xf] }
0x1c30   : > { %v8643_v52 = vpop.f32.mrf.mxu2 }
0x1c31   : > { %v8644_v62 = vadd.f32 %v12098_v58, %v8643_v52  ;;  %v11130_v52 = vor.u32 %v11668_v4, %v11127_v0  ;;  %v11695_v4 = vld [vmem:[#allocation9 + $0x338] sm:$0xff]  ;;  %v11702_v0 = vld [vmem:[#allocation9 + $0x370] sm:$0xff] }
0x1c33   : > { %v14352_v34 = vadd.f32 %v8644_v62, %v14039_v56  ;;  %v11686_v56 = vld [vmem:[#allocation7 + $0x3ec] sm:$0xf0]  ;;  %8931 = vmatpush.bf16.msra.mxu0 %v11130_v52 }
0x1c34   : > { %v11190_v43 = vor.u32 %v11686_v56, %v11189_v44  ;;  %v11666_v44 = vld [vmem:[#allocation7 + $0x34c] sm:$0xf0]  ;;  %v11664_v56 = vld [vmem:[#allocation7 + $0x344] sm:$0xf] }
0x1c35   : > { %8650 = vadd.xlane.f32.xlu2 %v14352_v34  ;;  %v8656_v53 = vmul.f32 %v14352_v34, %v14352_v34 }
0x1c36   : > { %8913 = vmatpush.bf16.msra.mxu3 %v11190_v43  ;;  %v11111_v43 = vld [vmem:[#allocation7 + $0x350] sm:$0xf0] }
0x1c37   : > { %8658 = vadd.xlane.f32.xlu1 %v8656_v53  ;;  %v11669_v53 = vld [vmem:[#allocation7 + $0x36c] sm:$0xf]  ;;  %v11114_v3 = vor.u32 %v11664_v56, %v11111_v43 }
0x1c38   : > { %v8645_v57 = vpop.f32.mrf.mxu2  ;;  %v11693_v56 = vld [vmem:[#allocation9 + $0x328] sm:$0xff] }
0x1c39   : > { %v8646_v16 = vadd.f32 %v12098_v58, %v8645_v57  ;;  %v11671_v58 = vld [vmem:[#allocation7 + $0x374] sm:$0xf0]  ;;  %v11135_v57 = vld [vmem:[#allocation7 + $0x378] sm:$0xf0]  ;;  %8932 = vmatpush.bf16.msra.mxu0 %v11114_v3 }
0x1c3a   : > { %8914 = vmatpush.bf16.msra.mxu3 %v11174_v5  ;;  %v11134_v62 = vor.u32 %v11671_v58, %v11133_v9  ;;  %v11662_v5 = vld [vmem:[#allocation7 + $0x32c] sm:$0xf0] }
0x1c3b   : > { %v14358_v40 = vadd.f32 %v8646_v16, %v14041_v59  ;;  %v11202_v59 = vor.u32 %v11685_v36, %v11199_v18  ;;  %v11138_v16 = vor.u32 %v11669_v53, %v11135_v57  ;;  %v11665_v36 = vld [vmem:[#allocation7 + $0x34c] sm:$0xf]  ;;  %v11119_v18 = vld [vmem:[#allocation7 + $0x358] sm:$0xf0]  ;;  %v11094_v42 = vor.u32 %v11662_v5, %v11093_v48  ;;  %v11710_v9 = vld [vmem:[#allocation9 + $0x3b0] sm:$0xff] }
0x1c3c   : > { %8945 = vmatpush.bf16.msra.mxu1 %v11134_v62  ;;  %v11122_v47 = vor.u32 %v11665_v36, %v11119_v18  ;;  %v11694_v62 = vld [vmem:[#allocation9 + $0x330] sm:$0xff] }
0x1c3d   : > { %8652 = vadd.xlane.f32.xlu0 %v14358_v40  ;;  %v8657_v19 = vmul.f32 %v14358_v40, %v14358_v40  ;;  %8955 = vmatpush.bf16.msra.mxu2 %v11202_v59  ;;  %v11718_v53 = vld [vmem:[#allocation9 + $0x3f0] sm:$0xff] }
0x1c3e   : > { %8915 = vmatpush.bf16.msra.mxu3 %v11158_v29 }
0x1c3f   : > { %8660 = vadd.xlane.f32.xlu2 %v8657_v19  ;;  %v11109_v19 = vld [vmem:[#allocation7 + $0x340] sm:$0xf] }
0x1c40   : > { %v11110_v50 = vor.u32 %v11666_v44, %v11109_v19  ;;  %8946 = vmatpush.bf16.msra.mxu1 %v11118_v1  ;;  %v11701_v19 = vld [vmem:[#allocation9 + $0x368] sm:$0xff] }
0x1c41   : > { %8956 = vmatpush.bf16.msra.mxu2 %v11186_v7  ;;  %v11098_v7 = vor.u32 %v11660_v49, %v11095_v39  ;;  %v11709_v44 = vld [vmem:[#allocation9 + $0x3a8] sm:$0xff]  ;;  %v12099_v49 = vld [vmem:[%s14491_s11 + $0x3] ss:$0 sm:$0xff] }
0x1c42   : > { %8916 = vmatpush.bf16.msra.mxu3 %v11142_v8  ;;  %v11657_v8 = vld [vmem:[#allocation7 + $0x30c] sm:$0xf] }
0x1c43   : > { %8933 = vmatpush.bf16.msra.mxu0 %v11098_v7  ;;  %v11090_v27 = vor.u32 %v11657_v8, %v11087_v63  ;;  %v11689_v8 = vld [vmem:[#allocation9 + $0x308] sm:$0xff] }
0x1c44   : > { %8947 = vmatpush.bf16.msra.mxu1 %v11102_v14  ;;  %v11713_v63 = vld [vmem:[#allocation9 + $0x3c8] sm:$0xff] }
0x1c45   : > { %8957 = vmatpush.bf16.msra.mxu2 %v11170_v46  ;;  %v11659_v46 = vld [vmem:[#allocation7 + $0x314] sm:$0xf0] }
0x1c46   : > { %8917 = vmatpush.bf16.msra.mxu3 %v11126_v25  ;;  %v11086_v28 = vor.u32 %v11659_v46, %v11085_v21  ;;  %v11719_v25 = vld [vmem:[#allocation9 + $0x3f8] sm:$0xff]  ;;  %v11705_v21 = vld [vmem:[#allocation9 + $0x388] sm:$0xff]  ;;  %v11690_v46 = vld [vmem:[#allocation9 + $0x310] sm:$0xff] }
0x1c47   : > { %8934 = vmatpush.bf16.msra.mxu0 %v11082_v11  ;;  %v11696_v11 = vld [vmem:[#allocation9 + $0x340] sm:$0xff] }
0x1c48   : > { %8948 = vmatpush.bf16.msra.mxu1 %v11086_v28  ;;  %v11704_v28 = vld [vmem:[#allocation9 + $0x380] sm:$0xff] }
0x1c49   : > { %8958 = vmatpush.bf16.msra.mxu2 %v11154_v31  ;;  %v11703_v31 = vld [vmem:[#allocation9 + $0x378] sm:$0xff] }
0x1c4a   : > { %8918 = vmatpush.bf16.msra.mxu3 %v11110_v50  ;;  %v11717_v50 = vld [vmem:[#allocation9 + $0x3e8] sm:$0xff] }
0x1c4b   : > { %9257 = vmatpush.bf16.msrb.mxu0 %v11703_v31 }
0x1c4c   : > { %9271 = vmatpush.bf16.msrb.mxu1 %v11711_v32 }
0x1c4d   : > { %8959 = vmatpush.bf16.msra.mxu2 %v11138_v16 }
0x1c4e   : > { %8919 = vmatpush.bf16.msra.mxu3 %v11094_v42 }
0x1c4f   : > { %9258 = vmatpush.bf16.msrb.mxu0 %v11702_v0 }
0x1c50   : > { %9272 = vmatpush.bf16.msrb.mxu1 %v11710_v9 }
0x1c51   : > { %8960 = vmatpush.bf16.msra.mxu2 %v11122_v47 }
0x1c52   : > { %8920 = vmatpush.bf16.msra.mxu3 %v11078_v30  ;;  %v11715_v30 = vld [vmem:[#allocation9 + $0x3d8] sm:$0xff] }
0x1c53   : > { %9259 = vmatpush.bf16.msrb.mxu0 %v11701_v19 }
0x1c54   : > { %9273 = vmatpush.bf16.msrb.mxu1 %v11709_v44 }
0x1c55   : > { %8961 = vmatpush.bf16.msra.mxu2 %v11106_v35  ;;  %v11716_v35 = vld [vmem:[#allocation9 + $0x3e0] sm:$0xff] }
0x1c56   : > { %9243 = vmatpush.bf16.msrb.mxu3 %v11695_v4 }
0x1c57   : > { %9260 = vmatpush.bf16.msrb.mxu0 %v11700_v23 }
0x1c59   : > { %8962 = vmatpush.bf16.msra.mxu2 %v11090_v27  ;;  %v11712_v27 = vld [vmem:[#allocation9 + $0x3c0] sm:$0xff] }
0x1c5a   : > { %9244 = vmatpush.bf16.msrb.mxu3 %v11694_v62 }
0x1c5d   : > { %9285 = vmatpush.bf16.msrb.mxu2 %v11719_v25 }
0x1c5e   : > { %9245 = vmatpush.bf16.msrb.mxu3 %v11693_v56 }
0x1c61   : > { %9286 = vmatpush.bf16.msrb.mxu2 %v11718_v53 }
0x1c65   : > { %9287 = vmatpush.bf16.msrb.mxu2 %v11717_v50 }
0x1c69   : > { %9288 = vmatpush.bf16.msrb.mxu2 %v11716_v35 }
0x1c6d   : > { %9289 = vmatpush.bf16.msrb.mxu2 %v11715_v30 }
0x1ca8   : > { %v8651_v54 = vpop.xlane.xlu2 %8650 }
0x1ca9   : > { %v14364_v59 = vmul.f32 %v8651_v54, %v13129_v60  ;;  %v11708_v54 = vld [vmem:[#allocation9 + $0x3a0] sm:$0xff] }
0x1caa   : > { %v8659_v55 = vpop.xlane.xlu1 %8658  ;;  %9274 = vmatpush.bf16.msrb.mxu1 %v11708_v54 }
0x1cab   : > { %v8664_v37 = vmul.f32 %v14364_v59, %v14364_v59  ;;  %v8662_v13 = vmul.f32 %v8659_v55, %v13129_v60  ;;  %v8668_v48 = vsub.f32 %v14352_v34, %v14364_v59  ;;  %v12100_v34 = vld [vmem:[%s14492_s12 + $0x3] ss:$0 sm:$0xff] }
0x1cad   : > { %v8666_v29 = vsub.f32 %v8662_v13, %v8664_v37 }
0x1cae   : > { %9275 = vmatpush.bf16.msrb.mxu1 %v11707_v10 }
0x1caf   : > { %v8670_v41 = vadd.f32 1e-05, %v8666_v29  ;;  %v11692_v29 = vld [vmem:[#allocation9 + $0x320] sm:$0xff] }
0x1cb0   : > { %v8653_v24 = vpop.xlane.xlu0 %8652  ;;  %9246 = vmatpush.bf16.msrb.mxu3 %v11692_v29 }
0x1cb1   : > { %12387 = vrsqrt.f32 %v8670_v41  ;;  %v14370_v2 = vmul.f32 %v8653_v24, %v13129_v60  ;;  %vm8678_vm1 = vweird.f32 %v8670_v41  ;;  %v11688_v24 = vld [vmem:[#allocation9 + $0x300] sm:$0xff] }
0x1cb2   : > { %v8661_v61 = vpop.xlane.xlu2 %8660  ;;  %9276 = vmatpush.bf16.msrb.mxu1 %v11706_v20 }
0x1cb3   : > { %v8665_v51 = vmul.f32 %v14370_v2, %v14370_v2  ;;  %v8663_v38 = vmul.f32 %v8661_v61, %v13129_v60  ;;  %v8669_v42 = vsub.f32 %v14358_v40, %v14370_v2  ;;  %v11699_v40 = vld [vmem:[#allocation9 + $0x358] sm:$0xff]  ;;  %v11074_v2 = vld [vmem:[%s14494_s14 + $0xc] sm:$0xf] }
0x1cb4   : > { %9261 = vmatpush.bf16.msrb.mxu0 %v11699_v40  ;;  %9247 = vmatpush.bf16.msrb.mxu3 %v11691_v12  ;;  %v8747_v31 = vperm.slane %v11074_v2, 2  ;;  %v8745_v9 = vperm.slane %v11074_v2, 0  ;;  %v8748_v62 = vperm.slane %v11074_v2, 3 }
0x1cb5   : > { %v8667_v15 = vsub.f32 %v8663_v38, %v8665_v51  ;;  %v8746_v38 = vperm.slane %v11074_v2, 1  ;;  %v9365_v2 = vld [vmem:[%s14529_s26 + $0x30] sm:$0xff] }
0x1cb6   : > { %9277 = vmatpush.bf16.msrb.mxu1 %v11705_v21 }
0x1cb7   : > { %v12388_v58 = vpop.eup %12387  ;;  %v8671_v52 = vadd.f32 1e-05, %v8667_v15 }
0x1cb8   : > { %v8673_v57 = vmul.f32 %v12388_v58, %v8670_v41  ;;  %vm8679_vm0 = vweird.f32 %v12388_v58  ;;  %9262 = vmatpush.bf16.msrb.mxu0 %v11698_v33  ;;  %v11714_v41 = vld [vmem:[#allocation9 + $0x3d0] sm:$0xff]  ;;  %9248 = vmatpush.bf16.msrb.mxu3 %v11690_v46  ;;  %v9374_v46 = vld [vmem:[%s14529_s26 + $0x78] sm:$0xff] }
0x1cb9   : > { %12389 = vrsqrt.f32 %v8671_v52  ;;  %vm8680_vm2 = vmor %vm8678_vm1, %vm8679_vm0  ;;  %vm8688_vm4 = vweird.f32 %v8671_v52  ;;  %9290 = vmatpush.bf16.msrb.mxu2 %v11714_v41  ;;  %v9373_v41 = vld [vmem:[%s14529_s26 + $0x70] sm:$0xff] }
0x1cba   : > { %v8674_v16 = vmul.f32 %v12388_v58, %v8673_v57  ;;  %9278 = vmatpush.bf16.msrb.mxu1 %v11704_v28  ;;  %v9370_v28 = vld [vmem:[%s14529_s26 + $0x58] sm:$0xff] }
0x1cbc   : > { %v8675_v43 = vmul.f32 0.5, %v8674_v16  ;;  %9263 = vmatpush.bf16.msrb.mxu0 %v11697_v22  ;;  %9249 = vmatpush.bf16.msrb.mxu3 %v11689_v8  ;;  %v9369_v8 = vld [vmem:[%s14529_s26 + $0x50] sm:$0xff] }
0x1cbd   : > { %9291 = vmatpush.bf16.msrb.mxu2 %v11713_v63  ;;  %v9368_v63 = vld [vmem:[%s14529_s26 + $0x48] sm:$0xff] }
0x1cbe   : > { %v8676_v6 = vsub.f32 1.5, %v8675_v43 }
0x1cbf   : > { %v12390_v3 = vpop.eup %12389 }
0x1cc0   : > { %v8677_v1 = vmul.f32 %v12388_v58, %v8676_v6  ;;  %v8683_v36 = vmul.f32 %v12390_v3, %v8671_v52  ;;  %vm8689_vm3 = vweird.f32 %v12390_v3  ;;  %9264 = vmatpush.bf16.msrb.mxu0 %v11696_v11  ;;  %9250 = vmatpush.bf16.msrb.mxu3 %v11688_v24  ;;  %v9371_v11 = vld [vmem:[%s14529_s26 + $0x60] sm:$0xff] }
0x1cc1   : > { %vm8690_vm5 = vmor %vm8688_vm4, %vm8689_vm3  ;;  %9292 = vmatpush.bf16.msrb.mxu2 %v11712_v27  ;;  %v9367_v24 = vld [vmem:[%s14529_s26 + $0x40] sm:$0xff]  ;;  %v9366_v27 = vld [vmem:[%s14529_s26 + $0x38] sm:$0xff] }
0x1cc2   : > { %v8684_v18 = vmul.f32 %v12390_v3, %v8683_v36  ;;  %v8681_v47 = vsel %vm8680_vm2, %v12388_v58, %v8677_v1 }
0x1cc3   : > { %v8692_v37 = vmul.f32 %v8681_v47, %v8668_v48 }
0x1cc4   : > { %v8685_v55 = vmul.f32 0.5, %v8684_v18 }
0x1cc5   : > { %v8699_v17 = vmul.f32 %v12099_v49, %v8692_v37 }
0x1cc6   : > { %v8686_v5 = vsub.f32 1.5, %v8685_v55 }
0x1cc7   : > { %v14385_v7 = vadd.f32 %v12100_v34, %v8699_v17 }
0x1cc8   : > { %v8687_v13 = vmul.f32 %v12390_v3, %v8686_v5 }
0x1cca   : > { %v8691_v39 = vsel %vm8690_vm5, %v12390_v3, %v8687_v13 }
0x1ccb   : > { %v8693_v26 = vmul.f32 %v8691_v39, %v8669_v42 }
0x1ccd   : > { %v8700_v59 = vmul.f32 %v12099_v49, %v8693_v26  ;;  %v12101_v49 = vld [vmem:[%s14496_s16 + $0x3] ss:$0 sm:$0xff] }
0x1ccf   : > { %v14387_v14 = vadd.f32 %v12100_v34, %v8700_v59 }
0x1cd1   : > { %v8708_v45 = vpack.c.bf16 %v14387_v14, %v14385_v7 }
0x1cd3   : > { %8921 = vmatmul.bf16.vlgmr.msra.gmra.mxu3 %v8708_v45  ;;  %8935 = vmatmul.bf16.vlgmr.msra.gmra.mxu0 %v8708_v45 }
0x1cd4   : > { %8949 = vmatmul.bf16.vlgmr.msra.gmra.mxu1 %v8708_v45  ;;  %8963 = vmatmul.bf16.vlgmr.msra.gmra.mxu2 %v8708_v45 }
0x1cd5   : > { %9386 = vmatpush.msra.mxu3 %v9374_v46 }
0x1cd7   : > { %9387 = vmatpush.msra.mxu3 %v9373_v41 }
0x1d50   : > { %v8936_v61 = vpop.f32.mrf.mxu0 }
0x1d51   : > { %v8950_v51 = vpop.f32.mrf.mxu1  ;;  %v8937_v15 = vadd.f32 %v8936_v61, %v8746_v38 }
0x1d52   : > { %v8951_v25 = vadd.f32 %v8950_v51, %v8747_v31 }
0x1d53   : > { %v8970_v57 = vmax.f32 %v8937_v15, 0.0 }
0x1d54   : > { %v8971_v19 = vmax.f32 %v8951_v25, 0.0  ;;  %v9362_v25 = vld [vmem:[%s14529_s26 + $0x18] sm:$0xff] }
0x1d56   : > { %v8922_v32 = vpop.f32.mrf.mxu3 }
0x1d57   : > { %v8964_v4 = vpop.f32.mrf.mxu2  ;;  %v8923_v56 = vadd.f32 %v8922_v32, %v8745_v9 }
0x1d58   : > { %v8938_v0 = vpop.f32.mrf.mxu0  ;;  %v8965_v43 = vadd.f32 %v8964_v4, %v8748_v62  ;;  %v9363_v4 = vld [vmem:[%s14529_s26 + $0x20] sm:$0xff] }
0x1d59   : > { %v8939_v58 = vadd.f32 %v8938_v0, %v8746_v38  ;;  %v8952_v52 = vpop.f32.mrf.mxu1  ;;  %v8969_v36 = vmax.f32 %v8923_v56, 0.0  ;;  %v9364_v38 = vld [vmem:[%s14529_s26 + $0x28] sm:$0xff] }
0x1d5a   : > { %v8953_v53 = vadd.f32 %v8952_v52, %v8747_v31  ;;  %v8972_v47 = vmax.f32 %v8965_v43, 0.0  ;;  %v9360_v52 = vld [vmem:[%s14529_s26 + $0x8] sm:$0xff] }
0x1d5b   : > { %v8974_v16 = vmax.f32 %v8939_v58, 0.0 }
0x1d5c   : > { %v8975_v44 = vmax.f32 %v8953_v53, 0.0 }
0x1d5d   : > { %v8978_v50 = vpack.c.bf16 %v8974_v16, %v8970_v57  ;;  %v9359_v57 = vld [vmem:[%s14529_s26] sm:$0xff] }
0x1d5e   : > { %v8979_v6 = vpack.c.bf16 %v8975_v44, %v8971_v19  ;;  %v8924_v23 = vpop.f32.mrf.mxu3 }
0x1d5f   : > { %v8925_v54 = vadd.f32 %v8924_v23, %v8745_v9  ;;  %v8966_v3 = vpop.f32.mrf.mxu2  ;;  %9265 = vmatmul.bf16.vlgmr.msrb.gmra.mxu0 %v8978_v50  ;;  %v9361_v9 = vld [vmem:[%s14529_s26 + $0x10] sm:$0xff] }
0x1d60   : > { %v8967_v1 = vadd.f32 %v8966_v3, %v8748_v62  ;;  %9279 = vmatmul.bf16.vlgmr.msrb.gmra.mxu1 %v8979_v6 }
0x1d61   : > { %v8973_v18 = vmax.f32 %v8925_v54, 0.0 }
0x1d62   : > { %v8976_v55 = vmax.f32 %v8967_v1, 0.0 }
0x1d63   : > { %v8977_v48 = vpack.c.bf16 %v8973_v18, %v8969_v36 }
0x1d64   : > { %v8980_v5 = vpack.c.bf16 %v8976_v55, %v8972_v47 }
0x1d65   : > { %9251 = vmatmul.bf16.vlgmr.msrb.gmra.mxu3 %v8977_v48 }
0x1d66   : > { %9293 = vmatmul.bf16.vlgmr.msrb.gmra.mxu2 %v8980_v5 }
0x1ddc   : > { %v9266_v37 = vpop.f32.mrf.mxu0 }
0x1ddd   : > { %v9280_v39 = vpop.f32.mrf.mxu1 }
0x1de4   : > { %v9268_v29 = vpop.f32.mrf.mxu0 }
0x1de5   : > { %v9282_v20 = vpop.f32.mrf.mxu1 }
0x1de8   : > { %v9252_v13 = vpop.f32.mrf.mxu3 }
0x1de9   : > { %v9253_v42 = vadd.f32 %v12101_v49, %v9252_v13  ;;  %v9294_v26 = vpop.f32.mrf.mxu2 }
0x1deb   : > { %v9267_v17 = vadd.f32 %v9266_v37, %v9253_v42 }
0x1ded   : > { %v9281_v34 = vadd.f32 %v9280_v39, %v9267_v17  ;;  %v12103_v17 = vld [vmem:[%s14498_s18 + $0x3] ss:$0 sm:$0xff] }
0x1def   : > { %v9295_v59 = vadd.f32 %v9294_v26, %v9281_v34 }
0x1df0   : > { %v9254_v45 = vpop.f32.mrf.mxu3 }
0x1df1   : > { %v14398_v40 = vadd.f32 %v9295_v59, %v14385_v7  ;;  %v9255_v10 = vadd.f32 %v12101_v49, %v9254_v45  ;;  %v9296_v30 = vpop.f32.mrf.mxu2  ;;  %v12102_v49 = vld [vmem:[%s14497_s17 + $0x3] ss:$0 sm:$0xff] }
0x1df3   : > { %v9269_v35 = vadd.f32 %v9268_v29, %v9255_v10  ;;  %9301 = vadd.xlane.f32.xlu0 %v14398_v40  ;;  %v9307_v33 = vmul.f32 %v14398_v40, %v14398_v40 }
0x1df5   : > { %v9283_v12 = vadd.f32 %v9282_v20, %v9269_v35  ;;  %9309 = vadd.xlane.f32.xlu2 %v9307_v33  ;;  %v12104_v33 = vld [vmem:[%s14530_s2] ss:$0 sm:$0xff] }
0x1df7   : > { %v9297_v22 = vadd.f32 %v9296_v30, %v9283_v12 }
0x1df9   : > { %v14404_v21 = vadd.f32 %v9297_v22, %v14387_v14  ;;  %v9372_v14 = vld [vmem:[%s14529_s26 + $0x68] sm:$0xff] }
0x1dfa   : > { %9388 = vmatpush.msra.mxu3 %v9372_v14 }
0x1dfb   : > { %9303 = vadd.xlane.f32.xlu1 %v14404_v21  ;;  %v9308_v7 = vmul.f32 %v14404_v21, %v14404_v21 }
0x1dfc   : > { %9389 = vmatpush.msra.mxu3 %v9371_v11 }
0x1dfd   : > { %9311 = vadd.xlane.f32.xlu0 %v9308_v7 }
0x1dfe   : > { %9390 = vmatpush.msra.mxu3 %v9370_v28 }
0x1e00   : > { %9391 = vmatpush.msra.mxu3 %v9369_v8 }
0x1e02   : > { %9392 = vmatpush.msra.mxu3 %v9368_v63 }
0x1e04   : > { %9393 = vmatpush.msra.mxu3 %v9367_v24 }
0x1e06   : > { %9394 = vmatpush.msra.mxu3 %v9366_v27 }
0x1e08   : > { %9395 = vmatpush.msra.mxu3 %v9365_v2 }
0x1e0a   : > { %9396 = vmatpush.msra.mxu3 %v9364_v38 }
0x1e0c   : > { %9397 = vmatpush.msra.mxu3 %v9363_v4 }
0x1e0e   : > { %9398 = vmatpush.msra.mxu3 %v9362_v25 }
0x1e10   : > { %9399 = vmatpush.msra.mxu3 %v9361_v9 }
0x1e12   : > { %9400 = vmatpush.msra.mxu3 %v9360_v52 }
0x1e14   : > { %9401 = vmatpush.msra.mxu3 %v9359_v57 }
0x1e66   : > { %v9302_v61 = vpop.xlane.xlu0 %9301 }
0x1e67   : > { %v9305_v51 = vmul.f32 %v9302_v61, %v13129_v60 }
0x1e68   : > { %v9310_v31 = vpop.xlane.xlu2 %9309 }
0x1e69   : > { %v9315_v32 = vmul.f32 %v9305_v51, %v9305_v51  ;;  %v9313_v15 = vmul.f32 %v9310_v31, %v13129_v60  ;;  %v9319_v48 = vsub.f32 %v14398_v40, %v9305_v51 }
0x1e6b   : > { %v9317_v0 = vsub.f32 %v9313_v15, %v9315_v32 }
0x1e6d   : > { %v9321_v58 = vadd.f32 1e-05, %v9317_v0 }
0x1e6e   : > { %v9304_v62 = vpop.xlane.xlu1 %9303 }
0x1e6f   : > { %12391 = vrsqrt.f32 %v9321_v58  ;;  %v9306_v53 = vmul.f32 %v9304_v62, %v13129_v60  ;;  %vm9329_vm7 = vweird.f32 %v9321_v58 }
0x1e70   : > { %v9312_v16 = vpop.xlane.xlu0 %9311 }
0x1e71   : > { %v9316_v19 = vmul.f32 %v9306_v53, %v9306_v53  ;;  %v9314_v44 = vmul.f32 %v9312_v16, %v13129_v60  ;;  %v9320_v42 = vsub.f32 %v14404_v21, %v9306_v53 }
0x1e73   : > { %v9318_v56 = vsub.f32 %v9314_v44, %v9316_v19 }
0x1e75   : > { %v12392_v50 = vpop.eup %12391  ;;  %v9322_v43 = vadd.f32 1e-05, %v9318_v56 }
0x1e76   : > { %v9324_v6 = vmul.f32 %v12392_v50, %v9321_v58  ;;  %vm9330_vm6 = vweird.f32 %v12392_v50 }
0x1e77   : > { %12393 = vrsqrt.f32 %v9322_v43  ;;  %vm9331_vm13 = vmor %vm9329_vm7, %vm9330_vm6  ;;  %vm9339_vm15 = vweird.f32 %v9322_v43 }
0x1e78   : > { %v9325_v23 = vmul.f32 %v12392_v50, %v9324_v6 }
0x1e7a   : > { %v9326_v54 = vmul.f32 0.5, %v9325_v23 }
0x1e7c   : > { %v9327_v3 = vsub.f32 1.5, %v9326_v54 }
0x1e7d   : > { %v12394_v1 = vpop.eup %12393 }
0x1e7e   : > { %v9328_v36 = vmul.f32 %v12392_v50, %v9327_v3  ;;  %v9334_v18 = vmul.f32 %v12394_v1, %v9322_v43  ;;  %vm9340_vm14 = vweird.f32 %v12394_v1 }
0x1e7f   : > { %vm9341_vm8 = vmor %vm9339_vm15, %vm9340_vm14 }
0x1e80   : > { %v9332_v47 = vsel %vm9331_vm13, %v12392_v50, %v9328_v36  ;;  %v9335_v55 = vmul.f32 %v12394_v1, %v9334_v18 }
0x1e81   : > { %v9343_v5 = vmul.f32 %v9332_v47, %v9319_v48 }
0x1e82   : > { %v9336_v60 = vmul.f32 0.5, %v9335_v55 }
0x1e83   : > { %v9350_v39 = vmul.f32 %v12102_v49, %v9343_v5 }
0x1e84   : > { %v9337_v37 = vsub.f32 1.5, %v9336_v60 }
0x1e85   : > { %v9357_v45 = vadd.f32 %v12103_v17, %v9350_v39 }
0x1e86   : > { %v9338_v13 = vmul.f32 %v12394_v1, %v9337_v37 }
0x1e87   : > { %v9381_v10 = vrot.slane %v9357_v45, 7 }
0x1e88   : > { %v9342_v26 = vsel %vm9341_vm8, %v12394_v1, %v9338_v13 }
0x1e89   : > { %v9344_v34 = vmul.f32 %v9342_v26, %v9320_v42 }
0x1e8b   : > { %v9351_v59 = vmul.f32 %v12102_v49, %v9344_v34 }
0x1e8d   : > { %v9358_v40 = vadd.f32 %v12103_v17, %v9351_v59 }
0x1e8f   : > { %v9382_v29 = vrot.slane %v9358_v40, 6 }
0x1e91   : > { %v9384_v35 = vsel %vm9383_vm9, %v9382_v29, %v9381_v10 }
0x1e92   : > { %9402 = vmatmul.f32.vlgmr.msra.gmra.mxu3 %v9384_v35 }
0x1f15   : > { %v9403_v20 = vpop.f32.mrf.mxu3 }
0x1f16   : > { %v9404_v12 = vadd.f32 %v12104_v33, %v9403_v20 }
0x1f18   : > { %9406 = vst [vmem:[%s739_s19] sm:$0x3] %v9404_v12 }
0x1f19 PF: > { %s14532_s20 = sld [smem:[#allocation13_spill]] }
0x1f1f   : > { %s34_s2 = sadd.s32 1, %s14532_s20  }
0x1f20   : > { %p31_p8 = scmp.ge.s32.totalorder %s34_s2, 4  }
0x1f22   :  { %33 = sbr.rel (!%p31_p8) target bundleno = 15 (0xf), region = 203 }
0x1f27   :  { %9426 = vsyncpa [#allocation3], 1 }
0x1f28   :  { %9428 = vsyncpa [#allocation3 + $0x1], 1 }
0x1f29   :  { %9429 = vsyncpa [#allocation5], 1 }
0x1f2a   :  { %9430 = vsyncpa [#allocation8], 1 }

</bundles_post_ra>
